<compile_context>
chip_gen: v7x
topology: tpu7x:2x2x1
jax: 0.10.0
libtpu: 0.0.40
codegen_flags: <defaults>
</compile_context>

<pallas_src>
import jax
import jax.numpy as jnp
from jax.experimental import pallas as pl
from jax.experimental.pallas import tpu as pltpu


_LAYER_SIZES = [1024, 1024, 2048, 1024, 1024, 8]
_N_LAYERS = len(_LAYER_SIZES)      # all 6 layers fused in one pallas_call
_PAD_LAST = 128                    # final layer padded to one lane-width


def _fused_mlp_kernel(x_ref,
                      w1_hbm, w2_hbm, w3_hbm, w4_hbm, w5_hbm, w6_hbm,
                      b1_ref, b2_ref, b3_ref, b4_ref, b5_ref, b6_ref,
                      o_ref,
                      w1_v, w2_v, w3_v, w4_v, w5_v, w6_v, sems):
    """relu(x @ W_i + b_i) for i = 1..6 with manual weight streaming.

    Weights live in HBM (pl.ANY) and are DMA'd into VMEM scratch; all six
    copies are issued immediately so the HBM weight stream runs back-to-back
    while the MXU consumes layers that have already arrived.  The (B, <=2048)
    activations stay on-chip the whole time.
    """
    w_hbm = (w1_hbm, w2_hbm, w3_hbm, w4_hbm, w5_hbm, w6_hbm)
    w_vmem = (w1_v, w2_v, w3_v, w4_v, w5_v, w6_v)
    biases = (b1_ref, b2_ref, b3_ref, b4_ref, b5_ref, b6_ref)

    copies = []
    for i in range(_N_LAYERS):
        cp = pltpu.make_async_copy(w_hbm[i], w_vmem[i], sems.at[i])
        cp.start()
        copies.append(cp)

    # In-kernel f32 -> bf16 cast of the (B, in) input: one vreg of VPU work,
    # avoids a standalone XLA convert op before the call.
    h = x_ref[...].astype(jnp.bfloat16)
    for i in range(_N_LAYERS):
        copies[i].wait()
        acc = jnp.dot(h, w_vmem[i][...], preferred_element_type=jnp.float32)
        act = jnp.maximum(acc + biases[i][...], 0.0)   # (1, N) broadcasts over (B, N)
        if i + 1 < _N_LAYERS:
            h = act.astype(jnp.bfloat16)               # bf16 activations feed the MXU
        else:
            # Final layer was zero-padded to 128 lanes; emit the real 8 Q-values
            # with one masked (B, 8) store -- negligible, and it avoids any
            # post-kernel XLA slice/GEMM.
            o_ref[...] = act[:, : o_ref.shape[-1]].astype(o_ref.dtype)


def dqn_fused_forward(x, prepared):
    """Forward pass of DQN_Model (ReLU after every layer, incl. the last)."""
    weights, biases = prepared
    if any(w.dtype != jnp.bfloat16 for w in weights):
        raise TypeError(
            "fused-layer weights must be stored as bf16 (use prepare_params); "
            "an in-call f32->bf16 conversion would double HBM traffic.")
    if x.ndim != 2:
        raise ValueError("expected x of shape (batch, input_size)")

    B, in_features = x.shape
    n_out = _LAYER_SIZES[-1]

    flops = 2 * B * sum(w.shape[0] * w.shape[1] for w in weights)
    bytes_accessed = (
        x.size * x.dtype.itemsize
        + sum(w.size * 2 for w in weights)
        + sum(b.size * 4 for b in biases)
        + B * n_out * 4
    )

    in_specs = (
        [pl.BlockSpec((B, in_features), lambda i: (0, 0))]        # x -> VMEM
        + [pl.BlockSpec(memory_space=pl.ANY) for _ in weights]    # Ws stay in HBM
        + [pl.BlockSpec((1, b.shape[1]), lambda i: (0, 0)) for b in biases]
    )

    # TODO(synk): for large B, add a batch grid axis marked "parallel", guard
    # the weight-DMA issuance/waits with pl.when(program_id == 0) so the
    # 12.5 MiB streams once (scratch persists across grid steps), and re-check
    # the v7x 64 MiB VMEM budget.
    grid_spec = pltpu.PrefetchScalarGridSpec(
        num_scalar_prefetch=0,
        grid=(1,),
        in_specs=in_specs,
        out_specs=pl.BlockSpec((B, n_out), lambda i: (0, 0)),
        scratch_shapes=(
            [pltpu.VMEM(w.shape, jnp.bfloat16) for w in weights]
            + [pltpu.SemaphoreType.DMA((_N_LAYERS,))]
        ),
    )

    return pl.pallas_call(
        _fused_mlp_kernel,
        out_shape=jax.ShapeDtypeStruct((B, n_out), jnp.float32),
        grid_spec=grid_spec,
        compiler_params=pltpu.CompilerParams(
            dimension_semantics=("arbitrary",),
            # Actual footprint ~13 MiB (12.5 MiB weight scratch + small
            # x/bias/out buffers); 20 MiB leaves headroom without reserving
            # 62% of v7x's 64 MiB physical VMEM.
            vmem_limit_bytes=20 * 1024 * 1024,
        ),
        cost_estimate=pl.CostEstimate(
            flops=flops, transcendentals=0, bytes_accessed=bytes_accessed),
    )(x, *weights, *biases)


dqn_forward = jax.jit(dqn_fused_forward)


# ---------------------------------------------------------------------------
# Parameter construction / preparation (deterministic, in-script)
# ---------------------------------------------------------------------------

def init_params(key, input_size):
    """Layer sizes exactly as in DQN_Model.__init__; torch-default uniform init."""
    params = []
    fan_in = input_size
    for fan_out in _LAYER_SIZES:
        key, kw, kb = jax.random.split(key, 3)
        bound = 1.0 / (fan_in ** 0.5)
        w = jax.random.uniform(kw, (fan_in, fan_out), jnp.float32,
                               minval=-bound, maxval=bound)
        b = jax.random.uniform(kb, (fan_out,), jnp.float32,
                               minval=-bound, maxval=bound)
        params.append((w, b))
        fan_in = fan_out
    return params


def prepare_params(params):
    """One-time conversion to the layout the kernel streams.

      * weights pre-transposed (in, out) and stored bf16 (half the HBM bytes)
      * biases reshaped to (1, out) f32 once, not per call
      * final 1024 -> 8 layer zero-padded to 128 output lanes so it fuses into
        the same kernel with a lane-aligned matmul
    """
    assert len(params) == _N_LAYERS
    weights, biases = [], []
    for idx, (w, b) in enumerate(params):
        if idx == _N_LAYERS - 1:
            w = jnp.pad(w, ((0, 0), (0, _PAD_LAST - w.shape[1])))
            b = jnp.pad(b, (0, _PAD_LAST - b.shape[0]))
        weights.append(w.astype(jnp.bfloat16))
        biases.append(b.reshape(1, -1).astype(jnp.float32))
    return tuple(weights), tuple(biases)


def dqn_forward_ref(x, prepared):
    """Pure-JAX reference with the same numerics (bf16 weights/acts, f32 accum)."""
    weights, biases = prepared
    h = x.astype(jnp.bfloat16)
    act = None
    for w, b in zip(weights, biases):
        acc = jnp.dot(h, w, preferred_element_type=jnp.float32) + b
        act = jnp.maximum(acc, 0.0)
        h = act.astype(jnp.bfloat16)
    return act[:, : _LAYER_SIZES[-1]]


if __name__ == "__main__":
    INPUT_SIZE = 128   # value passed to DQN_Model(input_size)
    BATCH = 8

    key = jax.random.PRNGKey(0)
    key, kx = jax.random.split(key)
    x = jax.random.normal(kx, (BATCH, INPUT_SIZE), jnp.float32)
    prepared = prepare_params(init_params(key, INPUT_SIZE))

    out = jax.block_until_ready(dqn_forward(x, prepared))
    assert out.shape == (BATCH, 8), out.shape

    ref = dqn_forward_ref(x, prepared)
    assert jnp.allclose(out, ref, atol=2e-2, rtol=2e-2), "mismatch vs reference"

    print("KERNEL_OK")
</pallas_src>

<mosaic_0001>
module attributes {stable_mosaic.version = 11 : i64} {
  func.func @_fused_mlp_kernel(%arg0: i32, %arg1: memref<8x128xf32, #tpu.memory_space<vmem>>, %arg2: memref<128x1024xbf16, #tpu.memory_space<any>>, %arg3: memref<1024x1024xbf16, #tpu.memory_space<any>>, %arg4: memref<1024x2048xbf16, #tpu.memory_space<any>>, %arg5: memref<2048x1024xbf16, #tpu.memory_space<any>>, %arg6: memref<1024x1024xbf16, #tpu.memory_space<any>>, %arg7: memref<1024x128xbf16, #tpu.memory_space<any>>, %arg8: memref<1x1024xf32, #tpu.memory_space<vmem>>, %arg9: memref<1x1024xf32, #tpu.memory_space<vmem>>, %arg10: memref<1x2048xf32, #tpu.memory_space<vmem>>, %arg11: memref<1x1024xf32, #tpu.memory_space<vmem>>, %arg12: memref<1x1024xf32, #tpu.memory_space<vmem>>, %arg13: memref<1x128xf32, #tpu.memory_space<vmem>>, %arg14: memref<8x8xf32, #tpu.memory_space<vmem>>, %arg15: memref<128x1024xbf16, #tpu.memory_space<vmem>>, %arg16: memref<1024x1024xbf16, #tpu.memory_space<vmem>>, %arg17: memref<1024x2048xbf16, #tpu.memory_space<vmem>>, %arg18: memref<2048x1024xbf16, #tpu.memory_space<vmem>>, %arg19: memref<1024x1024xbf16, #tpu.memory_space<vmem>>, %arg20: memref<1024x128xbf16, #tpu.memory_space<vmem>>, %arg21: memref<6x!tpu.dma_semaphore, #tpu.memory_space<semaphore_mem>>) attributes {dimension_semantics = [#tpu.dimension_semantics<arbitrary>], iteration_bounds = array<i64: 1>, scalar_prefetch = 0 : i64, scratch_operands = 7 : i64, tpu.core_type = #tpu.core_type<tc>, window_params = [{pipeline_mode = #tpu.pipeline_mode<synchronous>, transform_indices = @transform_0, window_bounds = array<i64: 8, 128>}, {}, {}, {}, {}, {}, {}, {pipeline_mode = #tpu.pipeline_mode<synchronous>, transform_indices = @transform_7, window_bounds = array<i64: 1, 1024>}, {pipeline_mode = #tpu.pipeline_mode<synchronous>, transform_indices = @transform_8, window_bounds = array<i64: 1, 1024>}, {pipeline_mode = #tpu.pipeline_mode<synchronous>, transform_indices = @transform_9, window_bounds = array<i64: 1, 2048>}, {pipeline_mode = #tpu.pipeline_mode<synchronous>, transform_indices = @transform_10, window_bounds = array<i64: 1, 1024>}, {pipeline_mode = #tpu.pipeline_mode<synchronous>, transform_indices = @transform_11, window_bounds = array<i64: 1, 1024>}, {pipeline_mode = #tpu.pipeline_mode<synchronous>, transform_indices = @transform_12, window_bounds = array<i64: 1, 128>}, {pipeline_mode = #tpu.pipeline_mode<synchronous>, transform_indices = @transform_13, window_bounds = array<i64: 8, 8>}]} {
    %c0_i32 = arith.constant 0 : i32
    %0 = tpu.memref_slice %arg21[%c0_i32] : memref<6x!tpu.dma_semaphore, #tpu.memory_space<semaphore_mem>> -> memref<1x!tpu.dma_semaphore, #tpu.memory_space<semaphore_mem>>
    %1 = tpu.memref_squeeze %0 : memref<1x!tpu.dma_semaphore, #tpu.memory_space<semaphore_mem>> -> memref<!tpu.dma_semaphore, #tpu.memory_space<semaphore_mem>>
    tpu.enqueue_dma source(%arg2 : memref<128x1024xbf16, #tpu.memory_space<any>>) target(%arg15 : memref<128x1024xbf16, #tpu.memory_space<vmem>>) target_semaphore(%1 : memref<!tpu.dma_semaphore, #tpu.memory_space<semaphore_mem>>)
    %c1_i32 = arith.constant 1 : i32
    %2 = tpu.memref_slice %arg21[%c1_i32] : memref<6x!tpu.dma_semaphore, #tpu.memory_space<semaphore_mem>> -> memref<1x!tpu.dma_semaphore, #tpu.memory_space<semaphore_mem>>
    %3 = tpu.memref_squeeze %2 : memref<1x!tpu.dma_semaphore, #tpu.memory_space<semaphore_mem>> -> memref<!tpu.dma_semaphore, #tpu.memory_space<semaphore_mem>>
    tpu.enqueue_dma source(%arg3 : memref<1024x1024xbf16, #tpu.memory_space<any>>) target(%arg16 : memref<1024x1024xbf16, #tpu.memory_space<vmem>>) target_semaphore(%3 : memref<!tpu.dma_semaphore, #tpu.memory_space<semaphore_mem>>)
    %c2_i32 = arith.constant 2 : i32
    %4 = tpu.memref_slice %arg21[%c2_i32] : memref<6x!tpu.dma_semaphore, #tpu.memory_space<semaphore_mem>> -> memref<1x!tpu.dma_semaphore, #tpu.memory_space<semaphore_mem>>
    %5 = tpu.memref_squeeze %4 : memref<1x!tpu.dma_semaphore, #tpu.memory_space<semaphore_mem>> -> memref<!tpu.dma_semaphore, #tpu.memory_space<semaphore_mem>>
    tpu.enqueue_dma source(%arg4 : memref<1024x2048xbf16, #tpu.memory_space<any>>) target(%arg17 : memref<1024x2048xbf16, #tpu.memory_space<vmem>>) target_semaphore(%5 : memref<!tpu.dma_semaphore, #tpu.memory_space<semaphore_mem>>)
    %c3_i32 = arith.constant 3 : i32
    %6 = tpu.memref_slice %arg21[%c3_i32] : memref<6x!tpu.dma_semaphore, #tpu.memory_space<semaphore_mem>> -> memref<1x!tpu.dma_semaphore, #tpu.memory_space<semaphore_mem>>
    %7 = tpu.memref_squeeze %6 : memref<1x!tpu.dma_semaphore, #tpu.memory_space<semaphore_mem>> -> memref<!tpu.dma_semaphore, #tpu.memory_space<semaphore_mem>>
    tpu.enqueue_dma source(%arg5 : memref<2048x1024xbf16, #tpu.memory_space<any>>) target(%arg18 : memref<2048x1024xbf16, #tpu.memory_space<vmem>>) target_semaphore(%7 : memref<!tpu.dma_semaphore, #tpu.memory_space<semaphore_mem>>)
    %c4_i32 = arith.constant 4 : i32
    %8 = tpu.memref_slice %arg21[%c4_i32] : memref<6x!tpu.dma_semaphore, #tpu.memory_space<semaphore_mem>> -> memref<1x!tpu.dma_semaphore, #tpu.memory_space<semaphore_mem>>
    %9 = tpu.memref_squeeze %8 : memref<1x!tpu.dma_semaphore, #tpu.memory_space<semaphore_mem>> -> memref<!tpu.dma_semaphore, #tpu.memory_space<semaphore_mem>>
    tpu.enqueue_dma source(%arg6 : memref<1024x1024xbf16, #tpu.memory_space<any>>) target(%arg19 : memref<1024x1024xbf16, #tpu.memory_space<vmem>>) target_semaphore(%9 : memref<!tpu.dma_semaphore, #tpu.memory_space<semaphore_mem>>)
    %c5_i32 = arith.constant 5 : i32
    %10 = tpu.memref_slice %arg21[%c5_i32] : memref<6x!tpu.dma_semaphore, #tpu.memory_space<semaphore_mem>> -> memref<1x!tpu.dma_semaphore, #tpu.memory_space<semaphore_mem>>
    %11 = tpu.memref_squeeze %10 : memref<1x!tpu.dma_semaphore, #tpu.memory_space<semaphore_mem>> -> memref<!tpu.dma_semaphore, #tpu.memory_space<semaphore_mem>>
    tpu.enqueue_dma source(%arg7 : memref<1024x128xbf16, #tpu.memory_space<any>>) target(%arg20 : memref<1024x128xbf16, #tpu.memory_space<vmem>>) target_semaphore(%11 : memref<!tpu.dma_semaphore, #tpu.memory_space<semaphore_mem>>)
    %c0 = arith.constant 0 : index
    %c0_0 = arith.constant 0 : index
    %12 = vector.load %arg1[%c0, %c0_0] : memref<8x128xf32, #tpu.memory_space<vmem>>, vector<8x128xf32>
    %13 = arith.truncf %12 : vector<8x128xf32> to vector<8x128xbf16>
    %c0_i32_1 = arith.constant 0 : i32
    %14 = tpu.memref_slice %arg21[%c0_i32_1] : memref<6x!tpu.dma_semaphore, #tpu.memory_space<semaphore_mem>> -> memref<1x!tpu.dma_semaphore, #tpu.memory_space<semaphore_mem>>
    %15 = tpu.memref_squeeze %14 : memref<1x!tpu.dma_semaphore, #tpu.memory_space<semaphore_mem>> -> memref<!tpu.dma_semaphore, #tpu.memory_space<semaphore_mem>>
    tpu.wait_dma2 semaphore(%15 : memref<!tpu.dma_semaphore, #tpu.memory_space<semaphore_mem>>) src(%arg2 : memref<128x1024xbf16, #tpu.memory_space<any>>) dst(%arg15 : memref<128x1024xbf16, #tpu.memory_space<vmem>>)
    %c0_2 = arith.constant 0 : index
    %c0_3 = arith.constant 0 : index
    %16 = vector.load %arg15[%c0_2, %c0_3] : memref<128x1024xbf16, #tpu.memory_space<vmem>>, vector<128x1024xbf16>
    %cst = arith.constant dense<0.000000e+00> : vector<8x1024xf32>
    %17 = tpu.matmul %13, %16, %cst {dimension_numbers = #tpu.dot_dimension_numbers<[1], [0], [0], [1], [0, 0, 1, 1], [], []>} : vector<8x128xbf16>, vector<128x1024xbf16>, vector<8x1024xf32> -> vector<8x1024xf32>
    %c0_4 = arith.constant 0 : index
    %c0_5 = arith.constant 0 : index
    %18 = vector.load %arg8[%c0_4, %c0_5] : memref<1x1024xf32, #tpu.memory_space<vmem>>, vector<1x1024xf32>
    %19 = vector.broadcast %18 : vector<1x1024xf32> to vector<8x1024xf32>
    %20 = arith.addf %17, %19 : vector<8x1024xf32>
    %cst_6 = arith.constant 0.000000e+00 : f32
    %21 = vector.broadcast %cst_6 : f32 to vector<8x1024xf32>
    %22 = arith.maximumf %20, %21 : vector<8x1024xf32>
    %23 = arith.truncf %22 : vector<8x1024xf32> to vector<8x1024xbf16>
    %c1_i32_7 = arith.constant 1 : i32
    %24 = tpu.memref_slice %arg21[%c1_i32_7] : memref<6x!tpu.dma_semaphore, #tpu.memory_space<semaphore_mem>> -> memref<1x!tpu.dma_semaphore, #tpu.memory_space<semaphore_mem>>
    %25 = tpu.memref_squeeze %24 : memref<1x!tpu.dma_semaphore, #tpu.memory_space<semaphore_mem>> -> memref<!tpu.dma_semaphore, #tpu.memory_space<semaphore_mem>>
    tpu.wait_dma2 semaphore(%25 : memref<!tpu.dma_semaphore, #tpu.memory_space<semaphore_mem>>) src(%arg3 : memref<1024x1024xbf16, #tpu.memory_space<any>>) dst(%arg16 : memref<1024x1024xbf16, #tpu.memory_space<vmem>>)
    %c0_8 = arith.constant 0 : index
    %c0_9 = arith.constant 0 : index
    %26 = vector.load %arg16[%c0_8, %c0_9] : memref<1024x1024xbf16, #tpu.memory_space<vmem>>, vector<1024x1024xbf16>
    %cst_10 = arith.constant dense<0.000000e+00> : vector<8x1024xf32>
    %27 = tpu.matmul %23, %26, %cst_10 {dimension_numbers = #tpu.dot_dimension_numbers<[1], [0], [0], [1], [0, 0, 1, 1], [], []>} : vector<8x1024xbf16>, vector<1024x1024xbf16>, vector<8x1024xf32> -> vector<8x1024xf32>
    %c0_11 = arith.constant 0 : index
    %c0_12 = arith.constant 0 : index
    %28 = vector.load %arg9[%c0_11, %c0_12] : memref<1x1024xf32, #tpu.memory_space<vmem>>, vector<1x1024xf32>
    %29 = vector.broadcast %28 : vector<1x1024xf32> to vector<8x1024xf32>
    %30 = arith.addf %27, %29 : vector<8x1024xf32>
    %cst_13 = arith.constant 0.000000e+00 : f32
    %31 = vector.broadcast %cst_13 : f32 to vector<8x1024xf32>
    %32 = arith.maximumf %30, %31 : vector<8x1024xf32>
    %33 = arith.truncf %32 : vector<8x1024xf32> to vector<8x1024xbf16>
    %c2_i32_14 = arith.constant 2 : i32
    %34 = tpu.memref_slice %arg21[%c2_i32_14] : memref<6x!tpu.dma_semaphore, #tpu.memory_space<semaphore_mem>> -> memref<1x!tpu.dma_semaphore, #tpu.memory_space<semaphore_mem>>
    %35 = tpu.memref_squeeze %34 : memref<1x!tpu.dma_semaphore, #tpu.memory_space<semaphore_mem>> -> memref<!tpu.dma_semaphore, #tpu.memory_space<semaphore_mem>>
    tpu.wait_dma2 semaphore(%35 : memref<!tpu.dma_semaphore, #tpu.memory_space<semaphore_mem>>) src(%arg4 : memref<1024x2048xbf16, #tpu.memory_space<any>>) dst(%arg17 : memref<1024x2048xbf16, #tpu.memory_space<vmem>>)
    %c0_15 = arith.constant 0 : index
    %c0_16 = arith.constant 0 : index
    %36 = vector.load %arg17[%c0_15, %c0_16] : memref<1024x2048xbf16, #tpu.memory_space<vmem>>, vector<1024x2048xbf16>
    %cst_17 = arith.constant dense<0.000000e+00> : vector<8x2048xf32>
    %37 = tpu.matmul %33, %36, %cst_17 {dimension_numbers = #tpu.dot_dimension_numbers<[1], [0], [0], [1], [0, 0, 1, 1], [], []>} : vector<8x1024xbf16>, vector<1024x2048xbf16>, vector<8x2048xf32> -> vector<8x2048xf32>
    %c0_18 = arith.constant 0 : index
    %c0_19 = arith.constant 0 : index
    %38 = vector.load %arg10[%c0_18, %c0_19] : memref<1x2048xf32, #tpu.memory_space<vmem>>, vector<1x2048xf32>
    %39 = vector.broadcast %38 : vector<1x2048xf32> to vector<8x2048xf32>
    %40 = arith.addf %37, %39 : vector<8x2048xf32>
    %cst_20 = arith.constant 0.000000e+00 : f32
    %41 = vector.broadcast %cst_20 : f32 to vector<8x2048xf32>
    %42 = arith.maximumf %40, %41 : vector<8x2048xf32>
    %43 = arith.truncf %42 : vector<8x2048xf32> to vector<8x2048xbf16>
    %c3_i32_21 = arith.constant 3 : i32
    %44 = tpu.memref_slice %arg21[%c3_i32_21] : memref<6x!tpu.dma_semaphore, #tpu.memory_space<semaphore_mem>> -> memref<1x!tpu.dma_semaphore, #tpu.memory_space<semaphore_mem>>
    %45 = tpu.memref_squeeze %44 : memref<1x!tpu.dma_semaphore, #tpu.memory_space<semaphore_mem>> -> memref<!tpu.dma_semaphore, #tpu.memory_space<semaphore_mem>>
    tpu.wait_dma2 semaphore(%45 : memref<!tpu.dma_semaphore, #tpu.memory_space<semaphore_mem>>) src(%arg5 : memref<2048x1024xbf16, #tpu.memory_space<any>>) dst(%arg18 : memref<2048x1024xbf16, #tpu.memory_space<vmem>>)
    %c0_22 = arith.constant 0 : index
    %c0_23 = arith.constant 0 : index
    %46 = vector.load %arg18[%c0_22, %c0_23] : memref<2048x1024xbf16, #tpu.memory_space<vmem>>, vector<2048x1024xbf16>
    %cst_24 = arith.constant dense<0.000000e+00> : vector<8x1024xf32>
    %47 = tpu.matmul %43, %46, %cst_24 {dimension_numbers = #tpu.dot_dimension_numbers<[1], [0], [0], [1], [0, 0, 1, 1], [], []>} : vector<8x2048xbf16>, vector<2048x1024xbf16>, vector<8x1024xf32> -> vector<8x1024xf32>
    %c0_25 = arith.constant 0 : index
    %c0_26 = arith.constant 0 : index
    %48 = vector.load %arg11[%c0_25, %c0_26] : memref<1x1024xf32, #tpu.memory_space<vmem>>, vector<1x1024xf32>
    %49 = vector.broadcast %48 : vector<1x1024xf32> to vector<8x1024xf32>
    %50 = arith.addf %47, %49 : vector<8x1024xf32>
    %cst_27 = arith.constant 0.000000e+00 : f32
    %51 = vector.broadcast %cst_27 : f32 to vector<8x1024xf32>
    %52 = arith.maximumf %50, %51 : vector<8x1024xf32>
    %53 = arith.truncf %52 : vector<8x1024xf32> to vector<8x1024xbf16>
    %c4_i32_28 = arith.constant 4 : i32
    %54 = tpu.memref_slice %arg21[%c4_i32_28] : memref<6x!tpu.dma_semaphore, #tpu.memory_space<semaphore_mem>> -> memref<1x!tpu.dma_semaphore, #tpu.memory_space<semaphore_mem>>
    %55 = tpu.memref_squeeze %54 : memref<1x!tpu.dma_semaphore, #tpu.memory_space<semaphore_mem>> -> memref<!tpu.dma_semaphore, #tpu.memory_space<semaphore_mem>>
    tpu.wait_dma2 semaphore(%55 : memref<!tpu.dma_semaphore, #tpu.memory_space<semaphore_mem>>) src(%arg6 : memref<1024x1024xbf16, #tpu.memory_space<any>>) dst(%arg19 : memref<1024x1024xbf16, #tpu.memory_space<vmem>>)
    %c0_29 = arith.constant 0 : index
    %c0_30 = arith.constant 0 : index
    %56 = vector.load %arg19[%c0_29, %c0_30] : memref<1024x1024xbf16, #tpu.memory_space<vmem>>, vector<1024x1024xbf16>
    %cst_31 = arith.constant dense<0.000000e+00> : vector<8x1024xf32>
    %57 = tpu.matmul %53, %56, %cst_31 {dimension_numbers = #tpu.dot_dimension_numbers<[1], [0], [0], [1], [0, 0, 1, 1], [], []>} : vector<8x1024xbf16>, vector<1024x1024xbf16>, vector<8x1024xf32> -> vector<8x1024xf32>
    %c0_32 = arith.constant 0 : index
    %c0_33 = arith.constant 0 : index
    %58 = vector.load %arg12[%c0_32, %c0_33] : memref<1x1024xf32, #tpu.memory_space<vmem>>, vector<1x1024xf32>
    %59 = vector.broadcast %58 : vector<1x1024xf32> to vector<8x1024xf32>
    %60 = arith.addf %57, %59 : vector<8x1024xf32>
    %cst_34 = arith.constant 0.000000e+00 : f32
    %61 = vector.broadcast %cst_34 : f32 to vector<8x1024xf32>
    %62 = arith.maximumf %60, %61 : vector<8x1024xf32>
    %63 = arith.truncf %62 : vector<8x1024xf32> to vector<8x1024xbf16>
    %c5_i32_35 = arith.constant 5 : i32
    %64 = tpu.memref_slice %arg21[%c5_i32_35] : memref<6x!tpu.dma_semaphore, #tpu.memory_space<semaphore_mem>> -> memref<1x!tpu.dma_semaphore, #tpu.memory_space<semaphore_mem>>
    %65 = tpu.memref_squeeze %64 : memref<1x!tpu.dma_semaphore, #tpu.memory_space<semaphore_mem>> -> memref<!tpu.dma_semaphore, #tpu.memory_space<semaphore_mem>>
    tpu.wait_dma2 semaphore(%65 : memref<!tpu.dma_semaphore, #tpu.memory_space<semaphore_mem>>) src(%arg7 : memref<1024x128xbf16, #tpu.memory_space<any>>) dst(%arg20 : memref<1024x128xbf16, #tpu.memory_space<vmem>>)
    %c0_36 = arith.constant 0 : index
    %c0_37 = arith.constant 0 : index
    %66 = vector.load %arg20[%c0_36, %c0_37] : memref<1024x128xbf16, #tpu.memory_space<vmem>>, vector<1024x128xbf16>
    %cst_38 = arith.constant dense<0.000000e+00> : vector<8x128xf32>
    %67 = tpu.matmul %63, %66, %cst_38 {dimension_numbers = #tpu.dot_dimension_numbers<[1], [0], [0], [1], [0, 0, 1, 1], [], []>} : vector<8x1024xbf16>, vector<1024x128xbf16>, vector<8x128xf32> -> vector<8x128xf32>
    %c0_39 = arith.constant 0 : index
    %c0_40 = arith.constant 0 : index
    %68 = vector.load %arg13[%c0_39, %c0_40] : memref<1x128xf32, #tpu.memory_space<vmem>>, vector<1x128xf32>
    %69 = vector.broadcast %68 : vector<1x128xf32> to vector<8x128xf32>
    %70 = arith.addf %67, %69 : vector<8x128xf32>
    %cst_41 = arith.constant 0.000000e+00 : f32
    %71 = vector.broadcast %cst_41 : f32 to vector<8x128xf32>
    %72 = arith.maximumf %70, %71 : vector<8x128xf32>
    %73 = vector.extract_strided_slice %72 {offsets = [0, 0], sizes = [8, 8], strides = [1, 1]} : vector<8x128xf32> to vector<8x8xf32>
    %c0_42 = arith.constant 0 : index
    %c0_43 = arith.constant 0 : index
    %74 = vector.load %arg14[%c0_42, %c0_43] : memref<8x8xf32, #tpu.memory_space<vmem>>, vector<8x8xf32>
    tpu.vector_store %arg14[%c0_42, %c0_43], %73 {strides = array<i32>} : memref<8x8xf32, #tpu.memory_space<vmem>>, vector<8x8xf32>,
    return
  }
  func.func @transform_0(%arg0: i32) -> (i32, i32) {
    %c0_i32 = arith.constant 0 : i32
    %c0_i32_0 = arith.constant 0 : i32
    %c0_i32_1 = arith.constant 0 : i32
    return %c0_i32, %c0_i32_0 : i32, i32
  }
  func.func @transform_7(%arg0: i32) -> (i32, i32) {
    %c0_i32 = arith.constant 0 : i32
    %c0_i32_0 = arith.constant 0 : i32
    %c0_i32_1 = arith.constant 0 : i32
    return %c0_i32, %c0_i32_0 : i32, i32
  }
  func.func @transform_8(%arg0: i32) -> (i32, i32) {
    %c0_i32 = arith.constant 0 : i32
    %c0_i32_0 = arith.constant 0 : i32
    %c0_i32_1 = arith.constant 0 : i32
    return %c0_i32, %c0_i32_0 : i32, i32
  }
  func.func @transform_9(%arg0: i32) -> (i32, i32) {
    %c0_i32 = arith.constant 0 : i32
    %c0_i32_0 = arith.constant 0 : i32
    %c0_i32_1 = arith.constant 0 : i32
    return %c0_i32, %c0_i32_0 : i32, i32
  }
  func.func @transform_10(%arg0: i32) -> (i32, i32) {
    %c0_i32 = arith.constant 0 : i32
    %c0_i32_0 = arith.constant 0 : i32
    %c0_i32_1 = arith.constant 0 : i32
    return %c0_i32, %c0_i32_0 : i32, i32
  }
  func.func @transform_11(%arg0: i32) -> (i32, i32) {
    %c0_i32 = arith.constant 0 : i32
    %c0_i32_0 = arith.constant 0 : i32
    %c0_i32_1 = arith.constant 0 : i32
    return %c0_i32, %c0_i32_0 : i32, i32
  }
  func.func @transform_12(%arg0: i32) -> (i32, i32) {
    %c0_i32 = arith.constant 0 : i32
    %c0_i32_0 = arith.constant 0 : i32
    %c0_i32_1 = arith.constant 0 : i32
    return %c0_i32, %c0_i32_0 : i32, i32
  }
  func.func @transform_13(%arg0: i32) -> (i32, i32) {
    %c0_i32 = arith.constant 0 : i32
    %c0_i32_0 = arith.constant 0 : i32
    %c0_i32_1 = arith.constant 0 : i32
    return %c0_i32, %c0_i32_0 : i32, i32
  }
}

</mosaic_0001>

<bundles_post_ra>
// kernel: dqn_fused_forward.1
= control target key start
LH: loop header
LB: loop body
LE: loop exit
PB: predicated region body
PF: predicated region fallthrough
CT: control target
= control target key end

     0   :  { %18 = vsyncpa [#allocation10], 0  ;;  %s9582_s0 = inlined_call_operand.hbm [shape: f32[8,128], index: 0, kind: input, shape index: {}]   ;;  %s9583_s1 = inlined_call_operand.hbm [shape: bf16[128,1024], index: 1, kind: input, shape index: {}]   ;;  %s9584_s2 = inlined_call_operand.hbm [shape: bf16[1024,1024], index: 2, kind: input, shape index: {}]   ;;  %s9585_s3 = inlined_call_operand.hbm [shape: bf16[1024,2048], index: 3, kind: input, shape index: {}]   ;;  %s9586_s4 = inlined_call_operand.hbm [shape: bf16[2048,1024], index: 4, kind: input, shape index: {}]   ;;  %s9587_s5 = inlined_call_operand.hbm [shape: bf16[1024,1024], index: 5, kind: input, shape index: {}]   ;;  %s9588_s6 = inlined_call_operand.hbm [shape: bf16[1024,128], index: 6, kind: input, shape index: {}]   ;;  %s9589_s7 = inlined_call_operand.hbm [shape: f32[1,1024], index: 7, kind: input, shape index: {}]   ;;  %s9590_s8 = inlined_call_operand.hbm [shape: f32[1,1024], index: 8, kind: input, shape index: {}]   ;;  %s9591_s9 = inlined_call_operand.hbm [shape: f32[1,2048], index: 9, kind: input, shape index: {}]   ;;  %s9592_s10 = inlined_call_operand.hbm [shape: f32[1,1024], index: 10, kind: input, shape index: {}]   ;;  %s9593_s11 = inlined_call_operand.hbm [shape: f32[1,1024], index: 11, kind: input, shape index: {}]   ;;  %s9594_s12 = inlined_call_operand.hbm [shape: f32[1,128], index: 12, kind: input, shape index: {}]   ;;  %s9595_s13 = inlined_call_operand.hbm [shape: f32[8,8], index: 13, kind: output, shape index: {}]  }
   0x1   :  { %19 = vsyncpa [#allocation13], 0 }
   0x2   :  { %20 = vsyncpa [#allocation16], 0 }
   0x3   :  { %21 = vsyncpa [#allocation19], 0 }
   0x4   :  { %22 = vsyncpa [#allocation11], 0  ;;  %s8906_s25 = smov [#allocation12]   ;;  %s8907_s27 = smov [#allocation15]  }
   0x5   :  { %s39_s26 = sshll.u32 %s8906_s25, 4  ;;  %s59_s28 = sshll.u32 %s8907_s27, 4  ;;  %s40_s26 = int_to_ptr.vmem [resolvable:$true] %s39_s26  ;;  %s60_s28 = int_to_ptr.vmem [resolvable:$true] %s59_s28 }
   0x6   :  { %s8686_s14 = scalar_lea.hbm %s9589_s7, 128 }
   0x7   :  { %p8687_p0 = scmp.ne.s32.totalorder %s9589_s7, %s8686_s14  ;;  %p8690_p1 = scmp.lt.u32.totalorder %s8686_s14, %s9589_s7 }
   0x9   :  { %p8692_p2 = pnand %p8690_p1, %p8687_p0 }
   0xb   :  { %8695 = shalt.err (!%p8692_p2)
}
   0xc   :  { %s8696_s19 = scalar_lea.vmem %s40_s26, 128  ;;  %p8701_p4 = scmp.lt.s32.totalorder %s40_s26, %s40_s26 }
   0xd   :  { %p8697_p3 = scmp.ne.s32.totalorder %s40_s26, %s8696_s19  ;;  %p8702_p5 = scmp.lt.s32.totalorder %s8696_s19, %s8696_s19 }
   0xf   :  { %p8703_p6 = por %p8702_p5, %p8701_p4 }
  0x11   :  { %p8704_p7 = pnand %p8703_p6, %p8697_p3 }
  0x13   :  { %8707 = shalt.err (!%p8704_p7)
}
  0x14   :  { %42 = dma.hbm_to_vmem [thread:$0]  %s9589_s7, 128, %s40_s26, [#allocation13]  }
  0x15   :  { %s8708_s24 = scalar_lea.hbm %s9591_s9, 256 }
  0x16   :  { %p8709_p8 = scmp.ne.s32.totalorder %s9591_s9, %s8708_s24  ;;  %p8712_p9 = scmp.lt.u32.totalorder %s8708_s24, %s9591_s9 }
  0x18   :  { %p8714_p10 = pnand %p8712_p9, %p8709_p8 }
  0x1a   :  { %8717 = shalt.err (!%p8714_p10)
}
  0x1b   :  { %s8718_s14 = scalar_lea.vmem %s60_s28, 256  ;;  %p8723_p12 = scmp.lt.s32.totalorder %s60_s28, %s60_s28 }
  0x1c   :  { %p8719_p11 = scmp.ne.s32.totalorder %s60_s28, %s8718_s14  ;;  %p8724_p13 = scmp.lt.s32.totalorder %s8718_s14, %s8718_s14 }
  0x1e   :  { %p8725_p0 = por %p8724_p13, %p8723_p12 }
  0x20   :  { %p8726_p1 = pnand %p8725_p0, %p8719_p11 }
  0x22   :  { %8729 = shalt.err (!%p8726_p1)
}
  0x23   :  { %62 = dma.hbm_to_vmem [thread:$0]  %s9591_s9, 256, %s60_s28, [#allocation16]  }
  0x24   :  { %s8908_s15 = smov [#allocation18]   ;;  %s8909_s17 = smov [#allocation9]  }
  0x25   :  { %s79_s16 = sshll.u32 %s8908_s15, 4  ;;  %s29_s18 = sshll.u32 %s8909_s17, 4  ;;  %s80_s16 = int_to_ptr.vmem [resolvable:$true] %s79_s16  ;;  %s30_s18 = int_to_ptr.vmem [resolvable:$true] %s29_s18 }
  0x26   :  { %s8730_s21 = scalar_lea.hbm %s9593_s11, 128 }
  0x27   :  { %p8731_p2 = scmp.ne.s32.totalorder %s9593_s11, %s8730_s21  ;;  %p8734_p3 = scmp.lt.u32.totalorder %s8730_s21, %s9593_s11 }
  0x29   :  { %p8736_p4 = pnand %p8734_p3, %p8731_p2 }
  0x2b   :  { %8739 = shalt.err (!%p8736_p4)
}
  0x2c   :  { %s8740_s9 = scalar_lea.vmem %s80_s16, 128  ;;  %p8745_p6 = scmp.lt.s32.totalorder %s80_s16, %s80_s16 }
  0x2d   :  { %p8741_p5 = scmp.ne.s32.totalorder %s80_s16, %s8740_s9  ;;  %p8746_p7 = scmp.lt.s32.totalorder %s8740_s9, %s8740_s9 }
  0x2f   :  { %p8747_p8 = por %p8746_p7, %p8745_p6 }
  0x31   :  { %p8748_p9 = pnand %p8747_p8, %p8741_p5 }
  0x33   :  { %8751 = shalt.err (!%p8748_p9)
}
  0x34   :  { %82 = dma.hbm_to_vmem [thread:$0]  %s9593_s11, 128, %s80_s16, [#allocation19]  }
  0x35   :  { %s8752_s14 = scalar_lea.hbm %s9582_s0, 128 }
  0x36   :  { %p8753_p10 = scmp.ne.s32.totalorder %s9582_s0, %s8752_s14  ;;  %p8756_p11 = scmp.lt.u32.totalorder %s8752_s14, %s9582_s0 }
  0x38   :  { %p8758_p12 = pnand %p8756_p11, %p8753_p10 }
  0x3a   :  { %8761 = shalt.err (!%p8758_p12)
}
  0x3b   :  { %s8762_s19 = scalar_lea.vmem %s30_s18, 128  ;;  %p8767_p0 = scmp.lt.s32.totalorder %s30_s18, %s30_s18 }
  0x3c   :  { %p8763_p13 = scmp.ne.s32.totalorder %s30_s18, %s8762_s19  ;;  %p8768_p1 = scmp.lt.s32.totalorder %s8762_s19, %s8762_s19 }
  0x3e   :  { %p8769_p2 = por %p8768_p1, %p8767_p0 }
  0x40   :  { %p8770_p3 = pnand %p8769_p2, %p8763_p13 }
  0x42   :  { %8773 = shalt.err (!%p8770_p3)
}
  0x43   :  { %32 = dma.hbm_to_vmem [thread:$0]  %s9582_s0, 128, %s30_s18, [#allocation10]  }
  0x44   :  { %s8910_s20 = smov [#allocation14]   ;;  %s8911_s22 = smov [#allocation17]  }
  0x45   :  { %s49_s21 = sshll.u32 %s8910_s20, 4  ;;  %s69_s23 = sshll.u32 %s8911_s22, 4  ;;  %s50_s21 = int_to_ptr.vmem [resolvable:$true] %s49_s21  ;;  %s70_s23 = int_to_ptr.vmem [resolvable:$true] %s69_s23 }
  0x46   :  { %s8774_s9 = scalar_lea.hbm %s9590_s8, 128 }
  0x47   :  { %p8775_p4 = scmp.ne.s32.totalorder %s9590_s8, %s8774_s9  ;;  %p8778_p5 = scmp.lt.u32.totalorder %s8774_s9, %s9590_s8 }
  0x49   :  { %p8780_p6 = pnand %p8778_p5, %p8775_p4 }
  0x4b   :  { %8783 = shalt.err (!%p8780_p6)
}
  0x4c   :  { %s8784_s0 = scalar_lea.vmem %s50_s21, 128  ;;  %p8789_p8 = scmp.lt.s32.totalorder %s50_s21, %s50_s21 }
  0x4d   :  { %p8785_p7 = scmp.ne.s32.totalorder %s50_s21, %s8784_s0  ;;  %p8790_p9 = scmp.lt.s32.totalorder %s8784_s0, %s8784_s0 }
  0x4f   :  { %p8791_p10 = por %p8790_p9, %p8789_p8 }
  0x51   :  { %p8792_p11 = pnand %p8791_p10, %p8785_p7 }
  0x53   :  { %8795 = shalt.err (!%p8792_p11)
}
  0x54   :  { %52 = dma.hbm_to_vmem [thread:$0]  %s9590_s8, 128, %s50_s21, [#allocation13]  }
  0x55   :  { %s8796_s15 = scalar_lea.hbm %s9592_s10, 128 }
  0x56   :  { %p8797_p12 = scmp.ne.s32.totalorder %s9592_s10, %s8796_s15  ;;  %p8800_p13 = scmp.lt.u32.totalorder %s8796_s15, %s9592_s10 }
  0x58   :  { %p8802_p0 = pnand %p8800_p13, %p8797_p12 }
  0x5a   :  { %8805 = shalt.err (!%p8802_p0)
}
  0x5b   :  { %s8806_s20 = scalar_lea.vmem %s70_s23, 128  ;;  %p8811_p2 = scmp.lt.s32.totalorder %s70_s23, %s70_s23 }
  0x5c   :  { %p8807_p1 = scmp.ne.s32.totalorder %s70_s23, %s8806_s20  ;;  %p8812_p3 = scmp.lt.s32.totalorder %s8806_s20, %s8806_s20 }
  0x5e   :  { %p8813_p4 = por %p8812_p3, %p8811_p2 }
  0x60   :  { %p8814_p5 = pnand %p8813_p4, %p8807_p1 }
  0x62   :  { %8817 = shalt.err (!%p8814_p5)
}
  0x63   :  { %72 = dma.hbm_to_vmem [thread:$0]  %s9592_s10, 128, %s70_s23, [#allocation16]  }
  0x64   :  { %s8912_s22 = smov [#allocation20]   ;;  %s8818_s28 = scalar_lea.hbm %s9594_s12, 16 }
  0x65   :  { %s89_s24 = sshll.u32 %s8912_s22, 4  ;;  %p8819_p6 = scmp.ne.s32.totalorder %s9594_s12, %s8818_s28  ;;  %s90_s24 = int_to_ptr.vmem [resolvable:$true] %s89_s24 }
  0x66   :  { %p8822_p7 = scmp.lt.u32.totalorder %s8818_s28, %s9594_s12 }
  0x68   :  { %p8824_p8 = pnand %p8822_p7, %p8819_p6 }
  0x6a   :  { %8827 = shalt.err (!%p8824_p8)
}
  0x6b   :  { %s8828_s18 = scalar_lea.vmem %s90_s24, 16  ;;  %s8832_s10 = scalar_lea.vmem %s90_s24, 32 }
  0x6c   :  { %p8829_p9 = scmp.ne.s32.totalorder %s90_s24, %s8828_s18  ;;  %p8833_p10 = scmp.lt.s32.totalorder %s90_s24, %s90_s24 }
  0x6d   :  { %p8834_p11 = scmp.lt.s32.totalorder %s8832_s10, %s8828_s18 }
  0x6f   :  { %p8835_p12 = por %p8834_p11, %p8833_p10 }
  0x71   :  { %p8836_p13 = pnand %p8835_p12, %p8829_p9 }
  0x73   :  { %8839 = shalt.err (!%p8836_p13)
}
  0x74   :  { %92 = dma.hbm_to_vmem [thread:$0]  %s9594_s12, 16, %s90_s24, [#allocation19]  }
  0x75   :  { %8884 = dma.done.wait [#allocation10], 128  }
  0x76   :  { %8885 = vsyncadd [#allocation10], 4294967168 }
  0x77   :  { %8886 = dma.done.wait [#allocation13], 256  }
  0x78   :  { %8887 = vsyncadd [#allocation13], 4294967040 }
  0x79   :  { %8888 = dma.done.wait [#allocation16], 384  }
  0x7a   :  { %8889 = vsyncadd [#allocation16], 4294966912 }
  0x7b   :  { %8890 = dma.done.wait [#allocation19], 144  }
  0x7c   :  { %8891 = vsyncadd [#allocation19], 4294967152  ;;  %s119_s7 = sld [smem:[#allocation0]]   ;;  %s8913_s26 = smov 1024  }
  0x7d   :  { %131 = sst [smem:[#allocation23]] %s8913_s26  ;;  %s8914_s15 = smov 64  }
  0x7e   :  { %133 = sst [smem:[#allocation23 + $0x1]] %s8913_s26  ;;  %s8915_s17 = smov 128  }
  0x7f   :  { %137 = sst [smem:[#allocation23 + $0x3]] %s8914_s15  ;;  %s8916_s12 = smov 2  }
  0x80   :  { %139 = sst [smem:[#allocation23 + $0x4]] %s8915_s17  ;;  %s8917_s19 = smov [#allocation2]  }
  0x81   :  { %141 = sst [smem:[#allocation23 + $0x5]] %s8916_s12  ;;  %s127_s11 = sshll.u32 %s8917_s19, 4  ;;  %s128_s11 = int_to_ptr.vmem [resolvable:$true] %s127_s11 }
  0x82   :  { %145 = sst [smem:[#allocation23 + $0x7]] %s8914_s15  ;;  %s8201_s16 = sshll.u32 %s119_s7, 26 }
  0x83   :  { %s8918_s20 = smov 4   ;;  %s9101_s8 = sadd.s32 134217728, %s8201_s16 }
  0x84   :  { %147 = sst [smem:[#allocation23 + $0x8]] %s8918_s20  ;;  %s8919_s21 = smov 8  }
  0x85   :  { %135 = sst [smem:[#allocation23 + $0x2]] %s8919_s21  ;;  %s8920_s22 = smov 512  }
  0x86   :  { %143 = sst [smem:[#allocation23 + $0x6]] %s8920_s22  ;;  %s8921_s24 = smov [#allocation8]  }
  0x87   :  { %s8922_s25 = smov [#allocation22]   ;;  %s8923_s27 = smov [#allocation3]  }
  0x88   :  { %149 = dma.general %s9583_s1, 8192, %s128_s11, %s8921_s24, %s8922_s25, [#allocation23], %s9101_s8, 0  }
  0x89   :  { %166 = sst [smem:[#allocation25]] %s8913_s26  ;;  %s162_s29 = sshll.u32 %s8923_s27, 4  ;;  %s163_s29 = int_to_ptr.vmem [resolvable:$true] %s162_s29 }
  0x8a   :  { %168 = sst [smem:[#allocation25 + $0x1]] %s8913_s26  ;;  %s8924_s1 = smov [#allocation8 + $0x1]  }
  0x8b   :  { %170 = sst [smem:[#allocation25 + $0x2]] %s8919_s21  ;;  %s8925_s30 = smov [#allocation24]  }
  0x8c   :  { %172 = sst [smem:[#allocation25 + $0x3]] %s8914_s15  ;;  %s8926_s10 = smov 2048  }
  0x8d   :  { %174 = sst [smem:[#allocation25 + $0x4]] %s8915_s17  ;;  %s8927_s23 = smov [#allocation4]  }
  0x8e   :  { %176 = sst [smem:[#allocation25 + $0x5]] %s8916_s12  ;;  %s197_s14 = sshll.u32 %s8927_s23, 4  ;;  %s198_s14 = int_to_ptr.vmem [resolvable:$true] %s197_s14 }
  0x8f   :  { %178 = sst [smem:[#allocation25 + $0x6]] %s8920_s22  ;;  %s8928_s7 = smov 16  }
  0x90   :  { %180 = sst [smem:[#allocation25 + $0x7]] %s8914_s15  ;;  %s8930_s19 = smov [#allocation26]  }
  0x91   :  { %182 = sst [smem:[#allocation25 + $0x8]] %s8918_s20  ;;  %s8931_s24 = smov [#allocation5]  }
  0x92   :  { %184 = dma.general %s9584_s2, 65536, %s163_s29, %s8924_s1, %s8925_s30, [#allocation25], %s9101_s8, 0  }
  0x93   :  { %201 = sst [smem:[#allocation27]] %s8926_s10  ;;  %s8929_s2 = smov [#allocation8 + $0x2]  }
  0x94   :  { %203 = sst [smem:[#allocation27 + $0x1]] %s8926_s10  ;;  %s232_s25 = sshll.u32 %s8931_s24, 4  ;;  %s233_s25 = int_to_ptr.vmem [resolvable:$true] %s232_s25 }
  0x95   :  { %205 = sst [smem:[#allocation27 + $0x2]] %s8928_s7  ;;  %s8933_s9 = smov [#allocation28]  }
  0x96   :  { %207 = sst [smem:[#allocation27 + $0x3]] %s8914_s15  ;;  %s8934_s29 = smov [#allocation6]  }
  0x97   :  { %209 = sst [smem:[#allocation27 + $0x4]] %s8915_s17  ;;  %s267_s1 = sshll.u32 %s8934_s29, 4  ;;  %s268_s1 = int_to_ptr.vmem [resolvable:$true] %s267_s1 }
  0x98   :  { %211 = sst [smem:[#allocation27 + $0x5]] %s8916_s12  ;;  %s8935_s30 = smov [#allocation7]  }
  0x99   :  { %213 = sst [smem:[#allocation27 + $0x6]] %s8913_s26  ;;  %s298_s0 = sshll.u32 %s8935_s30, 4  ;;  %s299_s0 = int_to_ptr.vmem [resolvable:$true] %s298_s0 }
  0x9a   :  { %215 = sst [smem:[#allocation27 + $0x7]] %s8914_s15 }
  0x9b   :  { %217 = sst [smem:[#allocation27 + $0x8]] %s8918_s20 }
  0x9c   :  { %219 = dma.general %s9585_s3, 131072, %s198_s14, %s8929_s2, %s8930_s19, [#allocation27], %s9101_s8, 0  }
  0x9d   :  { %236 = sst [smem:[#allocation29]] %s8913_s26  ;;  %s8932_s3 = smov [#allocation8 + $0x3]  }
  0x9e   :  { %238 = sst [smem:[#allocation29 + $0x1]] %s8913_s26 }
  0x9f   :  { %240 = sst [smem:[#allocation29 + $0x2]] %s8919_s21 }
  0xa0   :  { %242 = sst [smem:[#allocation29 + $0x3]] %s8914_s15 }
  0xa1   :  { %244 = sst [smem:[#allocation29 + $0x4]] %s8915_s17 }
  0xa2   :  { %246 = sst [smem:[#allocation29 + $0x5]] %s8916_s12 }
  0xa3   :  { %248 = sst [smem:[#allocation29 + $0x6]] %s8920_s22 }
  0xa4   :  { %250 = sst [smem:[#allocation29 + $0x7]] %s8914_s15 }
  0xa5   :  { %252 = sst [smem:[#allocation29 + $0x8]] %s8918_s20 }
  0xa6   :  { %254 = dma.general %s9586_s4, 131072, %s233_s25, %s8932_s3, %s8933_s9, [#allocation29], %s9101_s8, 0  }
  0xa7   :  { %271 = sst [smem:[#allocation31]] %s8913_s26  ;;  %s8936_s4 = smov [#allocation8 + $0x4]  }
  0xa8   :  { %273 = sst [smem:[#allocation31 + $0x1]] %s8913_s26  ;;  %s8937_s26 = smov [#allocation30]  }
  0xa9   :  { %275 = sst [smem:[#allocation31 + $0x2]] %s8919_s21 }
  0xaa   :  { %277 = sst [smem:[#allocation31 + $0x3]] %s8914_s15 }
  0xab   :  { %279 = sst [smem:[#allocation31 + $0x4]] %s8915_s17  ;;  %s8840_s17 = scalar_lea.hbm %s9588_s6, 8192 }
  0xac   :  { %281 = sst [smem:[#allocation31 + $0x5]] %s8916_s12  ;;  %p8841_p0 = scmp.ne.s32.totalorder %s9588_s6, %s8840_s17 }
  0xad   :  { %283 = sst [smem:[#allocation31 + $0x6]] %s8920_s22  ;;  %p8844_p1 = scmp.lt.u32.totalorder %s8840_s17, %s9588_s6 }
  0xae   :  { %285 = sst [smem:[#allocation31 + $0x7]] %s8914_s15 }
  0xaf   :  { %287 = sst [smem:[#allocation31 + $0x8]] %s8918_s20  ;;  %p8846_p2 = pnand %p8844_p1, %p8841_p0 }
  0xb0   :  { %289 = dma.general %s9587_s5, 65536, %s268_s1, %s8936_s4, %s8937_s26, [#allocation31], %s9101_s8, 0  }
  0xb1   :  { %8849 = shalt.err (!%p8846_p2)  }
  0xb2   :  { %s8850_s15 = scalar_lea.vmem %s299_s0, 8192  ;;  %p8855_p4 = scmp.lt.s32.totalorder %s299_s0, %s299_s0 }
  0xb3   :  { %p8851_p3 = scmp.ne.s32.totalorder %s299_s0, %s8850_s15  ;;  %p8856_p5 = scmp.lt.s32.totalorder %s8850_s15, %s8850_s15 }
  0xb5   :  { %p8857_p6 = por %p8856_p5, %p8855_p4 }
  0xb7   :  { %p8858_p7 = pnand %p8857_p6, %p8851_p3 }
  0xb9   :  { %8861 = shalt.err (!%p8858_p7)  }
  0xba   :  { %301 = dma.hbm_to_vmem [thread:$0]  %s9588_s6, 8192, %s299_s0, [#allocation8 + $0x5]  ;;  %v302_v0 = vld [vmem:[#allocation9] sm:$0xff] }
  0xbb   :  { %v9170_v1 = vpack.c.bf16 %v302_v0, %v302_v0 }
  0xbc   :  { %8892 = dma.done.wait [#allocation8], 8192 }
  0xbd   :  { %8893 = vsyncadd [#allocation8], 4294959104  ;;  %v8938_v2 = vmov 0   ;;  %v309_v3 = vld [vmem:[#allocation2 + $0x8] sm:$0xff]  ;;  %v311_v4 = vld [vmem:[#allocation2 + $0x18] sm:$0xff] }
  0xbe   :  { %446 = vmatprep.mubr.bf16.mxu0 %v8938_v2  ;;  %487 = vmatprep.mubr.bf16.mxu1 %v8938_v2  ;;  %v308_v5 = vld [vmem:[#allocation2] sm:$0xff]  ;;  %v310_v6 = vld [vmem:[#allocation2 + $0x10] sm:$0xff]  ;;  %v317_v7 = vld [vmem:[#allocation2 + $0x48] sm:$0xff] }
  0xbf   :  { %414 = vmatprep.subr.bf16.mxu0 %v309_v3  ;;  %455 = vmatprep.subr.bf16.mxu1 %v311_v4  ;;  %v319_v8 = vld [vmem:[#allocation2 + $0x58] sm:$0xff]  ;;  %v316_v9 = vld [vmem:[#allocation2 + $0x40] sm:$0xff]  ;;  %v318_v10 = vld [vmem:[#allocation2 + $0x50] sm:$0xff]  ;;  %v374_v4 = vlaneseq }
  0xc0   :  { %415 = vmatpush1.bf16.msra.mxu0 %v308_v5  ;;  %456 = vmatpush1.bf16.msra.mxu1 %v310_v6  ;;  %v325_v11 = vld [vmem:[#allocation2 + $0x88] sm:$0xff]  ;;  %v327_v12 = vld [vmem:[#allocation2 + $0x98] sm:$0xff]  ;;  %v324_v13 = vld [vmem:[#allocation2 + $0x80] sm:$0xff] }
  0xc1   :  { %416 = vmatprep.subr.bf16.mxu0 %v317_v7  ;;  %457 = vmatprep.subr.bf16.mxu1 %v319_v8  ;;  %v326_v14 = vld [vmem:[#allocation2 + $0x90] sm:$0xff]  ;;  %v333_v15 = vld [vmem:[#allocation2 + $0xc8] sm:$0xff]  ;;  %v335_v16 = vld [vmem:[#allocation2 + $0xd8] sm:$0xff]  ;;  %v375_v5 = vshrl.u32 %v374_v4, 7 }
  0xc2   :  { %v332_v17 = vld [vmem:[#allocation2 + $0xc0] sm:$0xff]  ;;  %v334_v18 = vld [vmem:[#allocation2 + $0xd0] sm:$0xff]  ;;  %v341_v19 = vld [vmem:[#allocation2 + $0x108] sm:$0xff] }
  0xc3   :  { %v343_v20 = vld [vmem:[#allocation2 + $0x118] sm:$0xff]  ;;  %v340_v21 = vld [vmem:[#allocation2 + $0x100] sm:$0xff]  ;;  %v342_v22 = vld [vmem:[#allocation2 + $0x110] sm:$0xff]  ;;  %v9180_v6 = vsub.s32 0, %v375_v5  ;;  %v9182_v7 = vsub.s32 2, %v375_v5 }
  0xc4   :  { %417 = vmatpush1.bf16.msra.mxu0 %v316_v9  ;;  %458 = vmatpush1.bf16.msra.mxu1 %v318_v10  ;;  %v349_v23 = vld [vmem:[#allocation2 + $0x148] sm:$0xff]  ;;  %v351_v24 = vld [vmem:[#allocation2 + $0x158] sm:$0xff]  ;;  %v348_v25 = vld [vmem:[#allocation2 + $0x140] sm:$0xff]  ;;  %v9184_v9 = vsub.s32 1, %v375_v5  ;;  %v9186_v10 = vsub.s32 3, %v375_v5 }
  0xc5   :  { %418 = vmatprep.subr.bf16.mxu0 %v325_v11  ;;  %459 = vmatprep.subr.bf16.mxu1 %v327_v12  ;;  %v350_v26 = vld [vmem:[#allocation2 + $0x150] sm:$0xff]  ;;  %v357_v27 = vld [vmem:[#allocation2 + $0x188] sm:$0xff]  ;;  %v359_v28 = vld [vmem:[#allocation2 + $0x198] sm:$0xff] }
  0xc6   :  { %v356_v29 = vld [vmem:[#allocation2 + $0x180] sm:$0xff]  ;;  %v358_v30 = vld [vmem:[#allocation2 + $0x190] sm:$0xff]  ;;  %v365_v31 = vld [vmem:[#allocation2 + $0x1c8] sm:$0xff] }
  0xc7   :  { %v367_v32 = vld [vmem:[#allocation2 + $0x1d8] sm:$0xff]  ;;  %v364_v33 = vld [vmem:[#allocation2 + $0x1c0] sm:$0xff]  ;;  %v366_v34 = vld [vmem:[#allocation2 + $0x1d0] sm:$0xff] }
  0xc8   :  { %419 = vmatpush1.bf16.msra.mxu0 %v324_v13  ;;  %460 = vmatpush1.bf16.msra.mxu1 %v326_v14  ;;  %v313_v35 = vld [vmem:[#allocation2 + $0x28] sm:$0xff]  ;;  %v315_v36 = vld [vmem:[#allocation2 + $0x38] sm:$0xff]  ;;  %v312_v37 = vld [vmem:[#allocation2 + $0x20] sm:$0xff] }
  0xc9   :  { %420 = vmatprep.subr.bf16.mxu0 %v333_v15  ;;  %461 = vmatprep.subr.bf16.mxu1 %v335_v16  ;;  %v314_v38 = vld [vmem:[#allocation2 + $0x30] sm:$0xff]  ;;  %v321_v39 = vld [vmem:[#allocation2 + $0x68] sm:$0xff]  ;;  %v323_v40 = vld [vmem:[#allocation2 + $0x78] sm:$0xff] }
  0xca   :  { %v320_v41 = vld [vmem:[#allocation2 + $0x60] sm:$0xff]  ;;  %v322_v42 = vld [vmem:[#allocation2 + $0x70] sm:$0xff]  ;;  %v329_v43 = vld [vmem:[#allocation2 + $0xa8] sm:$0xff] }
  0xcb   :  { %v331_v44 = vld [vmem:[#allocation2 + $0xb8] sm:$0xff]  ;;  %v328_v45 = vld [vmem:[#allocation2 + $0xa0] sm:$0xff]  ;;  %v330_v46 = vld [vmem:[#allocation2 + $0xb0] sm:$0xff] }
  0xcc   :  { %421 = vmatpush1.bf16.msra.mxu0 %v332_v17  ;;  %462 = vmatpush1.bf16.msra.mxu1 %v334_v18  ;;  %v337_v47 = vld [vmem:[#allocation2 + $0xe8] sm:$0xff]  ;;  %v339_v48 = vld [vmem:[#allocation2 + $0xf8] sm:$0xff]  ;;  %v336_v49 = vld [vmem:[#allocation2 + $0xe0] sm:$0xff] }
  0xcd   :  { %422 = vmatprep.subr.bf16.mxu0 %v341_v19  ;;  %463 = vmatprep.subr.bf16.mxu1 %v343_v20  ;;  %v338_v50 = vld [vmem:[#allocation2 + $0xf0] sm:$0xff]  ;;  %v345_v51 = vld [vmem:[#allocation2 + $0x128] sm:$0xff]  ;;  %v347_v52 = vld [vmem:[#allocation2 + $0x138] sm:$0xff] }
  0xce   :  { %v344_v53 = vld [vmem:[#allocation2 + $0x120] sm:$0xff]  ;;  %v346_v54 = vld [vmem:[#allocation2 + $0x130] sm:$0xff]  ;;  %v353_v55 = vld [vmem:[#allocation2 + $0x168] sm:$0xff] }
  0xcf   :  { %v355_v56 = vld [vmem:[#allocation2 + $0x178] sm:$0xff]  ;;  %v352_v57 = vld [vmem:[#allocation2 + $0x160] sm:$0xff]  ;;  %v354_v58 = vld [vmem:[#allocation2 + $0x170] sm:$0xff] }
  0xd0   :  { %423 = vmatpush1.bf16.msra.mxu0 %v340_v21  ;;  %464 = vmatpush1.bf16.msra.mxu1 %v342_v22  ;;  %v361_v59 = vld [vmem:[#allocation2 + $0x1a8] sm:$0xff]  ;;  %v363_v60 = vld [vmem:[#allocation2 + $0x1b8] sm:$0xff]  ;;  %v360_v61 = vld [vmem:[#allocation2 + $0x1a0] sm:$0xff] }
  0xd1   :  { %424 = vmatprep.subr.bf16.mxu0 %v349_v23  ;;  %465 = vmatprep.subr.bf16.mxu1 %v351_v24  ;;  %v362_v62 = vld [vmem:[#allocation2 + $0x1b0] sm:$0xff]  ;;  %v369_v63 = vld [vmem:[#allocation2 + $0x1e8] sm:$0xff]  ;;  %v371_v0 = vld [vmem:[#allocation2 + $0x1f8] sm:$0xff] }
  0xd2   :  { %v370_v3 = vld [vmem:[#allocation2 + $0x1f0] sm:$0xff]  ;;  %v372_v8 = vld [vmem:[#allocation12] sm:$0xff] }
  0xd3   :  { %v377_v11 = vrot.slane %v372_v8, %v9180_v6  ;;  %v385_v12 = vrot.slane %v372_v8, %v9182_v7  ;;  %v381_v13 = vrot.slane %v372_v8, %v9184_v9  ;;  %v389_v14 = vrot.slane %v372_v8, %v9186_v10 }
  0xd4   :  { %425 = vmatpush1.bf16.msra.mxu0 %v348_v25  ;;  %466 = vmatpush1.bf16.msra.mxu1 %v350_v26 }
  0xd5   :  { %426 = vmatprep.subr.bf16.mxu0 %v357_v27  ;;  %467 = vmatprep.subr.bf16.mxu1 %v359_v28 }
  0xd8   :  { %427 = vmatpush1.bf16.msra.mxu0 %v356_v29  ;;  %468 = vmatpush1.bf16.msra.mxu1 %v358_v30 }
  0xd9   :  { %428 = vmatprep.subr.bf16.mxu0 %v365_v31  ;;  %469 = vmatprep.subr.bf16.mxu1 %v367_v32 }
  0xdc   :  { %429 = vmatpush1.bf16.msra.mxu0 %v364_v33  ;;  %470 = vmatpush1.bf16.msra.mxu1 %v366_v34  ;;  %v9200_v34 = vsub.s32 4, %v375_v5 }
  0xdd   :  { %496 = vmatprep.subr.bf16.mxu0 %v313_v35  ;;  %537 = vmatprep.subr.bf16.mxu1 %v315_v36  ;;  %v9202_v35 = vsub.s32 6, %v375_v5  ;;  %v9204_v36 = vsub.s32 5, %v375_v5 }
  0xdf   :  { %447 = vmatmul.mubr.bf16.vlgmr.msra.gmra.mrb[0].mxu0 %v9170_v1  ;;  %488 = vmatmul.mubr.bf16.vlgmr.msra.gmra.mrb[0].mxu1 %v9170_v1 }
  0xe0   :  { %497 = vmatpush1.bf16.msra.mxu0 %v312_v37  ;;  %538 = vmatpush1.bf16.msra.mxu1 %v314_v38  ;;  %v9206_v37 = vsub.s32 7, %v375_v5  ;;  %v393_v38 = vrot.slane %v372_v8, %v9200_v34 }
  0xe1   :  { %498 = vmatprep.subr.bf16.mxu0 %v321_v39  ;;  %539 = vmatprep.subr.bf16.mxu1 %v323_v40  ;;  %v401_v39 = vrot.slane %v372_v8, %v9202_v35  ;;  %v397_v40 = vrot.slane %v372_v8, %v9204_v36 }
  0xe2   :  { %528 = vmatprep.mubr.bf16.mxu0 %v8938_v2  ;;  %569 = vmatprep.mubr.bf16.mxu1 %v8938_v2  ;;  %v368_v2 = vld [vmem:[#allocation2 + $0x1e0] sm:$0xff] }
  0xe4   :  { %499 = vmatpush1.bf16.msra.mxu0 %v320_v41  ;;  %540 = vmatpush1.bf16.msra.mxu1 %v322_v42  ;;  %v405_v41 = vrot.slane %v372_v8, %v9206_v37 }
  0xe5   :  { %500 = vmatprep.subr.bf16.mxu0 %v329_v43  ;;  %541 = vmatprep.subr.bf16.mxu1 %v331_v44 }
  0xe8   :  { %501 = vmatpush1.bf16.msra.mxu0 %v328_v45  ;;  %542 = vmatpush1.bf16.msra.mxu1 %v330_v46 }
  0xe9   :  { %502 = vmatprep.subr.bf16.mxu0 %v337_v47  ;;  %543 = vmatprep.subr.bf16.mxu1 %v339_v48 }
  0xec   :  { %503 = vmatpush1.bf16.msra.mxu0 %v336_v49  ;;  %544 = vmatpush1.bf16.msra.mxu1 %v338_v50 }
  0xed   :  { %504 = vmatprep.subr.bf16.mxu0 %v345_v51  ;;  %545 = vmatprep.subr.bf16.mxu1 %v347_v52 }
  0xf0   :  { %505 = vmatpush1.bf16.msra.mxu0 %v344_v53  ;;  %546 = vmatpush1.bf16.msra.mxu1 %v346_v54 }
  0xf1   :  { %506 = vmatprep.subr.bf16.mxu0 %v353_v55  ;;  %547 = vmatprep.subr.bf16.mxu1 %v355_v56 }
  0xf4   :  { %507 = vmatpush1.bf16.msra.mxu0 %v352_v57  ;;  %548 = vmatpush1.bf16.msra.mxu1 %v354_v58 }
  0xf5   :  { %508 = vmatprep.subr.bf16.mxu0 %v361_v59  ;;  %549 = vmatprep.subr.bf16.mxu1 %v363_v60 }
  0xf8   :  { %509 = vmatpush1.bf16.msra.mxu0 %v360_v61  ;;  %550 = vmatpush1.bf16.msra.mxu1 %v362_v62 }
  0xf9   :  { %510 = vmatprep.subr.bf16.mxu0 %v369_v63  ;;  %551 = vmatprep.subr.bf16.mxu1 %v371_v0 }
  0xfc   :  { %511 = vmatpush1.bf16.msra.mxu0 %v368_v2  ;;  %552 = vmatpush1.bf16.msra.mxu1 %v370_v3 }
  0xff   :  { %529 = vmatmul.mubr.bf16.vlgmr.msra.gmra.mrb[4].mxu0 %v9170_v1  ;;  %570 = vmatmul.mubr.bf16.vlgmr.msra.gmra.mrb[4].mxu1 %v9170_v1 }
 0x1b2   :  { %v448_v1 = vpop.f32.mrb[0].mxu0  ;;  %v489_v15 = vpop.f32.mrb[0].mxu1 }
 0x1b3   :  { %v449_v16 = vadd.f32 %v448_v1, %v377_v11  ;;  %v490_v17 = vadd.f32 %v489_v15, %v385_v12  ;;  %v450_v18 = vpop.f32.mrb[1].mxu0  ;;  %v491_v19 = vpop.f32.mrb[1].mxu1 }
 0x1b4   :  { %v451_v20 = vadd.f32 %v450_v18, %v381_v13  ;;  %v492_v21 = vadd.f32 %v491_v19, %v389_v14  ;;  %v452_v22 = vpop.f32.mrb[2].mxu0  ;;  %v493_v23 = vpop.f32.mrb[2].mxu1 }
 0x1b5   :  { %v578_v24 = vmax.f32 %v449_v16, 0.0  ;;  %v580_v25 = vmax.f32 %v490_v17, 0.0  ;;  %v453_v26 = vpop.f32.mrb[3].mxu0  ;;  %v494_v27 = vpop.f32.mrb[3].mxu1 }
 0x1b6   :  { %v579_v28 = vmax.f32 %v451_v20, 0.0  ;;  %v581_v29 = vmax.f32 %v492_v21, 0.0 }
 0x1b7   :  { %v9192_v30 = vpack.c.bf16 %v578_v24, %v578_v24  ;;  %v9194_v31 = vpack.c.bf16 %v580_v25, %v580_v25 }
 0x1b8   :  { %v9196_v32 = vpack.c.bf16 %v579_v28, %v579_v28  ;;  %v9198_v33 = vpack.c.bf16 %v581_v29, %v581_v29 }
 0x1d2   :  { %v530_v42 = vpop.f32.mrb[4].mxu0  ;;  %v571_v43 = vpop.f32.mrb[4].mxu1 }
 0x1d3   :  { %v531_v44 = vadd.f32 %v530_v42, %v393_v38  ;;  %v572_v45 = vadd.f32 %v571_v43, %v401_v39  ;;  %v532_v46 = vpop.f32.mrb[5].mxu0  ;;  %v573_v47 = vpop.f32.mrb[5].mxu1 }
 0x1d4   :  { %v533_v48 = vadd.f32 %v532_v46, %v397_v40  ;;  %v574_v49 = vadd.f32 %v573_v47, %v405_v41  ;;  %v534_v50 = vpop.f32.mrb[6].mxu0  ;;  %v575_v51 = vpop.f32.mrb[6].mxu1 }
 0x1d5   :  { %v582_v52 = vmax.f32 %v531_v44, 0.0  ;;  %v584_v53 = vmax.f32 %v572_v45, 0.0  ;;  %v535_v54 = vpop.f32.mrb[7].mxu0  ;;  %v576_v55 = vpop.f32.mrb[7].mxu1 }
 0x1d6   :  { %v583_v56 = vmax.f32 %v533_v48, 0.0  ;;  %v585_v57 = vmax.f32 %v574_v49, 0.0 }
 0x1d7   :  { %v9212_v58 = vpack.c.bf16 %v582_v52, %v582_v52  ;;  %v9214_v59 = vpack.c.bf16 %v584_v53, %v584_v53 }
 0x1d8   :  { %v9216_v60 = vpack.c.bf16 %v583_v56, %v583_v56  ;;  %v9218_v61 = vpack.c.bf16 %v585_v57, %v585_v57 }
 0x1d9   :  { %8894 = dma.done.wait [#allocation8 + $0x1], 65536 }
 0x1da   :  { %8895 = vsyncadd [#allocation8 + $0x1], 4294901760  ;;  %1184 = vmatprep.mubr.bf16.mxu0 %v9196_v32  ;;  %1348 = vmatprep.mubr.bf16.mxu1 %v9196_v32  ;;  %v599_v62 = vld [vmem:[#allocation3 + $0x8] sm:$0xff]  ;;  %v601_v63 = vld [vmem:[#allocation3 + $0x18] sm:$0xff] }
 0x1db   :  { %v598_v0 = vld [vmem:[#allocation3] sm:$0xff]  ;;  %1152 = vmatprep.subr.bf16.mxu0 %v599_v62  ;;  %1316 = vmatprep.subr.bf16.mxu1 %v601_v63  ;;  %v600_v2 = vld [vmem:[#allocation3 + $0x10] sm:$0xff]  ;;  %v607_v3 = vld [vmem:[#allocation3 + $0x48] sm:$0xff] }
 0x1dc   :  { %v609_v4 = vld [vmem:[#allocation3 + $0x58] sm:$0xff]  ;;  %1153 = vmatpush1.bf16.msra.mxu0 %v598_v0  ;;  %1317 = vmatpush1.bf16.msra.mxu1 %v600_v2  ;;  %v606_v5 = vld [vmem:[#allocation3 + $0x40] sm:$0xff]  ;;  %v608_v8 = vld [vmem:[#allocation3 + $0x50] sm:$0xff] }
 0x1dd   :  { %1154 = vmatprep.subr.bf16.mxu0 %v607_v3  ;;  %1318 = vmatprep.subr.bf16.mxu1 %v609_v4  ;;  %v615_v11 = vld [vmem:[#allocation3 + $0x88] sm:$0xff]  ;;  %v617_v12 = vld [vmem:[#allocation3 + $0x98] sm:$0xff]  ;;  %v614_v13 = vld [vmem:[#allocation3 + $0x80] sm:$0xff] }
 0x1de   :  { %v616_v14 = vld [vmem:[#allocation3 + $0x90] sm:$0xff]  ;;  %v623_v1 = vld [vmem:[#allocation3 + $0xc8] sm:$0xff]  ;;  %v625_v15 = vld [vmem:[#allocation3 + $0xd8] sm:$0xff] }
 0x1df   :  { %v622_v16 = vld [vmem:[#allocation3 + $0xc0] sm:$0xff]  ;;  %v624_v17 = vld [vmem:[#allocation3 + $0xd0] sm:$0xff]  ;;  %v631_v18 = vld [vmem:[#allocation3 + $0x108] sm:$0xff] }
 0x1e0   :  { %1155 = vmatpush1.bf16.msra.mxu0 %v606_v5  ;;  %1319 = vmatpush1.bf16.msra.mxu1 %v608_v8  ;;  %v633_v19 = vld [vmem:[#allocation3 + $0x118] sm:$0xff]  ;;  %v630_v20 = vld [vmem:[#allocation3 + $0x100] sm:$0xff]  ;;  %v632_v21 = vld [vmem:[#allocation3 + $0x110] sm:$0xff] }
 0x1e1   :  { %1156 = vmatprep.subr.bf16.mxu0 %v615_v11  ;;  %1320 = vmatprep.subr.bf16.mxu1 %v617_v12  ;;  %v639_v22 = vld [vmem:[#allocation3 + $0x148] sm:$0xff]  ;;  %v641_v23 = vld [vmem:[#allocation3 + $0x158] sm:$0xff]  ;;  %v638_v24 = vld [vmem:[#allocation3 + $0x140] sm:$0xff] }
 0x1e2   :  { %v640_v25 = vld [vmem:[#allocation3 + $0x150] sm:$0xff]  ;;  %v647_v26 = vld [vmem:[#allocation3 + $0x188] sm:$0xff]  ;;  %v649_v27 = vld [vmem:[#allocation3 + $0x198] sm:$0xff] }
 0x1e3   :  { %v646_v28 = vld [vmem:[#allocation3 + $0x180] sm:$0xff]  ;;  %v648_v29 = vld [vmem:[#allocation3 + $0x190] sm:$0xff]  ;;  %v655_v38 = vld [vmem:[#allocation3 + $0x1c8] sm:$0xff] }
 0x1e4   :  { %1157 = vmatpush1.bf16.msra.mxu0 %v614_v13  ;;  %1321 = vmatpush1.bf16.msra.mxu1 %v616_v14  ;;  %v657_v39 = vld [vmem:[#allocation3 + $0x1d8] sm:$0xff]  ;;  %v654_v40 = vld [vmem:[#allocation3 + $0x1c0] sm:$0xff]  ;;  %v656_v41 = vld [vmem:[#allocation3 + $0x1d0] sm:$0xff] }
 0x1e5   :  { %1158 = vmatprep.subr.bf16.mxu0 %v623_v1  ;;  %1322 = vmatprep.subr.bf16.mxu1 %v625_v15  ;;  %v663_v42 = vld [vmem:[#allocation3 + $0x208] sm:$0xff]  ;;  %v665_v43 = vld [vmem:[#allocation3 + $0x218] sm:$0xff]  ;;  %v662_v44 = vld [vmem:[#allocation3 + $0x200] sm:$0xff] }
 0x1e6   :  { %v664_v45 = vld [vmem:[#allocation3 + $0x210] sm:$0xff]  ;;  %v671_v46 = vld [vmem:[#allocation3 + $0x248] sm:$0xff]  ;;  %v673_v47 = vld [vmem:[#allocation3 + $0x258] sm:$0xff] }
 0x1e7   :  { %v670_v48 = vld [vmem:[#allocation3 + $0x240] sm:$0xff]  ;;  %v672_v49 = vld [vmem:[#allocation3 + $0x250] sm:$0xff]  ;;  %v679_v50 = vld [vmem:[#allocation3 + $0x288] sm:$0xff] }
 0x1e8   :  { %1159 = vmatpush1.bf16.msra.mxu0 %v622_v16  ;;  %1323 = vmatpush1.bf16.msra.mxu1 %v624_v17  ;;  %v681_v51 = vld [vmem:[#allocation3 + $0x298] sm:$0xff]  ;;  %v678_v52 = vld [vmem:[#allocation3 + $0x280] sm:$0xff]  ;;  %v680_v53 = vld [vmem:[#allocation3 + $0x290] sm:$0xff] }
 0x1e9   :  { %1160 = vmatprep.subr.bf16.mxu0 %v631_v18  ;;  %1324 = vmatprep.subr.bf16.mxu1 %v633_v19  ;;  %v687_v54 = vld [vmem:[#allocation3 + $0x2c8] sm:$0xff]  ;;  %v689_v55 = vld [vmem:[#allocation3 + $0x2d8] sm:$0xff]  ;;  %v686_v56 = vld [vmem:[#allocation3 + $0x2c0] sm:$0xff] }
 0x1ea   :  { %v688_v57 = vld [vmem:[#allocation3 + $0x2d0] sm:$0xff]  ;;  %v695_v62 = vld [vmem:[#allocation3 + $0x308] sm:$0xff]  ;;  %v697_v63 = vld [vmem:[#allocation3 + $0x318] sm:$0xff] }
 0x1eb   :  { %v694_v0 = vld [vmem:[#allocation3 + $0x300] sm:$0xff]  ;;  %v696_v2 = vld [vmem:[#allocation3 + $0x310] sm:$0xff]  ;;  %v703_v3 = vld [vmem:[#allocation3 + $0x348] sm:$0xff] }
 0x1ec   :  { %1161 = vmatpush1.bf16.msra.mxu0 %v630_v20  ;;  %1325 = vmatpush1.bf16.msra.mxu1 %v632_v21  ;;  %v705_v4 = vld [vmem:[#allocation3 + $0x358] sm:$0xff]  ;;  %v702_v5 = vld [vmem:[#allocation3 + $0x340] sm:$0xff]  ;;  %v704_v8 = vld [vmem:[#allocation3 + $0x350] sm:$0xff] }
 0x1ed   :  { %1162 = vmatprep.subr.bf16.mxu0 %v639_v22  ;;  %1326 = vmatprep.subr.bf16.mxu1 %v641_v23  ;;  %v711_v11 = vld [vmem:[#allocation3 + $0x388] sm:$0xff]  ;;  %v713_v12 = vld [vmem:[#allocation3 + $0x398] sm:$0xff]  ;;  %v710_v13 = vld [vmem:[#allocation3 + $0x380] sm:$0xff] }
 0x1ee   :  { %v712_v14 = vld [vmem:[#allocation3 + $0x390] sm:$0xff]  ;;  %v719_v1 = vld [vmem:[#allocation3 + $0x3c8] sm:$0xff]  ;;  %v721_v15 = vld [vmem:[#allocation3 + $0x3d8] sm:$0xff] }
 0x1ef   :  { %v718_v16 = vld [vmem:[#allocation3 + $0x3c0] sm:$0xff]  ;;  %v720_v17 = vld [vmem:[#allocation3 + $0x3d0] sm:$0xff]  ;;  %v727_v18 = vld [vmem:[#allocation3 + $0x408] sm:$0xff] }
 0x1f0   :  { %1163 = vmatpush1.bf16.msra.mxu0 %v638_v24  ;;  %1327 = vmatpush1.bf16.msra.mxu1 %v640_v25  ;;  %v729_v19 = vld [vmem:[#allocation3 + $0x418] sm:$0xff]  ;;  %v726_v20 = vld [vmem:[#allocation3 + $0x400] sm:$0xff]  ;;  %v728_v21 = vld [vmem:[#allocation3 + $0x410] sm:$0xff] }
 0x1f1   :  { %1164 = vmatprep.subr.bf16.mxu0 %v647_v26  ;;  %1328 = vmatprep.subr.bf16.mxu1 %v649_v27  ;;  %v735_v22 = vld [vmem:[#allocation3 + $0x448] sm:$0xff]  ;;  %v737_v23 = vld [vmem:[#allocation3 + $0x458] sm:$0xff]  ;;  %v734_v24 = vld [vmem:[#allocation3 + $0x440] sm:$0xff] }
 0x1f2   :  { %v736_v25 = vld [vmem:[#allocation3 + $0x450] sm:$0xff]  ;;  %v743_v26 = vld [vmem:[#allocation3 + $0x488] sm:$0xff]  ;;  %v745_v27 = vld [vmem:[#allocation3 + $0x498] sm:$0xff] }
 0x1f4   :  { %1165 = vmatpush1.bf16.msra.mxu0 %v646_v28  ;;  %1329 = vmatpush1.bf16.msra.mxu1 %v648_v29  ;;  %v742_v28 = vld [vmem:[#allocation3 + $0x480] sm:$0xff]  ;;  %v744_v29 = vld [vmem:[#allocation3 + $0x490] sm:$0xff] }
 0x1f5   :  { %1166 = vmatprep.subr.bf16.mxu0 %v655_v38  ;;  %1330 = vmatprep.subr.bf16.mxu1 %v657_v39  ;;  %v751_v38 = vld [vmem:[#allocation3 + $0x4c8] sm:$0xff]  ;;  %v753_v39 = vld [vmem:[#allocation3 + $0x4d8] sm:$0xff] }
 0x1f8   :  { %1167 = vmatpush1.bf16.msra.mxu0 %v654_v40  ;;  %1331 = vmatpush1.bf16.msra.mxu1 %v656_v41  ;;  %v750_v40 = vld [vmem:[#allocation3 + $0x4c0] sm:$0xff]  ;;  %v752_v41 = vld [vmem:[#allocation3 + $0x4d0] sm:$0xff] }
 0x1f9   :  { %1168 = vmatprep.subr.bf16.mxu0 %v663_v42  ;;  %1332 = vmatprep.subr.bf16.mxu1 %v665_v43  ;;  %v759_v42 = vld [vmem:[#allocation3 + $0x508] sm:$0xff]  ;;  %v761_v43 = vld [vmem:[#allocation3 + $0x518] sm:$0xff] }
 0x1fc   :  { %1169 = vmatpush1.bf16.msra.mxu0 %v662_v44  ;;  %1333 = vmatpush1.bf16.msra.mxu1 %v664_v45  ;;  %v758_v44 = vld [vmem:[#allocation3 + $0x500] sm:$0xff]  ;;  %v760_v45 = vld [vmem:[#allocation3 + $0x510] sm:$0xff] }
 0x1fd   :  { %1170 = vmatprep.subr.bf16.mxu0 %v671_v46  ;;  %1334 = vmatprep.subr.bf16.mxu1 %v673_v47  ;;  %v767_v46 = vld [vmem:[#allocation3 + $0x548] sm:$0xff]  ;;  %v769_v47 = vld [vmem:[#allocation3 + $0x558] sm:$0xff] }
 0x200   :  { %1171 = vmatpush1.bf16.msra.mxu0 %v670_v48  ;;  %1335 = vmatpush1.bf16.msra.mxu1 %v672_v49  ;;  %v766_v48 = vld [vmem:[#allocation3 + $0x540] sm:$0xff]  ;;  %v768_v49 = vld [vmem:[#allocation3 + $0x550] sm:$0xff] }
 0x201   :  { %1172 = vmatprep.subr.bf16.mxu0 %v679_v50  ;;  %1336 = vmatprep.subr.bf16.mxu1 %v681_v51  ;;  %v775_v50 = vld [vmem:[#allocation3 + $0x588] sm:$0xff]  ;;  %v777_v51 = vld [vmem:[#allocation3 + $0x598] sm:$0xff] }
 0x204   :  { %1173 = vmatpush1.bf16.msra.mxu0 %v678_v52  ;;  %1337 = vmatpush1.bf16.msra.mxu1 %v680_v53  ;;  %v774_v52 = vld [vmem:[#allocation3 + $0x580] sm:$0xff]  ;;  %v776_v53 = vld [vmem:[#allocation3 + $0x590] sm:$0xff] }
 0x205   :  { %1174 = vmatprep.subr.bf16.mxu0 %v687_v54  ;;  %1338 = vmatprep.subr.bf16.mxu1 %v689_v55  ;;  %v783_v54 = vld [vmem:[#allocation3 + $0x5c8] sm:$0xff]  ;;  %v785_v55 = vld [vmem:[#allocation3 + $0x5d8] sm:$0xff] }
 0x208   :  { %1175 = vmatpush1.bf16.msra.mxu0 %v686_v56  ;;  %1339 = vmatpush1.bf16.msra.mxu1 %v688_v57  ;;  %v782_v56 = vld [vmem:[#allocation3 + $0x5c0] sm:$0xff]  ;;  %v784_v57 = vld [vmem:[#allocation3 + $0x5d0] sm:$0xff] }
 0x209   :  { %1176 = vmatprep.subr.bf16.mxu0 %v695_v62  ;;  %1340 = vmatprep.subr.bf16.mxu1 %v697_v63  ;;  %v791_v62 = vld [vmem:[#allocation3 + $0x608] sm:$0xff]  ;;  %v793_v63 = vld [vmem:[#allocation3 + $0x618] sm:$0xff] }
 0x20c   :  { %1177 = vmatpush1.bf16.msra.mxu0 %v694_v0  ;;  %1341 = vmatpush1.bf16.msra.mxu1 %v696_v2  ;;  %v790_v0 = vld [vmem:[#allocation3 + $0x600] sm:$0xff]  ;;  %v792_v2 = vld [vmem:[#allocation3 + $0x610] sm:$0xff] }
 0x20d   :  { %1178 = vmatprep.subr.bf16.mxu0 %v703_v3  ;;  %1342 = vmatprep.subr.bf16.mxu1 %v705_v4  ;;  %v799_v3 = vld [vmem:[#allocation3 + $0x648] sm:$0xff]  ;;  %v801_v4 = vld [vmem:[#allocation3 + $0x658] sm:$0xff] }
 0x210   :  { %1179 = vmatpush1.bf16.msra.mxu0 %v702_v5  ;;  %1343 = vmatpush1.bf16.msra.mxu1 %v704_v8  ;;  %v798_v5 = vld [vmem:[#allocation3 + $0x640] sm:$0xff]  ;;  %v800_v8 = vld [vmem:[#allocation3 + $0x650] sm:$0xff] }
 0x211   :  { %1180 = vmatprep.subr.bf16.mxu0 %v711_v11  ;;  %1344 = vmatprep.subr.bf16.mxu1 %v713_v12  ;;  %v807_v11 = vld [vmem:[#allocation3 + $0x688] sm:$0xff]  ;;  %v809_v12 = vld [vmem:[#allocation3 + $0x698] sm:$0xff] }
 0x214   :  { %1181 = vmatpush1.bf16.msra.mxu0 %v710_v13  ;;  %1345 = vmatpush1.bf16.msra.mxu1 %v712_v14  ;;  %v806_v13 = vld [vmem:[#allocation3 + $0x680] sm:$0xff]  ;;  %v808_v14 = vld [vmem:[#allocation3 + $0x690] sm:$0xff] }
 0x215   :  { %1182 = vmatprep.subr.bf16.mxu0 %v719_v1  ;;  %1346 = vmatprep.subr.bf16.mxu1 %v721_v15  ;;  %v815_v1 = vld [vmem:[#allocation3 + $0x6c8] sm:$0xff]  ;;  %v817_v15 = vld [vmem:[#allocation3 + $0x6d8] sm:$0xff] }
 0x218   :  { %1183 = vmatpush1.bf16.msra.mxu0 %v718_v16  ;;  %1347 = vmatpush1.bf16.msra.mxu1 %v720_v17  ;;  %v814_v16 = vld [vmem:[#allocation3 + $0x6c0] sm:$0xff]  ;;  %v816_v17 = vld [vmem:[#allocation3 + $0x6d0] sm:$0xff] }
 0x219   :  { %1193 = vmatprep.subr.bf16.mxu0 %v727_v18  ;;  %1357 = vmatprep.subr.bf16.mxu1 %v729_v19  ;;  %v823_v18 = vld [vmem:[#allocation3 + $0x708] sm:$0xff]  ;;  %v825_v19 = vld [vmem:[#allocation3 + $0x718] sm:$0xff] }
 0x21b   :  { %1185 = vmatmul.mubr.bf16.vlgmr.msra.gmra.mrb[8].mxu0 %v9192_v30  ;;  %1349 = vmatmul.mubr.bf16.vlgmr.msra.gmra.mrb[8].mxu1 %v9192_v30 }
 0x21c   :  { %1194 = vmatpush1.bf16.msra.mxu0 %v726_v20  ;;  %1358 = vmatpush1.bf16.msra.mxu1 %v728_v21  ;;  %v822_v20 = vld [vmem:[#allocation3 + $0x700] sm:$0xff]  ;;  %v824_v21 = vld [vmem:[#allocation3 + $0x710] sm:$0xff] }
 0x21d   :  { %1195 = vmatprep.subr.bf16.mxu0 %v735_v22  ;;  %1359 = vmatprep.subr.bf16.mxu1 %v737_v23  ;;  %v831_v22 = vld [vmem:[#allocation3 + $0x748] sm:$0xff]  ;;  %v833_v23 = vld [vmem:[#allocation3 + $0x758] sm:$0xff] }
 0x21e   :  { %1225 = vmatprep.mubr.bf16.mxu0 %v9198_v33  ;;  %1389 = vmatprep.mubr.bf16.mxu1 %v9198_v33 }
 0x220   :  { %1196 = vmatpush1.bf16.msra.mxu0 %v734_v24  ;;  %1360 = vmatpush1.bf16.msra.mxu1 %v736_v25  ;;  %v830_v24 = vld [vmem:[#allocation3 + $0x740] sm:$0xff]  ;;  %v832_v25 = vld [vmem:[#allocation3 + $0x750] sm:$0xff] }
 0x221   :  { %1197 = vmatprep.subr.bf16.mxu0 %v743_v26  ;;  %1361 = vmatprep.subr.bf16.mxu1 %v745_v27  ;;  %v839_v26 = vld [vmem:[#allocation3 + $0x788] sm:$0xff]  ;;  %v841_v27 = vld [vmem:[#allocation3 + $0x798] sm:$0xff] }
 0x224   :  { %1198 = vmatpush1.bf16.msra.mxu0 %v742_v28  ;;  %1362 = vmatpush1.bf16.msra.mxu1 %v744_v29  ;;  %v838_v28 = vld [vmem:[#allocation3 + $0x780] sm:$0xff]  ;;  %v840_v29 = vld [vmem:[#allocation3 + $0x790] sm:$0xff] }
 0x225   :  { %1199 = vmatprep.subr.bf16.mxu0 %v751_v38  ;;  %1363 = vmatprep.subr.bf16.mxu1 %v753_v39  ;;  %v847_v38 = vld [vmem:[#allocation3 + $0x7c8] sm:$0xff]  ;;  %v849_v39 = vld [vmem:[#allocation3 + $0x7d8] sm:$0xff] }
 0x228   :  { %1200 = vmatpush1.bf16.msra.mxu0 %v750_v40  ;;  %1364 = vmatpush1.bf16.msra.mxu1 %v752_v41  ;;  %v846_v40 = vld [vmem:[#allocation3 + $0x7c0] sm:$0xff]  ;;  %v848_v41 = vld [vmem:[#allocation3 + $0x7d0] sm:$0xff] }
 0x229   :  { %1201 = vmatprep.subr.bf16.mxu0 %v759_v42  ;;  %1365 = vmatprep.subr.bf16.mxu1 %v761_v43  ;;  %v855_v42 = vld [vmem:[#allocation3 + $0x808] sm:$0xff]  ;;  %v857_v43 = vld [vmem:[#allocation3 + $0x818] sm:$0xff] }
 0x22c   :  { %1202 = vmatpush1.bf16.msra.mxu0 %v758_v44  ;;  %1366 = vmatpush1.bf16.msra.mxu1 %v760_v45  ;;  %v854_v44 = vld [vmem:[#allocation3 + $0x800] sm:$0xff]  ;;  %v856_v45 = vld [vmem:[#allocation3 + $0x810] sm:$0xff] }
 0x22d   :  { %1203 = vmatprep.subr.bf16.mxu0 %v767_v46  ;;  %1367 = vmatprep.subr.bf16.mxu1 %v769_v47  ;;  %v863_v46 = vld [vmem:[#allocation3 + $0x848] sm:$0xff]  ;;  %v865_v47 = vld [vmem:[#allocation3 + $0x858] sm:$0xff] }
 0x230   :  { %1204 = vmatpush1.bf16.msra.mxu0 %v766_v48  ;;  %1368 = vmatpush1.bf16.msra.mxu1 %v768_v49  ;;  %v862_v48 = vld [vmem:[#allocation3 + $0x840] sm:$0xff]  ;;  %v864_v49 = vld [vmem:[#allocation3 + $0x850] sm:$0xff] }
 0x231   :  { %1205 = vmatprep.subr.bf16.mxu0 %v775_v50  ;;  %1369 = vmatprep.subr.bf16.mxu1 %v777_v51  ;;  %v871_v50 = vld [vmem:[#allocation3 + $0x888] sm:$0xff]  ;;  %v873_v51 = vld [vmem:[#allocation3 + $0x898] sm:$0xff] }
 0x234   :  { %1206 = vmatpush1.bf16.msra.mxu0 %v774_v52  ;;  %1370 = vmatpush1.bf16.msra.mxu1 %v776_v53  ;;  %v870_v52 = vld [vmem:[#allocation3 + $0x880] sm:$0xff]  ;;  %v872_v53 = vld [vmem:[#allocation3 + $0x890] sm:$0xff] }
 0x235   :  { %1207 = vmatprep.subr.bf16.mxu0 %v783_v54  ;;  %1371 = vmatprep.subr.bf16.mxu1 %v785_v55  ;;  %v879_v54 = vld [vmem:[#allocation3 + $0x8c8] sm:$0xff]  ;;  %v881_v55 = vld [vmem:[#allocation3 + $0x8d8] sm:$0xff] }
 0x238   :  { %1208 = vmatpush1.bf16.msra.mxu0 %v782_v56  ;;  %1372 = vmatpush1.bf16.msra.mxu1 %v784_v57  ;;  %v878_v56 = vld [vmem:[#allocation3 + $0x8c0] sm:$0xff]  ;;  %v880_v57 = vld [vmem:[#allocation3 + $0x8d0] sm:$0xff] }
 0x239   :  { %1209 = vmatprep.subr.bf16.mxu0 %v791_v62  ;;  %1373 = vmatprep.subr.bf16.mxu1 %v793_v63  ;;  %v887_v62 = vld [vmem:[#allocation3 + $0x908] sm:$0xff]  ;;  %v889_v63 = vld [vmem:[#allocation3 + $0x918] sm:$0xff] }
 0x23c   :  { %1210 = vmatpush1.bf16.msra.mxu0 %v790_v0  ;;  %1374 = vmatpush1.bf16.msra.mxu1 %v792_v2  ;;  %v886_v0 = vld [vmem:[#allocation3 + $0x900] sm:$0xff]  ;;  %v888_v2 = vld [vmem:[#allocation3 + $0x910] sm:$0xff] }
 0x23d   :  { %1211 = vmatprep.subr.bf16.mxu0 %v799_v3  ;;  %1375 = vmatprep.subr.bf16.mxu1 %v801_v4  ;;  %v895_v3 = vld [vmem:[#allocation3 + $0x948] sm:$0xff]  ;;  %v897_v4 = vld [vmem:[#allocation3 + $0x958] sm:$0xff] }
 0x240   :  { %1212 = vmatpush1.bf16.msra.mxu0 %v798_v5  ;;  %1376 = vmatpush1.bf16.msra.mxu1 %v800_v8  ;;  %v894_v5 = vld [vmem:[#allocation3 + $0x940] sm:$0xff]  ;;  %v896_v8 = vld [vmem:[#allocation3 + $0x950] sm:$0xff] }
 0x241   :  { %1213 = vmatprep.subr.bf16.mxu0 %v807_v11  ;;  %1377 = vmatprep.subr.bf16.mxu1 %v809_v12  ;;  %v903_v11 = vld [vmem:[#allocation3 + $0x988] sm:$0xff]  ;;  %v905_v12 = vld [vmem:[#allocation3 + $0x998] sm:$0xff] }
 0x244   :  { %1214 = vmatpush1.bf16.msra.mxu0 %v806_v13  ;;  %1378 = vmatpush1.bf16.msra.mxu1 %v808_v14  ;;  %v902_v13 = vld [vmem:[#allocation3 + $0x980] sm:$0xff]  ;;  %v904_v14 = vld [vmem:[#allocation3 + $0x990] sm:$0xff] }
 0x245   :  { %1215 = vmatprep.subr.bf16.mxu0 %v815_v1  ;;  %1379 = vmatprep.subr.bf16.mxu1 %v817_v15  ;;  %v911_v1 = vld [vmem:[#allocation3 + $0x9c8] sm:$0xff]  ;;  %v913_v15 = vld [vmem:[#allocation3 + $0x9d8] sm:$0xff] }
 0x248   :  { %1216 = vmatpush1.bf16.msra.mxu0 %v814_v16  ;;  %1380 = vmatpush1.bf16.msra.mxu1 %v816_v17  ;;  %v910_v16 = vld [vmem:[#allocation3 + $0x9c0] sm:$0xff]  ;;  %v912_v17 = vld [vmem:[#allocation3 + $0x9d0] sm:$0xff] }
 0x249   :  { %1217 = vmatprep.subr.bf16.mxu0 %v823_v18  ;;  %1381 = vmatprep.subr.bf16.mxu1 %v825_v19  ;;  %v919_v18 = vld [vmem:[#allocation3 + $0xa08] sm:$0xff]  ;;  %v921_v19 = vld [vmem:[#allocation3 + $0xa18] sm:$0xff] }
 0x24c   :  { %1218 = vmatpush1.bf16.msra.mxu0 %v822_v20  ;;  %1382 = vmatpush1.bf16.msra.mxu1 %v824_v21  ;;  %v918_v20 = vld [vmem:[#allocation3 + $0xa00] sm:$0xff]  ;;  %v920_v21 = vld [vmem:[#allocation3 + $0xa10] sm:$0xff] }
 0x24d   :  { %1219 = vmatprep.subr.bf16.mxu0 %v831_v22  ;;  %1383 = vmatprep.subr.bf16.mxu1 %v833_v23  ;;  %v927_v22 = vld [vmem:[#allocation3 + $0xa48] sm:$0xff]  ;;  %v929_v23 = vld [vmem:[#allocation3 + $0xa58] sm:$0xff] }
 0x250   :  { %1220 = vmatpush1.bf16.msra.mxu0 %v830_v24  ;;  %1384 = vmatpush1.bf16.msra.mxu1 %v832_v25  ;;  %v926_v24 = vld [vmem:[#allocation3 + $0xa40] sm:$0xff]  ;;  %v928_v25 = vld [vmem:[#allocation3 + $0xa50] sm:$0xff] }
 0x251   :  { %1221 = vmatprep.subr.bf16.mxu0 %v839_v26  ;;  %1385 = vmatprep.subr.bf16.mxu1 %v841_v27  ;;  %v935_v26 = vld [vmem:[#allocation3 + $0xa88] sm:$0xff]  ;;  %v937_v27 = vld [vmem:[#allocation3 + $0xa98] sm:$0xff] }
 0x254   :  { %1222 = vmatpush1.bf16.msra.mxu0 %v838_v28  ;;  %1386 = vmatpush1.bf16.msra.mxu1 %v840_v29  ;;  %v934_v28 = vld [vmem:[#allocation3 + $0xa80] sm:$0xff]  ;;  %v936_v29 = vld [vmem:[#allocation3 + $0xa90] sm:$0xff] }
 0x255   :  { %1223 = vmatprep.subr.bf16.mxu0 %v847_v38  ;;  %1387 = vmatprep.subr.bf16.mxu1 %v849_v39  ;;  %v943_v38 = vld [vmem:[#allocation3 + $0xac8] sm:$0xff]  ;;  %v945_v39 = vld [vmem:[#allocation3 + $0xad8] sm:$0xff] }
 0x258   :  { %1224 = vmatpush1.bf16.msra.mxu0 %v846_v40  ;;  %1388 = vmatpush1.bf16.msra.mxu1 %v848_v41  ;;  %v942_v40 = vld [vmem:[#allocation3 + $0xac0] sm:$0xff]  ;;  %v944_v41 = vld [vmem:[#allocation3 + $0xad0] sm:$0xff] }
 0x259   :  { %1234 = vmatprep.subr.bf16.mxu0 %v855_v42  ;;  %1398 = vmatprep.subr.bf16.mxu1 %v857_v43  ;;  %v951_v42 = vld [vmem:[#allocation3 + $0xb08] sm:$0xff]  ;;  %v953_v43 = vld [vmem:[#allocation3 + $0xb18] sm:$0xff] }
 0x25b   :  { %1226 = vmatmul.mubr.bf16.vlgmr.msra.gmra.mrb[8].mxu0 %v9194_v31  ;;  %1390 = vmatmul.mubr.bf16.vlgmr.msra.gmra.mrb[8].mxu1 %v9194_v31 }
 0x25c   :  { %1235 = vmatpush1.bf16.msra.mxu0 %v854_v44  ;;  %1399 = vmatpush1.bf16.msra.mxu1 %v856_v45  ;;  %v950_v44 = vld [vmem:[#allocation3 + $0xb00] sm:$0xff]  ;;  %v952_v45 = vld [vmem:[#allocation3 + $0xb10] sm:$0xff] }
 0x25d   :  { %1236 = vmatprep.subr.bf16.mxu0 %v863_v46  ;;  %1400 = vmatprep.subr.bf16.mxu1 %v865_v47  ;;  %v959_v46 = vld [vmem:[#allocation3 + $0xb48] sm:$0xff]  ;;  %v961_v47 = vld [vmem:[#allocation3 + $0xb58] sm:$0xff] }
 0x25e   :  { %1266 = vmatprep.mubr.bf16.mxu0 %v9216_v60  ;;  %1430 = vmatprep.mubr.bf16.mxu1 %v9216_v60 }
 0x260   :  { %1237 = vmatpush1.bf16.msra.mxu0 %v862_v48  ;;  %1401 = vmatpush1.bf16.msra.mxu1 %v864_v49  ;;  %v958_v48 = vld [vmem:[#allocation3 + $0xb40] sm:$0xff]  ;;  %v960_v49 = vld [vmem:[#allocation3 + $0xb50] sm:$0xff] }
 0x261   :  { %1238 = vmatprep.subr.bf16.mxu0 %v871_v50  ;;  %1402 = vmatprep.subr.bf16.mxu1 %v873_v51  ;;  %v967_v50 = vld [vmem:[#allocation3 + $0xb88] sm:$0xff]  ;;  %v969_v51 = vld [vmem:[#allocation3 + $0xb98] sm:$0xff] }
 0x264   :  { %1239 = vmatpush1.bf16.msra.mxu0 %v870_v52  ;;  %1403 = vmatpush1.bf16.msra.mxu1 %v872_v53  ;;  %v966_v52 = vld [vmem:[#allocation3 + $0xb80] sm:$0xff]  ;;  %v968_v53 = vld [vmem:[#allocation3 + $0xb90] sm:$0xff] }
 0x265   :  { %1240 = vmatprep.subr.bf16.mxu0 %v879_v54  ;;  %1404 = vmatprep.subr.bf16.mxu1 %v881_v55  ;;  %v975_v54 = vld [vmem:[#allocation3 + $0xbc8] sm:$0xff]  ;;  %v977_v55 = vld [vmem:[#allocation3 + $0xbd8] sm:$0xff] }
 0x268   :  { %1241 = vmatpush1.bf16.msra.mxu0 %v878_v56  ;;  %1405 = vmatpush1.bf16.msra.mxu1 %v880_v57  ;;  %v974_v56 = vld [vmem:[#allocation3 + $0xbc0] sm:$0xff]  ;;  %v976_v57 = vld [vmem:[#allocation3 + $0xbd0] sm:$0xff] }
 0x269   :  { %1242 = vmatprep.subr.bf16.mxu0 %v887_v62  ;;  %1406 = vmatprep.subr.bf16.mxu1 %v889_v63  ;;  %v983_v62 = vld [vmem:[#allocation3 + $0xc08] sm:$0xff]  ;;  %v985_v63 = vld [vmem:[#allocation3 + $0xc18] sm:$0xff] }
 0x26c   :  { %1243 = vmatpush1.bf16.msra.mxu0 %v886_v0  ;;  %1407 = vmatpush1.bf16.msra.mxu1 %v888_v2  ;;  %v982_v0 = vld [vmem:[#allocation3 + $0xc00] sm:$0xff]  ;;  %v984_v2 = vld [vmem:[#allocation3 + $0xc10] sm:$0xff] }
 0x26d   :  { %1244 = vmatprep.subr.bf16.mxu0 %v895_v3  ;;  %1408 = vmatprep.subr.bf16.mxu1 %v897_v4  ;;  %v991_v3 = vld [vmem:[#allocation3 + $0xc48] sm:$0xff]  ;;  %v993_v4 = vld [vmem:[#allocation3 + $0xc58] sm:$0xff] }
 0x270   :  { %1245 = vmatpush1.bf16.msra.mxu0 %v894_v5  ;;  %1409 = vmatpush1.bf16.msra.mxu1 %v896_v8  ;;  %v990_v5 = vld [vmem:[#allocation3 + $0xc40] sm:$0xff]  ;;  %v992_v8 = vld [vmem:[#allocation3 + $0xc50] sm:$0xff] }
 0x271   :  { %1246 = vmatprep.subr.bf16.mxu0 %v903_v11  ;;  %1410 = vmatprep.subr.bf16.mxu1 %v905_v12  ;;  %v999_v11 = vld [vmem:[#allocation3 + $0xc88] sm:$0xff]  ;;  %v1001_v12 = vld [vmem:[#allocation3 + $0xc98] sm:$0xff] }
 0x274   :  { %1247 = vmatpush1.bf16.msra.mxu0 %v902_v13  ;;  %1411 = vmatpush1.bf16.msra.mxu1 %v904_v14  ;;  %v998_v13 = vld [vmem:[#allocation3 + $0xc80] sm:$0xff]  ;;  %v1000_v14 = vld [vmem:[#allocation3 + $0xc90] sm:$0xff] }
 0x275   :  { %1248 = vmatprep.subr.bf16.mxu0 %v911_v1  ;;  %1412 = vmatprep.subr.bf16.mxu1 %v913_v15  ;;  %v1007_v1 = vld [vmem:[#allocation3 + $0xcc8] sm:$0xff]  ;;  %v1009_v15 = vld [vmem:[#allocation3 + $0xcd8] sm:$0xff] }
 0x278   :  { %1249 = vmatpush1.bf16.msra.mxu0 %v910_v16  ;;  %1413 = vmatpush1.bf16.msra.mxu1 %v912_v17  ;;  %v1006_v16 = vld [vmem:[#allocation3 + $0xcc0] sm:$0xff]  ;;  %v1008_v17 = vld [vmem:[#allocation3 + $0xcd0] sm:$0xff] }
 0x279   :  { %1250 = vmatprep.subr.bf16.mxu0 %v919_v18  ;;  %1414 = vmatprep.subr.bf16.mxu1 %v921_v19  ;;  %v1015_v18 = vld [vmem:[#allocation3 + $0xd08] sm:$0xff]  ;;  %v1017_v19 = vld [vmem:[#allocation3 + $0xd18] sm:$0xff] }
 0x27c   :  { %1251 = vmatpush1.bf16.msra.mxu0 %v918_v20  ;;  %1415 = vmatpush1.bf16.msra.mxu1 %v920_v21  ;;  %v1014_v20 = vld [vmem:[#allocation3 + $0xd00] sm:$0xff]  ;;  %v1016_v21 = vld [vmem:[#allocation3 + $0xd10] sm:$0xff] }
 0x27d   :  { %1252 = vmatprep.subr.bf16.mxu0 %v927_v22  ;;  %1416 = vmatprep.subr.bf16.mxu1 %v929_v23  ;;  %v1023_v22 = vld [vmem:[#allocation3 + $0xd48] sm:$0xff]  ;;  %v1025_v23 = vld [vmem:[#allocation3 + $0xd58] sm:$0xff] }
 0x280   :  { %1253 = vmatpush1.bf16.msra.mxu0 %v926_v24  ;;  %1417 = vmatpush1.bf16.msra.mxu1 %v928_v25  ;;  %v1022_v24 = vld [vmem:[#allocation3 + $0xd40] sm:$0xff]  ;;  %v1024_v25 = vld [vmem:[#allocation3 + $0xd50] sm:$0xff] }
 0x281   :  { %1254 = vmatprep.subr.bf16.mxu0 %v935_v26  ;;  %1418 = vmatprep.subr.bf16.mxu1 %v937_v27  ;;  %v1031_v26 = vld [vmem:[#allocation3 + $0xd88] sm:$0xff]  ;;  %v1033_v27 = vld [vmem:[#allocation3 + $0xd98] sm:$0xff] }
 0x284   :  { %1255 = vmatpush1.bf16.msra.mxu0 %v934_v28  ;;  %1419 = vmatpush1.bf16.msra.mxu1 %v936_v29  ;;  %v1030_v28 = vld [vmem:[#allocation3 + $0xd80] sm:$0xff]  ;;  %v1032_v29 = vld [vmem:[#allocation3 + $0xd90] sm:$0xff] }
 0x285   :  { %1256 = vmatprep.subr.bf16.mxu0 %v943_v38  ;;  %1420 = vmatprep.subr.bf16.mxu1 %v945_v39  ;;  %v1039_v38 = vld [vmem:[#allocation3 + $0xdc8] sm:$0xff]  ;;  %v1041_v39 = vld [vmem:[#allocation3 + $0xdd8] sm:$0xff] }
 0x288   :  { %1257 = vmatpush1.bf16.msra.mxu0 %v942_v40  ;;  %1421 = vmatpush1.bf16.msra.mxu1 %v944_v41  ;;  %v1038_v40 = vld [vmem:[#allocation3 + $0xdc0] sm:$0xff]  ;;  %v1040_v41 = vld [vmem:[#allocation3 + $0xdd0] sm:$0xff] }
 0x289   :  { %1258 = vmatprep.subr.bf16.mxu0 %v951_v42  ;;  %1422 = vmatprep.subr.bf16.mxu1 %v953_v43  ;;  %v1047_v42 = vld [vmem:[#allocation3 + $0xe08] sm:$0xff]  ;;  %v1049_v43 = vld [vmem:[#allocation3 + $0xe18] sm:$0xff] }
 0x28c   :  { %1259 = vmatpush1.bf16.msra.mxu0 %v950_v44  ;;  %1423 = vmatpush1.bf16.msra.mxu1 %v952_v45  ;;  %v1046_v44 = vld [vmem:[#allocation3 + $0xe00] sm:$0xff]  ;;  %v1048_v45 = vld [vmem:[#allocation3 + $0xe10] sm:$0xff] }
 0x28d   :  { %1260 = vmatprep.subr.bf16.mxu0 %v959_v46  ;;  %1424 = vmatprep.subr.bf16.mxu1 %v961_v47  ;;  %v1055_v46 = vld [vmem:[#allocation3 + $0xe48] sm:$0xff]  ;;  %v1057_v47 = vld [vmem:[#allocation3 + $0xe58] sm:$0xff] }
 0x290   :  { %1261 = vmatpush1.bf16.msra.mxu0 %v958_v48  ;;  %1425 = vmatpush1.bf16.msra.mxu1 %v960_v49  ;;  %v1054_v48 = vld [vmem:[#allocation3 + $0xe40] sm:$0xff]  ;;  %v1056_v49 = vld [vmem:[#allocation3 + $0xe50] sm:$0xff] }
 0x291   :  { %1262 = vmatprep.subr.bf16.mxu0 %v967_v50  ;;  %1426 = vmatprep.subr.bf16.mxu1 %v969_v51  ;;  %v1063_v50 = vld [vmem:[#allocation3 + $0xe88] sm:$0xff]  ;;  %v1065_v51 = vld [vmem:[#allocation3 + $0xe98] sm:$0xff] }
 0x294   :  { %1263 = vmatpush1.bf16.msra.mxu0 %v966_v52  ;;  %1427 = vmatpush1.bf16.msra.mxu1 %v968_v53  ;;  %v1062_v52 = vld [vmem:[#allocation3 + $0xe80] sm:$0xff]  ;;  %v1064_v53 = vld [vmem:[#allocation3 + $0xe90] sm:$0xff] }
 0x295   :  { %1264 = vmatprep.subr.bf16.mxu0 %v975_v54  ;;  %1428 = vmatprep.subr.bf16.mxu1 %v977_v55  ;;  %v1071_v54 = vld [vmem:[#allocation3 + $0xec8] sm:$0xff]  ;;  %v1073_v55 = vld [vmem:[#allocation3 + $0xed8] sm:$0xff] }
 0x298   :  { %1265 = vmatpush1.bf16.msra.mxu0 %v974_v56  ;;  %1429 = vmatpush1.bf16.msra.mxu1 %v976_v57  ;;  %v1070_v56 = vld [vmem:[#allocation3 + $0xec0] sm:$0xff]  ;;  %v1072_v57 = vld [vmem:[#allocation3 + $0xed0] sm:$0xff] }
 0x299   :  { %1275 = vmatprep.subr.bf16.mxu0 %v983_v62  ;;  %1439 = vmatprep.subr.bf16.mxu1 %v985_v63  ;;  %v1079_v62 = vld [vmem:[#allocation3 + $0xf08] sm:$0xff]  ;;  %v1081_v63 = vld [vmem:[#allocation3 + $0xf18] sm:$0xff] }
 0x29b   :  { %1267 = vmatmul.mubr.bf16.vlgmr.msra.gmra.mrb[8].mxu0 %v9212_v58  ;;  %1431 = vmatmul.mubr.bf16.vlgmr.msra.gmra.mrb[8].mxu1 %v9212_v58 }
 0x29c   :  { %1276 = vmatpush1.bf16.msra.mxu0 %v982_v0  ;;  %1440 = vmatpush1.bf16.msra.mxu1 %v984_v2  ;;  %v1078_v0 = vld [vmem:[#allocation3 + $0xf00] sm:$0xff]  ;;  %v1080_v2 = vld [vmem:[#allocation3 + $0xf10] sm:$0xff] }
 0x29d   :  { %1277 = vmatprep.subr.bf16.mxu0 %v991_v3  ;;  %1441 = vmatprep.subr.bf16.mxu1 %v993_v4  ;;  %v1087_v3 = vld [vmem:[#allocation3 + $0xf48] sm:$0xff]  ;;  %v1089_v4 = vld [vmem:[#allocation3 + $0xf58] sm:$0xff] }
 0x29e   :  { %1307 = vmatprep.mubr.bf16.mxu0 %v9218_v61  ;;  %1471 = vmatprep.mubr.bf16.mxu1 %v9218_v61 }
 0x2a0   :  { %1278 = vmatpush1.bf16.msra.mxu0 %v990_v5  ;;  %1442 = vmatpush1.bf16.msra.mxu1 %v992_v8  ;;  %v1086_v5 = vld [vmem:[#allocation3 + $0xf40] sm:$0xff]  ;;  %v1088_v8 = vld [vmem:[#allocation3 + $0xf50] sm:$0xff] }
 0x2a1   :  { %1279 = vmatprep.subr.bf16.mxu0 %v999_v11  ;;  %1443 = vmatprep.subr.bf16.mxu1 %v1001_v12  ;;  %v1095_v11 = vld [vmem:[#allocation3 + $0xf88] sm:$0xff]  ;;  %v1097_v12 = vld [vmem:[#allocation3 + $0xf98] sm:$0xff] }
 0x2a4   :  { %1280 = vmatpush1.bf16.msra.mxu0 %v998_v13  ;;  %1444 = vmatpush1.bf16.msra.mxu1 %v1000_v14  ;;  %v1094_v13 = vld [vmem:[#allocation3 + $0xf80] sm:$0xff]  ;;  %v1096_v14 = vld [vmem:[#allocation3 + $0xf90] sm:$0xff] }
 0x2a5   :  { %1281 = vmatprep.subr.bf16.mxu0 %v1007_v1  ;;  %1445 = vmatprep.subr.bf16.mxu1 %v1009_v15  ;;  %v1103_v1 = vld [vmem:[#allocation3 + $0xfc8] sm:$0xff]  ;;  %v1105_v15 = vld [vmem:[#allocation3 + $0xfd8] sm:$0xff] }
 0x2a8   :  { %1282 = vmatpush1.bf16.msra.mxu0 %v1006_v16  ;;  %1446 = vmatpush1.bf16.msra.mxu1 %v1008_v17  ;;  %v1102_v16 = vld [vmem:[#allocation3 + $0xfc0] sm:$0xff]  ;;  %v1104_v17 = vld [vmem:[#allocation3 + $0xfd0] sm:$0xff] }
 0x2a9   :  { %1283 = vmatprep.subr.bf16.mxu0 %v1015_v18  ;;  %1447 = vmatprep.subr.bf16.mxu1 %v1017_v19  ;;  %v603_v18 = vld [vmem:[#allocation3 + $0x28] sm:$0xff]  ;;  %v605_v19 = vld [vmem:[#allocation3 + $0x38] sm:$0xff] }
 0x2ac   :  { %1284 = vmatpush1.bf16.msra.mxu0 %v1014_v20  ;;  %1448 = vmatpush1.bf16.msra.mxu1 %v1016_v21  ;;  %v602_v20 = vld [vmem:[#allocation3 + $0x20] sm:$0xff]  ;;  %v604_v21 = vld [vmem:[#allocation3 + $0x30] sm:$0xff] }
 0x2ad   :  { %1285 = vmatprep.subr.bf16.mxu0 %v1023_v22  ;;  %1449 = vmatprep.subr.bf16.mxu1 %v1025_v23  ;;  %v611_v22 = vld [vmem:[#allocation3 + $0x68] sm:$0xff]  ;;  %v613_v23 = vld [vmem:[#allocation3 + $0x78] sm:$0xff] }
 0x2b0   :  { %1286 = vmatpush1.bf16.msra.mxu0 %v1022_v24  ;;  %1450 = vmatpush1.bf16.msra.mxu1 %v1024_v25  ;;  %v610_v24 = vld [vmem:[#allocation3 + $0x60] sm:$0xff]  ;;  %v612_v25 = vld [vmem:[#allocation3 + $0x70] sm:$0xff] }
 0x2b1   :  { %1287 = vmatprep.subr.bf16.mxu0 %v1031_v26  ;;  %1451 = vmatprep.subr.bf16.mxu1 %v1033_v27  ;;  %v619_v26 = vld [vmem:[#allocation3 + $0xa8] sm:$0xff]  ;;  %v621_v27 = vld [vmem:[#allocation3 + $0xb8] sm:$0xff] }
 0x2b4   :  { %1288 = vmatpush1.bf16.msra.mxu0 %v1030_v28  ;;  %1452 = vmatpush1.bf16.msra.mxu1 %v1032_v29  ;;  %v618_v28 = vld [vmem:[#allocation3 + $0xa0] sm:$0xff]  ;;  %v620_v29 = vld [vmem:[#allocation3 + $0xb0] sm:$0xff] }
 0x2b5   :  { %1289 = vmatprep.subr.bf16.mxu0 %v1039_v38  ;;  %1453 = vmatprep.subr.bf16.mxu1 %v1041_v39  ;;  %v627_v38 = vld [vmem:[#allocation3 + $0xe8] sm:$0xff]  ;;  %v629_v39 = vld [vmem:[#allocation3 + $0xf8] sm:$0xff] }
 0x2b8   :  { %1290 = vmatpush1.bf16.msra.mxu0 %v1038_v40  ;;  %1454 = vmatpush1.bf16.msra.mxu1 %v1040_v41  ;;  %v626_v40 = vld [vmem:[#allocation3 + $0xe0] sm:$0xff]  ;;  %v628_v41 = vld [vmem:[#allocation3 + $0xf0] sm:$0xff] }
 0x2b9   :  { %1291 = vmatprep.subr.bf16.mxu0 %v1047_v42  ;;  %1455 = vmatprep.subr.bf16.mxu1 %v1049_v43  ;;  %v635_v42 = vld [vmem:[#allocation3 + $0x128] sm:$0xff]  ;;  %v637_v43 = vld [vmem:[#allocation3 + $0x138] sm:$0xff] }
 0x2bc   :  { %1292 = vmatpush1.bf16.msra.mxu0 %v1046_v44  ;;  %1456 = vmatpush1.bf16.msra.mxu1 %v1048_v45  ;;  %v636_v44 = vld [vmem:[#allocation3 + $0x130] sm:$0xff]  ;;  %v643_v45 = vld [vmem:[#allocation3 + $0x168] sm:$0xff] }
 0x2bd   :  { %1293 = vmatprep.subr.bf16.mxu0 %v1055_v46  ;;  %1457 = vmatprep.subr.bf16.mxu1 %v1057_v47  ;;  %v645_v46 = vld [vmem:[#allocation3 + $0x178] sm:$0xff]  ;;  %v642_v47 = vld [vmem:[#allocation3 + $0x160] sm:$0xff] }
 0x2c0   :  { %1294 = vmatpush1.bf16.msra.mxu0 %v1054_v48  ;;  %1458 = vmatpush1.bf16.msra.mxu1 %v1056_v49  ;;  %v644_v48 = vld [vmem:[#allocation3 + $0x170] sm:$0xff]  ;;  %v651_v49 = vld [vmem:[#allocation3 + $0x1a8] sm:$0xff] }
 0x2c1   :  { %1295 = vmatprep.subr.bf16.mxu0 %v1063_v50  ;;  %1459 = vmatprep.subr.bf16.mxu1 %v1065_v51  ;;  %v653_v50 = vld [vmem:[#allocation3 + $0x1b8] sm:$0xff]  ;;  %v650_v51 = vld [vmem:[#allocation3 + $0x1a0] sm:$0xff] }
 0x2c4   :  { %1296 = vmatpush1.bf16.msra.mxu0 %v1062_v52  ;;  %1460 = vmatpush1.bf16.msra.mxu1 %v1064_v53  ;;  %v652_v52 = vld [vmem:[#allocation3 + $0x1b0] sm:$0xff]  ;;  %v659_v53 = vld [vmem:[#allocation3 + $0x1e8] sm:$0xff] }
 0x2c5   :  { %1297 = vmatprep.subr.bf16.mxu0 %v1071_v54  ;;  %1461 = vmatprep.subr.bf16.mxu1 %v1073_v55  ;;  %v661_v54 = vld [vmem:[#allocation3 + $0x1f8] sm:$0xff]  ;;  %v658_v55 = vld [vmem:[#allocation3 + $0x1e0] sm:$0xff] }
 0x2c8   :  { %1298 = vmatpush1.bf16.msra.mxu0 %v1070_v56  ;;  %1462 = vmatpush1.bf16.msra.mxu1 %v1072_v57  ;;  %v660_v56 = vld [vmem:[#allocation3 + $0x1f0] sm:$0xff]  ;;  %v667_v57 = vld [vmem:[#allocation3 + $0x228] sm:$0xff] }
 0x2c9   :  { %1299 = vmatprep.subr.bf16.mxu0 %v1079_v62  ;;  %1463 = vmatprep.subr.bf16.mxu1 %v1081_v63  ;;  %v669_v62 = vld [vmem:[#allocation3 + $0x238] sm:$0xff]  ;;  %v666_v63 = vld [vmem:[#allocation3 + $0x220] sm:$0xff] }
 0x2cc   :  { %1300 = vmatpush1.bf16.msra.mxu0 %v1078_v0  ;;  %1464 = vmatpush1.bf16.msra.mxu1 %v1080_v2  ;;  %v668_v0 = vld [vmem:[#allocation3 + $0x230] sm:$0xff]  ;;  %v675_v2 = vld [vmem:[#allocation3 + $0x268] sm:$0xff] }
 0x2cd   :  { %1301 = vmatprep.subr.bf16.mxu0 %v1087_v3  ;;  %1465 = vmatprep.subr.bf16.mxu1 %v1089_v4  ;;  %v677_v3 = vld [vmem:[#allocation3 + $0x278] sm:$0xff]  ;;  %v674_v4 = vld [vmem:[#allocation3 + $0x260] sm:$0xff] }
 0x2d0   :  { %1302 = vmatpush1.bf16.msra.mxu0 %v1086_v5  ;;  %1466 = vmatpush1.bf16.msra.mxu1 %v1088_v8  ;;  %v676_v5 = vld [vmem:[#allocation3 + $0x270] sm:$0xff]  ;;  %v683_v8 = vld [vmem:[#allocation3 + $0x2a8] sm:$0xff] }
 0x2d1   :  { %1303 = vmatprep.subr.bf16.mxu0 %v1095_v11  ;;  %1467 = vmatprep.subr.bf16.mxu1 %v1097_v12  ;;  %v685_v11 = vld [vmem:[#allocation3 + $0x2b8] sm:$0xff]  ;;  %v682_v12 = vld [vmem:[#allocation3 + $0x2a0] sm:$0xff] }
 0x2d4   :  { %1304 = vmatpush1.bf16.msra.mxu0 %v1094_v13  ;;  %1468 = vmatpush1.bf16.msra.mxu1 %v1096_v14  ;;  %v684_v13 = vld [vmem:[#allocation3 + $0x2b0] sm:$0xff]  ;;  %v691_v14 = vld [vmem:[#allocation3 + $0x2e8] sm:$0xff] }
 0x2d5   :  { %1305 = vmatprep.subr.bf16.mxu0 %v1103_v1  ;;  %1469 = vmatprep.subr.bf16.mxu1 %v1105_v15  ;;  %v693_v1 = vld [vmem:[#allocation3 + $0x2f8] sm:$0xff]  ;;  %v690_v15 = vld [vmem:[#allocation3 + $0x2e0] sm:$0xff] }
 0x2d8   :  { %1306 = vmatpush1.bf16.msra.mxu0 %v1102_v16  ;;  %1470 = vmatpush1.bf16.msra.mxu1 %v1104_v17  ;;  %v692_v16 = vld [vmem:[#allocation3 + $0x2f0] sm:$0xff]  ;;  %v699_v17 = vld [vmem:[#allocation3 + $0x328] sm:$0xff] }
 0x2d9   :  { %1480 = vmatprep.subr.bf16.mxu0 %v603_v18  ;;  %1644 = vmatprep.subr.bf16.mxu1 %v605_v19  ;;  %v701_v18 = vld [vmem:[#allocation3 + $0x338] sm:$0xff]  ;;  %v698_v19 = vld [vmem:[#allocation3 + $0x320] sm:$0xff] }
 0x2db   :  { %1308 = vmatmul.mubr.bf16.vlgmr.msra.gmra.mrb[8].mxu0 %v9214_v59  ;;  %1472 = vmatmul.mubr.bf16.vlgmr.msra.gmra.mrb[8].mxu1 %v9214_v59 }
 0x2dc   :  { %1481 = vmatpush1.bf16.msra.mxu0 %v602_v20  ;;  %1645 = vmatpush1.bf16.msra.mxu1 %v604_v21  ;;  %v700_v20 = vld [vmem:[#allocation3 + $0x330] sm:$0xff]  ;;  %v707_v21 = vld [vmem:[#allocation3 + $0x368] sm:$0xff] }
 0x2dd   :  { %1482 = vmatprep.subr.bf16.mxu0 %v611_v22  ;;  %1646 = vmatprep.subr.bf16.mxu1 %v613_v23  ;;  %v709_v22 = vld [vmem:[#allocation3 + $0x378] sm:$0xff]  ;;  %v706_v23 = vld [vmem:[#allocation3 + $0x360] sm:$0xff] }
 0x2de   :  { %1512 = vmatprep.mubr.bf16.mxu0 %v9196_v32  ;;  %1676 = vmatprep.mubr.bf16.mxu1 %v9196_v32  ;;  %v634_v32 = vld [vmem:[#allocation3 + $0x120] sm:$0xff] }
 0x2e0   :  { %1483 = vmatpush1.bf16.msra.mxu0 %v610_v24  ;;  %1647 = vmatpush1.bf16.msra.mxu1 %v612_v25  ;;  %v708_v24 = vld [vmem:[#allocation3 + $0x370] sm:$0xff]  ;;  %v715_v25 = vld [vmem:[#allocation3 + $0x3a8] sm:$0xff] }
 0x2e1   :  { %1484 = vmatprep.subr.bf16.mxu0 %v619_v26  ;;  %1648 = vmatprep.subr.bf16.mxu1 %v621_v27  ;;  %v717_v26 = vld [vmem:[#allocation3 + $0x3b8] sm:$0xff]  ;;  %v714_v27 = vld [vmem:[#allocation3 + $0x3a0] sm:$0xff] }
 0x2e4   :  { %1485 = vmatpush1.bf16.msra.mxu0 %v618_v28  ;;  %1649 = vmatpush1.bf16.msra.mxu1 %v620_v29  ;;  %v716_v28 = vld [vmem:[#allocation3 + $0x3b0] sm:$0xff]  ;;  %v723_v29 = vld [vmem:[#allocation3 + $0x3e8] sm:$0xff] }
 0x2e5   :  { %1486 = vmatprep.subr.bf16.mxu0 %v627_v38  ;;  %1650 = vmatprep.subr.bf16.mxu1 %v629_v39  ;;  %v725_v38 = vld [vmem:[#allocation3 + $0x3f8] sm:$0xff]  ;;  %v722_v39 = vld [vmem:[#allocation3 + $0x3e0] sm:$0xff] }
 0x2e8   :  { %1487 = vmatpush1.bf16.msra.mxu0 %v626_v40  ;;  %1651 = vmatpush1.bf16.msra.mxu1 %v628_v41  ;;  %v724_v40 = vld [vmem:[#allocation3 + $0x3f0] sm:$0xff]  ;;  %v731_v41 = vld [vmem:[#allocation3 + $0x428] sm:$0xff] }
 0x2e9   :  { %1488 = vmatprep.subr.bf16.mxu0 %v635_v42  ;;  %1652 = vmatprep.subr.bf16.mxu1 %v637_v43  ;;  %v733_v42 = vld [vmem:[#allocation3 + $0x438] sm:$0xff]  ;;  %v730_v43 = vld [vmem:[#allocation3 + $0x420] sm:$0xff] }
 0x2ec   :  { %1489 = vmatpush1.bf16.msra.mxu0 %v634_v32  ;;  %1653 = vmatpush1.bf16.msra.mxu1 %v636_v44  ;;  %v732_v32 = vld [vmem:[#allocation3 + $0x430] sm:$0xff]  ;;  %v739_v44 = vld [vmem:[#allocation3 + $0x468] sm:$0xff] }
 0x2ed   :  { %1490 = vmatprep.subr.bf16.mxu0 %v643_v45  ;;  %1654 = vmatprep.subr.bf16.mxu1 %v645_v46  ;;  %v741_v45 = vld [vmem:[#allocation3 + $0x478] sm:$0xff]  ;;  %v738_v46 = vld [vmem:[#allocation3 + $0x460] sm:$0xff] }
 0x2f0   :  { %1491 = vmatpush1.bf16.msra.mxu0 %v642_v47  ;;  %1655 = vmatpush1.bf16.msra.mxu1 %v644_v48  ;;  %v740_v47 = vld [vmem:[#allocation3 + $0x470] sm:$0xff]  ;;  %v747_v48 = vld [vmem:[#allocation3 + $0x4a8] sm:$0xff] }
 0x2f1   :  { %1492 = vmatprep.subr.bf16.mxu0 %v651_v49  ;;  %1656 = vmatprep.subr.bf16.mxu1 %v653_v50  ;;  %v749_v49 = vld [vmem:[#allocation3 + $0x4b8] sm:$0xff]  ;;  %v746_v50 = vld [vmem:[#allocation3 + $0x4a0] sm:$0xff] }
 0x2f4   :  { %1493 = vmatpush1.bf16.msra.mxu0 %v650_v51  ;;  %1657 = vmatpush1.bf16.msra.mxu1 %v652_v52  ;;  %v748_v51 = vld [vmem:[#allocation3 + $0x4b0] sm:$0xff]  ;;  %v755_v52 = vld [vmem:[#allocation3 + $0x4e8] sm:$0xff] }
 0x2f5   :  { %1494 = vmatprep.subr.bf16.mxu0 %v659_v53  ;;  %1658 = vmatprep.subr.bf16.mxu1 %v661_v54  ;;  %v754_v53 = vld [vmem:[#allocation3 + $0x4e0] sm:$0xff]  ;;  %v756_v54 = vld [vmem:[#allocation3 + $0x4f0] sm:$0xff] }
 0x2f8   :  { %1495 = vmatpush1.bf16.msra.mxu0 %v658_v55  ;;  %1659 = vmatpush1.bf16.msra.mxu1 %v660_v56  ;;  %v763_v55 = vld [vmem:[#allocation3 + $0x528] sm:$0xff]  ;;  %v765_v56 = vld [vmem:[#allocation3 + $0x538] sm:$0xff] }
 0x2f9   :  { %1496 = vmatprep.subr.bf16.mxu0 %v667_v57  ;;  %1660 = vmatprep.subr.bf16.mxu1 %v669_v62  ;;  %v764_v57 = vld [vmem:[#allocation3 + $0x530] sm:$0xff]  ;;  %v771_v62 = vld [vmem:[#allocation3 + $0x568] sm:$0xff] }
 0x2fc   :  { %1497 = vmatpush1.bf16.msra.mxu0 %v666_v63  ;;  %1661 = vmatpush1.bf16.msra.mxu1 %v668_v0  ;;  %v773_v63 = vld [vmem:[#allocation3 + $0x578] sm:$0xff]  ;;  %v770_v0 = vld [vmem:[#allocation3 + $0x560] sm:$0xff] }
 0x2fd   :  { %1498 = vmatprep.subr.bf16.mxu0 %v675_v2  ;;  %1662 = vmatprep.subr.bf16.mxu1 %v677_v3  ;;  %v772_v2 = vld [vmem:[#allocation3 + $0x570] sm:$0xff]  ;;  %v779_v3 = vld [vmem:[#allocation3 + $0x5a8] sm:$0xff] }
 0x300   :  { %1499 = vmatpush1.bf16.msra.mxu0 %v674_v4  ;;  %1663 = vmatpush1.bf16.msra.mxu1 %v676_v5  ;;  %v781_v4 = vld [vmem:[#allocation3 + $0x5b8] sm:$0xff]  ;;  %v778_v5 = vld [vmem:[#allocation3 + $0x5a0] sm:$0xff] }
 0x301   :  { %1500 = vmatprep.subr.bf16.mxu0 %v683_v8  ;;  %1664 = vmatprep.subr.bf16.mxu1 %v685_v11  ;;  %v780_v8 = vld [vmem:[#allocation3 + $0x5b0] sm:$0xff]  ;;  %v787_v11 = vld [vmem:[#allocation3 + $0x5e8] sm:$0xff] }
 0x304   :  { %1501 = vmatpush1.bf16.msra.mxu0 %v682_v12  ;;  %1665 = vmatpush1.bf16.msra.mxu1 %v684_v13  ;;  %v789_v12 = vld [vmem:[#allocation3 + $0x5f8] sm:$0xff]  ;;  %v786_v13 = vld [vmem:[#allocation3 + $0x5e0] sm:$0xff] }
 0x305   :  { %1502 = vmatprep.subr.bf16.mxu0 %v691_v14  ;;  %1666 = vmatprep.subr.bf16.mxu1 %v693_v1  ;;  %v788_v14 = vld [vmem:[#allocation3 + $0x5f0] sm:$0xff]  ;;  %v795_v1 = vld [vmem:[#allocation3 + $0x628] sm:$0xff] }
 0x308   :  { %1503 = vmatpush1.bf16.msra.mxu0 %v690_v15  ;;  %1667 = vmatpush1.bf16.msra.mxu1 %v692_v16  ;;  %v797_v15 = vld [vmem:[#allocation3 + $0x638] sm:$0xff]  ;;  %v794_v16 = vld [vmem:[#allocation3 + $0x620] sm:$0xff] }
 0x309   :  { %1504 = vmatprep.subr.bf16.mxu0 %v699_v17  ;;  %1668 = vmatprep.subr.bf16.mxu1 %v701_v18  ;;  %v796_v17 = vld [vmem:[#allocation3 + $0x630] sm:$0xff]  ;;  %v803_v18 = vld [vmem:[#allocation3 + $0x668] sm:$0xff] }
 0x30c   :  { %1505 = vmatpush1.bf16.msra.mxu0 %v698_v19  ;;  %1669 = vmatpush1.bf16.msra.mxu1 %v700_v20  ;;  %v805_v19 = vld [vmem:[#allocation3 + $0x678] sm:$0xff]  ;;  %v802_v20 = vld [vmem:[#allocation3 + $0x660] sm:$0xff] }
 0x30d   :  { %1506 = vmatprep.subr.bf16.mxu0 %v707_v21  ;;  %1670 = vmatprep.subr.bf16.mxu1 %v709_v22  ;;  %v804_v21 = vld [vmem:[#allocation3 + $0x670] sm:$0xff]  ;;  %v811_v22 = vld [vmem:[#allocation3 + $0x6a8] sm:$0xff] }
 0x310   :  { %1507 = vmatpush1.bf16.msra.mxu0 %v706_v23  ;;  %1671 = vmatpush1.bf16.msra.mxu1 %v708_v24  ;;  %v813_v23 = vld [vmem:[#allocation3 + $0x6b8] sm:$0xff]  ;;  %v810_v24 = vld [vmem:[#allocation3 + $0x6a0] sm:$0xff] }
 0x311   :  { %1508 = vmatprep.subr.bf16.mxu0 %v715_v25  ;;  %1672 = vmatprep.subr.bf16.mxu1 %v717_v26  ;;  %v812_v25 = vld [vmem:[#allocation3 + $0x6b0] sm:$0xff]  ;;  %v819_v26 = vld [vmem:[#allocation3 + $0x6e8] sm:$0xff] }
 0x314   :  { %1509 = vmatpush1.bf16.msra.mxu0 %v714_v27  ;;  %1673 = vmatpush1.bf16.msra.mxu1 %v716_v28  ;;  %v821_v27 = vld [vmem:[#allocation3 + $0x6f8] sm:$0xff]  ;;  %v818_v28 = vld [vmem:[#allocation3 + $0x6e0] sm:$0xff] }
 0x315   :  { %1510 = vmatprep.subr.bf16.mxu0 %v723_v29  ;;  %1674 = vmatprep.subr.bf16.mxu1 %v725_v38  ;;  %v820_v29 = vld [vmem:[#allocation3 + $0x6f0] sm:$0xff]  ;;  %v827_v38 = vld [vmem:[#allocation3 + $0x728] sm:$0xff] }
 0x318   :  { %1511 = vmatpush1.bf16.msra.mxu0 %v722_v39  ;;  %1675 = vmatpush1.bf16.msra.mxu1 %v724_v40  ;;  %v829_v39 = vld [vmem:[#allocation3 + $0x738] sm:$0xff]  ;;  %v826_v40 = vld [vmem:[#allocation3 + $0x720] sm:$0xff] }
 0x319   :  { %1521 = vmatprep.subr.bf16.mxu0 %v731_v41  ;;  %1685 = vmatprep.subr.bf16.mxu1 %v733_v42  ;;  %v828_v41 = vld [vmem:[#allocation3 + $0x730] sm:$0xff]  ;;  %v835_v42 = vld [vmem:[#allocation3 + $0x768] sm:$0xff] }
 0x31b   :  { %1513 = vmatmul.mubr.bf16.vlgmr.msra.gmra.mrb[12].mxu0 %v9192_v30  ;;  %1677 = vmatmul.mubr.bf16.vlgmr.msra.gmra.mrb[12].mxu1 %v9192_v30  ;;  %v757_v30 = vld [vmem:[#allocation3 + $0x4f8] sm:$0xff] }
 0x31c   :  { %1522 = vmatpush1.bf16.msra.mxu0 %v730_v43  ;;  %1686 = vmatpush1.bf16.msra.mxu1 %v732_v32  ;;  %v837_v43 = vld [vmem:[#allocation3 + $0x778] sm:$0xff]  ;;  %v834_v32 = vld [vmem:[#allocation3 + $0x760] sm:$0xff] }
 0x31d   :  { %1523 = vmatprep.subr.bf16.mxu0 %v739_v44  ;;  %1687 = vmatprep.subr.bf16.mxu1 %v741_v45  ;;  %v836_v44 = vld [vmem:[#allocation3 + $0x770] sm:$0xff]  ;;  %v843_v45 = vld [vmem:[#allocation3 + $0x7a8] sm:$0xff] }
 0x31e   :  { %1553 = vmatprep.mubr.bf16.mxu0 %v9198_v33  ;;  %1717 = vmatprep.mubr.bf16.mxu1 %v9198_v33  ;;  %v762_v33 = vld [vmem:[#allocation3 + $0x520] sm:$0xff] }
 0x320   :  { %1524 = vmatpush1.bf16.msra.mxu0 %v738_v46  ;;  %1688 = vmatpush1.bf16.msra.mxu1 %v740_v47  ;;  %v845_v46 = vld [vmem:[#allocation3 + $0x7b8] sm:$0xff]  ;;  %v842_v47 = vld [vmem:[#allocation3 + $0x7a0] sm:$0xff] }
 0x321   :  { %1525 = vmatprep.subr.bf16.mxu0 %v747_v48  ;;  %1689 = vmatprep.subr.bf16.mxu1 %v749_v49  ;;  %v844_v48 = vld [vmem:[#allocation3 + $0x7b0] sm:$0xff]  ;;  %v851_v49 = vld [vmem:[#allocation3 + $0x7e8] sm:$0xff] }
 0x324   :  { %1526 = vmatpush1.bf16.msra.mxu0 %v746_v50  ;;  %1690 = vmatpush1.bf16.msra.mxu1 %v748_v51  ;;  %v853_v50 = vld [vmem:[#allocation3 + $0x7f8] sm:$0xff]  ;;  %v850_v51 = vld [vmem:[#allocation3 + $0x7e0] sm:$0xff] }
 0x325   :  { %1527 = vmatprep.subr.bf16.mxu0 %v755_v52  ;;  %1691 = vmatprep.subr.bf16.mxu1 %v757_v30  ;;  %v852_v52 = vld [vmem:[#allocation3 + $0x7f0] sm:$0xff]  ;;  %v859_v30 = vld [vmem:[#allocation3 + $0x828] sm:$0xff] }
 0x328   :  { %1528 = vmatpush1.bf16.msra.mxu0 %v754_v53  ;;  %1692 = vmatpush1.bf16.msra.mxu1 %v756_v54  ;;  %v861_v53 = vld [vmem:[#allocation3 + $0x838] sm:$0xff]  ;;  %v858_v54 = vld [vmem:[#allocation3 + $0x820] sm:$0xff] }
 0x329   :  { %1529 = vmatprep.subr.bf16.mxu0 %v763_v55  ;;  %1693 = vmatprep.subr.bf16.mxu1 %v765_v56  ;;  %v860_v55 = vld [vmem:[#allocation3 + $0x830] sm:$0xff]  ;;  %v867_v56 = vld [vmem:[#allocation3 + $0x868] sm:$0xff] }
 0x32c   :  { %1530 = vmatpush1.bf16.msra.mxu0 %v762_v33  ;;  %1694 = vmatpush1.bf16.msra.mxu1 %v764_v57  ;;  %v869_v33 = vld [vmem:[#allocation3 + $0x878] sm:$0xff]  ;;  %v866_v57 = vld [vmem:[#allocation3 + $0x860] sm:$0xff] }
 0x32d   :  { %1531 = vmatprep.subr.bf16.mxu0 %v771_v62  ;;  %1695 = vmatprep.subr.bf16.mxu1 %v773_v63  ;;  %v868_v62 = vld [vmem:[#allocation3 + $0x870] sm:$0xff]  ;;  %v875_v63 = vld [vmem:[#allocation3 + $0x8a8] sm:$0xff] }
 0x330   :  { %1532 = vmatpush1.bf16.msra.mxu0 %v770_v0  ;;  %1696 = vmatpush1.bf16.msra.mxu1 %v772_v2  ;;  %v877_v0 = vld [vmem:[#allocation3 + $0x8b8] sm:$0xff]  ;;  %v874_v2 = vld [vmem:[#allocation3 + $0x8a0] sm:$0xff] }
 0x331   :  { %1533 = vmatprep.subr.bf16.mxu0 %v779_v3  ;;  %1697 = vmatprep.subr.bf16.mxu1 %v781_v4  ;;  %v876_v3 = vld [vmem:[#allocation3 + $0x8b0] sm:$0xff]  ;;  %v883_v4 = vld [vmem:[#allocation3 + $0x8e8] sm:$0xff] }
 0x334   :  { %1534 = vmatpush1.bf16.msra.mxu0 %v778_v5  ;;  %1698 = vmatpush1.bf16.msra.mxu1 %v780_v8  ;;  %v882_v5 = vld [vmem:[#allocation3 + $0x8e0] sm:$0xff]  ;;  %v884_v8 = vld [vmem:[#allocation3 + $0x8f0] sm:$0xff] }
 0x335   :  { %1535 = vmatprep.subr.bf16.mxu0 %v787_v11  ;;  %1699 = vmatprep.subr.bf16.mxu1 %v789_v12  ;;  %v891_v11 = vld [vmem:[#allocation3 + $0x928] sm:$0xff]  ;;  %v893_v12 = vld [vmem:[#allocation3 + $0x938] sm:$0xff] }
 0x338   :  { %1536 = vmatpush1.bf16.msra.mxu0 %v786_v13  ;;  %1700 = vmatpush1.bf16.msra.mxu1 %v788_v14  ;;  %v892_v13 = vld [vmem:[#allocation3 + $0x930] sm:$0xff]  ;;  %v899_v14 = vld [vmem:[#allocation3 + $0x968] sm:$0xff] }
 0x339   :  { %1537 = vmatprep.subr.bf16.mxu0 %v795_v1  ;;  %1701 = vmatprep.subr.bf16.mxu1 %v797_v15  ;;  %v901_v1 = vld [vmem:[#allocation3 + $0x978] sm:$0xff]  ;;  %v898_v15 = vld [vmem:[#allocation3 + $0x960] sm:$0xff] }
 0x33c   :  { %1538 = vmatpush1.bf16.msra.mxu0 %v794_v16  ;;  %1702 = vmatpush1.bf16.msra.mxu1 %v796_v17  ;;  %v900_v16 = vld [vmem:[#allocation3 + $0x970] sm:$0xff]  ;;  %v907_v17 = vld [vmem:[#allocation3 + $0x9a8] sm:$0xff] }
 0x33d   :  { %1539 = vmatprep.subr.bf16.mxu0 %v803_v18  ;;  %1703 = vmatprep.subr.bf16.mxu1 %v805_v19  ;;  %v909_v18 = vld [vmem:[#allocation3 + $0x9b8] sm:$0xff]  ;;  %v906_v19 = vld [vmem:[#allocation3 + $0x9a0] sm:$0xff] }
 0x340   :  { %1540 = vmatpush1.bf16.msra.mxu0 %v802_v20  ;;  %1704 = vmatpush1.bf16.msra.mxu1 %v804_v21  ;;  %v908_v20 = vld [vmem:[#allocation3 + $0x9b0] sm:$0xff]  ;;  %v915_v21 = vld [vmem:[#allocation3 + $0x9e8] sm:$0xff] }
 0x341   :  { %1541 = vmatprep.subr.bf16.mxu0 %v811_v22  ;;  %1705 = vmatprep.subr.bf16.mxu1 %v813_v23  ;;  %v917_v22 = vld [vmem:[#allocation3 + $0x9f8] sm:$0xff]  ;;  %v914_v23 = vld [vmem:[#allocation3 + $0x9e0] sm:$0xff] }
 0x344   :  { %1542 = vmatpush1.bf16.msra.mxu0 %v810_v24  ;;  %1706 = vmatpush1.bf16.msra.mxu1 %v812_v25  ;;  %v916_v24 = vld [vmem:[#allocation3 + $0x9f0] sm:$0xff]  ;;  %v923_v25 = vld [vmem:[#allocation3 + $0xa28] sm:$0xff] }
 0x345   :  { %1543 = vmatprep.subr.bf16.mxu0 %v819_v26  ;;  %1707 = vmatprep.subr.bf16.mxu1 %v821_v27  ;;  %v925_v26 = vld [vmem:[#allocation3 + $0xa38] sm:$0xff]  ;;  %v922_v27 = vld [vmem:[#allocation3 + $0xa20] sm:$0xff] }
 0x348   :  { %1544 = vmatpush1.bf16.msra.mxu0 %v818_v28  ;;  %1708 = vmatpush1.bf16.msra.mxu1 %v820_v29  ;;  %v924_v28 = vld [vmem:[#allocation3 + $0xa30] sm:$0xff]  ;;  %v931_v29 = vld [vmem:[#allocation3 + $0xa68] sm:$0xff] }
 0x349   :  { %1545 = vmatprep.subr.bf16.mxu0 %v827_v38  ;;  %1709 = vmatprep.subr.bf16.mxu1 %v829_v39  ;;  %v933_v38 = vld [vmem:[#allocation3 + $0xa78] sm:$0xff]  ;;  %v930_v39 = vld [vmem:[#allocation3 + $0xa60] sm:$0xff] }
 0x34c   :  { %1546 = vmatpush1.bf16.msra.mxu0 %v826_v40  ;;  %1710 = vmatpush1.bf16.msra.mxu1 %v828_v41  ;;  %v932_v40 = vld [vmem:[#allocation3 + $0xa70] sm:$0xff]  ;;  %v939_v41 = vld [vmem:[#allocation3 + $0xaa8] sm:$0xff] }
 0x34d   :  { %1547 = vmatprep.subr.bf16.mxu0 %v835_v42  ;;  %1711 = vmatprep.subr.bf16.mxu1 %v837_v43  ;;  %v941_v42 = vld [vmem:[#allocation3 + $0xab8] sm:$0xff]  ;;  %v938_v43 = vld [vmem:[#allocation3 + $0xaa0] sm:$0xff] }
 0x350   :  { %1548 = vmatpush1.bf16.msra.mxu0 %v834_v32  ;;  %1712 = vmatpush1.bf16.msra.mxu1 %v836_v44  ;;  %v940_v32 = vld [vmem:[#allocation3 + $0xab0] sm:$0xff]  ;;  %v947_v44 = vld [vmem:[#allocation3 + $0xae8] sm:$0xff] }
 0x351   :  { %1549 = vmatprep.subr.bf16.mxu0 %v843_v45  ;;  %1713 = vmatprep.subr.bf16.mxu1 %v845_v46  ;;  %v949_v45 = vld [vmem:[#allocation3 + $0xaf8] sm:$0xff]  ;;  %v946_v46 = vld [vmem:[#allocation3 + $0xae0] sm:$0xff] }
 0x354   :  { %1550 = vmatpush1.bf16.msra.mxu0 %v842_v47  ;;  %1714 = vmatpush1.bf16.msra.mxu1 %v844_v48  ;;  %v948_v47 = vld [vmem:[#allocation3 + $0xaf0] sm:$0xff]  ;;  %v955_v48 = vld [vmem:[#allocation3 + $0xb28] sm:$0xff] }
 0x355   :  { %1551 = vmatprep.subr.bf16.mxu0 %v851_v49  ;;  %1715 = vmatprep.subr.bf16.mxu1 %v853_v50  ;;  %v957_v49 = vld [vmem:[#allocation3 + $0xb38] sm:$0xff]  ;;  %v954_v50 = vld [vmem:[#allocation3 + $0xb20] sm:$0xff] }
 0x358   :  { %1552 = vmatpush1.bf16.msra.mxu0 %v850_v51  ;;  %1716 = vmatpush1.bf16.msra.mxu1 %v852_v52  ;;  %v956_v51 = vld [vmem:[#allocation3 + $0xb30] sm:$0xff]  ;;  %v963_v52 = vld [vmem:[#allocation3 + $0xb68] sm:$0xff] }
 0x359   :  { %1562 = vmatprep.subr.bf16.mxu0 %v859_v30  ;;  %1726 = vmatprep.subr.bf16.mxu1 %v861_v53  ;;  %v965_v30 = vld [vmem:[#allocation3 + $0xb78] sm:$0xff]  ;;  %v962_v53 = vld [vmem:[#allocation3 + $0xb60] sm:$0xff] }
 0x35b   :  { %1554 = vmatmul.mubr.bf16.vlgmr.msra.gmra.mrb[12].mxu0 %v9194_v31  ;;  %1718 = vmatmul.mubr.bf16.vlgmr.msra.gmra.mrb[12].mxu1 %v9194_v31  ;;  %v885_v31 = vld [vmem:[#allocation3 + $0x8f8] sm:$0xff] }
 0x35c   :  { %1563 = vmatpush1.bf16.msra.mxu0 %v858_v54  ;;  %1727 = vmatpush1.bf16.msra.mxu1 %v860_v55  ;;  %v964_v54 = vld [vmem:[#allocation3 + $0xb70] sm:$0xff]  ;;  %v971_v55 = vld [vmem:[#allocation3 + $0xba8] sm:$0xff] }
 0x35d   :  { %1564 = vmatprep.subr.bf16.mxu0 %v867_v56  ;;  %1728 = vmatprep.subr.bf16.mxu1 %v869_v33  ;;  %v973_v56 = vld [vmem:[#allocation3 + $0xbb8] sm:$0xff]  ;;  %v970_v33 = vld [vmem:[#allocation3 + $0xba0] sm:$0xff] }
 0x35e   :  { %1594 = vmatprep.mubr.bf16.mxu0 %v9216_v60  ;;  %1758 = vmatprep.mubr.bf16.mxu1 %v9216_v60  ;;  %v890_v60 = vld [vmem:[#allocation3 + $0x920] sm:$0xff] }
 0x360   :  { %1565 = vmatpush1.bf16.msra.mxu0 %v866_v57  ;;  %1729 = vmatpush1.bf16.msra.mxu1 %v868_v62  ;;  %v972_v57 = vld [vmem:[#allocation3 + $0xbb0] sm:$0xff]  ;;  %v979_v62 = vld [vmem:[#allocation3 + $0xbe8] sm:$0xff] }
 0x361   :  { %1566 = vmatprep.subr.bf16.mxu0 %v875_v63  ;;  %1730 = vmatprep.subr.bf16.mxu1 %v877_v0  ;;  %v981_v63 = vld [vmem:[#allocation3 + $0xbf8] sm:$0xff]  ;;  %v978_v0 = vld [vmem:[#allocation3 + $0xbe0] sm:$0xff] }
 0x364   :  { %1567 = vmatpush1.bf16.msra.mxu0 %v874_v2  ;;  %1731 = vmatpush1.bf16.msra.mxu1 %v876_v3  ;;  %v980_v2 = vld [vmem:[#allocation3 + $0xbf0] sm:$0xff]  ;;  %v987_v3 = vld [vmem:[#allocation3 + $0xc28] sm:$0xff] }
 0x365   :  { %1568 = vmatprep.subr.bf16.mxu0 %v883_v4  ;;  %1732 = vmatprep.subr.bf16.mxu1 %v885_v31  ;;  %v989_v4 = vld [vmem:[#allocation3 + $0xc38] sm:$0xff]  ;;  %v986_v31 = vld [vmem:[#allocation3 + $0xc20] sm:$0xff] }
 0x368   :  { %1569 = vmatpush1.bf16.msra.mxu0 %v882_v5  ;;  %1733 = vmatpush1.bf16.msra.mxu1 %v884_v8  ;;  %v988_v5 = vld [vmem:[#allocation3 + $0xc30] sm:$0xff]  ;;  %v995_v8 = vld [vmem:[#allocation3 + $0xc68] sm:$0xff] }
 0x369   :  { %1570 = vmatprep.subr.bf16.mxu0 %v891_v11  ;;  %1734 = vmatprep.subr.bf16.mxu1 %v893_v12  ;;  %v997_v11 = vld [vmem:[#allocation3 + $0xc78] sm:$0xff]  ;;  %v994_v12 = vld [vmem:[#allocation3 + $0xc60] sm:$0xff] }
 0x36c   :  { %1571 = vmatpush1.bf16.msra.mxu0 %v890_v60  ;;  %1735 = vmatpush1.bf16.msra.mxu1 %v892_v13  ;;  %v996_v60 = vld [vmem:[#allocation3 + $0xc70] sm:$0xff]  ;;  %v1003_v13 = vld [vmem:[#allocation3 + $0xca8] sm:$0xff] }
 0x36d   :  { %1572 = vmatprep.subr.bf16.mxu0 %v899_v14  ;;  %1736 = vmatprep.subr.bf16.mxu1 %v901_v1  ;;  %v1005_v14 = vld [vmem:[#allocation3 + $0xcb8] sm:$0xff]  ;;  %v1002_v1 = vld [vmem:[#allocation3 + $0xca0] sm:$0xff] }
 0x370   :  { %1573 = vmatpush1.bf16.msra.mxu0 %v898_v15  ;;  %1737 = vmatpush1.bf16.msra.mxu1 %v900_v16  ;;  %v1004_v15 = vld [vmem:[#allocation3 + $0xcb0] sm:$0xff]  ;;  %v1011_v16 = vld [vmem:[#allocation3 + $0xce8] sm:$0xff] }
 0x371   :  { %1574 = vmatprep.subr.bf16.mxu0 %v907_v17  ;;  %1738 = vmatprep.subr.bf16.mxu1 %v909_v18  ;;  %v1010_v17 = vld [vmem:[#allocation3 + $0xce0] sm:$0xff]  ;;  %v1012_v18 = vld [vmem:[#allocation3 + $0xcf0] sm:$0xff] }
 0x374   :  { %1575 = vmatpush1.bf16.msra.mxu0 %v906_v19  ;;  %1739 = vmatpush1.bf16.msra.mxu1 %v908_v20  ;;  %v1019_v19 = vld [vmem:[#allocation3 + $0xd28] sm:$0xff]  ;;  %v1021_v20 = vld [vmem:[#allocation3 + $0xd38] sm:$0xff] }
 0x375   :  { %1576 = vmatprep.subr.bf16.mxu0 %v915_v21  ;;  %1740 = vmatprep.subr.bf16.mxu1 %v917_v22  ;;  %v9250_v21 = vld [vmem:[#allocation14] sm:$0xff] }
 0x376   :  { %v1020_v22 = vld [vmem:[#allocation3 + $0xd30] sm:$0xff] }
 0x378   :  { %1577 = vmatpush1.bf16.msra.mxu0 %v914_v23  ;;  %1741 = vmatpush1.bf16.msra.mxu1 %v916_v24  ;;  %v1027_v23 = vld [vmem:[#allocation3 + $0xd68] sm:$0xff]  ;;  %v1029_v24 = vld [vmem:[#allocation3 + $0xd78] sm:$0xff] }
 0x379   :  { %1578 = vmatprep.subr.bf16.mxu0 %v923_v25  ;;  %1742 = vmatprep.subr.bf16.mxu1 %v925_v26  ;;  %v1115_v25 = vrot.slane %v9250_v21, %v9180_v6  ;;  %v1123_v26 = vrot.slane %v9250_v21, %v9182_v7 }
 0x37c   :  { %1579 = vmatpush1.bf16.msra.mxu0 %v922_v27  ;;  %1743 = vmatpush1.bf16.msra.mxu1 %v924_v28  ;;  %v1119_v27 = vrot.slane %v9250_v21, %v9184_v9  ;;  %v1127_v28 = vrot.slane %v9250_v21, %v9186_v10 }
 0x37d   :  { %1580 = vmatprep.subr.bf16.mxu0 %v931_v29  ;;  %1744 = vmatprep.subr.bf16.mxu1 %v933_v38  ;;  %v1026_v29 = vld [vmem:[#allocation3 + $0xd60] sm:$0xff]  ;;  %v1028_v38 = vld [vmem:[#allocation3 + $0xd70] sm:$0xff] }
 0x380   :  { %1581 = vmatpush1.bf16.msra.mxu0 %v930_v39  ;;  %1745 = vmatpush1.bf16.msra.mxu1 %v932_v40 }
 0x381   :  { %1582 = vmatprep.subr.bf16.mxu0 %v939_v41  ;;  %1746 = vmatprep.subr.bf16.mxu1 %v941_v42  ;;  %v1035_v41 = vld [vmem:[#allocation3 + $0xda8] sm:$0xff]  ;;  %v1037_v42 = vld [vmem:[#allocation3 + $0xdb8] sm:$0xff] }
 0x384   :  { %1583 = vmatpush1.bf16.msra.mxu0 %v938_v43  ;;  %1747 = vmatpush1.bf16.msra.mxu1 %v940_v32 }
 0x385   :  { %1584 = vmatprep.subr.bf16.mxu0 %v947_v44  ;;  %1748 = vmatprep.subr.bf16.mxu1 %v949_v45 }
 0x388   :  { %1585 = vmatpush1.bf16.msra.mxu0 %v946_v46  ;;  %1749 = vmatpush1.bf16.msra.mxu1 %v948_v47 }
 0x389   :  { %1586 = vmatprep.subr.bf16.mxu0 %v955_v48  ;;  %1750 = vmatprep.subr.bf16.mxu1 %v957_v49 }
 0x38c   :  { %1587 = vmatpush1.bf16.msra.mxu0 %v954_v50  ;;  %1751 = vmatpush1.bf16.msra.mxu1 %v956_v51 }
 0x38d   :  { %1588 = vmatprep.subr.bf16.mxu0 %v963_v52  ;;  %1752 = vmatprep.subr.bf16.mxu1 %v965_v30 }
 0x390   :  { %1589 = vmatpush1.bf16.msra.mxu0 %v962_v53  ;;  %1753 = vmatpush1.bf16.msra.mxu1 %v964_v54  ;;  %v1034_v53 = vld [vmem:[#allocation3 + $0xda0] sm:$0xff]  ;;  %v1036_v54 = vld [vmem:[#allocation3 + $0xdb0] sm:$0xff] }
 0x391   :  { %1590 = vmatprep.subr.bf16.mxu0 %v971_v55  ;;  %1754 = vmatprep.subr.bf16.mxu1 %v973_v56 }
 0x394   :  { %1591 = vmatpush1.bf16.msra.mxu0 %v970_v33  ;;  %1755 = vmatpush1.bf16.msra.mxu1 %v972_v57  ;;  %v1043_v33 = vld [vmem:[#allocation3 + $0xde8] sm:$0xff]  ;;  %v1045_v57 = vld [vmem:[#allocation3 + $0xdf8] sm:$0xff] }
 0x395   :  { %1592 = vmatprep.subr.bf16.mxu0 %v979_v62  ;;  %1756 = vmatprep.subr.bf16.mxu1 %v981_v63 }
 0x398   :  { %1593 = vmatpush1.bf16.msra.mxu0 %v978_v0  ;;  %1757 = vmatpush1.bf16.msra.mxu1 %v980_v2 }
 0x399   :  { %1603 = vmatprep.subr.bf16.mxu0 %v987_v3  ;;  %1767 = vmatprep.subr.bf16.mxu1 %v989_v4  ;;  %v1042_v3 = vld [vmem:[#allocation3 + $0xde0] sm:$0xff]  ;;  %v1044_v4 = vld [vmem:[#allocation3 + $0xdf0] sm:$0xff] }
 0x39b   :  { %1595 = vmatmul.mubr.bf16.vlgmr.msra.gmra.mrb[12].mxu0 %v9212_v58  ;;  %1759 = vmatmul.mubr.bf16.vlgmr.msra.gmra.mrb[12].mxu1 %v9212_v58  ;;  %v1013_v58 = vld [vmem:[#allocation3 + $0xcf8] sm:$0xff] }
 0x39c   :  { %1604 = vmatpush1.bf16.msra.mxu0 %v986_v31  ;;  %1768 = vmatpush1.bf16.msra.mxu1 %v988_v5  ;;  %v1051_v31 = vld [vmem:[#allocation3 + $0xe28] sm:$0xff]  ;;  %v1053_v5 = vld [vmem:[#allocation3 + $0xe38] sm:$0xff] }
 0x39d   :  { %1605 = vmatprep.subr.bf16.mxu0 %v995_v8  ;;  %1769 = vmatprep.subr.bf16.mxu1 %v997_v11  ;;  %v1050_v8 = vld [vmem:[#allocation3 + $0xe20] sm:$0xff]  ;;  %v1052_v11 = vld [vmem:[#allocation3 + $0xe30] sm:$0xff] }
 0x39e   :  { %1635 = vmatprep.mubr.bf16.mxu0 %v9218_v61  ;;  %1799 = vmatprep.mubr.bf16.mxu1 %v9218_v61  ;;  %v1018_v61 = vld [vmem:[#allocation3 + $0xd20] sm:$0xff] }
 0x3a0   :  { %1606 = vmatpush1.bf16.msra.mxu0 %v994_v12  ;;  %1770 = vmatpush1.bf16.msra.mxu1 %v996_v60  ;;  %v1059_v12 = vld [vmem:[#allocation3 + $0xe68] sm:$0xff]  ;;  %v1061_v60 = vld [vmem:[#allocation3 + $0xe78] sm:$0xff] }
 0x3a1   :  { %1607 = vmatprep.subr.bf16.mxu0 %v1003_v13  ;;  %1771 = vmatprep.subr.bf16.mxu1 %v1005_v14  ;;  %v1058_v13 = vld [vmem:[#allocation3 + $0xe60] sm:$0xff]  ;;  %v1060_v14 = vld [vmem:[#allocation3 + $0xe70] sm:$0xff] }
 0x3a4   :  { %1608 = vmatpush1.bf16.msra.mxu0 %v1002_v1  ;;  %1772 = vmatpush1.bf16.msra.mxu1 %v1004_v15  ;;  %v1067_v1 = vld [vmem:[#allocation3 + $0xea8] sm:$0xff]  ;;  %v1069_v15 = vld [vmem:[#allocation3 + $0xeb8] sm:$0xff] }
 0x3a5   :  { %1609 = vmatprep.subr.bf16.mxu0 %v1011_v16  ;;  %1773 = vmatprep.subr.bf16.mxu1 %v1013_v58  ;;  %v1066_v16 = vld [vmem:[#allocation3 + $0xea0] sm:$0xff]  ;;  %v1068_v58 = vld [vmem:[#allocation3 + $0xeb0] sm:$0xff] }
 0x3a8   :  { %1610 = vmatpush1.bf16.msra.mxu0 %v1010_v17  ;;  %1774 = vmatpush1.bf16.msra.mxu1 %v1012_v18  ;;  %v1075_v17 = vld [vmem:[#allocation3 + $0xee8] sm:$0xff]  ;;  %v1077_v18 = vld [vmem:[#allocation3 + $0xef8] sm:$0xff] }
 0x3a9   :  { %1611 = vmatprep.subr.bf16.mxu0 %v1019_v19  ;;  %1775 = vmatprep.subr.bf16.mxu1 %v1021_v20  ;;  %v1074_v19 = vld [vmem:[#allocation3 + $0xee0] sm:$0xff]  ;;  %v1076_v20 = vld [vmem:[#allocation3 + $0xef0] sm:$0xff] }
 0x3ac   :  { %1612 = vmatpush1.bf16.msra.mxu0 %v1018_v61  ;;  %1776 = vmatpush1.bf16.msra.mxu1 %v1020_v22  ;;  %v1083_v61 = vld [vmem:[#allocation3 + $0xf28] sm:$0xff]  ;;  %v1085_v22 = vld [vmem:[#allocation3 + $0xf38] sm:$0xff] }
 0x3ad   :  { %1613 = vmatprep.subr.bf16.mxu0 %v1027_v23  ;;  %1777 = vmatprep.subr.bf16.mxu1 %v1029_v24  ;;  %v1082_v23 = vld [vmem:[#allocation3 + $0xf20] sm:$0xff]  ;;  %v1084_v24 = vld [vmem:[#allocation3 + $0xf30] sm:$0xff] }
 0x3ae   :  { %v1309_v39 = vpop.f32.mrb[8].mxu0  ;;  %v1473_v40 = vpop.f32.mrb[8].mxu1 }
 0x3af   :  { %v8306_v43 = vadd.f32 %v1309_v39, %v1115_v25  ;;  %v8308_v32 = vadd.f32 %v1473_v40, %v1123_v26  ;;  %v1311_v44 = vpop.f32.mrb[9].mxu0  ;;  %v1475_v45 = vpop.f32.mrb[9].mxu1  ;;  %v1091_v25 = vld [vmem:[#allocation3 + $0xf68] sm:$0xff]  ;;  %v1093_v26 = vld [vmem:[#allocation3 + $0xf78] sm:$0xff]  ;;  %v1098_v39 = vld [vmem:[#allocation3 + $0xfa0] sm:$0xff] }
 0x3b0   :  { %v8307_v46 = vadd.f32 %v1311_v44, %v1119_v27  ;;  %v8309_v47 = vadd.f32 %v1475_v45, %v1127_v28  ;;  %v1313_v48 = vpop.f32.mrb[10].mxu0  ;;  %v1477_v49 = vpop.f32.mrb[10].mxu1  ;;  %1614 = vmatpush1.bf16.msra.mxu0 %v1026_v29  ;;  %1778 = vmatpush1.bf16.msra.mxu1 %v1028_v38  ;;  %v1090_v27 = vld [vmem:[#allocation3 + $0xf60] sm:$0xff]  ;;  %v1092_v28 = vld [vmem:[#allocation3 + $0xf70] sm:$0xff]  ;;  %v1099_v29 = vld [vmem:[#allocation3 + $0xfa8] sm:$0xff]  ;;  %v1131_v44 = vrot.slane %v9250_v21, %v9200_v34 }
 0x3b1   :  { %v1808_v50 = vmax.f32 %v8306_v43, 0.0  ;;  %v1810_v51 = vmax.f32 %v8308_v32, 0.0  ;;  %v1314_v52 = vpop.f32.mrb[11].mxu0  ;;  %v1478_v30 = vpop.f32.mrb[11].mxu1  ;;  %1615 = vmatprep.subr.bf16.mxu0 %v1035_v41  ;;  %1779 = vmatprep.subr.bf16.mxu1 %v1037_v42  ;;  %v1101_v38 = vld [vmem:[#allocation3 + $0xfb8] sm:$0xff]  ;;  %v1100_v40 = vld [vmem:[#allocation3 + $0xfb0] sm:$0xff]  ;;  %v1139_v45 = vrot.slane %v9250_v21, %v9202_v35 }
 0x3b2   :  { %v1809_v55 = vmax.f32 %v8307_v46, 0.0  ;;  %v1811_v56 = vmax.f32 %v8309_v47, 0.0  ;;  %v1107_v41 = vld [vmem:[#allocation3 + $0xfe8] sm:$0xff]  ;;  %v1109_v42 = vld [vmem:[#allocation3 + $0xff8] sm:$0xff]  ;;  %v1106_v43 = vld [vmem:[#allocation3 + $0xfe0] sm:$0xff]  ;;  %v1135_v46 = vrot.slane %v9250_v21, %v9204_v36  ;;  %v1143_v47 = vrot.slane %v9250_v21, %v9206_v37 }
 0x3b3   :  { %v9260_v62 = vpack.c.bf16 %v1808_v50, %v1808_v50  ;;  %v9262_v63 = vpack.c.bf16 %v1810_v51, %v1810_v51  ;;  %v1108_v32 = vld [vmem:[#allocation3 + $0xff0] sm:$0xff] }
 0x3b4   :  { %v9264_v0 = vpack.c.bf16 %v1809_v55, %v1809_v55  ;;  %v9266_v2 = vpack.c.bf16 %v1811_v56, %v1811_v56  ;;  %1616 = vmatpush1.bf16.msra.mxu0 %v1034_v53  ;;  %1780 = vmatpush1.bf16.msra.mxu1 %v1036_v54 }
 0x3b5   :  { %1617 = vmatprep.subr.bf16.mxu0 %v1043_v33  ;;  %1781 = vmatprep.subr.bf16.mxu1 %v1045_v57 }
 0x3b8   :  { %1618 = vmatpush1.bf16.msra.mxu0 %v1042_v3  ;;  %1782 = vmatpush1.bf16.msra.mxu1 %v1044_v4 }
 0x3b9   :  { %1619 = vmatprep.subr.bf16.mxu0 %v1051_v31  ;;  %1783 = vmatprep.subr.bf16.mxu1 %v1053_v5 }
 0x3bc   :  { %1620 = vmatpush1.bf16.msra.mxu0 %v1050_v8  ;;  %1784 = vmatpush1.bf16.msra.mxu1 %v1052_v11 }
 0x3bd   :  { %1621 = vmatprep.subr.bf16.mxu0 %v1059_v12  ;;  %1785 = vmatprep.subr.bf16.mxu1 %v1061_v60 }
 0x3c0   :  { %1622 = vmatpush1.bf16.msra.mxu0 %v1058_v13  ;;  %1786 = vmatpush1.bf16.msra.mxu1 %v1060_v14 }
 0x3c1   :  { %1623 = vmatprep.subr.bf16.mxu0 %v1067_v1  ;;  %1787 = vmatprep.subr.bf16.mxu1 %v1069_v15 }
 0x3c4   :  { %1624 = vmatpush1.bf16.msra.mxu0 %v1066_v16  ;;  %1788 = vmatpush1.bf16.msra.mxu1 %v1068_v58 }
 0x3c5   :  { %1625 = vmatprep.subr.bf16.mxu0 %v1075_v17  ;;  %1789 = vmatprep.subr.bf16.mxu1 %v1077_v18 }
 0x3c8   :  { %1626 = vmatpush1.bf16.msra.mxu0 %v1074_v19  ;;  %1790 = vmatpush1.bf16.msra.mxu1 %v1076_v20 }
 0x3c9   :  { %1627 = vmatprep.subr.bf16.mxu0 %v1083_v61  ;;  %1791 = vmatprep.subr.bf16.mxu1 %v1085_v22 }
 0x3cc   :  { %1628 = vmatpush1.bf16.msra.mxu0 %v1082_v23  ;;  %1792 = vmatpush1.bf16.msra.mxu1 %v1084_v24 }
 0x3cd   :  { %1629 = vmatprep.subr.bf16.mxu0 %v1091_v25  ;;  %1793 = vmatprep.subr.bf16.mxu1 %v1093_v26 }
 0x3d0   :  { %1630 = vmatpush1.bf16.msra.mxu0 %v1090_v27  ;;  %1794 = vmatpush1.bf16.msra.mxu1 %v1092_v28 }
 0x3d1   :  { %1631 = vmatprep.subr.bf16.mxu0 %v1099_v29  ;;  %1795 = vmatprep.subr.bf16.mxu1 %v1101_v38 }
 0x3d4   :  { %1632 = vmatpush1.bf16.msra.mxu0 %v1098_v39  ;;  %1796 = vmatpush1.bf16.msra.mxu1 %v1100_v40 }
 0x3d5   :  { %1633 = vmatprep.subr.bf16.mxu0 %v1107_v41  ;;  %1797 = vmatprep.subr.bf16.mxu1 %v1109_v42 }
 0x3d8   :  { %1634 = vmatpush1.bf16.msra.mxu0 %v1106_v43  ;;  %1798 = vmatpush1.bf16.msra.mxu1 %v1108_v32 }
 0x3db   :  { %1636 = vmatmul.mubr.bf16.vlgmr.msra.gmra.mrb[12].mxu0 %v9214_v59  ;;  %1800 = vmatmul.mubr.bf16.vlgmr.msra.gmra.mrb[12].mxu1 %v9214_v59 }
 0x4ae   :  { %v1637_v48 = vpop.f32.mrb[12].mxu0  ;;  %v1801_v49 = vpop.f32.mrb[12].mxu1 }
 0x4af   :  { %v8310_v50 = vadd.f32 %v1637_v48, %v1131_v44  ;;  %v8312_v51 = vadd.f32 %v1801_v49, %v1139_v45  ;;  %v1639_v52 = vpop.f32.mrb[13].mxu0  ;;  %v1803_v30 = vpop.f32.mrb[13].mxu1 }
 0x4b0   :  { %v8311_v53 = vadd.f32 %v1639_v52, %v1135_v46  ;;  %v8313_v59 = vadd.f32 %v1803_v30, %v1143_v47  ;;  %v1641_v54 = vpop.f32.mrb[14].mxu0  ;;  %v1805_v55 = vpop.f32.mrb[14].mxu1 }
 0x4b1   :  { %v1812_v56 = vmax.f32 %v8310_v50, 0.0  ;;  %v1814_v33 = vmax.f32 %v8312_v51, 0.0  ;;  %v1642_v57 = vpop.f32.mrb[15].mxu0  ;;  %v1806_v3 = vpop.f32.mrb[15].mxu1 }
 0x4b2   :  { %v1813_v4 = vmax.f32 %v8311_v53, 0.0  ;;  %v1815_v31 = vmax.f32 %v8313_v59, 0.0 }
 0x4b3   :  { %v9278_v5 = vpack.c.bf16 %v1812_v56, %v1812_v56  ;;  %v9280_v8 = vpack.c.bf16 %v1814_v33, %v1814_v33 }
 0x4b4   :  { %v9282_v21 = vpack.c.bf16 %v1813_v4, %v1813_v4  ;;  %v9284_v11 = vpack.c.bf16 %v1815_v31, %v1815_v31 }
 0x4b5   :  { %8896 = dma.done.wait [#allocation8 + $0x2], 131072 }
 0x4b6   :  { %8897 = vsyncadd [#allocation8 + $0x2], 4294836224  ;;  %2967 = vmatprep.mubr.bf16.mxu0 %v9264_v0  ;;  %3131 = vmatprep.mubr.bf16.mxu1 %v9264_v0  ;;  %v1828_v12 = vld [vmem:[#allocation4 + $0x8] sm:$0xff]  ;;  %v1830_v60 = vld [vmem:[#allocation4 + $0x18] sm:$0xff] }
 0x4b7   :  { %v1827_v13 = vld [vmem:[#allocation4] sm:$0xff]  ;;  %2935 = vmatprep.subr.bf16.mxu0 %v1828_v12  ;;  %3099 = vmatprep.subr.bf16.mxu1 %v1830_v60  ;;  %v1829_v14 = vld [vmem:[#allocation4 + $0x10] sm:$0xff]  ;;  %v1844_v1 = vld [vmem:[#allocation4 + $0x88] sm:$0xff] }
 0x4b8   :  { %v1846_v15 = vld [vmem:[#allocation4 + $0x98] sm:$0xff]  ;;  %2936 = vmatpush1.bf16.msra.mxu0 %v1827_v13  ;;  %3100 = vmatpush1.bf16.msra.mxu1 %v1829_v14  ;;  %v1843_v16 = vld [vmem:[#allocation4 + $0x80] sm:$0xff]  ;;  %v1845_v58 = vld [vmem:[#allocation4 + $0x90] sm:$0xff] }
 0x4b9   :  { %2937 = vmatprep.subr.bf16.mxu0 %v1844_v1  ;;  %3101 = vmatprep.subr.bf16.mxu1 %v1846_v15  ;;  %v1860_v17 = vld [vmem:[#allocation4 + $0x108] sm:$0xff]  ;;  %v1862_v18 = vld [vmem:[#allocation4 + $0x118] sm:$0xff]  ;;  %v1859_v19 = vld [vmem:[#allocation4 + $0x100] sm:$0xff] }
 0x4ba   :  { %v1861_v20 = vld [vmem:[#allocation4 + $0x110] sm:$0xff]  ;;  %v1876_v61 = vld [vmem:[#allocation4 + $0x188] sm:$0xff]  ;;  %v1878_v22 = vld [vmem:[#allocation4 + $0x198] sm:$0xff] }
 0x4bb   :  { %v1875_v23 = vld [vmem:[#allocation4 + $0x180] sm:$0xff]  ;;  %v1877_v24 = vld [vmem:[#allocation4 + $0x190] sm:$0xff]  ;;  %v1892_v25 = vld [vmem:[#allocation4 + $0x208] sm:$0xff] }
 0x4bc   :  { %2938 = vmatpush1.bf16.msra.mxu0 %v1843_v16  ;;  %3102 = vmatpush1.bf16.msra.mxu1 %v1845_v58  ;;  %v1894_v26 = vld [vmem:[#allocation4 + $0x218] sm:$0xff]  ;;  %v1891_v27 = vld [vmem:[#allocation4 + $0x200] sm:$0xff]  ;;  %v1893_v28 = vld [vmem:[#allocation4 + $0x210] sm:$0xff] }
 0x4bd   :  { %2939 = vmatprep.subr.bf16.mxu0 %v1860_v17  ;;  %3103 = vmatprep.subr.bf16.mxu1 %v1862_v18  ;;  %v1908_v29 = vld [vmem:[#allocation4 + $0x288] sm:$0xff]  ;;  %v1910_v38 = vld [vmem:[#allocation4 + $0x298] sm:$0xff]  ;;  %v1907_v39 = vld [vmem:[#allocation4 + $0x280] sm:$0xff] }
 0x4be   :  { %v1909_v40 = vld [vmem:[#allocation4 + $0x290] sm:$0xff]  ;;  %v1924_v41 = vld [vmem:[#allocation4 + $0x308] sm:$0xff]  ;;  %v1926_v42 = vld [vmem:[#allocation4 + $0x318] sm:$0xff] }
 0x4bf   :  { %v1923_v43 = vld [vmem:[#allocation4 + $0x300] sm:$0xff]  ;;  %v1925_v32 = vld [vmem:[#allocation4 + $0x310] sm:$0xff]  ;;  %v1940_v44 = vld [vmem:[#allocation4 + $0x388] sm:$0xff] }
 0x4c0   :  { %2940 = vmatpush1.bf16.msra.mxu0 %v1859_v19  ;;  %3104 = vmatpush1.bf16.msra.mxu1 %v1861_v20  ;;  %v1942_v45 = vld [vmem:[#allocation4 + $0x398] sm:$0xff]  ;;  %v1939_v46 = vld [vmem:[#allocation4 + $0x380] sm:$0xff]  ;;  %v1941_v47 = vld [vmem:[#allocation4 + $0x390] sm:$0xff] }
 0x4c1   :  { %2941 = vmatprep.subr.bf16.mxu0 %v1876_v61  ;;  %3105 = vmatprep.subr.bf16.mxu1 %v1878_v22  ;;  %v1956_v48 = vld [vmem:[#allocation4 + $0x408] sm:$0xff]  ;;  %v1958_v49 = vld [vmem:[#allocation4 + $0x418] sm:$0xff]  ;;  %v1955_v50 = vld [vmem:[#allocation4 + $0x400] sm:$0xff] }
 0x4c2   :  { %v1957_v51 = vld [vmem:[#allocation4 + $0x410] sm:$0xff]  ;;  %v1972_v52 = vld [vmem:[#allocation4 + $0x488] sm:$0xff]  ;;  %v1974_v30 = vld [vmem:[#allocation4 + $0x498] sm:$0xff] }
 0x4c3   :  { %v1971_v53 = vld [vmem:[#allocation4 + $0x480] sm:$0xff]  ;;  %v1973_v59 = vld [vmem:[#allocation4 + $0x490] sm:$0xff]  ;;  %v1988_v54 = vld [vmem:[#allocation4 + $0x508] sm:$0xff] }
 0x4c4   :  { %2942 = vmatpush1.bf16.msra.mxu0 %v1875_v23  ;;  %3106 = vmatpush1.bf16.msra.mxu1 %v1877_v24  ;;  %v1990_v55 = vld [vmem:[#allocation4 + $0x518] sm:$0xff]  ;;  %v1987_v56 = vld [vmem:[#allocation4 + $0x500] sm:$0xff]  ;;  %v1989_v33 = vld [vmem:[#allocation4 + $0x510] sm:$0xff] }
 0x4c5   :  { %2943 = vmatprep.subr.bf16.mxu0 %v1892_v25  ;;  %3107 = vmatprep.subr.bf16.mxu1 %v1894_v26  ;;  %v2004_v57 = vld [vmem:[#allocation4 + $0x588] sm:$0xff]  ;;  %v2006_v3 = vld [vmem:[#allocation4 + $0x598] sm:$0xff]  ;;  %v2003_v4 = vld [vmem:[#allocation4 + $0x580] sm:$0xff] }
 0x4c6   :  { %v2005_v31 = vld [vmem:[#allocation4 + $0x590] sm:$0xff]  ;;  %v2020_v12 = vld [vmem:[#allocation4 + $0x608] sm:$0xff]  ;;  %v2022_v60 = vld [vmem:[#allocation4 + $0x618] sm:$0xff] }
 0x4c7   :  { %v2019_v13 = vld [vmem:[#allocation4 + $0x600] sm:$0xff]  ;;  %v2021_v14 = vld [vmem:[#allocation4 + $0x610] sm:$0xff]  ;;  %v2036_v1 = vld [vmem:[#allocation4 + $0x688] sm:$0xff] }
 0x4c8   :  { %2944 = vmatpush1.bf16.msra.mxu0 %v1891_v27  ;;  %3108 = vmatpush1.bf16.msra.mxu1 %v1893_v28  ;;  %v2038_v15 = vld [vmem:[#allocation4 + $0x698] sm:$0xff]  ;;  %v2035_v16 = vld [vmem:[#allocation4 + $0x680] sm:$0xff]  ;;  %v2037_v58 = vld [vmem:[#allocation4 + $0x690] sm:$0xff] }
 0x4c9   :  { %2945 = vmatprep.subr.bf16.mxu0 %v1908_v29  ;;  %3109 = vmatprep.subr.bf16.mxu1 %v1910_v38  ;;  %v2052_v17 = vld [vmem:[#allocation4 + $0x708] sm:$0xff]  ;;  %v2054_v18 = vld [vmem:[#allocation4 + $0x718] sm:$0xff]  ;;  %v2051_v19 = vld [vmem:[#allocation4 + $0x700] sm:$0xff] }
 0x4ca   :  { %v2053_v20 = vld [vmem:[#allocation4 + $0x710] sm:$0xff]  ;;  %v2068_v61 = vld [vmem:[#allocation4 + $0x788] sm:$0xff]  ;;  %v2070_v22 = vld [vmem:[#allocation4 + $0x798] sm:$0xff] }
 0x4cb   :  { %v2067_v23 = vld [vmem:[#allocation4 + $0x780] sm:$0xff]  ;;  %v2069_v24 = vld [vmem:[#allocation4 + $0x790] sm:$0xff]  ;;  %v2084_v25 = vld [vmem:[#allocation4 + $0x808] sm:$0xff] }
 0x4cc   :  { %2946 = vmatpush1.bf16.msra.mxu0 %v1907_v39  ;;  %3110 = vmatpush1.bf16.msra.mxu1 %v1909_v40  ;;  %v2086_v26 = vld [vmem:[#allocation4 + $0x818] sm:$0xff]  ;;  %v2083_v27 = vld [vmem:[#allocation4 + $0x800] sm:$0xff]  ;;  %v2085_v28 = vld [vmem:[#allocation4 + $0x810] sm:$0xff] }
 0x4cd   :  { %2947 = vmatprep.subr.bf16.mxu0 %v1924_v41  ;;  %3111 = vmatprep.subr.bf16.mxu1 %v1926_v42  ;;  %v2100_v29 = vld [vmem:[#allocation4 + $0x888] sm:$0xff]  ;;  %v2102_v38 = vld [vmem:[#allocation4 + $0x898] sm:$0xff]  ;;  %v2099_v39 = vld [vmem:[#allocation4 + $0x880] sm:$0xff] }
 0x4ce   :  { %v2101_v40 = vld [vmem:[#allocation4 + $0x890] sm:$0xff]  ;;  %v2116_v41 = vld [vmem:[#allocation4 + $0x908] sm:$0xff]  ;;  %v2118_v42 = vld [vmem:[#allocation4 + $0x918] sm:$0xff] }
 0x4d0   :  { %2948 = vmatpush1.bf16.msra.mxu0 %v1923_v43  ;;  %3112 = vmatpush1.bf16.msra.mxu1 %v1925_v32  ;;  %v2115_v43 = vld [vmem:[#allocation4 + $0x900] sm:$0xff]  ;;  %v2117_v32 = vld [vmem:[#allocation4 + $0x910] sm:$0xff] }
 0x4d1   :  { %2949 = vmatprep.subr.bf16.mxu0 %v1940_v44  ;;  %3113 = vmatprep.subr.bf16.mxu1 %v1942_v45  ;;  %v2132_v44 = vld [vmem:[#allocation4 + $0x988] sm:$0xff]  ;;  %v2134_v45 = vld [vmem:[#allocation4 + $0x998] sm:$0xff] }
 0x4d4   :  { %2950 = vmatpush1.bf16.msra.mxu0 %v1939_v46  ;;  %3114 = vmatpush1.bf16.msra.mxu1 %v1941_v47  ;;  %v2131_v46 = vld [vmem:[#allocation4 + $0x980] sm:$0xff]  ;;  %v2133_v47 = vld [vmem:[#allocation4 + $0x990] sm:$0xff] }
 0x4d5   :  { %2951 = vmatprep.subr.bf16.mxu0 %v1956_v48  ;;  %3115 = vmatprep.subr.bf16.mxu1 %v1958_v49  ;;  %v2148_v48 = vld [vmem:[#allocation4 + $0xa08] sm:$0xff]  ;;  %v2150_v49 = vld [vmem:[#allocation4 + $0xa18] sm:$0xff] }
 0x4d8   :  { %2952 = vmatpush1.bf16.msra.mxu0 %v1955_v50  ;;  %3116 = vmatpush1.bf16.msra.mxu1 %v1957_v51  ;;  %v2147_v50 = vld [vmem:[#allocation4 + $0xa00] sm:$0xff]  ;;  %v2149_v51 = vld [vmem:[#allocation4 + $0xa10] sm:$0xff] }
 0x4d9   :  { %2953 = vmatprep.subr.bf16.mxu0 %v1972_v52  ;;  %3117 = vmatprep.subr.bf16.mxu1 %v1974_v30  ;;  %v2164_v52 = vld [vmem:[#allocation4 + $0xa88] sm:$0xff]  ;;  %v2166_v30 = vld [vmem:[#allocation4 + $0xa98] sm:$0xff] }
 0x4dc   :  { %2954 = vmatpush1.bf16.msra.mxu0 %v1971_v53  ;;  %3118 = vmatpush1.bf16.msra.mxu1 %v1973_v59  ;;  %v2163_v53 = vld [vmem:[#allocation4 + $0xa80] sm:$0xff]  ;;  %v2165_v59 = vld [vmem:[#allocation4 + $0xa90] sm:$0xff] }
 0x4dd   :  { %2955 = vmatprep.subr.bf16.mxu0 %v1988_v54  ;;  %3119 = vmatprep.subr.bf16.mxu1 %v1990_v55  ;;  %v2180_v54 = vld [vmem:[#allocation4 + $0xb08] sm:$0xff]  ;;  %v2182_v55 = vld [vmem:[#allocation4 + $0xb18] sm:$0xff] }
 0x4e0   :  { %2956 = vmatpush1.bf16.msra.mxu0 %v1987_v56  ;;  %3120 = vmatpush1.bf16.msra.mxu1 %v1989_v33  ;;  %v2179_v56 = vld [vmem:[#allocation4 + $0xb00] sm:$0xff]  ;;  %v2181_v33 = vld [vmem:[#allocation4 + $0xb10] sm:$0xff] }
 0x4e1   :  { %2957 = vmatprep.subr.bf16.mxu0 %v2004_v57  ;;  %3121 = vmatprep.subr.bf16.mxu1 %v2006_v3  ;;  %v2196_v57 = vld [vmem:[#allocation4 + $0xb88] sm:$0xff]  ;;  %v2198_v3 = vld [vmem:[#allocation4 + $0xb98] sm:$0xff] }
 0x4e4   :  { %2958 = vmatpush1.bf16.msra.mxu0 %v2003_v4  ;;  %3122 = vmatpush1.bf16.msra.mxu1 %v2005_v31  ;;  %v2195_v4 = vld [vmem:[#allocation4 + $0xb80] sm:$0xff]  ;;  %v2197_v31 = vld [vmem:[#allocation4 + $0xb90] sm:$0xff] }
 0x4e5   :  { %2959 = vmatprep.subr.bf16.mxu0 %v2020_v12  ;;  %3123 = vmatprep.subr.bf16.mxu1 %v2022_v60  ;;  %v2212_v12 = vld [vmem:[#allocation4 + $0xc08] sm:$0xff]  ;;  %v2214_v60 = vld [vmem:[#allocation4 + $0xc18] sm:$0xff] }
 0x4e8   :  { %2960 = vmatpush1.bf16.msra.mxu0 %v2019_v13  ;;  %3124 = vmatpush1.bf16.msra.mxu1 %v2021_v14  ;;  %v2211_v13 = vld [vmem:[#allocation4 + $0xc00] sm:$0xff]  ;;  %v2213_v14 = vld [vmem:[#allocation4 + $0xc10] sm:$0xff] }
 0x4e9   :  { %2961 = vmatprep.subr.bf16.mxu0 %v2036_v1  ;;  %3125 = vmatprep.subr.bf16.mxu1 %v2038_v15  ;;  %v2228_v1 = vld [vmem:[#allocation4 + $0xc88] sm:$0xff]  ;;  %v2230_v15 = vld [vmem:[#allocation4 + $0xc98] sm:$0xff] }
 0x4ec   :  { %2962 = vmatpush1.bf16.msra.mxu0 %v2035_v16  ;;  %3126 = vmatpush1.bf16.msra.mxu1 %v2037_v58  ;;  %v2227_v16 = vld [vmem:[#allocation4 + $0xc80] sm:$0xff]  ;;  %v2229_v58 = vld [vmem:[#allocation4 + $0xc90] sm:$0xff] }
 0x4ed   :  { %2963 = vmatprep.subr.bf16.mxu0 %v2052_v17  ;;  %3127 = vmatprep.subr.bf16.mxu1 %v2054_v18  ;;  %v2244_v17 = vld [vmem:[#allocation4 + $0xd08] sm:$0xff]  ;;  %v2246_v18 = vld [vmem:[#allocation4 + $0xd18] sm:$0xff] }
 0x4f0   :  { %2964 = vmatpush1.bf16.msra.mxu0 %v2051_v19  ;;  %3128 = vmatpush1.bf16.msra.mxu1 %v2053_v20  ;;  %v2243_v19 = vld [vmem:[#allocation4 + $0xd00] sm:$0xff]  ;;  %v2245_v20 = vld [vmem:[#allocation4 + $0xd10] sm:$0xff] }
 0x4f1   :  { %2965 = vmatprep.subr.bf16.mxu0 %v2068_v61  ;;  %3129 = vmatprep.subr.bf16.mxu1 %v2070_v22  ;;  %v2260_v61 = vld [vmem:[#allocation4 + $0xd88] sm:$0xff]  ;;  %v2262_v22 = vld [vmem:[#allocation4 + $0xd98] sm:$0xff] }
 0x4f4   :  { %2966 = vmatpush1.bf16.msra.mxu0 %v2067_v23  ;;  %3130 = vmatpush1.bf16.msra.mxu1 %v2069_v24  ;;  %v2259_v23 = vld [vmem:[#allocation4 + $0xd80] sm:$0xff]  ;;  %v2261_v24 = vld [vmem:[#allocation4 + $0xd90] sm:$0xff] }
 0x4f5   :  { %2976 = vmatprep.subr.bf16.mxu0 %v2084_v25  ;;  %3140 = vmatprep.subr.bf16.mxu1 %v2086_v26  ;;  %v2276_v25 = vld [vmem:[#allocation4 + $0xe08] sm:$0xff]  ;;  %v2278_v26 = vld [vmem:[#allocation4 + $0xe18] sm:$0xff] }
 0x4f7   :  { %2968 = vmatmul.mubr.bf16.vlgmr.msra.gmra.mrb[16].mxu0 %v9260_v62  ;;  %3132 = vmatmul.mubr.bf16.vlgmr.msra.gmra.mrb[16].mxu1 %v9260_v62 }
 0x4f8   :  { %2977 = vmatpush1.bf16.msra.mxu0 %v2083_v27  ;;  %3141 = vmatpush1.bf16.msra.mxu1 %v2085_v28  ;;  %v2275_v27 = vld [vmem:[#allocation4 + $0xe00] sm:$0xff]  ;;  %v2277_v28 = vld [vmem:[#allocation4 + $0xe10] sm:$0xff] }
 0x4f9   :  { %2978 = vmatprep.subr.bf16.mxu0 %v2100_v29  ;;  %3142 = vmatprep.subr.bf16.mxu1 %v2102_v38  ;;  %v2292_v29 = vld [vmem:[#allocation4 + $0xe88] sm:$0xff]  ;;  %v2294_v38 = vld [vmem:[#allocation4 + $0xe98] sm:$0xff] }
 0x4fa   :  { %3008 = vmatprep.mubr.bf16.mxu0 %v9266_v2  ;;  %3172 = vmatprep.mubr.bf16.mxu1 %v9266_v2 }
 0x4fc   :  { %2979 = vmatpush1.bf16.msra.mxu0 %v2099_v39  ;;  %3143 = vmatpush1.bf16.msra.mxu1 %v2101_v40  ;;  %v2291_v39 = vld [vmem:[#allocation4 + $0xe80] sm:$0xff]  ;;  %v2293_v40 = vld [vmem:[#allocation4 + $0xe90] sm:$0xff] }
 0x4fd   :  { %2980 = vmatprep.subr.bf16.mxu0 %v2116_v41  ;;  %3144 = vmatprep.subr.bf16.mxu1 %v2118_v42  ;;  %v2308_v41 = vld [vmem:[#allocation4 + $0xf08] sm:$0xff]  ;;  %v2310_v42 = vld [vmem:[#allocation4 + $0xf18] sm:$0xff] }
 0x500   :  { %2981 = vmatpush1.bf16.msra.mxu0 %v2115_v43  ;;  %3145 = vmatpush1.bf16.msra.mxu1 %v2117_v32  ;;  %v2307_v43 = vld [vmem:[#allocation4 + $0xf00] sm:$0xff]  ;;  %v2309_v32 = vld [vmem:[#allocation4 + $0xf10] sm:$0xff] }
 0x501   :  { %2982 = vmatprep.subr.bf16.mxu0 %v2132_v44  ;;  %3146 = vmatprep.subr.bf16.mxu1 %v2134_v45  ;;  %v2324_v44 = vld [vmem:[#allocation4 + $0xf88] sm:$0xff]  ;;  %v2326_v45 = vld [vmem:[#allocation4 + $0xf98] sm:$0xff] }
 0x504   :  { %2983 = vmatpush1.bf16.msra.mxu0 %v2131_v46  ;;  %3147 = vmatpush1.bf16.msra.mxu1 %v2133_v47  ;;  %v2323_v46 = vld [vmem:[#allocation4 + $0xf80] sm:$0xff]  ;;  %v2325_v47 = vld [vmem:[#allocation4 + $0xf90] sm:$0xff] }
 0x505   :  { %2984 = vmatprep.subr.bf16.mxu0 %v2148_v48  ;;  %3148 = vmatprep.subr.bf16.mxu1 %v2150_v49  ;;  %v2340_v48 = vld [vmem:[#allocation4 + $0x1008] sm:$0xff]  ;;  %v2342_v49 = vld [vmem:[#allocation4 + $0x1018] sm:$0xff] }
 0x508   :  { %2985 = vmatpush1.bf16.msra.mxu0 %v2147_v50  ;;  %3149 = vmatpush1.bf16.msra.mxu1 %v2149_v51  ;;  %v2339_v50 = vld [vmem:[#allocation4 + $0x1000] sm:$0xff]  ;;  %v2341_v51 = vld [vmem:[#allocation4 + $0x1010] sm:$0xff] }
 0x509   :  { %2986 = vmatprep.subr.bf16.mxu0 %v2164_v52  ;;  %3150 = vmatprep.subr.bf16.mxu1 %v2166_v30  ;;  %v2356_v52 = vld [vmem:[#allocation4 + $0x1088] sm:$0xff]  ;;  %v2358_v30 = vld [vmem:[#allocation4 + $0x1098] sm:$0xff] }
 0x50c   :  { %2987 = vmatpush1.bf16.msra.mxu0 %v2163_v53  ;;  %3151 = vmatpush1.bf16.msra.mxu1 %v2165_v59  ;;  %v2355_v53 = vld [vmem:[#allocation4 + $0x1080] sm:$0xff]  ;;  %v2357_v59 = vld [vmem:[#allocation4 + $0x1090] sm:$0xff] }
 0x50d   :  { %2988 = vmatprep.subr.bf16.mxu0 %v2180_v54  ;;  %3152 = vmatprep.subr.bf16.mxu1 %v2182_v55  ;;  %v2372_v54 = vld [vmem:[#allocation4 + $0x1108] sm:$0xff]  ;;  %v2374_v55 = vld [vmem:[#allocation4 + $0x1118] sm:$0xff] }
 0x510   :  { %2989 = vmatpush1.bf16.msra.mxu0 %v2179_v56  ;;  %3153 = vmatpush1.bf16.msra.mxu1 %v2181_v33  ;;  %v2371_v56 = vld [vmem:[#allocation4 + $0x1100] sm:$0xff]  ;;  %v2373_v33 = vld [vmem:[#allocation4 + $0x1110] sm:$0xff] }
 0x511   :  { %2990 = vmatprep.subr.bf16.mxu0 %v2196_v57  ;;  %3154 = vmatprep.subr.bf16.mxu1 %v2198_v3  ;;  %v2388_v57 = vld [vmem:[#allocation4 + $0x1188] sm:$0xff]  ;;  %v2390_v3 = vld [vmem:[#allocation4 + $0x1198] sm:$0xff] }
 0x514   :  { %2991 = vmatpush1.bf16.msra.mxu0 %v2195_v4  ;;  %3155 = vmatpush1.bf16.msra.mxu1 %v2197_v31  ;;  %v2387_v4 = vld [vmem:[#allocation4 + $0x1180] sm:$0xff]  ;;  %v2389_v31 = vld [vmem:[#allocation4 + $0x1190] sm:$0xff] }
 0x515   :  { %2992 = vmatprep.subr.bf16.mxu0 %v2212_v12  ;;  %3156 = vmatprep.subr.bf16.mxu1 %v2214_v60  ;;  %v2404_v12 = vld [vmem:[#allocation4 + $0x1208] sm:$0xff]  ;;  %v2406_v60 = vld [vmem:[#allocation4 + $0x1218] sm:$0xff] }
 0x518   :  { %2993 = vmatpush1.bf16.msra.mxu0 %v2211_v13  ;;  %3157 = vmatpush1.bf16.msra.mxu1 %v2213_v14  ;;  %v2403_v13 = vld [vmem:[#allocation4 + $0x1200] sm:$0xff]  ;;  %v2405_v14 = vld [vmem:[#allocation4 + $0x1210] sm:$0xff] }
 0x519   :  { %2994 = vmatprep.subr.bf16.mxu0 %v2228_v1  ;;  %3158 = vmatprep.subr.bf16.mxu1 %v2230_v15  ;;  %v2420_v1 = vld [vmem:[#allocation4 + $0x1288] sm:$0xff]  ;;  %v2422_v15 = vld [vmem:[#allocation4 + $0x1298] sm:$0xff] }
 0x51c   :  { %2995 = vmatpush1.bf16.msra.mxu0 %v2227_v16  ;;  %3159 = vmatpush1.bf16.msra.mxu1 %v2229_v58  ;;  %v2419_v16 = vld [vmem:[#allocation4 + $0x1280] sm:$0xff]  ;;  %v2421_v58 = vld [vmem:[#allocation4 + $0x1290] sm:$0xff] }
 0x51d   :  { %2996 = vmatprep.subr.bf16.mxu0 %v2244_v17  ;;  %3160 = vmatprep.subr.bf16.mxu1 %v2246_v18  ;;  %v2436_v17 = vld [vmem:[#allocation4 + $0x1308] sm:$0xff]  ;;  %v2438_v18 = vld [vmem:[#allocation4 + $0x1318] sm:$0xff] }
 0x520   :  { %2997 = vmatpush1.bf16.msra.mxu0 %v2243_v19  ;;  %3161 = vmatpush1.bf16.msra.mxu1 %v2245_v20  ;;  %v2435_v19 = vld [vmem:[#allocation4 + $0x1300] sm:$0xff]  ;;  %v2437_v20 = vld [vmem:[#allocation4 + $0x1310] sm:$0xff] }
 0x521   :  { %2998 = vmatprep.subr.bf16.mxu0 %v2260_v61  ;;  %3162 = vmatprep.subr.bf16.mxu1 %v2262_v22  ;;  %v2452_v61 = vld [vmem:[#allocation4 + $0x1388] sm:$0xff]  ;;  %v2454_v22 = vld [vmem:[#allocation4 + $0x1398] sm:$0xff] }
 0x524   :  { %2999 = vmatpush1.bf16.msra.mxu0 %v2259_v23  ;;  %3163 = vmatpush1.bf16.msra.mxu1 %v2261_v24  ;;  %v2451_v23 = vld [vmem:[#allocation4 + $0x1380] sm:$0xff]  ;;  %v2453_v24 = vld [vmem:[#allocation4 + $0x1390] sm:$0xff] }
 0x525   :  { %3000 = vmatprep.subr.bf16.mxu0 %v2276_v25  ;;  %3164 = vmatprep.subr.bf16.mxu1 %v2278_v26  ;;  %v2468_v25 = vld [vmem:[#allocation4 + $0x1408] sm:$0xff]  ;;  %v2470_v26 = vld [vmem:[#allocation4 + $0x1418] sm:$0xff] }
 0x528   :  { %3001 = vmatpush1.bf16.msra.mxu0 %v2275_v27  ;;  %3165 = vmatpush1.bf16.msra.mxu1 %v2277_v28  ;;  %v2467_v27 = vld [vmem:[#allocation4 + $0x1400] sm:$0xff]  ;;  %v2469_v28 = vld [vmem:[#allocation4 + $0x1410] sm:$0xff] }
 0x529   :  { %3002 = vmatprep.subr.bf16.mxu0 %v2292_v29  ;;  %3166 = vmatprep.subr.bf16.mxu1 %v2294_v38  ;;  %v2484_v29 = vld [vmem:[#allocation4 + $0x1488] sm:$0xff]  ;;  %v2486_v38 = vld [vmem:[#allocation4 + $0x1498] sm:$0xff] }
 0x52c   :  { %3003 = vmatpush1.bf16.msra.mxu0 %v2291_v39  ;;  %3167 = vmatpush1.bf16.msra.mxu1 %v2293_v40  ;;  %v2483_v39 = vld [vmem:[#allocation4 + $0x1480] sm:$0xff]  ;;  %v2485_v40 = vld [vmem:[#allocation4 + $0x1490] sm:$0xff] }
 0x52d   :  { %3004 = vmatprep.subr.bf16.mxu0 %v2308_v41  ;;  %3168 = vmatprep.subr.bf16.mxu1 %v2310_v42  ;;  %v2500_v41 = vld [vmem:[#allocation4 + $0x1508] sm:$0xff]  ;;  %v2502_v42 = vld [vmem:[#allocation4 + $0x1518] sm:$0xff] }
 0x530   :  { %3005 = vmatpush1.bf16.msra.mxu0 %v2307_v43  ;;  %3169 = vmatpush1.bf16.msra.mxu1 %v2309_v32  ;;  %v2499_v43 = vld [vmem:[#allocation4 + $0x1500] sm:$0xff]  ;;  %v2501_v32 = vld [vmem:[#allocation4 + $0x1510] sm:$0xff] }
 0x531   :  { %3006 = vmatprep.subr.bf16.mxu0 %v2324_v44  ;;  %3170 = vmatprep.subr.bf16.mxu1 %v2326_v45  ;;  %v2516_v44 = vld [vmem:[#allocation4 + $0x1588] sm:$0xff]  ;;  %v2518_v45 = vld [vmem:[#allocation4 + $0x1598] sm:$0xff] }
 0x534   :  { %3007 = vmatpush1.bf16.msra.mxu0 %v2323_v46  ;;  %3171 = vmatpush1.bf16.msra.mxu1 %v2325_v47  ;;  %v2515_v46 = vld [vmem:[#allocation4 + $0x1580] sm:$0xff]  ;;  %v2517_v47 = vld [vmem:[#allocation4 + $0x1590] sm:$0xff] }
 0x535   :  { %3017 = vmatprep.subr.bf16.mxu0 %v2340_v48  ;;  %3181 = vmatprep.subr.bf16.mxu1 %v2342_v49  ;;  %v2532_v48 = vld [vmem:[#allocation4 + $0x1608] sm:$0xff]  ;;  %v2534_v49 = vld [vmem:[#allocation4 + $0x1618] sm:$0xff] }
 0x537   :  { %3009 = vmatmul.mubr.bf16.vlgmr.msra.gmra.mrb[16].mxu0 %v9262_v63  ;;  %3173 = vmatmul.mubr.bf16.vlgmr.msra.gmra.mrb[16].mxu1 %v9262_v63 }
 0x538   :  { %3018 = vmatpush1.bf16.msra.mxu0 %v2339_v50  ;;  %3182 = vmatpush1.bf16.msra.mxu1 %v2341_v51  ;;  %v2531_v50 = vld [vmem:[#allocation4 + $0x1600] sm:$0xff]  ;;  %v2533_v51 = vld [vmem:[#allocation4 + $0x1610] sm:$0xff] }
 0x539   :  { %3019 = vmatprep.subr.bf16.mxu0 %v2356_v52  ;;  %3183 = vmatprep.subr.bf16.mxu1 %v2358_v30  ;;  %v2548_v52 = vld [vmem:[#allocation4 + $0x1688] sm:$0xff]  ;;  %v2550_v30 = vld [vmem:[#allocation4 + $0x1698] sm:$0xff] }
 0x53a   :  { %3049 = vmatprep.mubr.bf16.mxu0 %v9282_v21  ;;  %3213 = vmatprep.mubr.bf16.mxu1 %v9282_v21 }
 0x53c   :  { %3020 = vmatpush1.bf16.msra.mxu0 %v2355_v53  ;;  %3184 = vmatpush1.bf16.msra.mxu1 %v2357_v59  ;;  %v2547_v53 = vld [vmem:[#allocation4 + $0x1680] sm:$0xff]  ;;  %v2549_v59 = vld [vmem:[#allocation4 + $0x1690] sm:$0xff] }
 0x53d   :  { %3021 = vmatprep.subr.bf16.mxu0 %v2372_v54  ;;  %3185 = vmatprep.subr.bf16.mxu1 %v2374_v55  ;;  %v2564_v54 = vld [vmem:[#allocation4 + $0x1708] sm:$0xff]  ;;  %v2566_v55 = vld [vmem:[#allocation4 + $0x1718] sm:$0xff] }
 0x540   :  { %3022 = vmatpush1.bf16.msra.mxu0 %v2371_v56  ;;  %3186 = vmatpush1.bf16.msra.mxu1 %v2373_v33  ;;  %v2563_v56 = vld [vmem:[#allocation4 + $0x1700] sm:$0xff]  ;;  %v2565_v33 = vld [vmem:[#allocation4 + $0x1710] sm:$0xff] }
 0x541   :  { %3023 = vmatprep.subr.bf16.mxu0 %v2388_v57  ;;  %3187 = vmatprep.subr.bf16.mxu1 %v2390_v3  ;;  %v2580_v57 = vld [vmem:[#allocation4 + $0x1788] sm:$0xff]  ;;  %v2582_v3 = vld [vmem:[#allocation4 + $0x1798] sm:$0xff] }
 0x544   :  { %3024 = vmatpush1.bf16.msra.mxu0 %v2387_v4  ;;  %3188 = vmatpush1.bf16.msra.mxu1 %v2389_v31  ;;  %v2579_v4 = vld [vmem:[#allocation4 + $0x1780] sm:$0xff]  ;;  %v2581_v31 = vld [vmem:[#allocation4 + $0x1790] sm:$0xff] }
 0x545   :  { %3025 = vmatprep.subr.bf16.mxu0 %v2404_v12  ;;  %3189 = vmatprep.subr.bf16.mxu1 %v2406_v60  ;;  %v2596_v12 = vld [vmem:[#allocation4 + $0x1808] sm:$0xff]  ;;  %v2598_v60 = vld [vmem:[#allocation4 + $0x1818] sm:$0xff] }
 0x548   :  { %3026 = vmatpush1.bf16.msra.mxu0 %v2403_v13  ;;  %3190 = vmatpush1.bf16.msra.mxu1 %v2405_v14  ;;  %v2595_v13 = vld [vmem:[#allocation4 + $0x1800] sm:$0xff]  ;;  %v2597_v14 = vld [vmem:[#allocation4 + $0x1810] sm:$0xff] }
 0x549   :  { %3027 = vmatprep.subr.bf16.mxu0 %v2420_v1  ;;  %3191 = vmatprep.subr.bf16.mxu1 %v2422_v15  ;;  %v2612_v1 = vld [vmem:[#allocation4 + $0x1888] sm:$0xff]  ;;  %v2614_v15 = vld [vmem:[#allocation4 + $0x1898] sm:$0xff] }
 0x54c   :  { %3028 = vmatpush1.bf16.msra.mxu0 %v2419_v16  ;;  %3192 = vmatpush1.bf16.msra.mxu1 %v2421_v58  ;;  %v2611_v16 = vld [vmem:[#allocation4 + $0x1880] sm:$0xff]  ;;  %v2613_v58 = vld [vmem:[#allocation4 + $0x1890] sm:$0xff] }
 0x54d   :  { %3029 = vmatprep.subr.bf16.mxu0 %v2436_v17  ;;  %3193 = vmatprep.subr.bf16.mxu1 %v2438_v18  ;;  %v2628_v17 = vld [vmem:[#allocation4 + $0x1908] sm:$0xff]  ;;  %v2630_v18 = vld [vmem:[#allocation4 + $0x1918] sm:$0xff] }
 0x550   :  { %3030 = vmatpush1.bf16.msra.mxu0 %v2435_v19  ;;  %3194 = vmatpush1.bf16.msra.mxu1 %v2437_v20  ;;  %v2627_v19 = vld [vmem:[#allocation4 + $0x1900] sm:$0xff]  ;;  %v2629_v20 = vld [vmem:[#allocation4 + $0x1910] sm:$0xff] }
 0x551   :  { %3031 = vmatprep.subr.bf16.mxu0 %v2452_v61  ;;  %3195 = vmatprep.subr.bf16.mxu1 %v2454_v22  ;;  %v2644_v61 = vld [vmem:[#allocation4 + $0x1988] sm:$0xff]  ;;  %v2646_v22 = vld [vmem:[#allocation4 + $0x1998] sm:$0xff] }
 0x554   :  { %3032 = vmatpush1.bf16.msra.mxu0 %v2451_v23  ;;  %3196 = vmatpush1.bf16.msra.mxu1 %v2453_v24  ;;  %v2643_v23 = vld [vmem:[#allocation4 + $0x1980] sm:$0xff]  ;;  %v2645_v24 = vld [vmem:[#allocation4 + $0x1990] sm:$0xff] }
 0x555   :  { %3033 = vmatprep.subr.bf16.mxu0 %v2468_v25  ;;  %3197 = vmatprep.subr.bf16.mxu1 %v2470_v26  ;;  %v2660_v25 = vld [vmem:[#allocation4 + $0x1a08] sm:$0xff]  ;;  %v2662_v26 = vld [vmem:[#allocation4 + $0x1a18] sm:$0xff] }
 0x558   :  { %3034 = vmatpush1.bf16.msra.mxu0 %v2467_v27  ;;  %3198 = vmatpush1.bf16.msra.mxu1 %v2469_v28  ;;  %v2659_v27 = vld [vmem:[#allocation4 + $0x1a00] sm:$0xff]  ;;  %v2661_v28 = vld [vmem:[#allocation4 + $0x1a10] sm:$0xff] }
 0x559   :  { %3035 = vmatprep.subr.bf16.mxu0 %v2484_v29  ;;  %3199 = vmatprep.subr.bf16.mxu1 %v2486_v38  ;;  %v2676_v29 = vld [vmem:[#allocation4 + $0x1a88] sm:$0xff]  ;;  %v2678_v38 = vld [vmem:[#allocation4 + $0x1a98] sm:$0xff] }
 0x55c   :  { %3036 = vmatpush1.bf16.msra.mxu0 %v2483_v39  ;;  %3200 = vmatpush1.bf16.msra.mxu1 %v2485_v40  ;;  %v2675_v39 = vld [vmem:[#allocation4 + $0x1a80] sm:$0xff]  ;;  %v2677_v40 = vld [vmem:[#allocation4 + $0x1a90] sm:$0xff] }
 0x55d   :  { %3037 = vmatprep.subr.bf16.mxu0 %v2500_v41  ;;  %3201 = vmatprep.subr.bf16.mxu1 %v2502_v42  ;;  %v2692_v41 = vld [vmem:[#allocation4 + $0x1b08] sm:$0xff]  ;;  %v2694_v42 = vld [vmem:[#allocation4 + $0x1b18] sm:$0xff] }
 0x560   :  { %3038 = vmatpush1.bf16.msra.mxu0 %v2499_v43  ;;  %3202 = vmatpush1.bf16.msra.mxu1 %v2501_v32  ;;  %v2691_v43 = vld [vmem:[#allocation4 + $0x1b00] sm:$0xff]  ;;  %v2693_v32 = vld [vmem:[#allocation4 + $0x1b10] sm:$0xff] }
 0x561   :  { %3039 = vmatprep.subr.bf16.mxu0 %v2516_v44  ;;  %3203 = vmatprep.subr.bf16.mxu1 %v2518_v45  ;;  %v2708_v44 = vld [vmem:[#allocation4 + $0x1b88] sm:$0xff]  ;;  %v2710_v45 = vld [vmem:[#allocation4 + $0x1b98] sm:$0xff] }
 0x564   :  { %3040 = vmatpush1.bf16.msra.mxu0 %v2515_v46  ;;  %3204 = vmatpush1.bf16.msra.mxu1 %v2517_v47  ;;  %v2707_v46 = vld [vmem:[#allocation4 + $0x1b80] sm:$0xff]  ;;  %v2709_v47 = vld [vmem:[#allocation4 + $0x1b90] sm:$0xff] }
 0x565   :  { %3041 = vmatprep.subr.bf16.mxu0 %v2532_v48  ;;  %3205 = vmatprep.subr.bf16.mxu1 %v2534_v49  ;;  %v2724_v48 = vld [vmem:[#allocation4 + $0x1c08] sm:$0xff]  ;;  %v2726_v49 = vld [vmem:[#allocation4 + $0x1c18] sm:$0xff] }
 0x568   :  { %3042 = vmatpush1.bf16.msra.mxu0 %v2531_v50  ;;  %3206 = vmatpush1.bf16.msra.mxu1 %v2533_v51  ;;  %v2723_v50 = vld [vmem:[#allocation4 + $0x1c00] sm:$0xff]  ;;  %v2725_v51 = vld [vmem:[#allocation4 + $0x1c10] sm:$0xff] }
 0x569   :  { %3043 = vmatprep.subr.bf16.mxu0 %v2548_v52  ;;  %3207 = vmatprep.subr.bf16.mxu1 %v2550_v30  ;;  %v2740_v52 = vld [vmem:[#allocation4 + $0x1c88] sm:$0xff]  ;;  %v2742_v30 = vld [vmem:[#allocation4 + $0x1c98] sm:$0xff] }
 0x56c   :  { %3044 = vmatpush1.bf16.msra.mxu0 %v2547_v53  ;;  %3208 = vmatpush1.bf16.msra.mxu1 %v2549_v59  ;;  %v2739_v53 = vld [vmem:[#allocation4 + $0x1c80] sm:$0xff]  ;;  %v2741_v59 = vld [vmem:[#allocation4 + $0x1c90] sm:$0xff] }
 0x56d   :  { %3045 = vmatprep.subr.bf16.mxu0 %v2564_v54  ;;  %3209 = vmatprep.subr.bf16.mxu1 %v2566_v55  ;;  %v2756_v54 = vld [vmem:[#allocation4 + $0x1d08] sm:$0xff]  ;;  %v2758_v55 = vld [vmem:[#allocation4 + $0x1d18] sm:$0xff] }
 0x570   :  { %3046 = vmatpush1.bf16.msra.mxu0 %v2563_v56  ;;  %3210 = vmatpush1.bf16.msra.mxu1 %v2565_v33  ;;  %v2755_v56 = vld [vmem:[#allocation4 + $0x1d00] sm:$0xff]  ;;  %v2757_v33 = vld [vmem:[#allocation4 + $0x1d10] sm:$0xff] }
 0x571   :  { %3047 = vmatprep.subr.bf16.mxu0 %v2580_v57  ;;  %3211 = vmatprep.subr.bf16.mxu1 %v2582_v3  ;;  %v2772_v57 = vld [vmem:[#allocation4 + $0x1d88] sm:$0xff]  ;;  %v2774_v3 = vld [vmem:[#allocation4 + $0x1d98] sm:$0xff] }
 0x574   :  { %3048 = vmatpush1.bf16.msra.mxu0 %v2579_v4  ;;  %3212 = vmatpush1.bf16.msra.mxu1 %v2581_v31  ;;  %v2771_v4 = vld [vmem:[#allocation4 + $0x1d80] sm:$0xff]  ;;  %v2773_v31 = vld [vmem:[#allocation4 + $0x1d90] sm:$0xff] }
 0x575   :  { %3058 = vmatprep.subr.bf16.mxu0 %v2596_v12  ;;  %3222 = vmatprep.subr.bf16.mxu1 %v2598_v60  ;;  %v2788_v12 = vld [vmem:[#allocation4 + $0x1e08] sm:$0xff]  ;;  %v2790_v60 = vld [vmem:[#allocation4 + $0x1e18] sm:$0xff] }
 0x577   :  { %3050 = vmatmul.mubr.bf16.vlgmr.msra.gmra.mrb[16].mxu0 %v9278_v5  ;;  %3214 = vmatmul.mubr.bf16.vlgmr.msra.gmra.mrb[16].mxu1 %v9278_v5 }
 0x578   :  { %3059 = vmatpush1.bf16.msra.mxu0 %v2595_v13  ;;  %3223 = vmatpush1.bf16.msra.mxu1 %v2597_v14  ;;  %v2787_v13 = vld [vmem:[#allocation4 + $0x1e00] sm:$0xff]  ;;  %v2789_v14 = vld [vmem:[#allocation4 + $0x1e10] sm:$0xff] }
 0x579   :  { %3060 = vmatprep.subr.bf16.mxu0 %v2612_v1  ;;  %3224 = vmatprep.subr.bf16.mxu1 %v2614_v15  ;;  %v2804_v1 = vld [vmem:[#allocation4 + $0x1e88] sm:$0xff]  ;;  %v2806_v15 = vld [vmem:[#allocation4 + $0x1e98] sm:$0xff] }
 0x57a   :  { %3090 = vmatprep.mubr.bf16.mxu0 %v9284_v11  ;;  %3254 = vmatprep.mubr.bf16.mxu1 %v9284_v11 }
 0x57c   :  { %3061 = vmatpush1.bf16.msra.mxu0 %v2611_v16  ;;  %3225 = vmatpush1.bf16.msra.mxu1 %v2613_v58  ;;  %v2803_v16 = vld [vmem:[#allocation4 + $0x1e80] sm:$0xff]  ;;  %v2805_v58 = vld [vmem:[#allocation4 + $0x1e90] sm:$0xff] }
 0x57d   :  { %3062 = vmatprep.subr.bf16.mxu0 %v2628_v17  ;;  %3226 = vmatprep.subr.bf16.mxu1 %v2630_v18  ;;  %v2820_v17 = vld [vmem:[#allocation4 + $0x1f08] sm:$0xff]  ;;  %v2822_v18 = vld [vmem:[#allocation4 + $0x1f18] sm:$0xff] }
 0x580   :  { %3063 = vmatpush1.bf16.msra.mxu0 %v2627_v19  ;;  %3227 = vmatpush1.bf16.msra.mxu1 %v2629_v20  ;;  %v2819_v19 = vld [vmem:[#allocation4 + $0x1f00] sm:$0xff]  ;;  %v2821_v20 = vld [vmem:[#allocation4 + $0x1f10] sm:$0xff] }
 0x581   :  { %3064 = vmatprep.subr.bf16.mxu0 %v2644_v61  ;;  %3228 = vmatprep.subr.bf16.mxu1 %v2646_v22  ;;  %v2836_v61 = vld [vmem:[#allocation4 + $0x1f88] sm:$0xff]  ;;  %v2838_v22 = vld [vmem:[#allocation4 + $0x1f98] sm:$0xff] }
 0x584   :  { %3065 = vmatpush1.bf16.msra.mxu0 %v2643_v23  ;;  %3229 = vmatpush1.bf16.msra.mxu1 %v2645_v24  ;;  %v2835_v23 = vld [vmem:[#allocation4 + $0x1f80] sm:$0xff]  ;;  %v2837_v24 = vld [vmem:[#allocation4 + $0x1f90] sm:$0xff] }
 0x585   :  { %3066 = vmatprep.subr.bf16.mxu0 %v2660_v25  ;;  %3230 = vmatprep.subr.bf16.mxu1 %v2662_v26  ;;  %v1832_v25 = vld [vmem:[#allocation4 + $0x28] sm:$0xff]  ;;  %v1834_v26 = vld [vmem:[#allocation4 + $0x38] sm:$0xff] }
 0x588   :  { %3067 = vmatpush1.bf16.msra.mxu0 %v2659_v27  ;;  %3231 = vmatpush1.bf16.msra.mxu1 %v2661_v28  ;;  %v1831_v27 = vld [vmem:[#allocation4 + $0x20] sm:$0xff]  ;;  %v1833_v28 = vld [vmem:[#allocation4 + $0x30] sm:$0xff] }
 0x589   :  { %3068 = vmatprep.subr.bf16.mxu0 %v2676_v29  ;;  %3232 = vmatprep.subr.bf16.mxu1 %v2678_v38  ;;  %v1848_v29 = vld [vmem:[#allocation4 + $0xa8] sm:$0xff]  ;;  %v1850_v38 = vld [vmem:[#allocation4 + $0xb8] sm:$0xff] }
 0x58c   :  { %3069 = vmatpush1.bf16.msra.mxu0 %v2675_v39  ;;  %3233 = vmatpush1.bf16.msra.mxu1 %v2677_v40  ;;  %v1847_v39 = vld [vmem:[#allocation4 + $0xa0] sm:$0xff]  ;;  %v1849_v40 = vld [vmem:[#allocation4 + $0xb0] sm:$0xff] }
 0x58d   :  { %3070 = vmatprep.subr.bf16.mxu0 %v2692_v41  ;;  %3234 = vmatprep.subr.bf16.mxu1 %v2694_v42  ;;  %v1864_v41 = vld [vmem:[#allocation4 + $0x128] sm:$0xff]  ;;  %v1866_v42 = vld [vmem:[#allocation4 + $0x138] sm:$0xff] }
 0x590   :  { %3071 = vmatpush1.bf16.msra.mxu0 %v2691_v43  ;;  %3235 = vmatpush1.bf16.msra.mxu1 %v2693_v32  ;;  %v1863_v43 = vld [vmem:[#allocation4 + $0x120] sm:$0xff]  ;;  %v1865_v32 = vld [vmem:[#allocation4 + $0x130] sm:$0xff] }
 0x591   :  { %3072 = vmatprep.subr.bf16.mxu0 %v2708_v44  ;;  %3236 = vmatprep.subr.bf16.mxu1 %v2710_v45  ;;  %v1880_v44 = vld [vmem:[#allocation4 + $0x1a8] sm:$0xff]  ;;  %v1882_v45 = vld [vmem:[#allocation4 + $0x1b8] sm:$0xff] }
 0x594   :  { %3073 = vmatpush1.bf16.msra.mxu0 %v2707_v46  ;;  %3237 = vmatpush1.bf16.msra.mxu1 %v2709_v47  ;;  %v1879_v46 = vld [vmem:[#allocation4 + $0x1a0] sm:$0xff]  ;;  %v1881_v47 = vld [vmem:[#allocation4 + $0x1b0] sm:$0xff] }
 0x595   :  { %3074 = vmatprep.subr.bf16.mxu0 %v2724_v48  ;;  %3238 = vmatprep.subr.bf16.mxu1 %v2726_v49  ;;  %v1896_v48 = vld [vmem:[#allocation4 + $0x228] sm:$0xff]  ;;  %v1898_v49 = vld [vmem:[#allocation4 + $0x238] sm:$0xff] }
 0x598   :  { %3075 = vmatpush1.bf16.msra.mxu0 %v2723_v50  ;;  %3239 = vmatpush1.bf16.msra.mxu1 %v2725_v51  ;;  %v1895_v50 = vld [vmem:[#allocation4 + $0x220] sm:$0xff]  ;;  %v1897_v51 = vld [vmem:[#allocation4 + $0x230] sm:$0xff] }
 0x599   :  { %3076 = vmatprep.subr.bf16.mxu0 %v2740_v52  ;;  %3240 = vmatprep.subr.bf16.mxu1 %v2742_v30  ;;  %v1912_v52 = vld [vmem:[#allocation4 + $0x2a8] sm:$0xff]  ;;  %v1914_v30 = vld [vmem:[#allocation4 + $0x2b8] sm:$0xff] }
 0x59c   :  { %3077 = vmatpush1.bf16.msra.mxu0 %v2739_v53  ;;  %3241 = vmatpush1.bf16.msra.mxu1 %v2741_v59  ;;  %v1911_v53 = vld [vmem:[#allocation4 + $0x2a0] sm:$0xff]  ;;  %v1913_v59 = vld [vmem:[#allocation4 + $0x2b0] sm:$0xff] }
 0x59d   :  { %3078 = vmatprep.subr.bf16.mxu0 %v2756_v54  ;;  %3242 = vmatprep.subr.bf16.mxu1 %v2758_v55  ;;  %v1928_v54 = vld [vmem:[#allocation4 + $0x328] sm:$0xff]  ;;  %v1930_v55 = vld [vmem:[#allocation4 + $0x338] sm:$0xff] }
 0x5a0   :  { %3079 = vmatpush1.bf16.msra.mxu0 %v2755_v56  ;;  %3243 = vmatpush1.bf16.msra.mxu1 %v2757_v33  ;;  %v1927_v56 = vld [vmem:[#allocation4 + $0x320] sm:$0xff]  ;;  %v1929_v33 = vld [vmem:[#allocation4 + $0x330] sm:$0xff] }
 0x5a1   :  { %3080 = vmatprep.subr.bf16.mxu0 %v2772_v57  ;;  %3244 = vmatprep.subr.bf16.mxu1 %v2774_v3  ;;  %v1944_v57 = vld [vmem:[#allocation4 + $0x3a8] sm:$0xff]  ;;  %v1946_v3 = vld [vmem:[#allocation4 + $0x3b8] sm:$0xff] }
 0x5a4   :  { %3081 = vmatpush1.bf16.msra.mxu0 %v2771_v4  ;;  %3245 = vmatpush1.bf16.msra.mxu1 %v2773_v31  ;;  %v1943_v4 = vld [vmem:[#allocation4 + $0x3a0] sm:$0xff]  ;;  %v1945_v31 = vld [vmem:[#allocation4 + $0x3b0] sm:$0xff] }
 0x5a5   :  { %3082 = vmatprep.subr.bf16.mxu0 %v2788_v12  ;;  %3246 = vmatprep.subr.bf16.mxu1 %v2790_v60  ;;  %v1960_v12 = vld [vmem:[#allocation4 + $0x428] sm:$0xff]  ;;  %v1962_v60 = vld [vmem:[#allocation4 + $0x438] sm:$0xff] }
 0x5a8   :  { %3083 = vmatpush1.bf16.msra.mxu0 %v2787_v13  ;;  %3247 = vmatpush1.bf16.msra.mxu1 %v2789_v14  ;;  %v1959_v13 = vld [vmem:[#allocation4 + $0x420] sm:$0xff]  ;;  %v1961_v14 = vld [vmem:[#allocation4 + $0x430] sm:$0xff] }
 0x5a9   :  { %3084 = vmatprep.subr.bf16.mxu0 %v2804_v1  ;;  %3248 = vmatprep.subr.bf16.mxu1 %v2806_v15  ;;  %v1976_v1 = vld [vmem:[#allocation4 + $0x4a8] sm:$0xff]  ;;  %v1978_v15 = vld [vmem:[#allocation4 + $0x4b8] sm:$0xff] }
 0x5ac   :  { %3085 = vmatpush1.bf16.msra.mxu0 %v2803_v16  ;;  %3249 = vmatpush1.bf16.msra.mxu1 %v2805_v58  ;;  %v1975_v16 = vld [vmem:[#allocation4 + $0x4a0] sm:$0xff]  ;;  %v1977_v58 = vld [vmem:[#allocation4 + $0x4b0] sm:$0xff] }
 0x5ad   :  { %3086 = vmatprep.subr.bf16.mxu0 %v2820_v17  ;;  %3250 = vmatprep.subr.bf16.mxu1 %v2822_v18  ;;  %v1992_v17 = vld [vmem:[#allocation4 + $0x528] sm:$0xff]  ;;  %v1994_v18 = vld [vmem:[#allocation4 + $0x538] sm:$0xff] }
 0x5b0   :  { %3087 = vmatpush1.bf16.msra.mxu0 %v2819_v19  ;;  %3251 = vmatpush1.bf16.msra.mxu1 %v2821_v20  ;;  %v1991_v19 = vld [vmem:[#allocation4 + $0x520] sm:$0xff]  ;;  %v1993_v20 = vld [vmem:[#allocation4 + $0x530] sm:$0xff] }
 0x5b1   :  { %3088 = vmatprep.subr.bf16.mxu0 %v2836_v61  ;;  %3252 = vmatprep.subr.bf16.mxu1 %v2838_v22  ;;  %v2008_v61 = vld [vmem:[#allocation4 + $0x5a8] sm:$0xff]  ;;  %v2010_v22 = vld [vmem:[#allocation4 + $0x5b8] sm:$0xff] }
 0x5b4   :  { %3089 = vmatpush1.bf16.msra.mxu0 %v2835_v23  ;;  %3253 = vmatpush1.bf16.msra.mxu1 %v2837_v24  ;;  %v2007_v23 = vld [vmem:[#allocation4 + $0x5a0] sm:$0xff]  ;;  %v2009_v24 = vld [vmem:[#allocation4 + $0x5b0] sm:$0xff] }
 0x5b5   :  { %3263 = vmatprep.subr.bf16.mxu0 %v1832_v25  ;;  %3427 = vmatprep.subr.bf16.mxu1 %v1834_v26  ;;  %v2024_v25 = vld [vmem:[#allocation4 + $0x628] sm:$0xff]  ;;  %v2026_v26 = vld [vmem:[#allocation4 + $0x638] sm:$0xff] }
 0x5b7   :  { %3091 = vmatmul.mubr.bf16.vlgmr.msra.gmra.mrb[16].mxu0 %v9280_v8  ;;  %3255 = vmatmul.mubr.bf16.vlgmr.msra.gmra.mrb[16].mxu1 %v9280_v8 }
 0x5b8   :  { %3264 = vmatpush1.bf16.msra.mxu0 %v1831_v27  ;;  %3428 = vmatpush1.bf16.msra.mxu1 %v1833_v28  ;;  %v2023_v27 = vld [vmem:[#allocation4 + $0x620] sm:$0xff]  ;;  %v2025_v28 = vld [vmem:[#allocation4 + $0x630] sm:$0xff] }
 0x5b9   :  { %3265 = vmatprep.subr.bf16.mxu0 %v1848_v29  ;;  %3429 = vmatprep.subr.bf16.mxu1 %v1850_v38  ;;  %v2040_v29 = vld [vmem:[#allocation4 + $0x6a8] sm:$0xff]  ;;  %v2042_v38 = vld [vmem:[#allocation4 + $0x6b8] sm:$0xff] }
 0x5ba   :  { %3295 = vmatprep.mubr.bf16.mxu0 %v9264_v0  ;;  %3459 = vmatprep.mubr.bf16.mxu1 %v9264_v0 }
 0x5bc   :  { %3266 = vmatpush1.bf16.msra.mxu0 %v1847_v39  ;;  %3430 = vmatpush1.bf16.msra.mxu1 %v1849_v40  ;;  %v2039_v39 = vld [vmem:[#allocation4 + $0x6a0] sm:$0xff]  ;;  %v2041_v40 = vld [vmem:[#allocation4 + $0x6b0] sm:$0xff] }
 0x5bd   :  { %3267 = vmatprep.subr.bf16.mxu0 %v1864_v41  ;;  %3431 = vmatprep.subr.bf16.mxu1 %v1866_v42  ;;  %v2056_v41 = vld [vmem:[#allocation4 + $0x728] sm:$0xff]  ;;  %v2058_v42 = vld [vmem:[#allocation4 + $0x738] sm:$0xff] }
 0x5c0   :  { %3268 = vmatpush1.bf16.msra.mxu0 %v1863_v43  ;;  %3432 = vmatpush1.bf16.msra.mxu1 %v1865_v32  ;;  %v2055_v43 = vld [vmem:[#allocation4 + $0x720] sm:$0xff]  ;;  %v2057_v32 = vld [vmem:[#allocation4 + $0x730] sm:$0xff] }
 0x5c1   :  { %3269 = vmatprep.subr.bf16.mxu0 %v1880_v44  ;;  %3433 = vmatprep.subr.bf16.mxu1 %v1882_v45  ;;  %v2072_v44 = vld [vmem:[#allocation4 + $0x7a8] sm:$0xff]  ;;  %v2074_v45 = vld [vmem:[#allocation4 + $0x7b8] sm:$0xff] }
 0x5c4   :  { %3270 = vmatpush1.bf16.msra.mxu0 %v1879_v46  ;;  %3434 = vmatpush1.bf16.msra.mxu1 %v1881_v47  ;;  %v2071_v46 = vld [vmem:[#allocation4 + $0x7a0] sm:$0xff]  ;;  %v2073_v47 = vld [vmem:[#allocation4 + $0x7b0] sm:$0xff] }
 0x5c5   :  { %3271 = vmatprep.subr.bf16.mxu0 %v1896_v48  ;;  %3435 = vmatprep.subr.bf16.mxu1 %v1898_v49  ;;  %v2088_v48 = vld [vmem:[#allocation4 + $0x828] sm:$0xff]  ;;  %v2090_v49 = vld [vmem:[#allocation4 + $0x838] sm:$0xff] }
 0x5c8   :  { %3272 = vmatpush1.bf16.msra.mxu0 %v1895_v50  ;;  %3436 = vmatpush1.bf16.msra.mxu1 %v1897_v51  ;;  %v2087_v50 = vld [vmem:[#allocation4 + $0x820] sm:$0xff]  ;;  %v2089_v51 = vld [vmem:[#allocation4 + $0x830] sm:$0xff] }
 0x5c9   :  { %3273 = vmatprep.subr.bf16.mxu0 %v1912_v52  ;;  %3437 = vmatprep.subr.bf16.mxu1 %v1914_v30  ;;  %v2104_v52 = vld [vmem:[#allocation4 + $0x8a8] sm:$0xff]  ;;  %v2106_v30 = vld [vmem:[#allocation4 + $0x8b8] sm:$0xff] }
 0x5cc   :  { %3274 = vmatpush1.bf16.msra.mxu0 %v1911_v53  ;;  %3438 = vmatpush1.bf16.msra.mxu1 %v1913_v59  ;;  %v2103_v53 = vld [vmem:[#allocation4 + $0x8a0] sm:$0xff]  ;;  %v2105_v59 = vld [vmem:[#allocation4 + $0x8b0] sm:$0xff] }
 0x5cd   :  { %3275 = vmatprep.subr.bf16.mxu0 %v1928_v54  ;;  %3439 = vmatprep.subr.bf16.mxu1 %v1930_v55  ;;  %v2120_v54 = vld [vmem:[#allocation4 + $0x928] sm:$0xff]  ;;  %v2122_v55 = vld [vmem:[#allocation4 + $0x938] sm:$0xff] }
 0x5d0   :  { %3276 = vmatpush1.bf16.msra.mxu0 %v1927_v56  ;;  %3440 = vmatpush1.bf16.msra.mxu1 %v1929_v33  ;;  %v2119_v56 = vld [vmem:[#allocation4 + $0x920] sm:$0xff]  ;;  %v2121_v33 = vld [vmem:[#allocation4 + $0x930] sm:$0xff] }
 0x5d1   :  { %3277 = vmatprep.subr.bf16.mxu0 %v1944_v57  ;;  %3441 = vmatprep.subr.bf16.mxu1 %v1946_v3  ;;  %v2136_v57 = vld [vmem:[#allocation4 + $0x9a8] sm:$0xff]  ;;  %v2138_v3 = vld [vmem:[#allocation4 + $0x9b8] sm:$0xff] }
 0x5d4   :  { %3278 = vmatpush1.bf16.msra.mxu0 %v1943_v4  ;;  %3442 = vmatpush1.bf16.msra.mxu1 %v1945_v31  ;;  %v2135_v4 = vld [vmem:[#allocation4 + $0x9a0] sm:$0xff]  ;;  %v2137_v31 = vld [vmem:[#allocation4 + $0x9b0] sm:$0xff] }
 0x5d5   :  { %3279 = vmatprep.subr.bf16.mxu0 %v1960_v12  ;;  %3443 = vmatprep.subr.bf16.mxu1 %v1962_v60  ;;  %v2152_v12 = vld [vmem:[#allocation4 + $0xa28] sm:$0xff]  ;;  %v2154_v60 = vld [vmem:[#allocation4 + $0xa38] sm:$0xff] }
 0x5d8   :  { %3280 = vmatpush1.bf16.msra.mxu0 %v1959_v13  ;;  %3444 = vmatpush1.bf16.msra.mxu1 %v1961_v14  ;;  %v2151_v13 = vld [vmem:[#allocation4 + $0xa20] sm:$0xff]  ;;  %v2153_v14 = vld [vmem:[#allocation4 + $0xa30] sm:$0xff] }
 0x5d9   :  { %3281 = vmatprep.subr.bf16.mxu0 %v1976_v1  ;;  %3445 = vmatprep.subr.bf16.mxu1 %v1978_v15  ;;  %v2168_v1 = vld [vmem:[#allocation4 + $0xaa8] sm:$0xff]  ;;  %v2170_v15 = vld [vmem:[#allocation4 + $0xab8] sm:$0xff] }
 0x5dc   :  { %3282 = vmatpush1.bf16.msra.mxu0 %v1975_v16  ;;  %3446 = vmatpush1.bf16.msra.mxu1 %v1977_v58  ;;  %v2167_v16 = vld [vmem:[#allocation4 + $0xaa0] sm:$0xff]  ;;  %v2169_v58 = vld [vmem:[#allocation4 + $0xab0] sm:$0xff] }
 0x5dd   :  { %3283 = vmatprep.subr.bf16.mxu0 %v1992_v17  ;;  %3447 = vmatprep.subr.bf16.mxu1 %v1994_v18  ;;  %v2184_v17 = vld [vmem:[#allocation4 + $0xb28] sm:$0xff]  ;;  %v2186_v18 = vld [vmem:[#allocation4 + $0xb38] sm:$0xff] }
 0x5e0   :  { %3284 = vmatpush1.bf16.msra.mxu0 %v1991_v19  ;;  %3448 = vmatpush1.bf16.msra.mxu1 %v1993_v20  ;;  %v2183_v19 = vld [vmem:[#allocation4 + $0xb20] sm:$0xff]  ;;  %v2185_v20 = vld [vmem:[#allocation4 + $0xb30] sm:$0xff] }
 0x5e1   :  { %3285 = vmatprep.subr.bf16.mxu0 %v2008_v61  ;;  %3449 = vmatprep.subr.bf16.mxu1 %v2010_v22  ;;  %v2200_v61 = vld [vmem:[#allocation4 + $0xba8] sm:$0xff]  ;;  %v2202_v22 = vld [vmem:[#allocation4 + $0xbb8] sm:$0xff] }
 0x5e4   :  { %3286 = vmatpush1.bf16.msra.mxu0 %v2007_v23  ;;  %3450 = vmatpush1.bf16.msra.mxu1 %v2009_v24  ;;  %v2199_v23 = vld [vmem:[#allocation4 + $0xba0] sm:$0xff]  ;;  %v2201_v24 = vld [vmem:[#allocation4 + $0xbb0] sm:$0xff] }
 0x5e5   :  { %3287 = vmatprep.subr.bf16.mxu0 %v2024_v25  ;;  %3451 = vmatprep.subr.bf16.mxu1 %v2026_v26  ;;  %v2216_v25 = vld [vmem:[#allocation4 + $0xc28] sm:$0xff]  ;;  %v2218_v26 = vld [vmem:[#allocation4 + $0xc38] sm:$0xff] }
 0x5e8   :  { %3288 = vmatpush1.bf16.msra.mxu0 %v2023_v27  ;;  %3452 = vmatpush1.bf16.msra.mxu1 %v2025_v28  ;;  %v2215_v27 = vld [vmem:[#allocation4 + $0xc20] sm:$0xff]  ;;  %v2217_v28 = vld [vmem:[#allocation4 + $0xc30] sm:$0xff] }
 0x5e9   :  { %3289 = vmatprep.subr.bf16.mxu0 %v2040_v29  ;;  %3453 = vmatprep.subr.bf16.mxu1 %v2042_v38  ;;  %v2232_v29 = vld [vmem:[#allocation4 + $0xca8] sm:$0xff]  ;;  %v2234_v38 = vld [vmem:[#allocation4 + $0xcb8] sm:$0xff] }
 0x5ec   :  { %3290 = vmatpush1.bf16.msra.mxu0 %v2039_v39  ;;  %3454 = vmatpush1.bf16.msra.mxu1 %v2041_v40  ;;  %v2231_v39 = vld [vmem:[#allocation4 + $0xca0] sm:$0xff]  ;;  %v2233_v40 = vld [vmem:[#allocation4 + $0xcb0] sm:$0xff] }
 0x5ed   :  { %3291 = vmatprep.subr.bf16.mxu0 %v2056_v41  ;;  %3455 = vmatprep.subr.bf16.mxu1 %v2058_v42  ;;  %v2248_v41 = vld [vmem:[#allocation4 + $0xd28] sm:$0xff]  ;;  %v2250_v42 = vld [vmem:[#allocation4 + $0xd38] sm:$0xff] }
 0x5f0   :  { %3292 = vmatpush1.bf16.msra.mxu0 %v2055_v43  ;;  %3456 = vmatpush1.bf16.msra.mxu1 %v2057_v32  ;;  %v2247_v43 = vld [vmem:[#allocation4 + $0xd20] sm:$0xff]  ;;  %v2249_v32 = vld [vmem:[#allocation4 + $0xd30] sm:$0xff] }
 0x5f1   :  { %3293 = vmatprep.subr.bf16.mxu0 %v2072_v44  ;;  %3457 = vmatprep.subr.bf16.mxu1 %v2074_v45  ;;  %v2264_v44 = vld [vmem:[#allocation4 + $0xda8] sm:$0xff]  ;;  %v2266_v45 = vld [vmem:[#allocation4 + $0xdb8] sm:$0xff] }
 0x5f4   :  { %3294 = vmatpush1.bf16.msra.mxu0 %v2071_v46  ;;  %3458 = vmatpush1.bf16.msra.mxu1 %v2073_v47  ;;  %v2263_v46 = vld [vmem:[#allocation4 + $0xda0] sm:$0xff]  ;;  %v2265_v47 = vld [vmem:[#allocation4 + $0xdb0] sm:$0xff] }
 0x5f5   :  { %3304 = vmatprep.subr.bf16.mxu0 %v2088_v48  ;;  %3468 = vmatprep.subr.bf16.mxu1 %v2090_v49  ;;  %v2280_v48 = vld [vmem:[#allocation4 + $0xe28] sm:$0xff]  ;;  %v2282_v49 = vld [vmem:[#allocation4 + $0xe38] sm:$0xff] }
 0x5f7   :  { %3296 = vmatmul.mubr.bf16.vlgmr.msra.gmra.mrb[20].mxu0 %v9260_v62  ;;  %3460 = vmatmul.mubr.bf16.vlgmr.msra.gmra.mrb[20].mxu1 %v9260_v62 }
 0x5f8   :  { %3305 = vmatpush1.bf16.msra.mxu0 %v2087_v50  ;;  %3469 = vmatpush1.bf16.msra.mxu1 %v2089_v51  ;;  %v2279_v50 = vld [vmem:[#allocation4 + $0xe20] sm:$0xff]  ;;  %v2281_v51 = vld [vmem:[#allocation4 + $0xe30] sm:$0xff] }
 0x5f9   :  { %3306 = vmatprep.subr.bf16.mxu0 %v2104_v52  ;;  %3470 = vmatprep.subr.bf16.mxu1 %v2106_v30  ;;  %v2296_v52 = vld [vmem:[#allocation4 + $0xea8] sm:$0xff]  ;;  %v2298_v30 = vld [vmem:[#allocation4 + $0xeb8] sm:$0xff] }
 0x5fa   :  { %3336 = vmatprep.mubr.bf16.mxu0 %v9266_v2  ;;  %3500 = vmatprep.mubr.bf16.mxu1 %v9266_v2 }
 0x5fc   :  { %3307 = vmatpush1.bf16.msra.mxu0 %v2103_v53  ;;  %3471 = vmatpush1.bf16.msra.mxu1 %v2105_v59  ;;  %v2295_v53 = vld [vmem:[#allocation4 + $0xea0] sm:$0xff]  ;;  %v2297_v59 = vld [vmem:[#allocation4 + $0xeb0] sm:$0xff] }
 0x5fd   :  { %3308 = vmatprep.subr.bf16.mxu0 %v2120_v54  ;;  %3472 = vmatprep.subr.bf16.mxu1 %v2122_v55  ;;  %v2312_v54 = vld [vmem:[#allocation4 + $0xf28] sm:$0xff]  ;;  %v2314_v55 = vld [vmem:[#allocation4 + $0xf38] sm:$0xff] }
 0x600   :  { %3309 = vmatpush1.bf16.msra.mxu0 %v2119_v56  ;;  %3473 = vmatpush1.bf16.msra.mxu1 %v2121_v33  ;;  %v2311_v56 = vld [vmem:[#allocation4 + $0xf20] sm:$0xff]  ;;  %v2313_v33 = vld [vmem:[#allocation4 + $0xf30] sm:$0xff] }
 0x601   :  { %3310 = vmatprep.subr.bf16.mxu0 %v2136_v57  ;;  %3474 = vmatprep.subr.bf16.mxu1 %v2138_v3  ;;  %v2328_v57 = vld [vmem:[#allocation4 + $0xfa8] sm:$0xff]  ;;  %v2330_v3 = vld [vmem:[#allocation4 + $0xfb8] sm:$0xff] }
 0x604   :  { %3311 = vmatpush1.bf16.msra.mxu0 %v2135_v4  ;;  %3475 = vmatpush1.bf16.msra.mxu1 %v2137_v31  ;;  %v2327_v4 = vld [vmem:[#allocation4 + $0xfa0] sm:$0xff]  ;;  %v2329_v31 = vld [vmem:[#allocation4 + $0xfb0] sm:$0xff] }
 0x605   :  { %3312 = vmatprep.subr.bf16.mxu0 %v2152_v12  ;;  %3476 = vmatprep.subr.bf16.mxu1 %v2154_v60  ;;  %v2344_v12 = vld [vmem:[#allocation4 + $0x1028] sm:$0xff]  ;;  %v2346_v60 = vld [vmem:[#allocation4 + $0x1038] sm:$0xff] }
 0x608   :  { %3313 = vmatpush1.bf16.msra.mxu0 %v2151_v13  ;;  %3477 = vmatpush1.bf16.msra.mxu1 %v2153_v14  ;;  %v2343_v13 = vld [vmem:[#allocation4 + $0x1020] sm:$0xff]  ;;  %v2345_v14 = vld [vmem:[#allocation4 + $0x1030] sm:$0xff] }
 0x609   :  { %3314 = vmatprep.subr.bf16.mxu0 %v2168_v1  ;;  %3478 = vmatprep.subr.bf16.mxu1 %v2170_v15  ;;  %v2360_v1 = vld [vmem:[#allocation4 + $0x10a8] sm:$0xff]  ;;  %v2362_v15 = vld [vmem:[#allocation4 + $0x10b8] sm:$0xff] }
 0x60c   :  { %3315 = vmatpush1.bf16.msra.mxu0 %v2167_v16  ;;  %3479 = vmatpush1.bf16.msra.mxu1 %v2169_v58  ;;  %v2359_v16 = vld [vmem:[#allocation4 + $0x10a0] sm:$0xff]  ;;  %v2361_v58 = vld [vmem:[#allocation4 + $0x10b0] sm:$0xff] }
 0x60d   :  { %3316 = vmatprep.subr.bf16.mxu0 %v2184_v17  ;;  %3480 = vmatprep.subr.bf16.mxu1 %v2186_v18  ;;  %v2376_v17 = vld [vmem:[#allocation4 + $0x1128] sm:$0xff]  ;;  %v2378_v18 = vld [vmem:[#allocation4 + $0x1138] sm:$0xff] }
 0x610   :  { %3317 = vmatpush1.bf16.msra.mxu0 %v2183_v19  ;;  %3481 = vmatpush1.bf16.msra.mxu1 %v2185_v20  ;;  %v2375_v19 = vld [vmem:[#allocation4 + $0x1120] sm:$0xff]  ;;  %v2377_v20 = vld [vmem:[#allocation4 + $0x1130] sm:$0xff] }
 0x611   :  { %3318 = vmatprep.subr.bf16.mxu0 %v2200_v61  ;;  %3482 = vmatprep.subr.bf16.mxu1 %v2202_v22  ;;  %v2392_v61 = vld [vmem:[#allocation4 + $0x11a8] sm:$0xff]  ;;  %v2394_v22 = vld [vmem:[#allocation4 + $0x11b8] sm:$0xff] }
 0x614   :  { %3319 = vmatpush1.bf16.msra.mxu0 %v2199_v23  ;;  %3483 = vmatpush1.bf16.msra.mxu1 %v2201_v24  ;;  %v2391_v23 = vld [vmem:[#allocation4 + $0x11a0] sm:$0xff]  ;;  %v2393_v24 = vld [vmem:[#allocation4 + $0x11b0] sm:$0xff] }
 0x615   :  { %3320 = vmatprep.subr.bf16.mxu0 %v2216_v25  ;;  %3484 = vmatprep.subr.bf16.mxu1 %v2218_v26  ;;  %v2408_v25 = vld [vmem:[#allocation4 + $0x1228] sm:$0xff]  ;;  %v2410_v26 = vld [vmem:[#allocation4 + $0x1238] sm:$0xff] }
 0x618   :  { %3321 = vmatpush1.bf16.msra.mxu0 %v2215_v27  ;;  %3485 = vmatpush1.bf16.msra.mxu1 %v2217_v28  ;;  %v2407_v27 = vld [vmem:[#allocation4 + $0x1220] sm:$0xff]  ;;  %v2409_v28 = vld [vmem:[#allocation4 + $0x1230] sm:$0xff] }
 0x619   :  { %3322 = vmatprep.subr.bf16.mxu0 %v2232_v29  ;;  %3486 = vmatprep.subr.bf16.mxu1 %v2234_v38  ;;  %v2424_v29 = vld [vmem:[#allocation4 + $0x12a8] sm:$0xff]  ;;  %v2426_v38 = vld [vmem:[#allocation4 + $0x12b8] sm:$0xff] }
 0x61c   :  { %3323 = vmatpush1.bf16.msra.mxu0 %v2231_v39  ;;  %3487 = vmatpush1.bf16.msra.mxu1 %v2233_v40  ;;  %v2423_v39 = vld [vmem:[#allocation4 + $0x12a0] sm:$0xff]  ;;  %v2425_v40 = vld [vmem:[#allocation4 + $0x12b0] sm:$0xff] }
 0x61d   :  { %3324 = vmatprep.subr.bf16.mxu0 %v2248_v41  ;;  %3488 = vmatprep.subr.bf16.mxu1 %v2250_v42  ;;  %v2440_v41 = vld [vmem:[#allocation4 + $0x1328] sm:$0xff]  ;;  %v2442_v42 = vld [vmem:[#allocation4 + $0x1338] sm:$0xff] }
 0x620   :  { %3325 = vmatpush1.bf16.msra.mxu0 %v2247_v43  ;;  %3489 = vmatpush1.bf16.msra.mxu1 %v2249_v32  ;;  %v2439_v43 = vld [vmem:[#allocation4 + $0x1320] sm:$0xff]  ;;  %v2441_v32 = vld [vmem:[#allocation4 + $0x1330] sm:$0xff] }
 0x621   :  { %3326 = vmatprep.subr.bf16.mxu0 %v2264_v44  ;;  %3490 = vmatprep.subr.bf16.mxu1 %v2266_v45  ;;  %v2456_v44 = vld [vmem:[#allocation4 + $0x13a8] sm:$0xff]  ;;  %v2458_v45 = vld [vmem:[#allocation4 + $0x13b8] sm:$0xff] }
 0x624   :  { %3327 = vmatpush1.bf16.msra.mxu0 %v2263_v46  ;;  %3491 = vmatpush1.bf16.msra.mxu1 %v2265_v47  ;;  %v2455_v46 = vld [vmem:[#allocation4 + $0x13a0] sm:$0xff]  ;;  %v2457_v47 = vld [vmem:[#allocation4 + $0x13b0] sm:$0xff] }
 0x625   :  { %3328 = vmatprep.subr.bf16.mxu0 %v2280_v48  ;;  %3492 = vmatprep.subr.bf16.mxu1 %v2282_v49  ;;  %v2472_v48 = vld [vmem:[#allocation4 + $0x1428] sm:$0xff]  ;;  %v2474_v49 = vld [vmem:[#allocation4 + $0x1438] sm:$0xff] }
 0x628   :  { %3329 = vmatpush1.bf16.msra.mxu0 %v2279_v50  ;;  %3493 = vmatpush1.bf16.msra.mxu1 %v2281_v51  ;;  %v2471_v50 = vld [vmem:[#allocation4 + $0x1420] sm:$0xff]  ;;  %v2473_v51 = vld [vmem:[#allocation4 + $0x1430] sm:$0xff] }
 0x629   :  { %3330 = vmatprep.subr.bf16.mxu0 %v2296_v52  ;;  %3494 = vmatprep.subr.bf16.mxu1 %v2298_v30  ;;  %v2488_v52 = vld [vmem:[#allocation4 + $0x14a8] sm:$0xff]  ;;  %v2490_v30 = vld [vmem:[#allocation4 + $0x14b8] sm:$0xff] }
 0x62c   :  { %3331 = vmatpush1.bf16.msra.mxu0 %v2295_v53  ;;  %3495 = vmatpush1.bf16.msra.mxu1 %v2297_v59  ;;  %v2487_v53 = vld [vmem:[#allocation4 + $0x14a0] sm:$0xff]  ;;  %v2489_v59 = vld [vmem:[#allocation4 + $0x14b0] sm:$0xff] }
 0x62d   :  { %3332 = vmatprep.subr.bf16.mxu0 %v2312_v54  ;;  %3496 = vmatprep.subr.bf16.mxu1 %v2314_v55  ;;  %v2504_v54 = vld [vmem:[#allocation4 + $0x1528] sm:$0xff]  ;;  %v2506_v55 = vld [vmem:[#allocation4 + $0x1538] sm:$0xff] }
 0x630   :  { %3333 = vmatpush1.bf16.msra.mxu0 %v2311_v56  ;;  %3497 = vmatpush1.bf16.msra.mxu1 %v2313_v33  ;;  %v2503_v56 = vld [vmem:[#allocation4 + $0x1520] sm:$0xff]  ;;  %v2505_v33 = vld [vmem:[#allocation4 + $0x1530] sm:$0xff] }
 0x631   :  { %3334 = vmatprep.subr.bf16.mxu0 %v2328_v57  ;;  %3498 = vmatprep.subr.bf16.mxu1 %v2330_v3  ;;  %v2520_v57 = vld [vmem:[#allocation4 + $0x15a8] sm:$0xff]  ;;  %v2522_v3 = vld [vmem:[#allocation4 + $0x15b8] sm:$0xff] }
 0x634   :  { %3335 = vmatpush1.bf16.msra.mxu0 %v2327_v4  ;;  %3499 = vmatpush1.bf16.msra.mxu1 %v2329_v31  ;;  %v2519_v4 = vld [vmem:[#allocation4 + $0x15a0] sm:$0xff]  ;;  %v2521_v31 = vld [vmem:[#allocation4 + $0x15b0] sm:$0xff] }
 0x635   :  { %3345 = vmatprep.subr.bf16.mxu0 %v2344_v12  ;;  %3509 = vmatprep.subr.bf16.mxu1 %v2346_v60  ;;  %v2536_v12 = vld [vmem:[#allocation4 + $0x1628] sm:$0xff]  ;;  %v2538_v60 = vld [vmem:[#allocation4 + $0x1638] sm:$0xff] }
 0x637   :  { %3337 = vmatmul.mubr.bf16.vlgmr.msra.gmra.mrb[20].mxu0 %v9262_v63  ;;  %3501 = vmatmul.mubr.bf16.vlgmr.msra.gmra.mrb[20].mxu1 %v9262_v63 }
 0x638   :  { %3346 = vmatpush1.bf16.msra.mxu0 %v2343_v13  ;;  %3510 = vmatpush1.bf16.msra.mxu1 %v2345_v14  ;;  %v2535_v13 = vld [vmem:[#allocation4 + $0x1620] sm:$0xff]  ;;  %v2537_v14 = vld [vmem:[#allocation4 + $0x1630] sm:$0xff] }
 0x639   :  { %3347 = vmatprep.subr.bf16.mxu0 %v2360_v1  ;;  %3511 = vmatprep.subr.bf16.mxu1 %v2362_v15  ;;  %v2552_v1 = vld [vmem:[#allocation4 + $0x16a8] sm:$0xff]  ;;  %v2554_v15 = vld [vmem:[#allocation4 + $0x16b8] sm:$0xff] }
 0x63a   :  { %3377 = vmatprep.mubr.bf16.mxu0 %v9282_v21  ;;  %3541 = vmatprep.mubr.bf16.mxu1 %v9282_v21 }
 0x63c   :  { %3348 = vmatpush1.bf16.msra.mxu0 %v2359_v16  ;;  %3512 = vmatpush1.bf16.msra.mxu1 %v2361_v58  ;;  %v2551_v16 = vld [vmem:[#allocation4 + $0x16a0] sm:$0xff]  ;;  %v2553_v58 = vld [vmem:[#allocation4 + $0x16b0] sm:$0xff] }
 0x63d   :  { %3349 = vmatprep.subr.bf16.mxu0 %v2376_v17  ;;  %3513 = vmatprep.subr.bf16.mxu1 %v2378_v18  ;;  %v2568_v17 = vld [vmem:[#allocation4 + $0x1728] sm:$0xff]  ;;  %v2570_v18 = vld [vmem:[#allocation4 + $0x1738] sm:$0xff] }
 0x640   :  { %3350 = vmatpush1.bf16.msra.mxu0 %v2375_v19  ;;  %3514 = vmatpush1.bf16.msra.mxu1 %v2377_v20  ;;  %v2567_v19 = vld [vmem:[#allocation4 + $0x1720] sm:$0xff]  ;;  %v2569_v20 = vld [vmem:[#allocation4 + $0x1730] sm:$0xff] }
 0x641   :  { %3351 = vmatprep.subr.bf16.mxu0 %v2392_v61  ;;  %3515 = vmatprep.subr.bf16.mxu1 %v2394_v22  ;;  %v2584_v61 = vld [vmem:[#allocation4 + $0x17a8] sm:$0xff]  ;;  %v2586_v22 = vld [vmem:[#allocation4 + $0x17b8] sm:$0xff] }
 0x644   :  { %3352 = vmatpush1.bf16.msra.mxu0 %v2391_v23  ;;  %3516 = vmatpush1.bf16.msra.mxu1 %v2393_v24  ;;  %v2583_v23 = vld [vmem:[#allocation4 + $0x17a0] sm:$0xff]  ;;  %v2585_v24 = vld [vmem:[#allocation4 + $0x17b0] sm:$0xff] }
 0x645   :  { %3353 = vmatprep.subr.bf16.mxu0 %v2408_v25  ;;  %3517 = vmatprep.subr.bf16.mxu1 %v2410_v26  ;;  %v2600_v25 = vld [vmem:[#allocation4 + $0x1828] sm:$0xff]  ;;  %v2602_v26 = vld [vmem:[#allocation4 + $0x1838] sm:$0xff] }
 0x648   :  { %3354 = vmatpush1.bf16.msra.mxu0 %v2407_v27  ;;  %3518 = vmatpush1.bf16.msra.mxu1 %v2409_v28  ;;  %v2599_v27 = vld [vmem:[#allocation4 + $0x1820] sm:$0xff]  ;;  %v2601_v28 = vld [vmem:[#allocation4 + $0x1830] sm:$0xff] }
 0x649   :  { %3355 = vmatprep.subr.bf16.mxu0 %v2424_v29  ;;  %3519 = vmatprep.subr.bf16.mxu1 %v2426_v38  ;;  %v2616_v29 = vld [vmem:[#allocation4 + $0x18a8] sm:$0xff]  ;;  %v2618_v38 = vld [vmem:[#allocation4 + $0x18b8] sm:$0xff] }
 0x64c   :  { %3356 = vmatpush1.bf16.msra.mxu0 %v2423_v39  ;;  %3520 = vmatpush1.bf16.msra.mxu1 %v2425_v40  ;;  %v2615_v39 = vld [vmem:[#allocation4 + $0x18a0] sm:$0xff]  ;;  %v2617_v40 = vld [vmem:[#allocation4 + $0x18b0] sm:$0xff] }
 0x64d   :  { %3357 = vmatprep.subr.bf16.mxu0 %v2440_v41  ;;  %3521 = vmatprep.subr.bf16.mxu1 %v2442_v42  ;;  %v2632_v41 = vld [vmem:[#allocation4 + $0x1928] sm:$0xff]  ;;  %v2634_v42 = vld [vmem:[#allocation4 + $0x1938] sm:$0xff] }
 0x650   :  { %3358 = vmatpush1.bf16.msra.mxu0 %v2439_v43  ;;  %3522 = vmatpush1.bf16.msra.mxu1 %v2441_v32  ;;  %v2631_v43 = vld [vmem:[#allocation4 + $0x1920] sm:$0xff]  ;;  %v2633_v32 = vld [vmem:[#allocation4 + $0x1930] sm:$0xff] }
 0x651   :  { %3359 = vmatprep.subr.bf16.mxu0 %v2456_v44  ;;  %3523 = vmatprep.subr.bf16.mxu1 %v2458_v45  ;;  %v2648_v44 = vld [vmem:[#allocation4 + $0x19a8] sm:$0xff]  ;;  %v2650_v45 = vld [vmem:[#allocation4 + $0x19b8] sm:$0xff] }
 0x654   :  { %3360 = vmatpush1.bf16.msra.mxu0 %v2455_v46  ;;  %3524 = vmatpush1.bf16.msra.mxu1 %v2457_v47  ;;  %v2647_v46 = vld [vmem:[#allocation4 + $0x19a0] sm:$0xff]  ;;  %v2649_v47 = vld [vmem:[#allocation4 + $0x19b0] sm:$0xff] }
 0x655   :  { %3361 = vmatprep.subr.bf16.mxu0 %v2472_v48  ;;  %3525 = vmatprep.subr.bf16.mxu1 %v2474_v49  ;;  %v2664_v48 = vld [vmem:[#allocation4 + $0x1a28] sm:$0xff]  ;;  %v2666_v49 = vld [vmem:[#allocation4 + $0x1a38] sm:$0xff] }
 0x658   :  { %3362 = vmatpush1.bf16.msra.mxu0 %v2471_v50  ;;  %3526 = vmatpush1.bf16.msra.mxu1 %v2473_v51  ;;  %v2851_v50 = vld [vmem:[#allocation15] sm:$0xff]  ;;  %v2663_v51 = vld [vmem:[#allocation4 + $0x1a20] sm:$0xff] }
 0x659   :  { %3363 = vmatprep.subr.bf16.mxu0 %v2488_v52  ;;  %3527 = vmatprep.subr.bf16.mxu1 %v2490_v30  ;;  %v2665_v52 = vld [vmem:[#allocation4 + $0x1a30] sm:$0xff]  ;;  %v2680_v30 = vld [vmem:[#allocation4 + $0x1aa8] sm:$0xff] }
 0x65c   :  { %3364 = vmatpush1.bf16.msra.mxu0 %v2487_v53  ;;  %3528 = vmatpush1.bf16.msra.mxu1 %v2489_v59  ;;  %v2682_v53 = vld [vmem:[#allocation4 + $0x1ab8] sm:$0xff]  ;;  %v2858_v59 = vrot.slane %v2851_v50, %v9180_v6 }
 0x65d   :  { %3365 = vmatprep.subr.bf16.mxu0 %v2504_v54  ;;  %3529 = vmatprep.subr.bf16.mxu1 %v2506_v55  ;;  %v2866_v54 = vrot.slane %v2851_v50, %v9182_v7  ;;  %v2862_v55 = vrot.slane %v2851_v50, %v9184_v9 }
 0x660   :  { %3366 = vmatpush1.bf16.msra.mxu0 %v2503_v56  ;;  %3530 = vmatpush1.bf16.msra.mxu1 %v2505_v33  ;;  %v2870_v56 = vrot.slane %v2851_v50, %v9186_v10  ;;  %v2679_v33 = vld [vmem:[#allocation4 + $0x1aa0] sm:$0xff]  ;;  %v2762_v50 = vld [vmem:[#allocation4 + $0x1d38] sm:$0xff] }
 0x661   :  { %3367 = vmatprep.subr.bf16.mxu0 %v2520_v57  ;;  %3531 = vmatprep.subr.bf16.mxu1 %v2522_v3  ;;  %v2681_v57 = vld [vmem:[#allocation4 + $0x1ab0] sm:$0xff] }
 0x664   :  { %3368 = vmatpush1.bf16.msra.mxu0 %v2519_v4  ;;  %3532 = vmatpush1.bf16.msra.mxu1 %v2521_v31  ;;  %v2696_v31 = vld [vmem:[#allocation4 + $0x1b28] sm:$0xff] }
 0x665   :  { %3369 = vmatprep.subr.bf16.mxu0 %v2536_v12  ;;  %3533 = vmatprep.subr.bf16.mxu1 %v2538_v60  ;;  %v2698_v12 = vld [vmem:[#allocation4 + $0x1b38] sm:$0xff] }
 0x668   :  { %3370 = vmatpush1.bf16.msra.mxu0 %v2535_v13  ;;  %3534 = vmatpush1.bf16.msra.mxu1 %v2537_v14 }
 0x669   :  { %3371 = vmatprep.subr.bf16.mxu0 %v2552_v1  ;;  %3535 = vmatprep.subr.bf16.mxu1 %v2554_v15 }
 0x66c   :  { %3372 = vmatpush1.bf16.msra.mxu0 %v2551_v16  ;;  %3536 = vmatpush1.bf16.msra.mxu1 %v2553_v58 }
 0x66d   :  { %3373 = vmatprep.subr.bf16.mxu0 %v2568_v17  ;;  %3537 = vmatprep.subr.bf16.mxu1 %v2570_v18 }
 0x670   :  { %3374 = vmatpush1.bf16.msra.mxu0 %v2567_v19  ;;  %3538 = vmatpush1.bf16.msra.mxu1 %v2569_v20 }
 0x671   :  { %3375 = vmatprep.subr.bf16.mxu0 %v2584_v61  ;;  %3539 = vmatprep.subr.bf16.mxu1 %v2586_v22  ;;  %v2695_v22 = vld [vmem:[#allocation4 + $0x1b20] sm:$0xff] }
 0x674   :  { %3376 = vmatpush1.bf16.msra.mxu0 %v2583_v23  ;;  %3540 = vmatpush1.bf16.msra.mxu1 %v2585_v24  ;;  %v2697_v23 = vld [vmem:[#allocation4 + $0x1b30] sm:$0xff] }
 0x675   :  { %3386 = vmatprep.subr.bf16.mxu0 %v2600_v25  ;;  %3550 = vmatprep.subr.bf16.mxu1 %v2602_v26  ;;  %v2712_v26 = vld [vmem:[#allocation4 + $0x1ba8] sm:$0xff] }
 0x677   :  { %3378 = vmatmul.mubr.bf16.vlgmr.msra.gmra.mrb[20].mxu0 %v9278_v5  ;;  %3542 = vmatmul.mubr.bf16.vlgmr.msra.gmra.mrb[20].mxu1 %v9278_v5 }
 0x678   :  { %3387 = vmatpush1.bf16.msra.mxu0 %v2599_v27  ;;  %3551 = vmatpush1.bf16.msra.mxu1 %v2601_v28  ;;  %v2714_v27 = vld [vmem:[#allocation4 + $0x1bb8] sm:$0xff] }
 0x679   :  { %3388 = vmatprep.subr.bf16.mxu0 %v2616_v29  ;;  %3552 = vmatprep.subr.bf16.mxu1 %v2618_v38 }
 0x67a   :  { %3418 = vmatprep.mubr.bf16.mxu0 %v9284_v11  ;;  %3582 = vmatprep.mubr.bf16.mxu1 %v9284_v11 }
 0x67c   :  { %3389 = vmatpush1.bf16.msra.mxu0 %v2615_v39  ;;  %3553 = vmatpush1.bf16.msra.mxu1 %v2617_v40  ;;  %v2711_v40 = vld [vmem:[#allocation4 + $0x1ba0] sm:$0xff] }
 0x67d   :  { %3390 = vmatprep.subr.bf16.mxu0 %v2632_v41  ;;  %3554 = vmatprep.subr.bf16.mxu1 %v2634_v42  ;;  %v2713_v41 = vld [vmem:[#allocation4 + $0x1bb0] sm:$0xff]  ;;  %v2728_v42 = vld [vmem:[#allocation4 + $0x1c28] sm:$0xff] }
 0x680   :  { %3391 = vmatpush1.bf16.msra.mxu0 %v2631_v43  ;;  %3555 = vmatpush1.bf16.msra.mxu1 %v2633_v32  ;;  %v2730_v43 = vld [vmem:[#allocation4 + $0x1c38] sm:$0xff]  ;;  %v2727_v32 = vld [vmem:[#allocation4 + $0x1c20] sm:$0xff] }
 0x681   :  { %3392 = vmatprep.subr.bf16.mxu0 %v2648_v44  ;;  %3556 = vmatprep.subr.bf16.mxu1 %v2650_v45  ;;  %v2729_v44 = vld [vmem:[#allocation4 + $0x1c30] sm:$0xff]  ;;  %v2744_v45 = vld [vmem:[#allocation4 + $0x1ca8] sm:$0xff] }
 0x684   :  { %3393 = vmatpush1.bf16.msra.mxu0 %v2647_v46  ;;  %3557 = vmatpush1.bf16.msra.mxu1 %v2649_v47  ;;  %v2746_v46 = vld [vmem:[#allocation4 + $0x1cb8] sm:$0xff]  ;;  %v2743_v47 = vld [vmem:[#allocation4 + $0x1ca0] sm:$0xff] }
 0x685   :  { %3394 = vmatprep.subr.bf16.mxu0 %v2664_v48  ;;  %3558 = vmatprep.subr.bf16.mxu1 %v2666_v49  ;;  %v2745_v48 = vld [vmem:[#allocation4 + $0x1cb0] sm:$0xff]  ;;  %v2760_v49 = vld [vmem:[#allocation4 + $0x1d28] sm:$0xff] }
 0x688   :  { %3395 = vmatpush1.bf16.msra.mxu0 %v2663_v51  ;;  %3559 = vmatpush1.bf16.msra.mxu1 %v2665_v52  ;;  %v2759_v51 = vld [vmem:[#allocation4 + $0x1d20] sm:$0xff]  ;;  %v2761_v52 = vld [vmem:[#allocation4 + $0x1d30] sm:$0xff] }
 0x689   :  { %3396 = vmatprep.subr.bf16.mxu0 %v2680_v30  ;;  %3560 = vmatprep.subr.bf16.mxu1 %v2682_v53  ;;  %v2776_v30 = vld [vmem:[#allocation4 + $0x1da8] sm:$0xff]  ;;  %v2778_v53 = vld [vmem:[#allocation4 + $0x1db8] sm:$0xff] }
 0x68a   :  { %v3092_v3 = vpop.f32.mrb[16].mxu0  ;;  %v3256_v4 = vpop.f32.mrb[16].mxu1 }
 0x68b   :  { %v8314_v60 = vadd.f32 %v3092_v3, %v2858_v59  ;;  %v8316_v13 = vadd.f32 %v3256_v4, %v2866_v54  ;;  %v3094_v14 = vpop.f32.mrb[17].mxu0  ;;  %v3258_v1 = vpop.f32.mrb[17].mxu1  ;;  %v2775_v59 = vld [vmem:[#allocation4 + $0x1da0] sm:$0xff]  ;;  %v2777_v54 = vld [vmem:[#allocation4 + $0x1db0] sm:$0xff]  ;;  %v2808_v3 = vld [vmem:[#allocation4 + $0x1ea8] sm:$0xff] }
 0x68c   :  { %v8315_v15 = vadd.f32 %v3094_v14, %v2862_v55  ;;  %v8317_v16 = vadd.f32 %v3258_v1, %v2870_v56  ;;  %v3096_v58 = vpop.f32.mrb[18].mxu0  ;;  %v3260_v17 = vpop.f32.mrb[18].mxu1  ;;  %3397 = vmatpush1.bf16.msra.mxu0 %v2679_v33  ;;  %3561 = vmatpush1.bf16.msra.mxu1 %v2681_v57  ;;  %v2792_v55 = vld [vmem:[#allocation4 + $0x1e28] sm:$0xff]  ;;  %v2794_v56 = vld [vmem:[#allocation4 + $0x1e38] sm:$0xff]  ;;  %v2791_v33 = vld [vmem:[#allocation4 + $0x1e20] sm:$0xff] }
 0x68d   :  { %v4247_v18 = vmax.f32 %v8314_v60, 0.0  ;;  %v4249_v19 = vmax.f32 %v8316_v13, 0.0  ;;  %v3097_v20 = vpop.f32.mrb[19].mxu0  ;;  %v3261_v61 = vpop.f32.mrb[19].mxu1  ;;  %3398 = vmatprep.subr.bf16.mxu0 %v2696_v31  ;;  %3562 = vmatprep.subr.bf16.mxu1 %v2698_v12  ;;  %v2793_v57 = vld [vmem:[#allocation4 + $0x1e30] sm:$0xff]  ;;  %v2810_v4 = vld [vmem:[#allocation4 + $0x1eb8] sm:$0xff] }
 0x68e   :  { %v4248_v24 = vmax.f32 %v8315_v15, 0.0  ;;  %v4250_v25 = vmax.f32 %v8317_v16, 0.0  ;;  %v2807_v31 = vld [vmem:[#allocation4 + $0x1ea0] sm:$0xff]  ;;  %v2809_v12 = vld [vmem:[#allocation4 + $0x1eb0] sm:$0xff]  ;;  %v2824_v60 = vld [vmem:[#allocation4 + $0x1f28] sm:$0xff] }
 0x68f   :  { %v9320_v28 = vpack.c.bf16 %v4247_v18, %v4247_v18  ;;  %v9322_v29 = vpack.c.bf16 %v4249_v19, %v4249_v19  ;;  %v2826_v13 = vld [vmem:[#allocation4 + $0x1f38] sm:$0xff]  ;;  %v2823_v14 = vld [vmem:[#allocation4 + $0x1f20] sm:$0xff]  ;;  %v2825_v1 = vld [vmem:[#allocation4 + $0x1f30] sm:$0xff] }
 0x690   :  { %v9324_v38 = vpack.c.bf16 %v4248_v24, %v4248_v24  ;;  %v9326_v39 = vpack.c.bf16 %v4250_v25, %v4250_v25  ;;  %3399 = vmatpush1.bf16.msra.mxu0 %v2695_v22  ;;  %3563 = vmatpush1.bf16.msra.mxu1 %v2697_v23  ;;  %v2840_v15 = vld [vmem:[#allocation4 + $0x1fa8] sm:$0xff]  ;;  %v2842_v16 = vld [vmem:[#allocation4 + $0x1fb8] sm:$0xff]  ;;  %v2839_v58 = vld [vmem:[#allocation4 + $0x1fa0] sm:$0xff] }
 0x691   :  { %3400 = vmatprep.subr.bf16.mxu0 %v2712_v26  ;;  %3564 = vmatprep.subr.bf16.mxu1 %v2714_v27  ;;  %v2841_v17 = vld [vmem:[#allocation4 + $0x1fb0] sm:$0xff]  ;;  %v1836_v18 = vld [vmem:[#allocation4 + $0x48] sm:$0xff]  ;;  %v1838_v19 = vld [vmem:[#allocation4 + $0x58] sm:$0xff] }
 0x692   :  { %v1835_v20 = vld [vmem:[#allocation4 + $0x40] sm:$0xff]  ;;  %v1837_v61 = vld [vmem:[#allocation4 + $0x50] sm:$0xff]  ;;  %v1852_v22 = vld [vmem:[#allocation4 + $0xc8] sm:$0xff] }
 0x693   :  { %v1854_v23 = vld [vmem:[#allocation4 + $0xd8] sm:$0xff]  ;;  %v1851_v24 = vld [vmem:[#allocation4 + $0xc0] sm:$0xff]  ;;  %v1853_v25 = vld [vmem:[#allocation4 + $0xd0] sm:$0xff] }
 0x694   :  { %3401 = vmatpush1.bf16.msra.mxu0 %v2711_v40  ;;  %3565 = vmatpush1.bf16.msra.mxu1 %v2713_v41  ;;  %v1868_v26 = vld [vmem:[#allocation4 + $0x148] sm:$0xff]  ;;  %v1870_v27 = vld [vmem:[#allocation4 + $0x158] sm:$0xff]  ;;  %v1867_v40 = vld [vmem:[#allocation4 + $0x140] sm:$0xff] }
 0x695   :  { %3402 = vmatprep.subr.bf16.mxu0 %v2728_v42  ;;  %3566 = vmatprep.subr.bf16.mxu1 %v2730_v43  ;;  %v1869_v41 = vld [vmem:[#allocation4 + $0x150] sm:$0xff]  ;;  %v1884_v42 = vld [vmem:[#allocation4 + $0x1c8] sm:$0xff]  ;;  %v1886_v43 = vld [vmem:[#allocation4 + $0x1d8] sm:$0xff] }
 0x698   :  { %3403 = vmatpush1.bf16.msra.mxu0 %v2727_v32  ;;  %3567 = vmatpush1.bf16.msra.mxu1 %v2729_v44  ;;  %v1883_v32 = vld [vmem:[#allocation4 + $0x1c0] sm:$0xff]  ;;  %v1885_v44 = vld [vmem:[#allocation4 + $0x1d0] sm:$0xff] }
 0x699   :  { %3404 = vmatprep.subr.bf16.mxu0 %v2744_v45  ;;  %3568 = vmatprep.subr.bf16.mxu1 %v2746_v46  ;;  %v1900_v45 = vld [vmem:[#allocation4 + $0x248] sm:$0xff]  ;;  %v1902_v46 = vld [vmem:[#allocation4 + $0x258] sm:$0xff] }
 0x69c   :  { %3405 = vmatpush1.bf16.msra.mxu0 %v2743_v47  ;;  %3569 = vmatpush1.bf16.msra.mxu1 %v2745_v48  ;;  %v1899_v47 = vld [vmem:[#allocation4 + $0x240] sm:$0xff]  ;;  %v1901_v48 = vld [vmem:[#allocation4 + $0x250] sm:$0xff] }
 0x69d   :  { %3406 = vmatprep.subr.bf16.mxu0 %v2760_v49  ;;  %3570 = vmatprep.subr.bf16.mxu1 %v2762_v50  ;;  %v1916_v49 = vld [vmem:[#allocation4 + $0x2c8] sm:$0xff]  ;;  %v1918_v50 = vld [vmem:[#allocation4 + $0x2d8] sm:$0xff] }
 0x6a0   :  { %3407 = vmatpush1.bf16.msra.mxu0 %v2759_v51  ;;  %3571 = vmatpush1.bf16.msra.mxu1 %v2761_v52  ;;  %v1915_v51 = vld [vmem:[#allocation4 + $0x2c0] sm:$0xff]  ;;  %v1917_v52 = vld [vmem:[#allocation4 + $0x2d0] sm:$0xff] }
 0x6a1   :  { %3408 = vmatprep.subr.bf16.mxu0 %v2776_v30  ;;  %3572 = vmatprep.subr.bf16.mxu1 %v2778_v53  ;;  %v1932_v30 = vld [vmem:[#allocation4 + $0x348] sm:$0xff]  ;;  %v1934_v53 = vld [vmem:[#allocation4 + $0x358] sm:$0xff] }
 0x6a4   :  { %3409 = vmatpush1.bf16.msra.mxu0 %v2775_v59  ;;  %3573 = vmatpush1.bf16.msra.mxu1 %v2777_v54  ;;  %v1931_v59 = vld [vmem:[#allocation4 + $0x340] sm:$0xff]  ;;  %v1933_v54 = vld [vmem:[#allocation4 + $0x350] sm:$0xff] }
 0x6a5   :  { %3410 = vmatprep.subr.bf16.mxu0 %v2792_v55  ;;  %3574 = vmatprep.subr.bf16.mxu1 %v2794_v56  ;;  %v1948_v55 = vld [vmem:[#allocation4 + $0x3c8] sm:$0xff]  ;;  %v1950_v56 = vld [vmem:[#allocation4 + $0x3d8] sm:$0xff] }
 0x6a8   :  { %3411 = vmatpush1.bf16.msra.mxu0 %v2791_v33  ;;  %3575 = vmatpush1.bf16.msra.mxu1 %v2793_v57  ;;  %v1947_v33 = vld [vmem:[#allocation4 + $0x3c0] sm:$0xff]  ;;  %v1949_v57 = vld [vmem:[#allocation4 + $0x3d0] sm:$0xff] }
 0x6a9   :  { %3412 = vmatprep.subr.bf16.mxu0 %v2808_v3  ;;  %3576 = vmatprep.subr.bf16.mxu1 %v2810_v4  ;;  %v1964_v3 = vld [vmem:[#allocation4 + $0x448] sm:$0xff]  ;;  %v1966_v4 = vld [vmem:[#allocation4 + $0x458] sm:$0xff] }
 0x6ac   :  { %3413 = vmatpush1.bf16.msra.mxu0 %v2807_v31  ;;  %3577 = vmatpush1.bf16.msra.mxu1 %v2809_v12  ;;  %v1963_v31 = vld [vmem:[#allocation4 + $0x440] sm:$0xff]  ;;  %v1965_v12 = vld [vmem:[#allocation4 + $0x450] sm:$0xff] }
 0x6ad   :  { %3414 = vmatprep.subr.bf16.mxu0 %v2824_v60  ;;  %3578 = vmatprep.subr.bf16.mxu1 %v2826_v13  ;;  %v1980_v60 = vld [vmem:[#allocation4 + $0x4c8] sm:$0xff]  ;;  %v1982_v13 = vld [vmem:[#allocation4 + $0x4d8] sm:$0xff] }
 0x6b0   :  { %3415 = vmatpush1.bf16.msra.mxu0 %v2823_v14  ;;  %3579 = vmatpush1.bf16.msra.mxu1 %v2825_v1  ;;  %v1979_v14 = vld [vmem:[#allocation4 + $0x4c0] sm:$0xff]  ;;  %v1981_v1 = vld [vmem:[#allocation4 + $0x4d0] sm:$0xff] }
 0x6b1   :  { %3416 = vmatprep.subr.bf16.mxu0 %v2840_v15  ;;  %3580 = vmatprep.subr.bf16.mxu1 %v2842_v16  ;;  %v1996_v15 = vld [vmem:[#allocation4 + $0x548] sm:$0xff]  ;;  %v1998_v16 = vld [vmem:[#allocation4 + $0x558] sm:$0xff] }
 0x6b4   :  { %3417 = vmatpush1.bf16.msra.mxu0 %v2839_v58  ;;  %3581 = vmatpush1.bf16.msra.mxu1 %v2841_v17  ;;  %v1995_v58 = vld [vmem:[#allocation4 + $0x540] sm:$0xff]  ;;  %v1997_v17 = vld [vmem:[#allocation4 + $0x550] sm:$0xff] }
 0x6b5   :  { %3591 = vmatprep.subr.bf16.mxu0 %v1836_v18  ;;  %3755 = vmatprep.subr.bf16.mxu1 %v1838_v19  ;;  %v2012_v18 = vld [vmem:[#allocation4 + $0x5c8] sm:$0xff]  ;;  %v2014_v19 = vld [vmem:[#allocation4 + $0x5d8] sm:$0xff] }
 0x6b7   :  { %3419 = vmatmul.mubr.bf16.vlgmr.msra.gmra.mrb[20].mxu0 %v9280_v8  ;;  %3583 = vmatmul.mubr.bf16.vlgmr.msra.gmra.mrb[20].mxu1 %v9280_v8 }
 0x6b8   :  { %3592 = vmatpush1.bf16.msra.mxu0 %v1835_v20  ;;  %3756 = vmatpush1.bf16.msra.mxu1 %v1837_v61  ;;  %v2011_v20 = vld [vmem:[#allocation4 + $0x5c0] sm:$0xff]  ;;  %v2013_v61 = vld [vmem:[#allocation4 + $0x5d0] sm:$0xff] }
 0x6b9   :  { %3593 = vmatprep.subr.bf16.mxu0 %v1852_v22  ;;  %3757 = vmatprep.subr.bf16.mxu1 %v1854_v23  ;;  %v2028_v22 = vld [vmem:[#allocation4 + $0x648] sm:$0xff]  ;;  %v2030_v23 = vld [vmem:[#allocation4 + $0x658] sm:$0xff] }
 0x6ba   :  { %3623 = vmatprep.mubr.bf16.mxu0 %v9264_v0  ;;  %3787 = vmatprep.mubr.bf16.mxu1 %v9264_v0 }
 0x6bc   :  { %3594 = vmatpush1.bf16.msra.mxu0 %v1851_v24  ;;  %3758 = vmatpush1.bf16.msra.mxu1 %v1853_v25  ;;  %v2027_v24 = vld [vmem:[#allocation4 + $0x640] sm:$0xff]  ;;  %v2029_v25 = vld [vmem:[#allocation4 + $0x650] sm:$0xff] }
 0x6bd   :  { %3595 = vmatprep.subr.bf16.mxu0 %v1868_v26  ;;  %3759 = vmatprep.subr.bf16.mxu1 %v1870_v27  ;;  %v2044_v26 = vld [vmem:[#allocation4 + $0x6c8] sm:$0xff]  ;;  %v2046_v27 = vld [vmem:[#allocation4 + $0x6d8] sm:$0xff] }
 0x6c0   :  { %3596 = vmatpush1.bf16.msra.mxu0 %v1867_v40  ;;  %3760 = vmatpush1.bf16.msra.mxu1 %v1869_v41  ;;  %v2043_v40 = vld [vmem:[#allocation4 + $0x6c0] sm:$0xff]  ;;  %v2045_v41 = vld [vmem:[#allocation4 + $0x6d0] sm:$0xff] }
 0x6c1   :  { %3597 = vmatprep.subr.bf16.mxu0 %v1884_v42  ;;  %3761 = vmatprep.subr.bf16.mxu1 %v1886_v43  ;;  %v2060_v42 = vld [vmem:[#allocation4 + $0x748] sm:$0xff]  ;;  %v2062_v43 = vld [vmem:[#allocation4 + $0x758] sm:$0xff] }
 0x6c4   :  { %3598 = vmatpush1.bf16.msra.mxu0 %v1883_v32  ;;  %3762 = vmatpush1.bf16.msra.mxu1 %v1885_v44  ;;  %v2059_v32 = vld [vmem:[#allocation4 + $0x740] sm:$0xff]  ;;  %v2061_v44 = vld [vmem:[#allocation4 + $0x750] sm:$0xff] }
 0x6c5   :  { %3599 = vmatprep.subr.bf16.mxu0 %v1900_v45  ;;  %3763 = vmatprep.subr.bf16.mxu1 %v1902_v46  ;;  %v2076_v45 = vld [vmem:[#allocation4 + $0x7c8] sm:$0xff]  ;;  %v2078_v46 = vld [vmem:[#allocation4 + $0x7d8] sm:$0xff] }
 0x6c8   :  { %3600 = vmatpush1.bf16.msra.mxu0 %v1899_v47  ;;  %3764 = vmatpush1.bf16.msra.mxu1 %v1901_v48  ;;  %v2075_v47 = vld [vmem:[#allocation4 + $0x7c0] sm:$0xff]  ;;  %v2077_v48 = vld [vmem:[#allocation4 + $0x7d0] sm:$0xff] }
 0x6c9   :  { %3601 = vmatprep.subr.bf16.mxu0 %v1916_v49  ;;  %3765 = vmatprep.subr.bf16.mxu1 %v1918_v50  ;;  %v2092_v49 = vld [vmem:[#allocation4 + $0x848] sm:$0xff]  ;;  %v2094_v50 = vld [vmem:[#allocation4 + $0x858] sm:$0xff] }
 0x6cc   :  { %3602 = vmatpush1.bf16.msra.mxu0 %v1915_v51  ;;  %3766 = vmatpush1.bf16.msra.mxu1 %v1917_v52  ;;  %v2091_v51 = vld [vmem:[#allocation4 + $0x840] sm:$0xff]  ;;  %v2093_v52 = vld [vmem:[#allocation4 + $0x850] sm:$0xff] }
 0x6cd   :  { %3603 = vmatprep.subr.bf16.mxu0 %v1932_v30  ;;  %3767 = vmatprep.subr.bf16.mxu1 %v1934_v53  ;;  %v2108_v30 = vld [vmem:[#allocation4 + $0x8c8] sm:$0xff]  ;;  %v2110_v53 = vld [vmem:[#allocation4 + $0x8d8] sm:$0xff] }
 0x6d0   :  { %3604 = vmatpush1.bf16.msra.mxu0 %v1931_v59  ;;  %3768 = vmatpush1.bf16.msra.mxu1 %v1933_v54  ;;  %v2107_v59 = vld [vmem:[#allocation4 + $0x8c0] sm:$0xff]  ;;  %v2109_v54 = vld [vmem:[#allocation4 + $0x8d0] sm:$0xff] }
 0x6d1   :  { %3605 = vmatprep.subr.bf16.mxu0 %v1948_v55  ;;  %3769 = vmatprep.subr.bf16.mxu1 %v1950_v56  ;;  %v2124_v55 = vld [vmem:[#allocation4 + $0x948] sm:$0xff]  ;;  %v2126_v56 = vld [vmem:[#allocation4 + $0x958] sm:$0xff] }
 0x6d4   :  { %3606 = vmatpush1.bf16.msra.mxu0 %v1947_v33  ;;  %3770 = vmatpush1.bf16.msra.mxu1 %v1949_v57  ;;  %v2123_v33 = vld [vmem:[#allocation4 + $0x940] sm:$0xff]  ;;  %v2125_v57 = vld [vmem:[#allocation4 + $0x950] sm:$0xff] }
 0x6d5   :  { %3607 = vmatprep.subr.bf16.mxu0 %v1964_v3  ;;  %3771 = vmatprep.subr.bf16.mxu1 %v1966_v4  ;;  %v2140_v3 = vld [vmem:[#allocation4 + $0x9c8] sm:$0xff]  ;;  %v2142_v4 = vld [vmem:[#allocation4 + $0x9d8] sm:$0xff] }
 0x6d8   :  { %3608 = vmatpush1.bf16.msra.mxu0 %v1963_v31  ;;  %3772 = vmatpush1.bf16.msra.mxu1 %v1965_v12  ;;  %v2139_v31 = vld [vmem:[#allocation4 + $0x9c0] sm:$0xff]  ;;  %v2141_v12 = vld [vmem:[#allocation4 + $0x9d0] sm:$0xff] }
 0x6d9   :  { %3609 = vmatprep.subr.bf16.mxu0 %v1980_v60  ;;  %3773 = vmatprep.subr.bf16.mxu1 %v1982_v13  ;;  %v2156_v60 = vld [vmem:[#allocation4 + $0xa48] sm:$0xff]  ;;  %v2158_v13 = vld [vmem:[#allocation4 + $0xa58] sm:$0xff] }
 0x6dc   :  { %3610 = vmatpush1.bf16.msra.mxu0 %v1979_v14  ;;  %3774 = vmatpush1.bf16.msra.mxu1 %v1981_v1  ;;  %v2155_v14 = vld [vmem:[#allocation4 + $0xa40] sm:$0xff]  ;;  %v2157_v1 = vld [vmem:[#allocation4 + $0xa50] sm:$0xff] }
 0x6dd   :  { %3611 = vmatprep.subr.bf16.mxu0 %v1996_v15  ;;  %3775 = vmatprep.subr.bf16.mxu1 %v1998_v16  ;;  %v2172_v15 = vld [vmem:[#allocation4 + $0xac8] sm:$0xff]  ;;  %v2174_v16 = vld [vmem:[#allocation4 + $0xad8] sm:$0xff] }
 0x6e0   :  { %3612 = vmatpush1.bf16.msra.mxu0 %v1995_v58  ;;  %3776 = vmatpush1.bf16.msra.mxu1 %v1997_v17  ;;  %v2171_v58 = vld [vmem:[#allocation4 + $0xac0] sm:$0xff]  ;;  %v2173_v17 = vld [vmem:[#allocation4 + $0xad0] sm:$0xff] }
 0x6e1   :  { %3613 = vmatprep.subr.bf16.mxu0 %v2012_v18  ;;  %3777 = vmatprep.subr.bf16.mxu1 %v2014_v19  ;;  %v2188_v18 = vld [vmem:[#allocation4 + $0xb48] sm:$0xff]  ;;  %v2190_v19 = vld [vmem:[#allocation4 + $0xb58] sm:$0xff] }
 0x6e4   :  { %3614 = vmatpush1.bf16.msra.mxu0 %v2011_v20  ;;  %3778 = vmatpush1.bf16.msra.mxu1 %v2013_v61  ;;  %v2187_v20 = vld [vmem:[#allocation4 + $0xb40] sm:$0xff]  ;;  %v2189_v61 = vld [vmem:[#allocation4 + $0xb50] sm:$0xff] }
 0x6e5   :  { %3615 = vmatprep.subr.bf16.mxu0 %v2028_v22  ;;  %3779 = vmatprep.subr.bf16.mxu1 %v2030_v23  ;;  %v2204_v22 = vld [vmem:[#allocation4 + $0xbc8] sm:$0xff]  ;;  %v2206_v23 = vld [vmem:[#allocation4 + $0xbd8] sm:$0xff] }
 0x6e8   :  { %3616 = vmatpush1.bf16.msra.mxu0 %v2027_v24  ;;  %3780 = vmatpush1.bf16.msra.mxu1 %v2029_v25  ;;  %v2203_v24 = vld [vmem:[#allocation4 + $0xbc0] sm:$0xff]  ;;  %v2205_v25 = vld [vmem:[#allocation4 + $0xbd0] sm:$0xff] }
 0x6e9   :  { %3617 = vmatprep.subr.bf16.mxu0 %v2044_v26  ;;  %3781 = vmatprep.subr.bf16.mxu1 %v2046_v27  ;;  %v2220_v26 = vld [vmem:[#allocation4 + $0xc48] sm:$0xff]  ;;  %v2222_v27 = vld [vmem:[#allocation4 + $0xc58] sm:$0xff] }
 0x6ec   :  { %3618 = vmatpush1.bf16.msra.mxu0 %v2043_v40  ;;  %3782 = vmatpush1.bf16.msra.mxu1 %v2045_v41  ;;  %v2219_v40 = vld [vmem:[#allocation4 + $0xc40] sm:$0xff]  ;;  %v2221_v41 = vld [vmem:[#allocation4 + $0xc50] sm:$0xff] }
 0x6ed   :  { %3619 = vmatprep.subr.bf16.mxu0 %v2060_v42  ;;  %3783 = vmatprep.subr.bf16.mxu1 %v2062_v43  ;;  %v2236_v42 = vld [vmem:[#allocation4 + $0xcc8] sm:$0xff]  ;;  %v2238_v43 = vld [vmem:[#allocation4 + $0xcd8] sm:$0xff] }
 0x6f0   :  { %3620 = vmatpush1.bf16.msra.mxu0 %v2059_v32  ;;  %3784 = vmatpush1.bf16.msra.mxu1 %v2061_v44  ;;  %v2235_v32 = vld [vmem:[#allocation4 + $0xcc0] sm:$0xff]  ;;  %v2237_v44 = vld [vmem:[#allocation4 + $0xcd0] sm:$0xff] }
 0x6f1   :  { %3621 = vmatprep.subr.bf16.mxu0 %v2076_v45  ;;  %3785 = vmatprep.subr.bf16.mxu1 %v2078_v46  ;;  %v2252_v45 = vld [vmem:[#allocation4 + $0xd48] sm:$0xff]  ;;  %v2254_v46 = vld [vmem:[#allocation4 + $0xd58] sm:$0xff] }
 0x6f4   :  { %3622 = vmatpush1.bf16.msra.mxu0 %v2075_v47  ;;  %3786 = vmatpush1.bf16.msra.mxu1 %v2077_v48  ;;  %v2251_v47 = vld [vmem:[#allocation4 + $0xd40] sm:$0xff]  ;;  %v2253_v48 = vld [vmem:[#allocation4 + $0xd50] sm:$0xff] }
 0x6f5   :  { %3632 = vmatprep.subr.bf16.mxu0 %v2092_v49  ;;  %3796 = vmatprep.subr.bf16.mxu1 %v2094_v50  ;;  %v2268_v49 = vld [vmem:[#allocation4 + $0xdc8] sm:$0xff]  ;;  %v2270_v50 = vld [vmem:[#allocation4 + $0xdd8] sm:$0xff] }
 0x6f7   :  { %3624 = vmatmul.mubr.bf16.vlgmr.msra.gmra.mrb[24].mxu0 %v9260_v62  ;;  %3788 = vmatmul.mubr.bf16.vlgmr.msra.gmra.mrb[24].mxu1 %v9260_v62 }
 0x6f8   :  { %3633 = vmatpush1.bf16.msra.mxu0 %v2091_v51  ;;  %3797 = vmatpush1.bf16.msra.mxu1 %v2093_v52  ;;  %v2267_v51 = vld [vmem:[#allocation4 + $0xdc0] sm:$0xff]  ;;  %v2269_v52 = vld [vmem:[#allocation4 + $0xdd0] sm:$0xff] }
 0x6f9   :  { %3634 = vmatprep.subr.bf16.mxu0 %v2108_v30  ;;  %3798 = vmatprep.subr.bf16.mxu1 %v2110_v53  ;;  %v2284_v30 = vld [vmem:[#allocation4 + $0xe48] sm:$0xff]  ;;  %v2286_v53 = vld [vmem:[#allocation4 + $0xe58] sm:$0xff] }
 0x6fa   :  { %3664 = vmatprep.mubr.bf16.mxu0 %v9266_v2  ;;  %3828 = vmatprep.mubr.bf16.mxu1 %v9266_v2 }
 0x6fc   :  { %3635 = vmatpush1.bf16.msra.mxu0 %v2107_v59  ;;  %3799 = vmatpush1.bf16.msra.mxu1 %v2109_v54  ;;  %v2283_v59 = vld [vmem:[#allocation4 + $0xe40] sm:$0xff]  ;;  %v2285_v54 = vld [vmem:[#allocation4 + $0xe50] sm:$0xff] }
 0x6fd   :  { %3636 = vmatprep.subr.bf16.mxu0 %v2124_v55  ;;  %3800 = vmatprep.subr.bf16.mxu1 %v2126_v56  ;;  %v2300_v55 = vld [vmem:[#allocation4 + $0xec8] sm:$0xff]  ;;  %v2302_v56 = vld [vmem:[#allocation4 + $0xed8] sm:$0xff] }
 0x700   :  { %3637 = vmatpush1.bf16.msra.mxu0 %v2123_v33  ;;  %3801 = vmatpush1.bf16.msra.mxu1 %v2125_v57  ;;  %v2299_v33 = vld [vmem:[#allocation4 + $0xec0] sm:$0xff]  ;;  %v2301_v57 = vld [vmem:[#allocation4 + $0xed0] sm:$0xff] }
 0x701   :  { %3638 = vmatprep.subr.bf16.mxu0 %v2140_v3  ;;  %3802 = vmatprep.subr.bf16.mxu1 %v2142_v4  ;;  %v2316_v3 = vld [vmem:[#allocation4 + $0xf48] sm:$0xff]  ;;  %v2318_v4 = vld [vmem:[#allocation4 + $0xf58] sm:$0xff] }
 0x704   :  { %3639 = vmatpush1.bf16.msra.mxu0 %v2139_v31  ;;  %3803 = vmatpush1.bf16.msra.mxu1 %v2141_v12  ;;  %v2315_v31 = vld [vmem:[#allocation4 + $0xf40] sm:$0xff]  ;;  %v2317_v12 = vld [vmem:[#allocation4 + $0xf50] sm:$0xff] }
 0x705   :  { %3640 = vmatprep.subr.bf16.mxu0 %v2156_v60  ;;  %3804 = vmatprep.subr.bf16.mxu1 %v2158_v13  ;;  %v2332_v60 = vld [vmem:[#allocation4 + $0xfc8] sm:$0xff]  ;;  %v2334_v13 = vld [vmem:[#allocation4 + $0xfd8] sm:$0xff] }
 0x708   :  { %3641 = vmatpush1.bf16.msra.mxu0 %v2155_v14  ;;  %3805 = vmatpush1.bf16.msra.mxu1 %v2157_v1  ;;  %v2331_v14 = vld [vmem:[#allocation4 + $0xfc0] sm:$0xff]  ;;  %v2333_v1 = vld [vmem:[#allocation4 + $0xfd0] sm:$0xff] }
 0x709   :  { %3642 = vmatprep.subr.bf16.mxu0 %v2172_v15  ;;  %3806 = vmatprep.subr.bf16.mxu1 %v2174_v16  ;;  %v2348_v15 = vld [vmem:[#allocation4 + $0x1048] sm:$0xff]  ;;  %v2350_v16 = vld [vmem:[#allocation4 + $0x1058] sm:$0xff] }
 0x70c   :  { %3643 = vmatpush1.bf16.msra.mxu0 %v2171_v58  ;;  %3807 = vmatpush1.bf16.msra.mxu1 %v2173_v17  ;;  %v2347_v58 = vld [vmem:[#allocation4 + $0x1040] sm:$0xff]  ;;  %v2349_v17 = vld [vmem:[#allocation4 + $0x1050] sm:$0xff] }
 0x70d   :  { %3644 = vmatprep.subr.bf16.mxu0 %v2188_v18  ;;  %3808 = vmatprep.subr.bf16.mxu1 %v2190_v19  ;;  %v2364_v18 = vld [vmem:[#allocation4 + $0x10c8] sm:$0xff]  ;;  %v2366_v19 = vld [vmem:[#allocation4 + $0x10d8] sm:$0xff] }
 0x710   :  { %3645 = vmatpush1.bf16.msra.mxu0 %v2187_v20  ;;  %3809 = vmatpush1.bf16.msra.mxu1 %v2189_v61  ;;  %v2363_v20 = vld [vmem:[#allocation4 + $0x10c0] sm:$0xff]  ;;  %v2365_v61 = vld [vmem:[#allocation4 + $0x10d0] sm:$0xff] }
 0x711   :  { %3646 = vmatprep.subr.bf16.mxu0 %v2204_v22  ;;  %3810 = vmatprep.subr.bf16.mxu1 %v2206_v23  ;;  %v2380_v22 = vld [vmem:[#allocation4 + $0x1148] sm:$0xff]  ;;  %v2382_v23 = vld [vmem:[#allocation4 + $0x1158] sm:$0xff] }
 0x714   :  { %3647 = vmatpush1.bf16.msra.mxu0 %v2203_v24  ;;  %3811 = vmatpush1.bf16.msra.mxu1 %v2205_v25  ;;  %v2379_v24 = vld [vmem:[#allocation4 + $0x1140] sm:$0xff]  ;;  %v2381_v25 = vld [vmem:[#allocation4 + $0x1150] sm:$0xff] }
 0x715   :  { %3648 = vmatprep.subr.bf16.mxu0 %v2220_v26  ;;  %3812 = vmatprep.subr.bf16.mxu1 %v2222_v27  ;;  %v2396_v26 = vld [vmem:[#allocation4 + $0x11c8] sm:$0xff]  ;;  %v2398_v27 = vld [vmem:[#allocation4 + $0x11d8] sm:$0xff] }
 0x718   :  { %3649 = vmatpush1.bf16.msra.mxu0 %v2219_v40  ;;  %3813 = vmatpush1.bf16.msra.mxu1 %v2221_v41  ;;  %v2395_v40 = vld [vmem:[#allocation4 + $0x11c0] sm:$0xff]  ;;  %v2397_v41 = vld [vmem:[#allocation4 + $0x11d0] sm:$0xff] }
 0x719   :  { %3650 = vmatprep.subr.bf16.mxu0 %v2236_v42  ;;  %3814 = vmatprep.subr.bf16.mxu1 %v2238_v43  ;;  %v2412_v42 = vld [vmem:[#allocation4 + $0x1248] sm:$0xff]  ;;  %v2414_v43 = vld [vmem:[#allocation4 + $0x1258] sm:$0xff] }
 0x71c   :  { %3651 = vmatpush1.bf16.msra.mxu0 %v2235_v32  ;;  %3815 = vmatpush1.bf16.msra.mxu1 %v2237_v44  ;;  %v2411_v32 = vld [vmem:[#allocation4 + $0x1240] sm:$0xff]  ;;  %v2413_v44 = vld [vmem:[#allocation4 + $0x1250] sm:$0xff] }
 0x71d   :  { %3652 = vmatprep.subr.bf16.mxu0 %v2252_v45  ;;  %3816 = vmatprep.subr.bf16.mxu1 %v2254_v46  ;;  %v2428_v45 = vld [vmem:[#allocation4 + $0x12c8] sm:$0xff]  ;;  %v2430_v46 = vld [vmem:[#allocation4 + $0x12d8] sm:$0xff] }
 0x720   :  { %3653 = vmatpush1.bf16.msra.mxu0 %v2251_v47  ;;  %3817 = vmatpush1.bf16.msra.mxu1 %v2253_v48  ;;  %v2427_v47 = vld [vmem:[#allocation4 + $0x12c0] sm:$0xff]  ;;  %v2429_v48 = vld [vmem:[#allocation4 + $0x12d0] sm:$0xff] }
 0x721   :  { %3654 = vmatprep.subr.bf16.mxu0 %v2268_v49  ;;  %3818 = vmatprep.subr.bf16.mxu1 %v2270_v50  ;;  %v2444_v49 = vld [vmem:[#allocation4 + $0x1348] sm:$0xff]  ;;  %v2446_v50 = vld [vmem:[#allocation4 + $0x1358] sm:$0xff] }
 0x724   :  { %3655 = vmatpush1.bf16.msra.mxu0 %v2267_v51  ;;  %3819 = vmatpush1.bf16.msra.mxu1 %v2269_v52  ;;  %v2443_v51 = vld [vmem:[#allocation4 + $0x1340] sm:$0xff]  ;;  %v2445_v52 = vld [vmem:[#allocation4 + $0x1350] sm:$0xff] }
 0x725   :  { %3656 = vmatprep.subr.bf16.mxu0 %v2284_v30  ;;  %3820 = vmatprep.subr.bf16.mxu1 %v2286_v53  ;;  %v2460_v30 = vld [vmem:[#allocation4 + $0x13c8] sm:$0xff]  ;;  %v2462_v53 = vld [vmem:[#allocation4 + $0x13d8] sm:$0xff] }
 0x728   :  { %3657 = vmatpush1.bf16.msra.mxu0 %v2283_v59  ;;  %3821 = vmatpush1.bf16.msra.mxu1 %v2285_v54  ;;  %v2459_v59 = vld [vmem:[#allocation4 + $0x13c0] sm:$0xff]  ;;  %v2461_v54 = vld [vmem:[#allocation4 + $0x13d0] sm:$0xff] }
 0x729   :  { %3658 = vmatprep.subr.bf16.mxu0 %v2300_v55  ;;  %3822 = vmatprep.subr.bf16.mxu1 %v2302_v56  ;;  %v2476_v55 = vld [vmem:[#allocation4 + $0x1448] sm:$0xff]  ;;  %v2478_v56 = vld [vmem:[#allocation4 + $0x1458] sm:$0xff] }
 0x72c   :  { %3659 = vmatpush1.bf16.msra.mxu0 %v2299_v33  ;;  %3823 = vmatpush1.bf16.msra.mxu1 %v2301_v57  ;;  %v2475_v33 = vld [vmem:[#allocation4 + $0x1440] sm:$0xff]  ;;  %v2477_v57 = vld [vmem:[#allocation4 + $0x1450] sm:$0xff] }
 0x72d   :  { %3660 = vmatprep.subr.bf16.mxu0 %v2316_v3  ;;  %3824 = vmatprep.subr.bf16.mxu1 %v2318_v4  ;;  %v2492_v3 = vld [vmem:[#allocation4 + $0x14c8] sm:$0xff]  ;;  %v2494_v4 = vld [vmem:[#allocation4 + $0x14d8] sm:$0xff] }
 0x730   :  { %3661 = vmatpush1.bf16.msra.mxu0 %v2315_v31  ;;  %3825 = vmatpush1.bf16.msra.mxu1 %v2317_v12  ;;  %v2491_v31 = vld [vmem:[#allocation4 + $0x14c0] sm:$0xff]  ;;  %v2493_v12 = vld [vmem:[#allocation4 + $0x14d0] sm:$0xff] }
 0x731   :  { %3662 = vmatprep.subr.bf16.mxu0 %v2332_v60  ;;  %3826 = vmatprep.subr.bf16.mxu1 %v2334_v13  ;;  %v2508_v60 = vld [vmem:[#allocation4 + $0x1548] sm:$0xff]  ;;  %v2510_v13 = vld [vmem:[#allocation4 + $0x1558] sm:$0xff] }
 0x734   :  { %3663 = vmatpush1.bf16.msra.mxu0 %v2331_v14  ;;  %3827 = vmatpush1.bf16.msra.mxu1 %v2333_v1  ;;  %v2507_v14 = vld [vmem:[#allocation4 + $0x1540] sm:$0xff]  ;;  %v2509_v1 = vld [vmem:[#allocation4 + $0x1550] sm:$0xff] }
 0x735   :  { %3673 = vmatprep.subr.bf16.mxu0 %v2348_v15  ;;  %3837 = vmatprep.subr.bf16.mxu1 %v2350_v16  ;;  %v2524_v15 = vld [vmem:[#allocation4 + $0x15c8] sm:$0xff]  ;;  %v2526_v16 = vld [vmem:[#allocation4 + $0x15d8] sm:$0xff] }
 0x737   :  { %3665 = vmatmul.mubr.bf16.vlgmr.msra.gmra.mrb[24].mxu0 %v9262_v63  ;;  %3829 = vmatmul.mubr.bf16.vlgmr.msra.gmra.mrb[24].mxu1 %v9262_v63 }
 0x738   :  { %3674 = vmatpush1.bf16.msra.mxu0 %v2347_v58  ;;  %3838 = vmatpush1.bf16.msra.mxu1 %v2349_v17  ;;  %v2523_v58 = vld [vmem:[#allocation4 + $0x15c0] sm:$0xff]  ;;  %v2525_v17 = vld [vmem:[#allocation4 + $0x15d0] sm:$0xff] }
 0x739   :  { %3675 = vmatprep.subr.bf16.mxu0 %v2364_v18  ;;  %3839 = vmatprep.subr.bf16.mxu1 %v2366_v19  ;;  %v2540_v18 = vld [vmem:[#allocation4 + $0x1648] sm:$0xff]  ;;  %v2542_v19 = vld [vmem:[#allocation4 + $0x1658] sm:$0xff] }
 0x73a   :  { %3705 = vmatprep.mubr.bf16.mxu0 %v9282_v21  ;;  %3869 = vmatprep.mubr.bf16.mxu1 %v9282_v21 }
 0x73c   :  { %3676 = vmatpush1.bf16.msra.mxu0 %v2363_v20  ;;  %3840 = vmatpush1.bf16.msra.mxu1 %v2365_v61  ;;  %v2539_v20 = vld [vmem:[#allocation4 + $0x1640] sm:$0xff]  ;;  %v2541_v61 = vld [vmem:[#allocation4 + $0x1650] sm:$0xff] }
 0x73d   :  { %3677 = vmatprep.subr.bf16.mxu0 %v2380_v22  ;;  %3841 = vmatprep.subr.bf16.mxu1 %v2382_v23  ;;  %v2556_v22 = vld [vmem:[#allocation4 + $0x16c8] sm:$0xff]  ;;  %v2558_v23 = vld [vmem:[#allocation4 + $0x16d8] sm:$0xff] }
 0x740   :  { %3678 = vmatpush1.bf16.msra.mxu0 %v2379_v24  ;;  %3842 = vmatpush1.bf16.msra.mxu1 %v2381_v25  ;;  %v2555_v24 = vld [vmem:[#allocation4 + $0x16c0] sm:$0xff]  ;;  %v2557_v25 = vld [vmem:[#allocation4 + $0x16d0] sm:$0xff] }
 0x741   :  { %3679 = vmatprep.subr.bf16.mxu0 %v2396_v26  ;;  %3843 = vmatprep.subr.bf16.mxu1 %v2398_v27  ;;  %v2572_v26 = vld [vmem:[#allocation4 + $0x1748] sm:$0xff]  ;;  %v2574_v27 = vld [vmem:[#allocation4 + $0x1758] sm:$0xff] }
 0x744   :  { %3680 = vmatpush1.bf16.msra.mxu0 %v2395_v40  ;;  %3844 = vmatpush1.bf16.msra.mxu1 %v2397_v41  ;;  %v2571_v40 = vld [vmem:[#allocation4 + $0x1740] sm:$0xff]  ;;  %v2573_v41 = vld [vmem:[#allocation4 + $0x1750] sm:$0xff] }
 0x745   :  { %3681 = vmatprep.subr.bf16.mxu0 %v2412_v42  ;;  %3845 = vmatprep.subr.bf16.mxu1 %v2414_v43  ;;  %v2588_v42 = vld [vmem:[#allocation4 + $0x17c8] sm:$0xff]  ;;  %v2590_v43 = vld [vmem:[#allocation4 + $0x17d8] sm:$0xff] }
 0x748   :  { %3682 = vmatpush1.bf16.msra.mxu0 %v2411_v32  ;;  %3846 = vmatpush1.bf16.msra.mxu1 %v2413_v44  ;;  %v2587_v32 = vld [vmem:[#allocation4 + $0x17c0] sm:$0xff]  ;;  %v2589_v44 = vld [vmem:[#allocation4 + $0x17d0] sm:$0xff] }
 0x749   :  { %3683 = vmatprep.subr.bf16.mxu0 %v2428_v45  ;;  %3847 = vmatprep.subr.bf16.mxu1 %v2430_v46  ;;  %v2604_v45 = vld [vmem:[#allocation4 + $0x1848] sm:$0xff]  ;;  %v2606_v46 = vld [vmem:[#allocation4 + $0x1858] sm:$0xff] }
 0x74c   :  { %3684 = vmatpush1.bf16.msra.mxu0 %v2427_v47  ;;  %3848 = vmatpush1.bf16.msra.mxu1 %v2429_v48  ;;  %v2603_v47 = vld [vmem:[#allocation4 + $0x1840] sm:$0xff]  ;;  %v2605_v48 = vld [vmem:[#allocation4 + $0x1850] sm:$0xff] }
 0x74d   :  { %3685 = vmatprep.subr.bf16.mxu0 %v2444_v49  ;;  %3849 = vmatprep.subr.bf16.mxu1 %v2446_v50  ;;  %v2620_v49 = vld [vmem:[#allocation4 + $0x18c8] sm:$0xff]  ;;  %v2622_v50 = vld [vmem:[#allocation4 + $0x18d8] sm:$0xff] }
 0x750   :  { %3686 = vmatpush1.bf16.msra.mxu0 %v2443_v51  ;;  %3850 = vmatpush1.bf16.msra.mxu1 %v2445_v52  ;;  %v2619_v51 = vld [vmem:[#allocation4 + $0x18c0] sm:$0xff]  ;;  %v2621_v52 = vld [vmem:[#allocation4 + $0x18d0] sm:$0xff] }
 0x751   :  { %3687 = vmatprep.subr.bf16.mxu0 %v2460_v30  ;;  %3851 = vmatprep.subr.bf16.mxu1 %v2462_v53  ;;  %v2636_v30 = vld [vmem:[#allocation4 + $0x1948] sm:$0xff]  ;;  %v2638_v53 = vld [vmem:[#allocation4 + $0x1958] sm:$0xff] }
 0x754   :  { %3688 = vmatpush1.bf16.msra.mxu0 %v2459_v59  ;;  %3852 = vmatpush1.bf16.msra.mxu1 %v2461_v54  ;;  %v2635_v59 = vld [vmem:[#allocation4 + $0x1940] sm:$0xff]  ;;  %v2637_v54 = vld [vmem:[#allocation4 + $0x1950] sm:$0xff] }
 0x755   :  { %3689 = vmatprep.subr.bf16.mxu0 %v2476_v55  ;;  %3853 = vmatprep.subr.bf16.mxu1 %v2478_v56  ;;  %v2652_v55 = vld [vmem:[#allocation4 + $0x19c8] sm:$0xff]  ;;  %v2654_v56 = vld [vmem:[#allocation4 + $0x19d8] sm:$0xff] }
 0x758   :  { %3690 = vmatpush1.bf16.msra.mxu0 %v2475_v33  ;;  %3854 = vmatpush1.bf16.msra.mxu1 %v2477_v57  ;;  %v2651_v33 = vld [vmem:[#allocation4 + $0x19c0] sm:$0xff]  ;;  %v2653_v57 = vld [vmem:[#allocation4 + $0x19d0] sm:$0xff] }
 0x759   :  { %3691 = vmatprep.subr.bf16.mxu0 %v2492_v3  ;;  %3855 = vmatprep.subr.bf16.mxu1 %v2494_v4  ;;  %v2668_v3 = vld [vmem:[#allocation4 + $0x1a48] sm:$0xff]  ;;  %v2670_v4 = vld [vmem:[#allocation4 + $0x1a58] sm:$0xff] }
 0x75c   :  { %3692 = vmatpush1.bf16.msra.mxu0 %v2491_v31  ;;  %3856 = vmatpush1.bf16.msra.mxu1 %v2493_v12  ;;  %v2667_v31 = vld [vmem:[#allocation4 + $0x1a40] sm:$0xff]  ;;  %v2669_v12 = vld [vmem:[#allocation4 + $0x1a50] sm:$0xff] }
 0x75d   :  { %3693 = vmatprep.subr.bf16.mxu0 %v2508_v60  ;;  %3857 = vmatprep.subr.bf16.mxu1 %v2510_v13  ;;  %v2684_v60 = vld [vmem:[#allocation4 + $0x1ac8] sm:$0xff]  ;;  %v2686_v13 = vld [vmem:[#allocation4 + $0x1ad8] sm:$0xff] }
 0x760   :  { %3694 = vmatpush1.bf16.msra.mxu0 %v2507_v14  ;;  %3858 = vmatpush1.bf16.msra.mxu1 %v2509_v1  ;;  %v8684_v14 = vld [vmem:[#allocation15] sm:$0xff] }
 0x761   :  { %3695 = vmatprep.subr.bf16.mxu0 %v2524_v15  ;;  %3859 = vmatprep.subr.bf16.mxu1 %v2526_v16  ;;  %v2874_v1 = vrot.slane %v8684_v14, %v9200_v34  ;;  %v2882_v15 = vrot.slane %v8684_v14, %v9202_v35  ;;  %v2878_v16 = vrot.slane %v8684_v14, %v9204_v36 }
 0x764   :  { %3696 = vmatpush1.bf16.msra.mxu0 %v2523_v58  ;;  %3860 = vmatpush1.bf16.msra.mxu1 %v2525_v17  ;;  %v2886_v58 = vrot.slane %v8684_v14, %v9206_v37  ;;  %v2683_v17 = vld [vmem:[#allocation4 + $0x1ac0] sm:$0xff]  ;;  %v2766_v14 = vld [vmem:[#allocation4 + $0x1d58] sm:$0xff] }
 0x765   :  { %3697 = vmatprep.subr.bf16.mxu0 %v2540_v18  ;;  %3861 = vmatprep.subr.bf16.mxu1 %v2542_v19  ;;  %v2685_v18 = vld [vmem:[#allocation4 + $0x1ad0] sm:$0xff] }
 0x768   :  { %3698 = vmatpush1.bf16.msra.mxu0 %v2539_v20  ;;  %3862 = vmatpush1.bf16.msra.mxu1 %v2541_v61  ;;  %v2700_v61 = vld [vmem:[#allocation4 + $0x1b48] sm:$0xff] }
 0x769   :  { %3699 = vmatprep.subr.bf16.mxu0 %v2556_v22  ;;  %3863 = vmatprep.subr.bf16.mxu1 %v2558_v23  ;;  %v2702_v22 = vld [vmem:[#allocation4 + $0x1b58] sm:$0xff] }
 0x76c   :  { %3700 = vmatpush1.bf16.msra.mxu0 %v2555_v24  ;;  %3864 = vmatpush1.bf16.msra.mxu1 %v2557_v25 }
 0x76d   :  { %3701 = vmatprep.subr.bf16.mxu0 %v2572_v26  ;;  %3865 = vmatprep.subr.bf16.mxu1 %v2574_v27 }
 0x770   :  { %3702 = vmatpush1.bf16.msra.mxu0 %v2571_v40  ;;  %3866 = vmatpush1.bf16.msra.mxu1 %v2573_v41 }
 0x771   :  { %3703 = vmatprep.subr.bf16.mxu0 %v2588_v42  ;;  %3867 = vmatprep.subr.bf16.mxu1 %v2590_v43 }
 0x774   :  { %3704 = vmatpush1.bf16.msra.mxu0 %v2587_v32  ;;  %3868 = vmatpush1.bf16.msra.mxu1 %v2589_v44 }
 0x775   :  { %3714 = vmatprep.subr.bf16.mxu0 %v2604_v45  ;;  %3878 = vmatprep.subr.bf16.mxu1 %v2606_v46  ;;  %v2699_v46 = vld [vmem:[#allocation4 + $0x1b40] sm:$0xff] }
 0x777   :  { %3706 = vmatmul.mubr.bf16.vlgmr.msra.gmra.mrb[24].mxu0 %v9278_v5  ;;  %3870 = vmatmul.mubr.bf16.vlgmr.msra.gmra.mrb[24].mxu1 %v9278_v5 }
 0x778   :  { %3715 = vmatpush1.bf16.msra.mxu0 %v2603_v47  ;;  %3879 = vmatpush1.bf16.msra.mxu1 %v2605_v48  ;;  %v2701_v47 = vld [vmem:[#allocation4 + $0x1b50] sm:$0xff] }
 0x779   :  { %3716 = vmatprep.subr.bf16.mxu0 %v2620_v49  ;;  %3880 = vmatprep.subr.bf16.mxu1 %v2622_v50  ;;  %v2716_v50 = vld [vmem:[#allocation4 + $0x1bc8] sm:$0xff] }
 0x77a   :  { %3746 = vmatprep.mubr.bf16.mxu0 %v9284_v11  ;;  %3910 = vmatprep.mubr.bf16.mxu1 %v9284_v11 }
 0x77c   :  { %3717 = vmatpush1.bf16.msra.mxu0 %v2619_v51  ;;  %3881 = vmatpush1.bf16.msra.mxu1 %v2621_v52  ;;  %v2718_v51 = vld [vmem:[#allocation4 + $0x1bd8] sm:$0xff] }
 0x77d   :  { %3718 = vmatprep.subr.bf16.mxu0 %v2636_v30  ;;  %3882 = vmatprep.subr.bf16.mxu1 %v2638_v53 }
 0x780   :  { %3719 = vmatpush1.bf16.msra.mxu0 %v2635_v59  ;;  %3883 = vmatpush1.bf16.msra.mxu1 %v2637_v54  ;;  %v2715_v54 = vld [vmem:[#allocation4 + $0x1bc0] sm:$0xff] }
 0x781   :  { %3720 = vmatprep.subr.bf16.mxu0 %v2652_v55  ;;  %3884 = vmatprep.subr.bf16.mxu1 %v2654_v56  ;;  %v2717_v55 = vld [vmem:[#allocation4 + $0x1bd0] sm:$0xff]  ;;  %v2732_v56 = vld [vmem:[#allocation4 + $0x1c48] sm:$0xff] }
 0x784   :  { %3721 = vmatpush1.bf16.msra.mxu0 %v2651_v33  ;;  %3885 = vmatpush1.bf16.msra.mxu1 %v2653_v57  ;;  %v2734_v33 = vld [vmem:[#allocation4 + $0x1c58] sm:$0xff]  ;;  %v2731_v57 = vld [vmem:[#allocation4 + $0x1c40] sm:$0xff] }
 0x785   :  { %3722 = vmatprep.subr.bf16.mxu0 %v2668_v3  ;;  %3886 = vmatprep.subr.bf16.mxu1 %v2670_v4  ;;  %v2733_v3 = vld [vmem:[#allocation4 + $0x1c50] sm:$0xff]  ;;  %v2748_v4 = vld [vmem:[#allocation4 + $0x1cc8] sm:$0xff] }
 0x788   :  { %3723 = vmatpush1.bf16.msra.mxu0 %v2667_v31  ;;  %3887 = vmatpush1.bf16.msra.mxu1 %v2669_v12  ;;  %v2750_v31 = vld [vmem:[#allocation4 + $0x1cd8] sm:$0xff]  ;;  %v2747_v12 = vld [vmem:[#allocation4 + $0x1cc0] sm:$0xff] }
 0x789   :  { %3724 = vmatprep.subr.bf16.mxu0 %v2684_v60  ;;  %3888 = vmatprep.subr.bf16.mxu1 %v2686_v13  ;;  %v2749_v60 = vld [vmem:[#allocation4 + $0x1cd0] sm:$0xff]  ;;  %v2764_v13 = vld [vmem:[#allocation4 + $0x1d48] sm:$0xff] }
 0x78a   :  { %v3420_v19 = vpop.f32.mrb[20].mxu0  ;;  %v3584_v20 = vpop.f32.mrb[20].mxu1 }
 0x78b   :  { %v8318_v23 = vadd.f32 %v3420_v19, %v2874_v1  ;;  %v8320_v24 = vadd.f32 %v3584_v20, %v2882_v15  ;;  %v3422_v25 = vpop.f32.mrb[21].mxu0  ;;  %v3586_v26 = vpop.f32.mrb[21].mxu1  ;;  %v2763_v1 = vld [vmem:[#allocation4 + $0x1d40] sm:$0xff]  ;;  %v2765_v15 = vld [vmem:[#allocation4 + $0x1d50] sm:$0xff]  ;;  %v2796_v19 = vld [vmem:[#allocation4 + $0x1e48] sm:$0xff] }
 0x78c   :  { %v8319_v27 = vadd.f32 %v3422_v25, %v2878_v16  ;;  %v8321_v40 = vadd.f32 %v3586_v26, %v2886_v58  ;;  %v3424_v41 = vpop.f32.mrb[22].mxu0  ;;  %v3588_v42 = vpop.f32.mrb[22].mxu1  ;;  %3725 = vmatpush1.bf16.msra.mxu0 %v2683_v17  ;;  %3889 = vmatpush1.bf16.msra.mxu1 %v2685_v18  ;;  %v2780_v16 = vld [vmem:[#allocation4 + $0x1dc8] sm:$0xff]  ;;  %v2782_v58 = vld [vmem:[#allocation4 + $0x1dd8] sm:$0xff]  ;;  %v2779_v17 = vld [vmem:[#allocation4 + $0x1dc0] sm:$0xff] }
 0x78d   :  { %v4251_v43 = vmax.f32 %v8318_v23, 0.0  ;;  %v4253_v32 = vmax.f32 %v8320_v24, 0.0  ;;  %v3425_v44 = vpop.f32.mrb[23].mxu0  ;;  %v3589_v45 = vpop.f32.mrb[23].mxu1  ;;  %3726 = vmatprep.subr.bf16.mxu0 %v2700_v61  ;;  %3890 = vmatprep.subr.bf16.mxu1 %v2702_v22  ;;  %v2781_v18 = vld [vmem:[#allocation4 + $0x1dd0] sm:$0xff]  ;;  %v2798_v20 = vld [vmem:[#allocation4 + $0x1e58] sm:$0xff] }
 0x78e   :  { %v4252_v48 = vmax.f32 %v8319_v27, 0.0  ;;  %v4254_v49 = vmax.f32 %v8321_v40, 0.0  ;;  %v2795_v61 = vld [vmem:[#allocation4 + $0x1e40] sm:$0xff]  ;;  %v2797_v22 = vld [vmem:[#allocation4 + $0x1e50] sm:$0xff]  ;;  %v2812_v23 = vld [vmem:[#allocation4 + $0x1ec8] sm:$0xff] }
 0x78f   :  { %v9348_v52 = vpack.c.bf16 %v4251_v43, %v4251_v43  ;;  %v9350_v30 = vpack.c.bf16 %v4253_v32, %v4253_v32  ;;  %v2814_v24 = vld [vmem:[#allocation4 + $0x1ed8] sm:$0xff]  ;;  %v2811_v25 = vld [vmem:[#allocation4 + $0x1ec0] sm:$0xff]  ;;  %v2813_v26 = vld [vmem:[#allocation4 + $0x1ed0] sm:$0xff] }
 0x790   :  { %v9352_v53 = vpack.c.bf16 %v4252_v48, %v4252_v48  ;;  %v9354_v59 = vpack.c.bf16 %v4254_v49, %v4254_v49  ;;  %3727 = vmatpush1.bf16.msra.mxu0 %v2699_v46  ;;  %3891 = vmatpush1.bf16.msra.mxu1 %v2701_v47  ;;  %v2828_v27 = vld [vmem:[#allocation4 + $0x1f48] sm:$0xff]  ;;  %v2830_v40 = vld [vmem:[#allocation4 + $0x1f58] sm:$0xff]  ;;  %v2827_v41 = vld [vmem:[#allocation4 + $0x1f40] sm:$0xff] }
 0x791   :  { %3728 = vmatprep.subr.bf16.mxu0 %v2716_v50  ;;  %3892 = vmatprep.subr.bf16.mxu1 %v2718_v51  ;;  %v2829_v42 = vld [vmem:[#allocation4 + $0x1f50] sm:$0xff]  ;;  %v2844_v43 = vld [vmem:[#allocation4 + $0x1fc8] sm:$0xff]  ;;  %v2846_v32 = vld [vmem:[#allocation4 + $0x1fd8] sm:$0xff] }
 0x792   :  { %v2843_v44 = vld [vmem:[#allocation4 + $0x1fc0] sm:$0xff]  ;;  %v2845_v45 = vld [vmem:[#allocation4 + $0x1fd0] sm:$0xff]  ;;  %v1840_v46 = vld [vmem:[#allocation4 + $0x68] sm:$0xff] }
 0x793   :  { %v1842_v47 = vld [vmem:[#allocation4 + $0x78] sm:$0xff]  ;;  %v1839_v48 = vld [vmem:[#allocation4 + $0x60] sm:$0xff]  ;;  %v1841_v49 = vld [vmem:[#allocation4 + $0x70] sm:$0xff] }
 0x794   :  { %3729 = vmatpush1.bf16.msra.mxu0 %v2715_v54  ;;  %3893 = vmatpush1.bf16.msra.mxu1 %v2717_v55  ;;  %v1856_v50 = vld [vmem:[#allocation4 + $0xe8] sm:$0xff]  ;;  %v1858_v51 = vld [vmem:[#allocation4 + $0xf8] sm:$0xff]  ;;  %v1855_v54 = vld [vmem:[#allocation4 + $0xe0] sm:$0xff] }
 0x795   :  { %3730 = vmatprep.subr.bf16.mxu0 %v2732_v56  ;;  %3894 = vmatprep.subr.bf16.mxu1 %v2734_v33  ;;  %v1857_v55 = vld [vmem:[#allocation4 + $0xf0] sm:$0xff]  ;;  %v1872_v56 = vld [vmem:[#allocation4 + $0x168] sm:$0xff]  ;;  %v1874_v33 = vld [vmem:[#allocation4 + $0x178] sm:$0xff] }
 0x798   :  { %3731 = vmatpush1.bf16.msra.mxu0 %v2731_v57  ;;  %3895 = vmatpush1.bf16.msra.mxu1 %v2733_v3  ;;  %v1871_v57 = vld [vmem:[#allocation4 + $0x160] sm:$0xff]  ;;  %v1873_v3 = vld [vmem:[#allocation4 + $0x170] sm:$0xff] }
 0x799   :  { %3732 = vmatprep.subr.bf16.mxu0 %v2748_v4  ;;  %3896 = vmatprep.subr.bf16.mxu1 %v2750_v31  ;;  %v1888_v4 = vld [vmem:[#allocation4 + $0x1e8] sm:$0xff]  ;;  %v1890_v31 = vld [vmem:[#allocation4 + $0x1f8] sm:$0xff] }
 0x79c   :  { %3733 = vmatpush1.bf16.msra.mxu0 %v2747_v12  ;;  %3897 = vmatpush1.bf16.msra.mxu1 %v2749_v60  ;;  %v1887_v12 = vld [vmem:[#allocation4 + $0x1e0] sm:$0xff]  ;;  %v1889_v60 = vld [vmem:[#allocation4 + $0x1f0] sm:$0xff] }
 0x79d   :  { %3734 = vmatprep.subr.bf16.mxu0 %v2764_v13  ;;  %3898 = vmatprep.subr.bf16.mxu1 %v2766_v14  ;;  %v1904_v13 = vld [vmem:[#allocation4 + $0x268] sm:$0xff]  ;;  %v1906_v14 = vld [vmem:[#allocation4 + $0x278] sm:$0xff] }
 0x7a0   :  { %3735 = vmatpush1.bf16.msra.mxu0 %v2763_v1  ;;  %3899 = vmatpush1.bf16.msra.mxu1 %v2765_v15  ;;  %v1905_v1 = vld [vmem:[#allocation4 + $0x270] sm:$0xff]  ;;  %v1920_v15 = vld [vmem:[#allocation4 + $0x2e8] sm:$0xff] }
 0x7a1   :  { %3736 = vmatprep.subr.bf16.mxu0 %v2780_v16  ;;  %3900 = vmatprep.subr.bf16.mxu1 %v2782_v58  ;;  %v1922_v16 = vld [vmem:[#allocation4 + $0x2f8] sm:$0xff]  ;;  %v1919_v58 = vld [vmem:[#allocation4 + $0x2e0] sm:$0xff] }
 0x7a4   :  { %3737 = vmatpush1.bf16.msra.mxu0 %v2779_v17  ;;  %3901 = vmatpush1.bf16.msra.mxu1 %v2781_v18  ;;  %v1921_v17 = vld [vmem:[#allocation4 + $0x2f0] sm:$0xff]  ;;  %v1936_v18 = vld [vmem:[#allocation4 + $0x368] sm:$0xff] }
 0x7a5   :  { %3738 = vmatprep.subr.bf16.mxu0 %v2796_v19  ;;  %3902 = vmatprep.subr.bf16.mxu1 %v2798_v20  ;;  %v1938_v19 = vld [vmem:[#allocation4 + $0x378] sm:$0xff]  ;;  %v1935_v20 = vld [vmem:[#allocation4 + $0x360] sm:$0xff] }
 0x7a8   :  { %3739 = vmatpush1.bf16.msra.mxu0 %v2795_v61  ;;  %3903 = vmatpush1.bf16.msra.mxu1 %v2797_v22  ;;  %v1937_v61 = vld [vmem:[#allocation4 + $0x370] sm:$0xff]  ;;  %v1952_v22 = vld [vmem:[#allocation4 + $0x3e8] sm:$0xff] }
 0x7a9   :  { %3740 = vmatprep.subr.bf16.mxu0 %v2812_v23  ;;  %3904 = vmatprep.subr.bf16.mxu1 %v2814_v24  ;;  %v1954_v23 = vld [vmem:[#allocation4 + $0x3f8] sm:$0xff]  ;;  %v1951_v24 = vld [vmem:[#allocation4 + $0x3e0] sm:$0xff] }
 0x7ac   :  { %3741 = vmatpush1.bf16.msra.mxu0 %v2811_v25  ;;  %3905 = vmatpush1.bf16.msra.mxu1 %v2813_v26  ;;  %v1953_v25 = vld [vmem:[#allocation4 + $0x3f0] sm:$0xff]  ;;  %v1968_v26 = vld [vmem:[#allocation4 + $0x468] sm:$0xff] }
 0x7ad   :  { %3742 = vmatprep.subr.bf16.mxu0 %v2828_v27  ;;  %3906 = vmatprep.subr.bf16.mxu1 %v2830_v40  ;;  %v1970_v27 = vld [vmem:[#allocation4 + $0x478] sm:$0xff]  ;;  %v1967_v40 = vld [vmem:[#allocation4 + $0x460] sm:$0xff] }
 0x7b0   :  { %3743 = vmatpush1.bf16.msra.mxu0 %v2827_v41  ;;  %3907 = vmatpush1.bf16.msra.mxu1 %v2829_v42  ;;  %v1969_v41 = vld [vmem:[#allocation4 + $0x470] sm:$0xff]  ;;  %v1984_v42 = vld [vmem:[#allocation4 + $0x4e8] sm:$0xff] }
 0x7b1   :  { %3744 = vmatprep.subr.bf16.mxu0 %v2844_v43  ;;  %3908 = vmatprep.subr.bf16.mxu1 %v2846_v32  ;;  %v1986_v43 = vld [vmem:[#allocation4 + $0x4f8] sm:$0xff]  ;;  %v1983_v32 = vld [vmem:[#allocation4 + $0x4e0] sm:$0xff] }
 0x7b4   :  { %3745 = vmatpush1.bf16.msra.mxu0 %v2843_v44  ;;  %3909 = vmatpush1.bf16.msra.mxu1 %v2845_v45  ;;  %v1985_v44 = vld [vmem:[#allocation4 + $0x4f0] sm:$0xff]  ;;  %v2000_v45 = vld [vmem:[#allocation4 + $0x568] sm:$0xff] }
 0x7b5   :  { %3919 = vmatprep.subr.bf16.mxu0 %v1840_v46  ;;  %4083 = vmatprep.subr.bf16.mxu1 %v1842_v47  ;;  %v2002_v46 = vld [vmem:[#allocation4 + $0x578] sm:$0xff]  ;;  %v1999_v47 = vld [vmem:[#allocation4 + $0x560] sm:$0xff] }
 0x7b7   :  { %3747 = vmatmul.mubr.bf16.vlgmr.msra.gmra.mrb[24].mxu0 %v9280_v8  ;;  %3911 = vmatmul.mubr.bf16.vlgmr.msra.gmra.mrb[24].mxu1 %v9280_v8 }
 0x7b8   :  { %3920 = vmatpush1.bf16.msra.mxu0 %v1839_v48  ;;  %4084 = vmatpush1.bf16.msra.mxu1 %v1841_v49  ;;  %v2001_v48 = vld [vmem:[#allocation4 + $0x570] sm:$0xff]  ;;  %v2016_v49 = vld [vmem:[#allocation4 + $0x5e8] sm:$0xff] }
 0x7b9   :  { %3921 = vmatprep.subr.bf16.mxu0 %v1856_v50  ;;  %4085 = vmatprep.subr.bf16.mxu1 %v1858_v51  ;;  %v2018_v50 = vld [vmem:[#allocation4 + $0x5f8] sm:$0xff]  ;;  %v2015_v51 = vld [vmem:[#allocation4 + $0x5e0] sm:$0xff] }
 0x7ba   :  { %3951 = vmatprep.mubr.bf16.mxu0 %v9264_v0  ;;  %4115 = vmatprep.mubr.bf16.mxu1 %v9264_v0  ;;  %v1903_v0 = vld [vmem:[#allocation4 + $0x260] sm:$0xff] }
 0x7bc   :  { %3922 = vmatpush1.bf16.msra.mxu0 %v1855_v54  ;;  %4086 = vmatpush1.bf16.msra.mxu1 %v1857_v55  ;;  %v2017_v54 = vld [vmem:[#allocation4 + $0x5f0] sm:$0xff]  ;;  %v2032_v55 = vld [vmem:[#allocation4 + $0x668] sm:$0xff] }
 0x7bd   :  { %3923 = vmatprep.subr.bf16.mxu0 %v1872_v56  ;;  %4087 = vmatprep.subr.bf16.mxu1 %v1874_v33  ;;  %v2034_v56 = vld [vmem:[#allocation4 + $0x678] sm:$0xff]  ;;  %v2031_v33 = vld [vmem:[#allocation4 + $0x660] sm:$0xff] }
 0x7c0   :  { %3924 = vmatpush1.bf16.msra.mxu0 %v1871_v57  ;;  %4088 = vmatpush1.bf16.msra.mxu1 %v1873_v3  ;;  %v2033_v57 = vld [vmem:[#allocation4 + $0x670] sm:$0xff]  ;;  %v2048_v3 = vld [vmem:[#allocation4 + $0x6e8] sm:$0xff] }
 0x7c1   :  { %3925 = vmatprep.subr.bf16.mxu0 %v1888_v4  ;;  %4089 = vmatprep.subr.bf16.mxu1 %v1890_v31  ;;  %v2050_v4 = vld [vmem:[#allocation4 + $0x6f8] sm:$0xff]  ;;  %v2047_v31 = vld [vmem:[#allocation4 + $0x6e0] sm:$0xff] }
 0x7c4   :  { %3926 = vmatpush1.bf16.msra.mxu0 %v1887_v12  ;;  %4090 = vmatpush1.bf16.msra.mxu1 %v1889_v60  ;;  %v2049_v12 = vld [vmem:[#allocation4 + $0x6f0] sm:$0xff]  ;;  %v2064_v60 = vld [vmem:[#allocation4 + $0x768] sm:$0xff] }
 0x7c5   :  { %3927 = vmatprep.subr.bf16.mxu0 %v1904_v13  ;;  %4091 = vmatprep.subr.bf16.mxu1 %v1906_v14  ;;  %v2066_v13 = vld [vmem:[#allocation4 + $0x778] sm:$0xff]  ;;  %v2063_v14 = vld [vmem:[#allocation4 + $0x760] sm:$0xff] }
 0x7c8   :  { %3928 = vmatpush1.bf16.msra.mxu0 %v1903_v0  ;;  %4092 = vmatpush1.bf16.msra.mxu1 %v1905_v1  ;;  %v2065_v0 = vld [vmem:[#allocation4 + $0x770] sm:$0xff]  ;;  %v2080_v1 = vld [vmem:[#allocation4 + $0x7e8] sm:$0xff] }
 0x7c9   :  { %3929 = vmatprep.subr.bf16.mxu0 %v1920_v15  ;;  %4093 = vmatprep.subr.bf16.mxu1 %v1922_v16  ;;  %v2082_v15 = vld [vmem:[#allocation4 + $0x7f8] sm:$0xff]  ;;  %v2079_v16 = vld [vmem:[#allocation4 + $0x7e0] sm:$0xff] }
 0x7cc   :  { %3930 = vmatpush1.bf16.msra.mxu0 %v1919_v58  ;;  %4094 = vmatpush1.bf16.msra.mxu1 %v1921_v17  ;;  %v2081_v58 = vld [vmem:[#allocation4 + $0x7f0] sm:$0xff]  ;;  %v2096_v17 = vld [vmem:[#allocation4 + $0x868] sm:$0xff] }
 0x7cd   :  { %3931 = vmatprep.subr.bf16.mxu0 %v1936_v18  ;;  %4095 = vmatprep.subr.bf16.mxu1 %v1938_v19  ;;  %v2098_v18 = vld [vmem:[#allocation4 + $0x878] sm:$0xff]  ;;  %v2095_v19 = vld [vmem:[#allocation4 + $0x860] sm:$0xff] }
 0x7d0   :  { %3932 = vmatpush1.bf16.msra.mxu0 %v1935_v20  ;;  %4096 = vmatpush1.bf16.msra.mxu1 %v1937_v61  ;;  %v2097_v20 = vld [vmem:[#allocation4 + $0x870] sm:$0xff]  ;;  %v2112_v61 = vld [vmem:[#allocation4 + $0x8e8] sm:$0xff] }
 0x7d1   :  { %3933 = vmatprep.subr.bf16.mxu0 %v1952_v22  ;;  %4097 = vmatprep.subr.bf16.mxu1 %v1954_v23  ;;  %v2114_v22 = vld [vmem:[#allocation4 + $0x8f8] sm:$0xff]  ;;  %v2111_v23 = vld [vmem:[#allocation4 + $0x8e0] sm:$0xff] }
 0x7d4   :  { %3934 = vmatpush1.bf16.msra.mxu0 %v1951_v24  ;;  %4098 = vmatpush1.bf16.msra.mxu1 %v1953_v25  ;;  %v2113_v24 = vld [vmem:[#allocation4 + $0x8f0] sm:$0xff]  ;;  %v2128_v25 = vld [vmem:[#allocation4 + $0x968] sm:$0xff] }
 0x7d5   :  { %3935 = vmatprep.subr.bf16.mxu0 %v1968_v26  ;;  %4099 = vmatprep.subr.bf16.mxu1 %v1970_v27  ;;  %v2130_v26 = vld [vmem:[#allocation4 + $0x978] sm:$0xff]  ;;  %v2127_v27 = vld [vmem:[#allocation4 + $0x960] sm:$0xff] }
 0x7d8   :  { %3936 = vmatpush1.bf16.msra.mxu0 %v1967_v40  ;;  %4100 = vmatpush1.bf16.msra.mxu1 %v1969_v41  ;;  %v2129_v40 = vld [vmem:[#allocation4 + $0x970] sm:$0xff]  ;;  %v2144_v41 = vld [vmem:[#allocation4 + $0x9e8] sm:$0xff] }
 0x7d9   :  { %3937 = vmatprep.subr.bf16.mxu0 %v1984_v42  ;;  %4101 = vmatprep.subr.bf16.mxu1 %v1986_v43  ;;  %v2143_v42 = vld [vmem:[#allocation4 + $0x9e0] sm:$0xff]  ;;  %v2145_v43 = vld [vmem:[#allocation4 + $0x9f0] sm:$0xff] }
 0x7dc   :  { %3938 = vmatpush1.bf16.msra.mxu0 %v1983_v32  ;;  %4102 = vmatpush1.bf16.msra.mxu1 %v1985_v44  ;;  %v2160_v32 = vld [vmem:[#allocation4 + $0xa68] sm:$0xff]  ;;  %v2162_v44 = vld [vmem:[#allocation4 + $0xa78] sm:$0xff] }
 0x7dd   :  { %3939 = vmatprep.subr.bf16.mxu0 %v2000_v45  ;;  %4103 = vmatprep.subr.bf16.mxu1 %v2002_v46  ;;  %v2161_v45 = vld [vmem:[#allocation4 + $0xa70] sm:$0xff]  ;;  %v2176_v46 = vld [vmem:[#allocation4 + $0xae8] sm:$0xff] }
 0x7e0   :  { %3940 = vmatpush1.bf16.msra.mxu0 %v1999_v47  ;;  %4104 = vmatpush1.bf16.msra.mxu1 %v2001_v48  ;;  %v2178_v47 = vld [vmem:[#allocation4 + $0xaf8] sm:$0xff]  ;;  %v2175_v48 = vld [vmem:[#allocation4 + $0xae0] sm:$0xff] }
 0x7e1   :  { %3941 = vmatprep.subr.bf16.mxu0 %v2016_v49  ;;  %4105 = vmatprep.subr.bf16.mxu1 %v2018_v50  ;;  %v2177_v49 = vld [vmem:[#allocation4 + $0xaf0] sm:$0xff]  ;;  %v2192_v50 = vld [vmem:[#allocation4 + $0xb68] sm:$0xff] }
 0x7e4   :  { %3942 = vmatpush1.bf16.msra.mxu0 %v2015_v51  ;;  %4106 = vmatpush1.bf16.msra.mxu1 %v2017_v54  ;;  %v2194_v51 = vld [vmem:[#allocation4 + $0xb78] sm:$0xff]  ;;  %v2191_v54 = vld [vmem:[#allocation4 + $0xb60] sm:$0xff] }
 0x7e5   :  { %3943 = vmatprep.subr.bf16.mxu0 %v2032_v55  ;;  %4107 = vmatprep.subr.bf16.mxu1 %v2034_v56  ;;  %v2193_v55 = vld [vmem:[#allocation4 + $0xb70] sm:$0xff]  ;;  %v2208_v56 = vld [vmem:[#allocation4 + $0xbe8] sm:$0xff] }
 0x7e8   :  { %3944 = vmatpush1.bf16.msra.mxu0 %v2031_v33  ;;  %4108 = vmatpush1.bf16.msra.mxu1 %v2033_v57  ;;  %v2210_v33 = vld [vmem:[#allocation4 + $0xbf8] sm:$0xff]  ;;  %v2207_v57 = vld [vmem:[#allocation4 + $0xbe0] sm:$0xff] }
 0x7e9   :  { %3945 = vmatprep.subr.bf16.mxu0 %v2048_v3  ;;  %4109 = vmatprep.subr.bf16.mxu1 %v2050_v4  ;;  %v2209_v3 = vld [vmem:[#allocation4 + $0xbf0] sm:$0xff]  ;;  %v2224_v4 = vld [vmem:[#allocation4 + $0xc68] sm:$0xff] }
 0x7ec   :  { %3946 = vmatpush1.bf16.msra.mxu0 %v2047_v31  ;;  %4110 = vmatpush1.bf16.msra.mxu1 %v2049_v12  ;;  %v2226_v31 = vld [vmem:[#allocation4 + $0xc78] sm:$0xff]  ;;  %v2223_v12 = vld [vmem:[#allocation4 + $0xc60] sm:$0xff] }
 0x7ed   :  { %3947 = vmatprep.subr.bf16.mxu0 %v2064_v60  ;;  %4111 = vmatprep.subr.bf16.mxu1 %v2066_v13  ;;  %v2225_v60 = vld [vmem:[#allocation4 + $0xc70] sm:$0xff]  ;;  %v2240_v13 = vld [vmem:[#allocation4 + $0xce8] sm:$0xff] }
 0x7f0   :  { %3948 = vmatpush1.bf16.msra.mxu0 %v2063_v14  ;;  %4112 = vmatpush1.bf16.msra.mxu1 %v2065_v0  ;;  %v2242_v14 = vld [vmem:[#allocation4 + $0xcf8] sm:$0xff]  ;;  %v2239_v0 = vld [vmem:[#allocation4 + $0xce0] sm:$0xff] }
 0x7f1   :  { %3949 = vmatprep.subr.bf16.mxu0 %v2080_v1  ;;  %4113 = vmatprep.subr.bf16.mxu1 %v2082_v15  ;;  %v2241_v1 = vld [vmem:[#allocation4 + $0xcf0] sm:$0xff]  ;;  %v2256_v15 = vld [vmem:[#allocation4 + $0xd68] sm:$0xff] }
 0x7f4   :  { %3950 = vmatpush1.bf16.msra.mxu0 %v2079_v16  ;;  %4114 = vmatpush1.bf16.msra.mxu1 %v2081_v58  ;;  %v2258_v16 = vld [vmem:[#allocation4 + $0xd78] sm:$0xff]  ;;  %v2255_v58 = vld [vmem:[#allocation4 + $0xd60] sm:$0xff] }
 0x7f5   :  { %3960 = vmatprep.subr.bf16.mxu0 %v2096_v17  ;;  %4124 = vmatprep.subr.bf16.mxu1 %v2098_v18  ;;  %v2257_v17 = vld [vmem:[#allocation4 + $0xd70] sm:$0xff]  ;;  %v2272_v18 = vld [vmem:[#allocation4 + $0xde8] sm:$0xff] }
 0x7f7   :  { %3952 = vmatmul.mubr.bf16.vlgmr.msra.gmra.mrb[28].mxu0 %v9260_v62  ;;  %4116 = vmatmul.mubr.bf16.vlgmr.msra.gmra.mrb[28].mxu1 %v9260_v62  ;;  %v2146_v62 = vld [vmem:[#allocation4 + $0x9f8] sm:$0xff] }
 0x7f8   :  { %3961 = vmatpush1.bf16.msra.mxu0 %v2095_v19  ;;  %4125 = vmatpush1.bf16.msra.mxu1 %v2097_v20  ;;  %v2274_v19 = vld [vmem:[#allocation4 + $0xdf8] sm:$0xff]  ;;  %v2271_v20 = vld [vmem:[#allocation4 + $0xde0] sm:$0xff] }
 0x7f9   :  { %3962 = vmatprep.subr.bf16.mxu0 %v2112_v61  ;;  %4126 = vmatprep.subr.bf16.mxu1 %v2114_v22  ;;  %v2273_v61 = vld [vmem:[#allocation4 + $0xdf0] sm:$0xff]  ;;  %v2288_v22 = vld [vmem:[#allocation4 + $0xe68] sm:$0xff] }
 0x7fa   :  { %3992 = vmatprep.mubr.bf16.mxu0 %v9266_v2  ;;  %4156 = vmatprep.mubr.bf16.mxu1 %v9266_v2  ;;  %v2159_v2 = vld [vmem:[#allocation4 + $0xa60] sm:$0xff] }
 0x7fc   :  { %3963 = vmatpush1.bf16.msra.mxu0 %v2111_v23  ;;  %4127 = vmatpush1.bf16.msra.mxu1 %v2113_v24  ;;  %v2290_v23 = vld [vmem:[#allocation4 + $0xe78] sm:$0xff]  ;;  %v2287_v24 = vld [vmem:[#allocation4 + $0xe60] sm:$0xff] }
 0x7fd   :  { %3964 = vmatprep.subr.bf16.mxu0 %v2128_v25  ;;  %4128 = vmatprep.subr.bf16.mxu1 %v2130_v26  ;;  %v2289_v25 = vld [vmem:[#allocation4 + $0xe70] sm:$0xff]  ;;  %v2304_v26 = vld [vmem:[#allocation4 + $0xee8] sm:$0xff] }
 0x800   :  { %3965 = vmatpush1.bf16.msra.mxu0 %v2127_v27  ;;  %4129 = vmatpush1.bf16.msra.mxu1 %v2129_v40  ;;  %v2306_v27 = vld [vmem:[#allocation4 + $0xef8] sm:$0xff]  ;;  %v2303_v40 = vld [vmem:[#allocation4 + $0xee0] sm:$0xff] }
 0x801   :  { %3966 = vmatprep.subr.bf16.mxu0 %v2144_v41  ;;  %4130 = vmatprep.subr.bf16.mxu1 %v2146_v62  ;;  %v2305_v41 = vld [vmem:[#allocation4 + $0xef0] sm:$0xff]  ;;  %v2320_v62 = vld [vmem:[#allocation4 + $0xf68] sm:$0xff] }
 0x804   :  { %3967 = vmatpush1.bf16.msra.mxu0 %v2143_v42  ;;  %4131 = vmatpush1.bf16.msra.mxu1 %v2145_v43  ;;  %v2322_v42 = vld [vmem:[#allocation4 + $0xf78] sm:$0xff]  ;;  %v2319_v43 = vld [vmem:[#allocation4 + $0xf60] sm:$0xff] }
 0x805   :  { %3968 = vmatprep.subr.bf16.mxu0 %v2160_v32  ;;  %4132 = vmatprep.subr.bf16.mxu1 %v2162_v44  ;;  %v2321_v32 = vld [vmem:[#allocation4 + $0xf70] sm:$0xff]  ;;  %v2336_v44 = vld [vmem:[#allocation4 + $0xfe8] sm:$0xff] }
 0x808   :  { %3969 = vmatpush1.bf16.msra.mxu0 %v2159_v2  ;;  %4133 = vmatpush1.bf16.msra.mxu1 %v2161_v45  ;;  %v2338_v2 = vld [vmem:[#allocation4 + $0xff8] sm:$0xff]  ;;  %v2335_v45 = vld [vmem:[#allocation4 + $0xfe0] sm:$0xff] }
 0x809   :  { %3970 = vmatprep.subr.bf16.mxu0 %v2176_v46  ;;  %4134 = vmatprep.subr.bf16.mxu1 %v2178_v47  ;;  %v2337_v46 = vld [vmem:[#allocation4 + $0xff0] sm:$0xff]  ;;  %v2352_v47 = vld [vmem:[#allocation4 + $0x1068] sm:$0xff] }
 0x80c   :  { %3971 = vmatpush1.bf16.msra.mxu0 %v2175_v48  ;;  %4135 = vmatpush1.bf16.msra.mxu1 %v2177_v49  ;;  %v2354_v48 = vld [vmem:[#allocation4 + $0x1078] sm:$0xff]  ;;  %v2351_v49 = vld [vmem:[#allocation4 + $0x1060] sm:$0xff] }
 0x80d   :  { %3972 = vmatprep.subr.bf16.mxu0 %v2192_v50  ;;  %4136 = vmatprep.subr.bf16.mxu1 %v2194_v51  ;;  %v2353_v50 = vld [vmem:[#allocation4 + $0x1070] sm:$0xff]  ;;  %v2368_v51 = vld [vmem:[#allocation4 + $0x10e8] sm:$0xff] }
 0x810   :  { %3973 = vmatpush1.bf16.msra.mxu0 %v2191_v54  ;;  %4137 = vmatpush1.bf16.msra.mxu1 %v2193_v55  ;;  %v2370_v54 = vld [vmem:[#allocation4 + $0x10f8] sm:$0xff]  ;;  %v2367_v55 = vld [vmem:[#allocation4 + $0x10e0] sm:$0xff] }
 0x811   :  { %3974 = vmatprep.subr.bf16.mxu0 %v2208_v56  ;;  %4138 = vmatprep.subr.bf16.mxu1 %v2210_v33  ;;  %v2369_v56 = vld [vmem:[#allocation4 + $0x10f0] sm:$0xff]  ;;  %v2384_v33 = vld [vmem:[#allocation4 + $0x1168] sm:$0xff] }
 0x814   :  { %3975 = vmatpush1.bf16.msra.mxu0 %v2207_v57  ;;  %4139 = vmatpush1.bf16.msra.mxu1 %v2209_v3  ;;  %v2386_v57 = vld [vmem:[#allocation4 + $0x1178] sm:$0xff]  ;;  %v2383_v3 = vld [vmem:[#allocation4 + $0x1160] sm:$0xff] }
 0x815   :  { %3976 = vmatprep.subr.bf16.mxu0 %v2224_v4  ;;  %4140 = vmatprep.subr.bf16.mxu1 %v2226_v31  ;;  %v2385_v4 = vld [vmem:[#allocation4 + $0x1170] sm:$0xff]  ;;  %v2400_v31 = vld [vmem:[#allocation4 + $0x11e8] sm:$0xff] }
 0x818   :  { %3977 = vmatpush1.bf16.msra.mxu0 %v2223_v12  ;;  %4141 = vmatpush1.bf16.msra.mxu1 %v2225_v60  ;;  %v2399_v12 = vld [vmem:[#allocation4 + $0x11e0] sm:$0xff]  ;;  %v2401_v60 = vld [vmem:[#allocation4 + $0x11f0] sm:$0xff] }
 0x819   :  { %3978 = vmatprep.subr.bf16.mxu0 %v2240_v13  ;;  %4142 = vmatprep.subr.bf16.mxu1 %v2242_v14  ;;  %v2416_v13 = vld [vmem:[#allocation4 + $0x1268] sm:$0xff]  ;;  %v2418_v14 = vld [vmem:[#allocation4 + $0x1278] sm:$0xff] }
 0x81c   :  { %3979 = vmatpush1.bf16.msra.mxu0 %v2239_v0  ;;  %4143 = vmatpush1.bf16.msra.mxu1 %v2241_v1  ;;  %v2417_v0 = vld [vmem:[#allocation4 + $0x1270] sm:$0xff]  ;;  %v2432_v1 = vld [vmem:[#allocation4 + $0x12e8] sm:$0xff] }
 0x81d   :  { %3980 = vmatprep.subr.bf16.mxu0 %v2256_v15  ;;  %4144 = vmatprep.subr.bf16.mxu1 %v2258_v16  ;;  %v2434_v15 = vld [vmem:[#allocation4 + $0x12f8] sm:$0xff]  ;;  %v2431_v16 = vld [vmem:[#allocation4 + $0x12e0] sm:$0xff] }
 0x820   :  { %3981 = vmatpush1.bf16.msra.mxu0 %v2255_v58  ;;  %4145 = vmatpush1.bf16.msra.mxu1 %v2257_v17  ;;  %v2433_v58 = vld [vmem:[#allocation4 + $0x12f0] sm:$0xff]  ;;  %v2448_v17 = vld [vmem:[#allocation4 + $0x1368] sm:$0xff] }
 0x821   :  { %3982 = vmatprep.subr.bf16.mxu0 %v2272_v18  ;;  %4146 = vmatprep.subr.bf16.mxu1 %v2274_v19  ;;  %v2450_v18 = vld [vmem:[#allocation4 + $0x1378] sm:$0xff]  ;;  %v2447_v19 = vld [vmem:[#allocation4 + $0x1360] sm:$0xff] }
 0x824   :  { %3983 = vmatpush1.bf16.msra.mxu0 %v2271_v20  ;;  %4147 = vmatpush1.bf16.msra.mxu1 %v2273_v61  ;;  %v2449_v20 = vld [vmem:[#allocation4 + $0x1370] sm:$0xff]  ;;  %v2464_v61 = vld [vmem:[#allocation4 + $0x13e8] sm:$0xff] }
 0x825   :  { %3984 = vmatprep.subr.bf16.mxu0 %v2288_v22  ;;  %4148 = vmatprep.subr.bf16.mxu1 %v2290_v23  ;;  %v2466_v22 = vld [vmem:[#allocation4 + $0x13f8] sm:$0xff]  ;;  %v2463_v23 = vld [vmem:[#allocation4 + $0x13e0] sm:$0xff] }
 0x828   :  { %3985 = vmatpush1.bf16.msra.mxu0 %v2287_v24  ;;  %4149 = vmatpush1.bf16.msra.mxu1 %v2289_v25  ;;  %v2465_v24 = vld [vmem:[#allocation4 + $0x13f0] sm:$0xff]  ;;  %v2480_v25 = vld [vmem:[#allocation4 + $0x1468] sm:$0xff] }
 0x829   :  { %3986 = vmatprep.subr.bf16.mxu0 %v2304_v26  ;;  %4150 = vmatprep.subr.bf16.mxu1 %v2306_v27  ;;  %v2482_v26 = vld [vmem:[#allocation4 + $0x1478] sm:$0xff]  ;;  %v2479_v27 = vld [vmem:[#allocation4 + $0x1460] sm:$0xff] }
 0x82c   :  { %3987 = vmatpush1.bf16.msra.mxu0 %v2303_v40  ;;  %4151 = vmatpush1.bf16.msra.mxu1 %v2305_v41  ;;  %v2481_v40 = vld [vmem:[#allocation4 + $0x1470] sm:$0xff]  ;;  %v2496_v41 = vld [vmem:[#allocation4 + $0x14e8] sm:$0xff] }
 0x82d   :  { %3988 = vmatprep.subr.bf16.mxu0 %v2320_v62  ;;  %4152 = vmatprep.subr.bf16.mxu1 %v2322_v42  ;;  %v2498_v62 = vld [vmem:[#allocation4 + $0x14f8] sm:$0xff]  ;;  %v2495_v42 = vld [vmem:[#allocation4 + $0x14e0] sm:$0xff] }
 0x830   :  { %3989 = vmatpush1.bf16.msra.mxu0 %v2319_v43  ;;  %4153 = vmatpush1.bf16.msra.mxu1 %v2321_v32  ;;  %v2497_v43 = vld [vmem:[#allocation4 + $0x14f0] sm:$0xff]  ;;  %v2512_v32 = vld [vmem:[#allocation4 + $0x1568] sm:$0xff] }
 0x831   :  { %3990 = vmatprep.subr.bf16.mxu0 %v2336_v44  ;;  %4154 = vmatprep.subr.bf16.mxu1 %v2338_v2  ;;  %v2514_v44 = vld [vmem:[#allocation4 + $0x1578] sm:$0xff]  ;;  %v2511_v2 = vld [vmem:[#allocation4 + $0x1560] sm:$0xff] }
 0x834   :  { %3991 = vmatpush1.bf16.msra.mxu0 %v2335_v45  ;;  %4155 = vmatpush1.bf16.msra.mxu1 %v2337_v46  ;;  %v2513_v45 = vld [vmem:[#allocation4 + $0x1570] sm:$0xff]  ;;  %v2528_v46 = vld [vmem:[#allocation4 + $0x15e8] sm:$0xff] }
 0x835   :  { %4001 = vmatprep.subr.bf16.mxu0 %v2352_v47  ;;  %4165 = vmatprep.subr.bf16.mxu1 %v2354_v48  ;;  %v2530_v47 = vld [vmem:[#allocation4 + $0x15f8] sm:$0xff]  ;;  %v2527_v48 = vld [vmem:[#allocation4 + $0x15e0] sm:$0xff] }
 0x837   :  { %3993 = vmatmul.mubr.bf16.vlgmr.msra.gmra.mrb[28].mxu0 %v9262_v63  ;;  %4157 = vmatmul.mubr.bf16.vlgmr.msra.gmra.mrb[28].mxu1 %v9262_v63  ;;  %v2402_v63 = vld [vmem:[#allocation4 + $0x11f8] sm:$0xff] }
 0x838   :  { %4002 = vmatpush1.bf16.msra.mxu0 %v2351_v49  ;;  %4166 = vmatpush1.bf16.msra.mxu1 %v2353_v50  ;;  %v2529_v49 = vld [vmem:[#allocation4 + $0x15f0] sm:$0xff]  ;;  %v2544_v50 = vld [vmem:[#allocation4 + $0x1668] sm:$0xff] }
 0x839   :  { %4003 = vmatprep.subr.bf16.mxu0 %v2368_v51  ;;  %4167 = vmatprep.subr.bf16.mxu1 %v2370_v54  ;;  %v2546_v51 = vld [vmem:[#allocation4 + $0x1678] sm:$0xff]  ;;  %v2543_v54 = vld [vmem:[#allocation4 + $0x1660] sm:$0xff] }
 0x83a   :  { %4033 = vmatprep.mubr.bf16.mxu0 %v9282_v21  ;;  %4197 = vmatprep.mubr.bf16.mxu1 %v9282_v21  ;;  %v2415_v21 = vld [vmem:[#allocation4 + $0x1260] sm:$0xff] }
 0x83c   :  { %4004 = vmatpush1.bf16.msra.mxu0 %v2367_v55  ;;  %4168 = vmatpush1.bf16.msra.mxu1 %v2369_v56  ;;  %v2545_v55 = vld [vmem:[#allocation4 + $0x1670] sm:$0xff]  ;;  %v2560_v56 = vld [vmem:[#allocation4 + $0x16e8] sm:$0xff] }
 0x83d   :  { %4005 = vmatprep.subr.bf16.mxu0 %v2384_v33  ;;  %4169 = vmatprep.subr.bf16.mxu1 %v2386_v57  ;;  %v2562_v33 = vld [vmem:[#allocation4 + $0x16f8] sm:$0xff]  ;;  %v2559_v57 = vld [vmem:[#allocation4 + $0x16e0] sm:$0xff] }
 0x840   :  { %4006 = vmatpush1.bf16.msra.mxu0 %v2383_v3  ;;  %4170 = vmatpush1.bf16.msra.mxu1 %v2385_v4  ;;  %v2561_v3 = vld [vmem:[#allocation4 + $0x16f0] sm:$0xff]  ;;  %v2576_v4 = vld [vmem:[#allocation4 + $0x1768] sm:$0xff] }
 0x841   :  { %4007 = vmatprep.subr.bf16.mxu0 %v2400_v31  ;;  %4171 = vmatprep.subr.bf16.mxu1 %v2402_v63  ;;  %v2578_v31 = vld [vmem:[#allocation4 + $0x1778] sm:$0xff]  ;;  %v2575_v63 = vld [vmem:[#allocation4 + $0x1760] sm:$0xff] }
 0x844   :  { %4008 = vmatpush1.bf16.msra.mxu0 %v2399_v12  ;;  %4172 = vmatpush1.bf16.msra.mxu1 %v2401_v60  ;;  %v2577_v12 = vld [vmem:[#allocation4 + $0x1770] sm:$0xff]  ;;  %v2592_v60 = vld [vmem:[#allocation4 + $0x17e8] sm:$0xff] }
 0x845   :  { %4009 = vmatprep.subr.bf16.mxu0 %v2416_v13  ;;  %4173 = vmatprep.subr.bf16.mxu1 %v2418_v14  ;;  %v2594_v13 = vld [vmem:[#allocation4 + $0x17f8] sm:$0xff]  ;;  %v2591_v14 = vld [vmem:[#allocation4 + $0x17e0] sm:$0xff] }
 0x848   :  { %4010 = vmatpush1.bf16.msra.mxu0 %v2415_v21  ;;  %4174 = vmatpush1.bf16.msra.mxu1 %v2417_v0  ;;  %v2593_v21 = vld [vmem:[#allocation4 + $0x17f0] sm:$0xff]  ;;  %v2608_v0 = vld [vmem:[#allocation4 + $0x1868] sm:$0xff] }
 0x849   :  { %4011 = vmatprep.subr.bf16.mxu0 %v2432_v1  ;;  %4175 = vmatprep.subr.bf16.mxu1 %v2434_v15  ;;  %v2610_v1 = vld [vmem:[#allocation4 + $0x1878] sm:$0xff]  ;;  %v2607_v15 = vld [vmem:[#allocation4 + $0x1860] sm:$0xff] }
 0x84c   :  { %4012 = vmatpush1.bf16.msra.mxu0 %v2431_v16  ;;  %4176 = vmatpush1.bf16.msra.mxu1 %v2433_v58  ;;  %v2609_v16 = vld [vmem:[#allocation4 + $0x1870] sm:$0xff]  ;;  %v2624_v58 = vld [vmem:[#allocation4 + $0x18e8] sm:$0xff] }
 0x84d   :  { %4013 = vmatprep.subr.bf16.mxu0 %v2448_v17  ;;  %4177 = vmatprep.subr.bf16.mxu1 %v2450_v18  ;;  %v2626_v17 = vld [vmem:[#allocation4 + $0x18f8] sm:$0xff]  ;;  %v2623_v18 = vld [vmem:[#allocation4 + $0x18e0] sm:$0xff] }
 0x850   :  { %4014 = vmatpush1.bf16.msra.mxu0 %v2447_v19  ;;  %4178 = vmatpush1.bf16.msra.mxu1 %v2449_v20  ;;  %v2625_v19 = vld [vmem:[#allocation4 + $0x18f0] sm:$0xff]  ;;  %v2640_v20 = vld [vmem:[#allocation4 + $0x1968] sm:$0xff] }
 0x851   :  { %4015 = vmatprep.subr.bf16.mxu0 %v2464_v61  ;;  %4179 = vmatprep.subr.bf16.mxu1 %v2466_v22  ;;  %v2642_v61 = vld [vmem:[#allocation4 + $0x1978] sm:$0xff]  ;;  %v2639_v22 = vld [vmem:[#allocation4 + $0x1960] sm:$0xff] }
 0x854   :  { %4016 = vmatpush1.bf16.msra.mxu0 %v2463_v23  ;;  %4180 = vmatpush1.bf16.msra.mxu1 %v2465_v24  ;;  %v2641_v23 = vld [vmem:[#allocation4 + $0x1970] sm:$0xff]  ;;  %v2656_v24 = vld [vmem:[#allocation4 + $0x19e8] sm:$0xff] }
 0x855   :  { %4017 = vmatprep.subr.bf16.mxu0 %v2480_v25  ;;  %4181 = vmatprep.subr.bf16.mxu1 %v2482_v26  ;;  %v2655_v25 = vld [vmem:[#allocation4 + $0x19e0] sm:$0xff]  ;;  %v2657_v26 = vld [vmem:[#allocation4 + $0x19f0] sm:$0xff] }
 0x858   :  { %4018 = vmatpush1.bf16.msra.mxu0 %v2479_v27  ;;  %4182 = vmatpush1.bf16.msra.mxu1 %v2481_v40  ;;  %v2672_v27 = vld [vmem:[#allocation4 + $0x1a68] sm:$0xff]  ;;  %v2674_v40 = vld [vmem:[#allocation4 + $0x1a78] sm:$0xff] }
 0x859   :  { %4019 = vmatprep.subr.bf16.mxu0 %v2496_v41  ;;  %4183 = vmatprep.subr.bf16.mxu1 %v2498_v62  ;;  %v9372_v41 = vld [vmem:[#allocation15 + $0x8] sm:$0xff]  ;;  %v2673_v62 = vld [vmem:[#allocation4 + $0x1a70] sm:$0xff] }
 0x85c   :  { %4020 = vmatpush1.bf16.msra.mxu0 %v2495_v42  ;;  %4184 = vmatpush1.bf16.msra.mxu1 %v2497_v43  ;;  %v2688_v42 = vld [vmem:[#allocation4 + $0x1ae8] sm:$0xff]  ;;  %v2690_v43 = vld [vmem:[#allocation4 + $0x1af8] sm:$0xff] }
 0x85d   :  { %4021 = vmatprep.subr.bf16.mxu0 %v2512_v32  ;;  %4185 = vmatprep.subr.bf16.mxu1 %v2514_v44  ;;  %v2890_v32 = vrot.slane %v9372_v41, %v9180_v6  ;;  %v2898_v44 = vrot.slane %v9372_v41, %v9182_v7 }
 0x860   :  { %4022 = vmatpush1.bf16.msra.mxu0 %v2511_v2  ;;  %4186 = vmatpush1.bf16.msra.mxu1 %v2513_v45  ;;  %v2894_v2 = vrot.slane %v9372_v41, %v9184_v9  ;;  %v2902_v45 = vrot.slane %v9372_v41, %v9186_v10 }
 0x861   :  { %4023 = vmatprep.subr.bf16.mxu0 %v2528_v46  ;;  %4187 = vmatprep.subr.bf16.mxu1 %v2530_v47  ;;  %v2687_v46 = vld [vmem:[#allocation4 + $0x1ae0] sm:$0xff]  ;;  %v2689_v47 = vld [vmem:[#allocation4 + $0x1af0] sm:$0xff] }
 0x864   :  { %4024 = vmatpush1.bf16.msra.mxu0 %v2527_v48  ;;  %4188 = vmatpush1.bf16.msra.mxu1 %v2529_v49 }
 0x865   :  { %4025 = vmatprep.subr.bf16.mxu0 %v2544_v50  ;;  %4189 = vmatprep.subr.bf16.mxu1 %v2546_v51  ;;  %v2704_v50 = vld [vmem:[#allocation4 + $0x1b68] sm:$0xff]  ;;  %v2706_v51 = vld [vmem:[#allocation4 + $0x1b78] sm:$0xff] }
 0x868   :  { %4026 = vmatpush1.bf16.msra.mxu0 %v2543_v54  ;;  %4190 = vmatpush1.bf16.msra.mxu1 %v2545_v55 }
 0x869   :  { %4027 = vmatprep.subr.bf16.mxu0 %v2560_v56  ;;  %4191 = vmatprep.subr.bf16.mxu1 %v2562_v33 }
 0x86c   :  { %4028 = vmatpush1.bf16.msra.mxu0 %v2559_v57  ;;  %4192 = vmatpush1.bf16.msra.mxu1 %v2561_v3 }
 0x86d   :  { %4029 = vmatprep.subr.bf16.mxu0 %v2576_v4  ;;  %4193 = vmatprep.subr.bf16.mxu1 %v2578_v31 }
 0x870   :  { %4030 = vmatpush1.bf16.msra.mxu0 %v2575_v63  ;;  %4194 = vmatpush1.bf16.msra.mxu1 %v2577_v12 }
 0x871   :  { %4031 = vmatprep.subr.bf16.mxu0 %v2592_v60  ;;  %4195 = vmatprep.subr.bf16.mxu1 %v2594_v13 }
 0x874   :  { %4032 = vmatpush1.bf16.msra.mxu0 %v2591_v14  ;;  %4196 = vmatpush1.bf16.msra.mxu1 %v2593_v21  ;;  %v2703_v14 = vld [vmem:[#allocation4 + $0x1b60] sm:$0xff]  ;;  %v2705_v21 = vld [vmem:[#allocation4 + $0x1b70] sm:$0xff] }
 0x875   :  { %4042 = vmatprep.subr.bf16.mxu0 %v2608_v0  ;;  %4206 = vmatprep.subr.bf16.mxu1 %v2610_v1 }
 0x877   :  { %4034 = vmatmul.mubr.bf16.vlgmr.msra.gmra.mrb[28].mxu0 %v9278_v5  ;;  %4198 = vmatmul.mubr.bf16.vlgmr.msra.gmra.mrb[28].mxu1 %v9278_v5  ;;  %v2658_v5 = vld [vmem:[#allocation4 + $0x19f8] sm:$0xff] }
 0x878   :  { %4043 = vmatpush1.bf16.msra.mxu0 %v2607_v15  ;;  %4207 = vmatpush1.bf16.msra.mxu1 %v2609_v16  ;;  %v2720_v15 = vld [vmem:[#allocation4 + $0x1be8] sm:$0xff]  ;;  %v2722_v16 = vld [vmem:[#allocation4 + $0x1bf8] sm:$0xff] }
 0x879   :  { %4044 = vmatprep.subr.bf16.mxu0 %v2624_v58  ;;  %4208 = vmatprep.subr.bf16.mxu1 %v2626_v17 }
 0x87a   :  { %4074 = vmatprep.mubr.bf16.mxu0 %v9284_v11  ;;  %4238 = vmatprep.mubr.bf16.mxu1 %v9284_v11  ;;  %v2671_v11 = vld [vmem:[#allocation4 + $0x1a60] sm:$0xff] }
 0x87c   :  { %4045 = vmatpush1.bf16.msra.mxu0 %v2623_v18  ;;  %4209 = vmatpush1.bf16.msra.mxu1 %v2625_v19 }
 0x87d   :  { %4046 = vmatprep.subr.bf16.mxu0 %v2640_v20  ;;  %4210 = vmatprep.subr.bf16.mxu1 %v2642_v61  ;;  %v2719_v20 = vld [vmem:[#allocation4 + $0x1be0] sm:$0xff]  ;;  %v2721_v61 = vld [vmem:[#allocation4 + $0x1bf0] sm:$0xff] }
 0x880   :  { %4047 = vmatpush1.bf16.msra.mxu0 %v2639_v22  ;;  %4211 = vmatpush1.bf16.msra.mxu1 %v2641_v23  ;;  %v2736_v22 = vld [vmem:[#allocation4 + $0x1c68] sm:$0xff]  ;;  %v2738_v23 = vld [vmem:[#allocation4 + $0x1c78] sm:$0xff] }
 0x881   :  { %4048 = vmatprep.subr.bf16.mxu0 %v2656_v24  ;;  %4212 = vmatprep.subr.bf16.mxu1 %v2658_v5  ;;  %v2735_v24 = vld [vmem:[#allocation4 + $0x1c60] sm:$0xff]  ;;  %v2737_v5 = vld [vmem:[#allocation4 + $0x1c70] sm:$0xff] }
 0x884   :  { %4049 = vmatpush1.bf16.msra.mxu0 %v2655_v25  ;;  %4213 = vmatpush1.bf16.msra.mxu1 %v2657_v26  ;;  %v2752_v25 = vld [vmem:[#allocation4 + $0x1ce8] sm:$0xff]  ;;  %v2754_v26 = vld [vmem:[#allocation4 + $0x1cf8] sm:$0xff] }
 0x885   :  { %4050 = vmatprep.subr.bf16.mxu0 %v2672_v27  ;;  %4214 = vmatprep.subr.bf16.mxu1 %v2674_v40  ;;  %v2751_v27 = vld [vmem:[#allocation4 + $0x1ce0] sm:$0xff]  ;;  %v2753_v40 = vld [vmem:[#allocation4 + $0x1cf0] sm:$0xff] }
 0x888   :  { %4051 = vmatpush1.bf16.msra.mxu0 %v2671_v11  ;;  %4215 = vmatpush1.bf16.msra.mxu1 %v2673_v62  ;;  %v2768_v11 = vld [vmem:[#allocation4 + $0x1d68] sm:$0xff]  ;;  %v2770_v62 = vld [vmem:[#allocation4 + $0x1d78] sm:$0xff] }
 0x889   :  { %4052 = vmatprep.subr.bf16.mxu0 %v2688_v42  ;;  %4216 = vmatprep.subr.bf16.mxu1 %v2690_v43  ;;  %v2767_v42 = vld [vmem:[#allocation4 + $0x1d60] sm:$0xff]  ;;  %v2769_v43 = vld [vmem:[#allocation4 + $0x1d70] sm:$0xff] }
 0x88a   :  { %v3748_v48 = vpop.f32.mrb[24].mxu0  ;;  %v3912_v49 = vpop.f32.mrb[24].mxu1 }
 0x88b   :  { %v8322_v54 = vadd.f32 %v3748_v48, %v2890_v32  ;;  %v8324_v55 = vadd.f32 %v3912_v49, %v2898_v44  ;;  %v3750_v56 = vpop.f32.mrb[25].mxu0  ;;  %v3914_v33 = vpop.f32.mrb[25].mxu1  ;;  %v2784_v32 = vld [vmem:[#allocation4 + $0x1de8] sm:$0xff]  ;;  %v2786_v44 = vld [vmem:[#allocation4 + $0x1df8] sm:$0xff]  ;;  %v2799_v48 = vld [vmem:[#allocation4 + $0x1e60] sm:$0xff] }
 0x88c   :  { %v8323_v57 = vadd.f32 %v3750_v56, %v2894_v2  ;;  %v8325_v3 = vadd.f32 %v3914_v33, %v2902_v45  ;;  %v3752_v4 = vpop.f32.mrb[26].mxu0  ;;  %v3916_v31 = vpop.f32.mrb[26].mxu1  ;;  %4053 = vmatpush1.bf16.msra.mxu0 %v2687_v46  ;;  %4217 = vmatpush1.bf16.msra.mxu1 %v2689_v47  ;;  %v2783_v2 = vld [vmem:[#allocation4 + $0x1de0] sm:$0xff]  ;;  %v2785_v45 = vld [vmem:[#allocation4 + $0x1df0] sm:$0xff]  ;;  %v2800_v46 = vld [vmem:[#allocation4 + $0x1e68] sm:$0xff] }
 0x88d   :  { %v4255_v63 = vmax.f32 %v8322_v54, 0.0  ;;  %v4257_v12 = vmax.f32 %v8324_v55, 0.0  ;;  %v3753_v60 = vpop.f32.mrb[27].mxu0  ;;  %v3917_v13 = vpop.f32.mrb[27].mxu1  ;;  %4054 = vmatprep.subr.bf16.mxu0 %v2704_v50  ;;  %4218 = vmatprep.subr.bf16.mxu1 %v2706_v51  ;;  %v2802_v47 = vld [vmem:[#allocation4 + $0x1e78] sm:$0xff]  ;;  %v2801_v49 = vld [vmem:[#allocation4 + $0x1e70] sm:$0xff] }
 0x88e   :  { %v4256_v0 = vmax.f32 %v8323_v57, 0.0  ;;  %v4258_v1 = vmax.f32 %v8325_v3, 0.0  ;;  %v2816_v50 = vld [vmem:[#allocation4 + $0x1ee8] sm:$0xff]  ;;  %v2818_v51 = vld [vmem:[#allocation4 + $0x1ef8] sm:$0xff]  ;;  %v2815_v54 = vld [vmem:[#allocation4 + $0x1ee0] sm:$0xff]  ;;  %v2906_v60 = vrot.slane %v9372_v41, %v9200_v34  ;;  %v2914_v13 = vrot.slane %v9372_v41, %v9202_v35 }
 0x88f   :  { %v9382_v58 = vpack.c.bf16 %v4255_v63, %v4255_v63  ;;  %v9384_v17 = vpack.c.bf16 %v4257_v12, %v4257_v12  ;;  %v2817_v55 = vld [vmem:[#allocation4 + $0x1ef0] sm:$0xff]  ;;  %v2832_v56 = vld [vmem:[#allocation4 + $0x1f68] sm:$0xff]  ;;  %v2834_v33 = vld [vmem:[#allocation4 + $0x1f78] sm:$0xff] }
 0x890   :  { %v9386_v18 = vpack.c.bf16 %v4256_v0, %v4256_v0  ;;  %v9388_v19 = vpack.c.bf16 %v4258_v1, %v4258_v1  ;;  %4055 = vmatpush1.bf16.msra.mxu0 %v2703_v14  ;;  %4219 = vmatpush1.bf16.msra.mxu1 %v2705_v21  ;;  %v2831_v57 = vld [vmem:[#allocation4 + $0x1f60] sm:$0xff]  ;;  %v2833_v3 = vld [vmem:[#allocation4 + $0x1f70] sm:$0xff]  ;;  %v2848_v4 = vld [vmem:[#allocation4 + $0x1fe8] sm:$0xff]  ;;  %v2910_v14 = vrot.slane %v9372_v41, %v9204_v36 }
 0x891   :  { %4056 = vmatprep.subr.bf16.mxu0 %v2720_v15  ;;  %4220 = vmatprep.subr.bf16.mxu1 %v2722_v16  ;;  %v2850_v31 = vld [vmem:[#allocation4 + $0x1ff8] sm:$0xff]  ;;  %v2847_v63 = vld [vmem:[#allocation4 + $0x1fe0] sm:$0xff]  ;;  %v2849_v12 = vld [vmem:[#allocation4 + $0x1ff0] sm:$0xff]  ;;  %v2918_v21 = vrot.slane %v9372_v41, %v9206_v37 }
 0x894   :  { %4057 = vmatpush1.bf16.msra.mxu0 %v2719_v20  ;;  %4221 = vmatpush1.bf16.msra.mxu1 %v2721_v61 }
 0x895   :  { %4058 = vmatprep.subr.bf16.mxu0 %v2736_v22  ;;  %4222 = vmatprep.subr.bf16.mxu1 %v2738_v23 }
 0x898   :  { %4059 = vmatpush1.bf16.msra.mxu0 %v2735_v24  ;;  %4223 = vmatpush1.bf16.msra.mxu1 %v2737_v5 }
 0x899   :  { %4060 = vmatprep.subr.bf16.mxu0 %v2752_v25  ;;  %4224 = vmatprep.subr.bf16.mxu1 %v2754_v26 }
 0x89c   :  { %4061 = vmatpush1.bf16.msra.mxu0 %v2751_v27  ;;  %4225 = vmatpush1.bf16.msra.mxu1 %v2753_v40 }
 0x89d   :  { %4062 = vmatprep.subr.bf16.mxu0 %v2768_v11  ;;  %4226 = vmatprep.subr.bf16.mxu1 %v2770_v62 }
 0x8a0   :  { %4063 = vmatpush1.bf16.msra.mxu0 %v2767_v42  ;;  %4227 = vmatpush1.bf16.msra.mxu1 %v2769_v43 }
 0x8a1   :  { %4064 = vmatprep.subr.bf16.mxu0 %v2784_v32  ;;  %4228 = vmatprep.subr.bf16.mxu1 %v2786_v44 }
 0x8a4   :  { %4065 = vmatpush1.bf16.msra.mxu0 %v2783_v2  ;;  %4229 = vmatpush1.bf16.msra.mxu1 %v2785_v45 }
 0x8a5   :  { %4066 = vmatprep.subr.bf16.mxu0 %v2800_v46  ;;  %4230 = vmatprep.subr.bf16.mxu1 %v2802_v47 }
 0x8a8   :  { %4067 = vmatpush1.bf16.msra.mxu0 %v2799_v48  ;;  %4231 = vmatpush1.bf16.msra.mxu1 %v2801_v49 }
 0x8a9   :  { %4068 = vmatprep.subr.bf16.mxu0 %v2816_v50  ;;  %4232 = vmatprep.subr.bf16.mxu1 %v2818_v51 }
 0x8ac   :  { %4069 = vmatpush1.bf16.msra.mxu0 %v2815_v54  ;;  %4233 = vmatpush1.bf16.msra.mxu1 %v2817_v55 }
 0x8ad   :  { %4070 = vmatprep.subr.bf16.mxu0 %v2832_v56  ;;  %4234 = vmatprep.subr.bf16.mxu1 %v2834_v33 }
 0x8b0   :  { %4071 = vmatpush1.bf16.msra.mxu0 %v2831_v57  ;;  %4235 = vmatpush1.bf16.msra.mxu1 %v2833_v3 }
 0x8b1   :  { %4072 = vmatprep.subr.bf16.mxu0 %v2848_v4  ;;  %4236 = vmatprep.subr.bf16.mxu1 %v2850_v31 }
 0x8b4   :  { %4073 = vmatpush1.bf16.msra.mxu0 %v2847_v63  ;;  %4237 = vmatpush1.bf16.msra.mxu1 %v2849_v12 }
 0x8b7   :  { %4075 = vmatmul.mubr.bf16.vlgmr.msra.gmra.mrb[28].mxu0 %v9280_v8  ;;  %4239 = vmatmul.mubr.bf16.vlgmr.msra.gmra.mrb[28].mxu1 %v9280_v8 }
 0x98a   :  { %v4076_v0 = vpop.f32.mrb[28].mxu0  ;;  %v4240_v1 = vpop.f32.mrb[28].mxu1 }
 0x98b   :  { %v8326_v15 = vadd.f32 %v4076_v0, %v2906_v60  ;;  %v8328_v16 = vadd.f32 %v4240_v1, %v2914_v13  ;;  %v4078_v20 = vpop.f32.mrb[29].mxu0  ;;  %v4242_v61 = vpop.f32.mrb[29].mxu1 }
 0x98c   :  { %v8327_v22 = vadd.f32 %v4078_v20, %v2910_v14  ;;  %v8329_v8 = vadd.f32 %v4242_v61, %v2918_v21  ;;  %v4080_v23 = vpop.f32.mrb[30].mxu0  ;;  %v4244_v24 = vpop.f32.mrb[30].mxu1 }
 0x98d   :  { %v4259_v5 = vmax.f32 %v8326_v15, 0.0  ;;  %v4261_v25 = vmax.f32 %v8328_v16, 0.0  ;;  %v4081_v26 = vpop.f32.mrb[31].mxu0  ;;  %v4245_v27 = vpop.f32.mrb[31].mxu1 }
 0x98e   :  { %v4260_v40 = vmax.f32 %v8327_v22, 0.0  ;;  %v4262_v11 = vmax.f32 %v8329_v8, 0.0 }
 0x98f   :  { %v9400_v62 = vpack.c.bf16 %v4259_v5, %v4259_v5  ;;  %v9402_v42 = vpack.c.bf16 %v4261_v25, %v4261_v25 }
 0x990   :  { %v9404_v41 = vpack.c.bf16 %v4260_v40, %v4260_v40  ;;  %v9406_v43 = vpack.c.bf16 %v4262_v11, %v4262_v11 }
 0x991   :  { %8898 = dma.done.wait [#allocation8 + $0x3], 131072 }
 0x992   :  { %8899 = vsyncadd [#allocation8 + $0x3], 4294836224  ;;  %5381 = vmatprep.mubr.bf16.mxu0 %v9324_v38  ;;  %5709 = vmatprep.mubr.bf16.mxu1 %v9324_v38  ;;  %v4284_v32 = vld [vmem:[#allocation5 + $0x8] sm:$0xff]  ;;  %v4286_v44 = vld [vmem:[#allocation5 + $0x18] sm:$0xff] }
 0x993   :  { %v4283_v2 = vld [vmem:[#allocation5] sm:$0xff]  ;;  %5349 = vmatprep.subr.bf16.mxu0 %v4284_v32  ;;  %5677 = vmatprep.subr.bf16.mxu1 %v4286_v44  ;;  %v4285_v45 = vld [vmem:[#allocation5 + $0x10] sm:$0xff]  ;;  %v4292_v46 = vld [vmem:[#allocation5 + $0x48] sm:$0xff] }
 0x994   :  { %v4294_v47 = vld [vmem:[#allocation5 + $0x58] sm:$0xff]  ;;  %5350 = vmatpush1.bf16.msra.mxu0 %v4283_v2  ;;  %5678 = vmatpush1.bf16.msra.mxu1 %v4285_v45  ;;  %v4291_v48 = vld [vmem:[#allocation5 + $0x40] sm:$0xff]  ;;  %v4293_v49 = vld [vmem:[#allocation5 + $0x50] sm:$0xff] }
 0x995   :  { %5351 = vmatprep.subr.bf16.mxu0 %v4292_v46  ;;  %5679 = vmatprep.subr.bf16.mxu1 %v4294_v47  ;;  %v4300_v50 = vld [vmem:[#allocation5 + $0x88] sm:$0xff]  ;;  %v4302_v51 = vld [vmem:[#allocation5 + $0x98] sm:$0xff]  ;;  %v4299_v54 = vld [vmem:[#allocation5 + $0x80] sm:$0xff] }
 0x996   :  { %v4301_v55 = vld [vmem:[#allocation5 + $0x90] sm:$0xff]  ;;  %v4308_v56 = vld [vmem:[#allocation5 + $0xc8] sm:$0xff]  ;;  %v4310_v33 = vld [vmem:[#allocation5 + $0xd8] sm:$0xff] }
 0x997   :  { %v4307_v57 = vld [vmem:[#allocation5 + $0xc0] sm:$0xff]  ;;  %v4309_v3 = vld [vmem:[#allocation5 + $0xd0] sm:$0xff]  ;;  %v4316_v4 = vld [vmem:[#allocation5 + $0x108] sm:$0xff] }
 0x998   :  { %5352 = vmatpush1.bf16.msra.mxu0 %v4291_v48  ;;  %5680 = vmatpush1.bf16.msra.mxu1 %v4293_v49  ;;  %v4318_v31 = vld [vmem:[#allocation5 + $0x118] sm:$0xff]  ;;  %v4315_v63 = vld [vmem:[#allocation5 + $0x100] sm:$0xff]  ;;  %v4317_v12 = vld [vmem:[#allocation5 + $0x110] sm:$0xff] }
 0x999   :  { %5353 = vmatprep.subr.bf16.mxu0 %v4300_v50  ;;  %5681 = vmatprep.subr.bf16.mxu1 %v4302_v51  ;;  %v4324_v60 = vld [vmem:[#allocation5 + $0x148] sm:$0xff]  ;;  %v4326_v13 = vld [vmem:[#allocation5 + $0x158] sm:$0xff]  ;;  %v4323_v14 = vld [vmem:[#allocation5 + $0x140] sm:$0xff] }
 0x99a   :  { %v4325_v21 = vld [vmem:[#allocation5 + $0x150] sm:$0xff]  ;;  %v4332_v0 = vld [vmem:[#allocation5 + $0x188] sm:$0xff]  ;;  %v4334_v1 = vld [vmem:[#allocation5 + $0x198] sm:$0xff] }
 0x99b   :  { %v4331_v15 = vld [vmem:[#allocation5 + $0x180] sm:$0xff]  ;;  %v4333_v16 = vld [vmem:[#allocation5 + $0x190] sm:$0xff]  ;;  %v4340_v20 = vld [vmem:[#allocation5 + $0x1c8] sm:$0xff] }
 0x99c   :  { %5354 = vmatpush1.bf16.msra.mxu0 %v4299_v54  ;;  %5682 = vmatpush1.bf16.msra.mxu1 %v4301_v55  ;;  %v4342_v61 = vld [vmem:[#allocation5 + $0x1d8] sm:$0xff]  ;;  %v4339_v22 = vld [vmem:[#allocation5 + $0x1c0] sm:$0xff]  ;;  %v4341_v8 = vld [vmem:[#allocation5 + $0x1d0] sm:$0xff] }
 0x99d   :  { %5355 = vmatprep.subr.bf16.mxu0 %v4308_v56  ;;  %5683 = vmatprep.subr.bf16.mxu1 %v4310_v33  ;;  %v4348_v23 = vld [vmem:[#allocation5 + $0x208] sm:$0xff]  ;;  %v4350_v24 = vld [vmem:[#allocation5 + $0x218] sm:$0xff]  ;;  %v4347_v5 = vld [vmem:[#allocation5 + $0x200] sm:$0xff] }
 0x99e   :  { %v4349_v25 = vld [vmem:[#allocation5 + $0x210] sm:$0xff]  ;;  %v4356_v26 = vld [vmem:[#allocation5 + $0x248] sm:$0xff]  ;;  %v4358_v27 = vld [vmem:[#allocation5 + $0x258] sm:$0xff] }
 0x99f   :  { %v4355_v40 = vld [vmem:[#allocation5 + $0x240] sm:$0xff]  ;;  %v4357_v11 = vld [vmem:[#allocation5 + $0x250] sm:$0xff]  ;;  %v4364_v32 = vld [vmem:[#allocation5 + $0x288] sm:$0xff] }
 0x9a0   :  { %5356 = vmatpush1.bf16.msra.mxu0 %v4307_v57  ;;  %5684 = vmatpush1.bf16.msra.mxu1 %v4309_v3  ;;  %v4366_v44 = vld [vmem:[#allocation5 + $0x298] sm:$0xff]  ;;  %v4363_v2 = vld [vmem:[#allocation5 + $0x280] sm:$0xff]  ;;  %v4365_v45 = vld [vmem:[#allocation5 + $0x290] sm:$0xff] }
 0x9a1   :  { %5357 = vmatprep.subr.bf16.mxu0 %v4316_v4  ;;  %5685 = vmatprep.subr.bf16.mxu1 %v4318_v31  ;;  %v4372_v46 = vld [vmem:[#allocation5 + $0x2c8] sm:$0xff]  ;;  %v4374_v47 = vld [vmem:[#allocation5 + $0x2d8] sm:$0xff]  ;;  %v4371_v48 = vld [vmem:[#allocation5 + $0x2c0] sm:$0xff] }
 0x9a2   :  { %v4373_v49 = vld [vmem:[#allocation5 + $0x2d0] sm:$0xff]  ;;  %v4380_v50 = vld [vmem:[#allocation5 + $0x308] sm:$0xff]  ;;  %v4382_v51 = vld [vmem:[#allocation5 + $0x318] sm:$0xff] }
 0x9a3   :  { %v4379_v54 = vld [vmem:[#allocation5 + $0x300] sm:$0xff]  ;;  %v4381_v55 = vld [vmem:[#allocation5 + $0x310] sm:$0xff]  ;;  %v4388_v56 = vld [vmem:[#allocation5 + $0x348] sm:$0xff] }
 0x9a4   :  { %5358 = vmatpush1.bf16.msra.mxu0 %v4315_v63  ;;  %5686 = vmatpush1.bf16.msra.mxu1 %v4317_v12  ;;  %v4390_v33 = vld [vmem:[#allocation5 + $0x358] sm:$0xff]  ;;  %v4387_v57 = vld [vmem:[#allocation5 + $0x340] sm:$0xff]  ;;  %v4389_v3 = vld [vmem:[#allocation5 + $0x350] sm:$0xff] }
 0x9a5   :  { %5359 = vmatprep.subr.bf16.mxu0 %v4324_v60  ;;  %5687 = vmatprep.subr.bf16.mxu1 %v4326_v13  ;;  %v4396_v4 = vld [vmem:[#allocation5 + $0x388] sm:$0xff]  ;;  %v4398_v31 = vld [vmem:[#allocation5 + $0x398] sm:$0xff]  ;;  %v4395_v63 = vld [vmem:[#allocation5 + $0x380] sm:$0xff] }
 0x9a6   :  { %v4397_v12 = vld [vmem:[#allocation5 + $0x390] sm:$0xff]  ;;  %v4404_v60 = vld [vmem:[#allocation5 + $0x3c8] sm:$0xff]  ;;  %v4406_v13 = vld [vmem:[#allocation5 + $0x3d8] sm:$0xff] }
 0x9a8   :  { %5360 = vmatpush1.bf16.msra.mxu0 %v4323_v14  ;;  %5688 = vmatpush1.bf16.msra.mxu1 %v4325_v21  ;;  %v4403_v14 = vld [vmem:[#allocation5 + $0x3c0] sm:$0xff]  ;;  %v4405_v21 = vld [vmem:[#allocation5 + $0x3d0] sm:$0xff] }
 0x9a9   :  { %5361 = vmatprep.subr.bf16.mxu0 %v4332_v0  ;;  %5689 = vmatprep.subr.bf16.mxu1 %v4334_v1  ;;  %v4412_v0 = vld [vmem:[#allocation5 + $0x408] sm:$0xff]  ;;  %v4414_v1 = vld [vmem:[#allocation5 + $0x418] sm:$0xff] }
 0x9ac   :  { %5362 = vmatpush1.bf16.msra.mxu0 %v4331_v15  ;;  %5690 = vmatpush1.bf16.msra.mxu1 %v4333_v16  ;;  %v4411_v15 = vld [vmem:[#allocation5 + $0x400] sm:$0xff]  ;;  %v4413_v16 = vld [vmem:[#allocation5 + $0x410] sm:$0xff] }
 0x9ad   :  { %5363 = vmatprep.subr.bf16.mxu0 %v4340_v20  ;;  %5691 = vmatprep.subr.bf16.mxu1 %v4342_v61  ;;  %v4420_v20 = vld [vmem:[#allocation5 + $0x448] sm:$0xff]  ;;  %v4422_v61 = vld [vmem:[#allocation5 + $0x458] sm:$0xff] }
 0x9b0   :  { %5364 = vmatpush1.bf16.msra.mxu0 %v4339_v22  ;;  %5692 = vmatpush1.bf16.msra.mxu1 %v4341_v8  ;;  %v4419_v22 = vld [vmem:[#allocation5 + $0x440] sm:$0xff]  ;;  %v4421_v8 = vld [vmem:[#allocation5 + $0x450] sm:$0xff] }
 0x9b1   :  { %5365 = vmatprep.subr.bf16.mxu0 %v4348_v23  ;;  %5693 = vmatprep.subr.bf16.mxu1 %v4350_v24  ;;  %v4428_v23 = vld [vmem:[#allocation5 + $0x488] sm:$0xff]  ;;  %v4430_v24 = vld [vmem:[#allocation5 + $0x498] sm:$0xff] }
 0x9b4   :  { %5366 = vmatpush1.bf16.msra.mxu0 %v4347_v5  ;;  %5694 = vmatpush1.bf16.msra.mxu1 %v4349_v25  ;;  %v4427_v5 = vld [vmem:[#allocation5 + $0x480] sm:$0xff]  ;;  %v4429_v25 = vld [vmem:[#allocation5 + $0x490] sm:$0xff] }
 0x9b5   :  { %5367 = vmatprep.subr.bf16.mxu0 %v4356_v26  ;;  %5695 = vmatprep.subr.bf16.mxu1 %v4358_v27  ;;  %v4436_v26 = vld [vmem:[#allocation5 + $0x4c8] sm:$0xff]  ;;  %v4438_v27 = vld [vmem:[#allocation5 + $0x4d8] sm:$0xff] }
 0x9b8   :  { %5368 = vmatpush1.bf16.msra.mxu0 %v4355_v40  ;;  %5696 = vmatpush1.bf16.msra.mxu1 %v4357_v11  ;;  %v4435_v40 = vld [vmem:[#allocation5 + $0x4c0] sm:$0xff]  ;;  %v4437_v11 = vld [vmem:[#allocation5 + $0x4d0] sm:$0xff] }
 0x9b9   :  { %5369 = vmatprep.subr.bf16.mxu0 %v4364_v32  ;;  %5697 = vmatprep.subr.bf16.mxu1 %v4366_v44  ;;  %v4444_v32 = vld [vmem:[#allocation5 + $0x508] sm:$0xff]  ;;  %v4446_v44 = vld [vmem:[#allocation5 + $0x518] sm:$0xff] }
 0x9bc   :  { %5370 = vmatpush1.bf16.msra.mxu0 %v4363_v2  ;;  %5698 = vmatpush1.bf16.msra.mxu1 %v4365_v45  ;;  %v4443_v2 = vld [vmem:[#allocation5 + $0x500] sm:$0xff]  ;;  %v4445_v45 = vld [vmem:[#allocation5 + $0x510] sm:$0xff] }
 0x9bd   :  { %5371 = vmatprep.subr.bf16.mxu0 %v4372_v46  ;;  %5699 = vmatprep.subr.bf16.mxu1 %v4374_v47  ;;  %v4452_v46 = vld [vmem:[#allocation5 + $0x548] sm:$0xff]  ;;  %v4454_v47 = vld [vmem:[#allocation5 + $0x558] sm:$0xff] }
 0x9c0   :  { %5372 = vmatpush1.bf16.msra.mxu0 %v4371_v48  ;;  %5700 = vmatpush1.bf16.msra.mxu1 %v4373_v49  ;;  %v4451_v48 = vld [vmem:[#allocation5 + $0x540] sm:$0xff]  ;;  %v4453_v49 = vld [vmem:[#allocation5 + $0x550] sm:$0xff] }
 0x9c1   :  { %5373 = vmatprep.subr.bf16.mxu0 %v4380_v50  ;;  %5701 = vmatprep.subr.bf16.mxu1 %v4382_v51  ;;  %v4460_v50 = vld [vmem:[#allocation5 + $0x588] sm:$0xff]  ;;  %v4462_v51 = vld [vmem:[#allocation5 + $0x598] sm:$0xff] }
 0x9c4   :  { %5374 = vmatpush1.bf16.msra.mxu0 %v4379_v54  ;;  %5702 = vmatpush1.bf16.msra.mxu1 %v4381_v55  ;;  %v4459_v54 = vld [vmem:[#allocation5 + $0x580] sm:$0xff]  ;;  %v4461_v55 = vld [vmem:[#allocation5 + $0x590] sm:$0xff] }
 0x9c5   :  { %5375 = vmatprep.subr.bf16.mxu0 %v4388_v56  ;;  %5703 = vmatprep.subr.bf16.mxu1 %v4390_v33  ;;  %v4468_v56 = vld [vmem:[#allocation5 + $0x5c8] sm:$0xff]  ;;  %v4470_v33 = vld [vmem:[#allocation5 + $0x5d8] sm:$0xff] }
 0x9c8   :  { %5376 = vmatpush1.bf16.msra.mxu0 %v4387_v57  ;;  %5704 = vmatpush1.bf16.msra.mxu1 %v4389_v3  ;;  %v4467_v57 = vld [vmem:[#allocation5 + $0x5c0] sm:$0xff]  ;;  %v4469_v3 = vld [vmem:[#allocation5 + $0x5d0] sm:$0xff] }
 0x9c9   :  { %5377 = vmatprep.subr.bf16.mxu0 %v4396_v4  ;;  %5705 = vmatprep.subr.bf16.mxu1 %v4398_v31  ;;  %v4476_v4 = vld [vmem:[#allocation5 + $0x608] sm:$0xff]  ;;  %v4478_v31 = vld [vmem:[#allocation5 + $0x618] sm:$0xff] }
 0x9cc   :  { %5378 = vmatpush1.bf16.msra.mxu0 %v4395_v63  ;;  %5706 = vmatpush1.bf16.msra.mxu1 %v4397_v12  ;;  %v4475_v63 = vld [vmem:[#allocation5 + $0x600] sm:$0xff]  ;;  %v4477_v12 = vld [vmem:[#allocation5 + $0x610] sm:$0xff] }
 0x9cd   :  { %5379 = vmatprep.subr.bf16.mxu0 %v4404_v60  ;;  %5707 = vmatprep.subr.bf16.mxu1 %v4406_v13  ;;  %v4484_v60 = vld [vmem:[#allocation5 + $0x648] sm:$0xff]  ;;  %v4486_v13 = vld [vmem:[#allocation5 + $0x658] sm:$0xff] }
 0x9d0   :  { %5380 = vmatpush1.bf16.msra.mxu0 %v4403_v14  ;;  %5708 = vmatpush1.bf16.msra.mxu1 %v4405_v21  ;;  %v4483_v14 = vld [vmem:[#allocation5 + $0x640] sm:$0xff]  ;;  %v4485_v21 = vld [vmem:[#allocation5 + $0x650] sm:$0xff] }
 0x9d1   :  { %5390 = vmatprep.subr.bf16.mxu0 %v4412_v0  ;;  %5718 = vmatprep.subr.bf16.mxu1 %v4414_v1  ;;  %v4492_v0 = vld [vmem:[#allocation5 + $0x688] sm:$0xff]  ;;  %v4494_v1 = vld [vmem:[#allocation5 + $0x698] sm:$0xff] }
 0x9d3   :  { %5382 = vmatmul.mubr.bf16.vlgmr.msra.gmra.mrb[32].mxu0 %v9320_v28  ;;  %5710 = vmatmul.mubr.bf16.vlgmr.msra.gmra.mrb[32].mxu1 %v9320_v28 }
 0x9d4   :  { %5391 = vmatpush1.bf16.msra.mxu0 %v4411_v15  ;;  %5719 = vmatpush1.bf16.msra.mxu1 %v4413_v16  ;;  %v4491_v15 = vld [vmem:[#allocation5 + $0x680] sm:$0xff]  ;;  %v4493_v16 = vld [vmem:[#allocation5 + $0x690] sm:$0xff] }
 0x9d5   :  { %5392 = vmatprep.subr.bf16.mxu0 %v4420_v20  ;;  %5720 = vmatprep.subr.bf16.mxu1 %v4422_v61  ;;  %v4500_v20 = vld [vmem:[#allocation5 + $0x6c8] sm:$0xff]  ;;  %v4502_v61 = vld [vmem:[#allocation5 + $0x6d8] sm:$0xff] }
 0x9d6   :  { %5422 = vmatprep.mubr.bf16.mxu0 %v9326_v39  ;;  %5750 = vmatprep.mubr.bf16.mxu1 %v9326_v39 }
 0x9d8   :  { %5393 = vmatpush1.bf16.msra.mxu0 %v4419_v22  ;;  %5721 = vmatpush1.bf16.msra.mxu1 %v4421_v8  ;;  %v4499_v22 = vld [vmem:[#allocation5 + $0x6c0] sm:$0xff]  ;;  %v4501_v8 = vld [vmem:[#allocation5 + $0x6d0] sm:$0xff] }
 0x9d9   :  { %5394 = vmatprep.subr.bf16.mxu0 %v4428_v23  ;;  %5722 = vmatprep.subr.bf16.mxu1 %v4430_v24  ;;  %v4508_v23 = vld [vmem:[#allocation5 + $0x708] sm:$0xff]  ;;  %v4510_v24 = vld [vmem:[#allocation5 + $0x718] sm:$0xff] }
 0x9dc   :  { %5395 = vmatpush1.bf16.msra.mxu0 %v4427_v5  ;;  %5723 = vmatpush1.bf16.msra.mxu1 %v4429_v25  ;;  %v4507_v5 = vld [vmem:[#allocation5 + $0x700] sm:$0xff]  ;;  %v4509_v25 = vld [vmem:[#allocation5 + $0x710] sm:$0xff] }
 0x9dd   :  { %5396 = vmatprep.subr.bf16.mxu0 %v4436_v26  ;;  %5724 = vmatprep.subr.bf16.mxu1 %v4438_v27  ;;  %v4516_v26 = vld [vmem:[#allocation5 + $0x748] sm:$0xff]  ;;  %v4518_v27 = vld [vmem:[#allocation5 + $0x758] sm:$0xff] }
 0x9e0   :  { %5397 = vmatpush1.bf16.msra.mxu0 %v4435_v40  ;;  %5725 = vmatpush1.bf16.msra.mxu1 %v4437_v11  ;;  %v4515_v40 = vld [vmem:[#allocation5 + $0x740] sm:$0xff]  ;;  %v4517_v11 = vld [vmem:[#allocation5 + $0x750] sm:$0xff] }
 0x9e1   :  { %5398 = vmatprep.subr.bf16.mxu0 %v4444_v32  ;;  %5726 = vmatprep.subr.bf16.mxu1 %v4446_v44  ;;  %v4524_v32 = vld [vmem:[#allocation5 + $0x788] sm:$0xff]  ;;  %v4526_v44 = vld [vmem:[#allocation5 + $0x798] sm:$0xff] }
 0x9e4   :  { %5399 = vmatpush1.bf16.msra.mxu0 %v4443_v2  ;;  %5727 = vmatpush1.bf16.msra.mxu1 %v4445_v45  ;;  %v4523_v2 = vld [vmem:[#allocation5 + $0x780] sm:$0xff]  ;;  %v4525_v45 = vld [vmem:[#allocation5 + $0x790] sm:$0xff] }
 0x9e5   :  { %5400 = vmatprep.subr.bf16.mxu0 %v4452_v46  ;;  %5728 = vmatprep.subr.bf16.mxu1 %v4454_v47  ;;  %v4532_v46 = vld [vmem:[#allocation5 + $0x7c8] sm:$0xff]  ;;  %v4534_v47 = vld [vmem:[#allocation5 + $0x7d8] sm:$0xff] }
 0x9e8   :  { %5401 = vmatpush1.bf16.msra.mxu0 %v4451_v48  ;;  %5729 = vmatpush1.bf16.msra.mxu1 %v4453_v49  ;;  %v4531_v48 = vld [vmem:[#allocation5 + $0x7c0] sm:$0xff]  ;;  %v4533_v49 = vld [vmem:[#allocation5 + $0x7d0] sm:$0xff] }
 0x9e9   :  { %5402 = vmatprep.subr.bf16.mxu0 %v4460_v50  ;;  %5730 = vmatprep.subr.bf16.mxu1 %v4462_v51  ;;  %v4540_v50 = vld [vmem:[#allocation5 + $0x808] sm:$0xff]  ;;  %v4542_v51 = vld [vmem:[#allocation5 + $0x818] sm:$0xff] }
 0x9ec   :  { %5403 = vmatpush1.bf16.msra.mxu0 %v4459_v54  ;;  %5731 = vmatpush1.bf16.msra.mxu1 %v4461_v55  ;;  %v4539_v54 = vld [vmem:[#allocation5 + $0x800] sm:$0xff]  ;;  %v4541_v55 = vld [vmem:[#allocation5 + $0x810] sm:$0xff] }
 0x9ed   :  { %5404 = vmatprep.subr.bf16.mxu0 %v4468_v56  ;;  %5732 = vmatprep.subr.bf16.mxu1 %v4470_v33  ;;  %v4548_v56 = vld [vmem:[#allocation5 + $0x848] sm:$0xff]  ;;  %v4550_v33 = vld [vmem:[#allocation5 + $0x858] sm:$0xff] }
 0x9f0   :  { %5405 = vmatpush1.bf16.msra.mxu0 %v4467_v57  ;;  %5733 = vmatpush1.bf16.msra.mxu1 %v4469_v3  ;;  %v4547_v57 = vld [vmem:[#allocation5 + $0x840] sm:$0xff]  ;;  %v4549_v3 = vld [vmem:[#allocation5 + $0x850] sm:$0xff] }
 0x9f1   :  { %5406 = vmatprep.subr.bf16.mxu0 %v4476_v4  ;;  %5734 = vmatprep.subr.bf16.mxu1 %v4478_v31  ;;  %v4556_v4 = vld [vmem:[#allocation5 + $0x888] sm:$0xff]  ;;  %v4558_v31 = vld [vmem:[#allocation5 + $0x898] sm:$0xff] }
 0x9f4   :  { %5407 = vmatpush1.bf16.msra.mxu0 %v4475_v63  ;;  %5735 = vmatpush1.bf16.msra.mxu1 %v4477_v12  ;;  %v4555_v63 = vld [vmem:[#allocation5 + $0x880] sm:$0xff]  ;;  %v4557_v12 = vld [vmem:[#allocation5 + $0x890] sm:$0xff] }
 0x9f5   :  { %5408 = vmatprep.subr.bf16.mxu0 %v4484_v60  ;;  %5736 = vmatprep.subr.bf16.mxu1 %v4486_v13  ;;  %v4564_v60 = vld [vmem:[#allocation5 + $0x8c8] sm:$0xff]  ;;  %v4566_v13 = vld [vmem:[#allocation5 + $0x8d8] sm:$0xff] }
 0x9f8   :  { %5409 = vmatpush1.bf16.msra.mxu0 %v4483_v14  ;;  %5737 = vmatpush1.bf16.msra.mxu1 %v4485_v21  ;;  %v4563_v14 = vld [vmem:[#allocation5 + $0x8c0] sm:$0xff]  ;;  %v4565_v21 = vld [vmem:[#allocation5 + $0x8d0] sm:$0xff] }
 0x9f9   :  { %5410 = vmatprep.subr.bf16.mxu0 %v4492_v0  ;;  %5738 = vmatprep.subr.bf16.mxu1 %v4494_v1  ;;  %v4572_v0 = vld [vmem:[#allocation5 + $0x908] sm:$0xff]  ;;  %v4574_v1 = vld [vmem:[#allocation5 + $0x918] sm:$0xff] }
 0x9fc   :  { %5411 = vmatpush1.bf16.msra.mxu0 %v4491_v15  ;;  %5739 = vmatpush1.bf16.msra.mxu1 %v4493_v16  ;;  %v4571_v15 = vld [vmem:[#allocation5 + $0x900] sm:$0xff]  ;;  %v4573_v16 = vld [vmem:[#allocation5 + $0x910] sm:$0xff] }
 0x9fd   :  { %5412 = vmatprep.subr.bf16.mxu0 %v4500_v20  ;;  %5740 = vmatprep.subr.bf16.mxu1 %v4502_v61  ;;  %v4580_v20 = vld [vmem:[#allocation5 + $0x948] sm:$0xff]  ;;  %v4582_v61 = vld [vmem:[#allocation5 + $0x958] sm:$0xff] }
 0xa00   :  { %5413 = vmatpush1.bf16.msra.mxu0 %v4499_v22  ;;  %5741 = vmatpush1.bf16.msra.mxu1 %v4501_v8  ;;  %v4579_v22 = vld [vmem:[#allocation5 + $0x940] sm:$0xff]  ;;  %v4581_v8 = vld [vmem:[#allocation5 + $0x950] sm:$0xff] }
 0xa01   :  { %5414 = vmatprep.subr.bf16.mxu0 %v4508_v23  ;;  %5742 = vmatprep.subr.bf16.mxu1 %v4510_v24  ;;  %v4588_v23 = vld [vmem:[#allocation5 + $0x988] sm:$0xff]  ;;  %v4590_v24 = vld [vmem:[#allocation5 + $0x998] sm:$0xff] }
 0xa04   :  { %5415 = vmatpush1.bf16.msra.mxu0 %v4507_v5  ;;  %5743 = vmatpush1.bf16.msra.mxu1 %v4509_v25  ;;  %v4587_v5 = vld [vmem:[#allocation5 + $0x980] sm:$0xff]  ;;  %v4589_v25 = vld [vmem:[#allocation5 + $0x990] sm:$0xff] }
 0xa05   :  { %5416 = vmatprep.subr.bf16.mxu0 %v4516_v26  ;;  %5744 = vmatprep.subr.bf16.mxu1 %v4518_v27  ;;  %v4596_v26 = vld [vmem:[#allocation5 + $0x9c8] sm:$0xff]  ;;  %v4598_v27 = vld [vmem:[#allocation5 + $0x9d8] sm:$0xff] }
 0xa08   :  { %5417 = vmatpush1.bf16.msra.mxu0 %v4515_v40  ;;  %5745 = vmatpush1.bf16.msra.mxu1 %v4517_v11  ;;  %v4595_v40 = vld [vmem:[#allocation5 + $0x9c0] sm:$0xff]  ;;  %v4597_v11 = vld [vmem:[#allocation5 + $0x9d0] sm:$0xff] }
 0xa09   :  { %5418 = vmatprep.subr.bf16.mxu0 %v4524_v32  ;;  %5746 = vmatprep.subr.bf16.mxu1 %v4526_v44  ;;  %v4604_v32 = vld [vmem:[#allocation5 + $0xa08] sm:$0xff]  ;;  %v4606_v44 = vld [vmem:[#allocation5 + $0xa18] sm:$0xff] }
 0xa0c   :  { %5419 = vmatpush1.bf16.msra.mxu0 %v4523_v2  ;;  %5747 = vmatpush1.bf16.msra.mxu1 %v4525_v45  ;;  %v4603_v2 = vld [vmem:[#allocation5 + $0xa00] sm:$0xff]  ;;  %v4605_v45 = vld [vmem:[#allocation5 + $0xa10] sm:$0xff] }
 0xa0d   :  { %5420 = vmatprep.subr.bf16.mxu0 %v4532_v46  ;;  %5748 = vmatprep.subr.bf16.mxu1 %v4534_v47  ;;  %v4612_v46 = vld [vmem:[#allocation5 + $0xa48] sm:$0xff]  ;;  %v4614_v47 = vld [vmem:[#allocation5 + $0xa58] sm:$0xff] }
 0xa10   :  { %5421 = vmatpush1.bf16.msra.mxu0 %v4531_v48  ;;  %5749 = vmatpush1.bf16.msra.mxu1 %v4533_v49  ;;  %v4611_v48 = vld [vmem:[#allocation5 + $0xa40] sm:$0xff]  ;;  %v4613_v49 = vld [vmem:[#allocation5 + $0xa50] sm:$0xff] }
 0xa11   :  { %5431 = vmatprep.subr.bf16.mxu0 %v4540_v50  ;;  %5759 = vmatprep.subr.bf16.mxu1 %v4542_v51  ;;  %v4620_v50 = vld [vmem:[#allocation5 + $0xa88] sm:$0xff]  ;;  %v4622_v51 = vld [vmem:[#allocation5 + $0xa98] sm:$0xff] }
 0xa13   :  { %5423 = vmatmul.mubr.bf16.vlgmr.msra.gmra.mrb[32].mxu0 %v9322_v29  ;;  %5751 = vmatmul.mubr.bf16.vlgmr.msra.gmra.mrb[32].mxu1 %v9322_v29 }
 0xa14   :  { %5432 = vmatpush1.bf16.msra.mxu0 %v4539_v54  ;;  %5760 = vmatpush1.bf16.msra.mxu1 %v4541_v55  ;;  %v4619_v54 = vld [vmem:[#allocation5 + $0xa80] sm:$0xff]  ;;  %v4621_v55 = vld [vmem:[#allocation5 + $0xa90] sm:$0xff] }
 0xa15   :  { %5433 = vmatprep.subr.bf16.mxu0 %v4548_v56  ;;  %5761 = vmatprep.subr.bf16.mxu1 %v4550_v33  ;;  %v4628_v56 = vld [vmem:[#allocation5 + $0xac8] sm:$0xff]  ;;  %v4630_v33 = vld [vmem:[#allocation5 + $0xad8] sm:$0xff] }
 0xa16   :  { %5463 = vmatprep.mubr.bf16.mxu0 %v9352_v53  ;;  %5791 = vmatprep.mubr.bf16.mxu1 %v9352_v53 }
 0xa18   :  { %5434 = vmatpush1.bf16.msra.mxu0 %v4547_v57  ;;  %5762 = vmatpush1.bf16.msra.mxu1 %v4549_v3  ;;  %v4627_v57 = vld [vmem:[#allocation5 + $0xac0] sm:$0xff]  ;;  %v4629_v3 = vld [vmem:[#allocation5 + $0xad0] sm:$0xff] }
 0xa19   :  { %5435 = vmatprep.subr.bf16.mxu0 %v4556_v4  ;;  %5763 = vmatprep.subr.bf16.mxu1 %v4558_v31  ;;  %v4636_v4 = vld [vmem:[#allocation5 + $0xb08] sm:$0xff]  ;;  %v4638_v31 = vld [vmem:[#allocation5 + $0xb18] sm:$0xff] }
 0xa1c   :  { %5436 = vmatpush1.bf16.msra.mxu0 %v4555_v63  ;;  %5764 = vmatpush1.bf16.msra.mxu1 %v4557_v12  ;;  %v4635_v63 = vld [vmem:[#allocation5 + $0xb00] sm:$0xff]  ;;  %v4637_v12 = vld [vmem:[#allocation5 + $0xb10] sm:$0xff] }
 0xa1d   :  { %5437 = vmatprep.subr.bf16.mxu0 %v4564_v60  ;;  %5765 = vmatprep.subr.bf16.mxu1 %v4566_v13  ;;  %v4644_v60 = vld [vmem:[#allocation5 + $0xb48] sm:$0xff]  ;;  %v4646_v13 = vld [vmem:[#allocation5 + $0xb58] sm:$0xff] }
 0xa20   :  { %5438 = vmatpush1.bf16.msra.mxu0 %v4563_v14  ;;  %5766 = vmatpush1.bf16.msra.mxu1 %v4565_v21  ;;  %v4643_v14 = vld [vmem:[#allocation5 + $0xb40] sm:$0xff]  ;;  %v4645_v21 = vld [vmem:[#allocation5 + $0xb50] sm:$0xff] }
 0xa21   :  { %5439 = vmatprep.subr.bf16.mxu0 %v4572_v0  ;;  %5767 = vmatprep.subr.bf16.mxu1 %v4574_v1  ;;  %v4652_v0 = vld [vmem:[#allocation5 + $0xb88] sm:$0xff]  ;;  %v4654_v1 = vld [vmem:[#allocation5 + $0xb98] sm:$0xff] }
 0xa24   :  { %5440 = vmatpush1.bf16.msra.mxu0 %v4571_v15  ;;  %5768 = vmatpush1.bf16.msra.mxu1 %v4573_v16  ;;  %v4651_v15 = vld [vmem:[#allocation5 + $0xb80] sm:$0xff]  ;;  %v4653_v16 = vld [vmem:[#allocation5 + $0xb90] sm:$0xff] }
 0xa25   :  { %5441 = vmatprep.subr.bf16.mxu0 %v4580_v20  ;;  %5769 = vmatprep.subr.bf16.mxu1 %v4582_v61  ;;  %v4660_v20 = vld [vmem:[#allocation5 + $0xbc8] sm:$0xff]  ;;  %v4662_v61 = vld [vmem:[#allocation5 + $0xbd8] sm:$0xff] }
 0xa28   :  { %5442 = vmatpush1.bf16.msra.mxu0 %v4579_v22  ;;  %5770 = vmatpush1.bf16.msra.mxu1 %v4581_v8  ;;  %v4659_v22 = vld [vmem:[#allocation5 + $0xbc0] sm:$0xff]  ;;  %v4661_v8 = vld [vmem:[#allocation5 + $0xbd0] sm:$0xff] }
 0xa29   :  { %5443 = vmatprep.subr.bf16.mxu0 %v4588_v23  ;;  %5771 = vmatprep.subr.bf16.mxu1 %v4590_v24  ;;  %v4668_v23 = vld [vmem:[#allocation5 + $0xc08] sm:$0xff]  ;;  %v4670_v24 = vld [vmem:[#allocation5 + $0xc18] sm:$0xff] }
 0xa2c   :  { %5444 = vmatpush1.bf16.msra.mxu0 %v4587_v5  ;;  %5772 = vmatpush1.bf16.msra.mxu1 %v4589_v25  ;;  %v4667_v5 = vld [vmem:[#allocation5 + $0xc00] sm:$0xff]  ;;  %v4669_v25 = vld [vmem:[#allocation5 + $0xc10] sm:$0xff] }
 0xa2d   :  { %5445 = vmatprep.subr.bf16.mxu0 %v4596_v26  ;;  %5773 = vmatprep.subr.bf16.mxu1 %v4598_v27  ;;  %v4676_v26 = vld [vmem:[#allocation5 + $0xc48] sm:$0xff]  ;;  %v4678_v27 = vld [vmem:[#allocation5 + $0xc58] sm:$0xff] }
 0xa30   :  { %5446 = vmatpush1.bf16.msra.mxu0 %v4595_v40  ;;  %5774 = vmatpush1.bf16.msra.mxu1 %v4597_v11  ;;  %v4675_v40 = vld [vmem:[#allocation5 + $0xc40] sm:$0xff]  ;;  %v4677_v11 = vld [vmem:[#allocation5 + $0xc50] sm:$0xff] }
 0xa31   :  { %5447 = vmatprep.subr.bf16.mxu0 %v4604_v32  ;;  %5775 = vmatprep.subr.bf16.mxu1 %v4606_v44  ;;  %v4684_v32 = vld [vmem:[#allocation5 + $0xc88] sm:$0xff]  ;;  %v4686_v44 = vld [vmem:[#allocation5 + $0xc98] sm:$0xff] }
 0xa34   :  { %5448 = vmatpush1.bf16.msra.mxu0 %v4603_v2  ;;  %5776 = vmatpush1.bf16.msra.mxu1 %v4605_v45  ;;  %v4683_v2 = vld [vmem:[#allocation5 + $0xc80] sm:$0xff]  ;;  %v4685_v45 = vld [vmem:[#allocation5 + $0xc90] sm:$0xff] }
 0xa35   :  { %5449 = vmatprep.subr.bf16.mxu0 %v4612_v46  ;;  %5777 = vmatprep.subr.bf16.mxu1 %v4614_v47  ;;  %v4692_v46 = vld [vmem:[#allocation5 + $0xcc8] sm:$0xff]  ;;  %v4694_v47 = vld [vmem:[#allocation5 + $0xcd8] sm:$0xff] }
 0xa38   :  { %5450 = vmatpush1.bf16.msra.mxu0 %v4611_v48  ;;  %5778 = vmatpush1.bf16.msra.mxu1 %v4613_v49  ;;  %v4691_v48 = vld [vmem:[#allocation5 + $0xcc0] sm:$0xff]  ;;  %v4693_v49 = vld [vmem:[#allocation5 + $0xcd0] sm:$0xff] }
 0xa39   :  { %5451 = vmatprep.subr.bf16.mxu0 %v4620_v50  ;;  %5779 = vmatprep.subr.bf16.mxu1 %v4622_v51  ;;  %v4700_v50 = vld [vmem:[#allocation5 + $0xd08] sm:$0xff]  ;;  %v4702_v51 = vld [vmem:[#allocation5 + $0xd18] sm:$0xff] }
 0xa3c   :  { %5452 = vmatpush1.bf16.msra.mxu0 %v4619_v54  ;;  %5780 = vmatpush1.bf16.msra.mxu1 %v4621_v55  ;;  %v4699_v54 = vld [vmem:[#allocation5 + $0xd00] sm:$0xff]  ;;  %v4701_v55 = vld [vmem:[#allocation5 + $0xd10] sm:$0xff] }
 0xa3d   :  { %5453 = vmatprep.subr.bf16.mxu0 %v4628_v56  ;;  %5781 = vmatprep.subr.bf16.mxu1 %v4630_v33  ;;  %v4708_v56 = vld [vmem:[#allocation5 + $0xd48] sm:$0xff]  ;;  %v4710_v33 = vld [vmem:[#allocation5 + $0xd58] sm:$0xff] }
 0xa40   :  { %5454 = vmatpush1.bf16.msra.mxu0 %v4627_v57  ;;  %5782 = vmatpush1.bf16.msra.mxu1 %v4629_v3  ;;  %v4707_v57 = vld [vmem:[#allocation5 + $0xd40] sm:$0xff]  ;;  %v4709_v3 = vld [vmem:[#allocation5 + $0xd50] sm:$0xff] }
 0xa41   :  { %5455 = vmatprep.subr.bf16.mxu0 %v4636_v4  ;;  %5783 = vmatprep.subr.bf16.mxu1 %v4638_v31  ;;  %v4716_v4 = vld [vmem:[#allocation5 + $0xd88] sm:$0xff]  ;;  %v4718_v31 = vld [vmem:[#allocation5 + $0xd98] sm:$0xff] }
 0xa44   :  { %5456 = vmatpush1.bf16.msra.mxu0 %v4635_v63  ;;  %5784 = vmatpush1.bf16.msra.mxu1 %v4637_v12  ;;  %v4715_v63 = vld [vmem:[#allocation5 + $0xd80] sm:$0xff]  ;;  %v4717_v12 = vld [vmem:[#allocation5 + $0xd90] sm:$0xff] }
 0xa45   :  { %5457 = vmatprep.subr.bf16.mxu0 %v4644_v60  ;;  %5785 = vmatprep.subr.bf16.mxu1 %v4646_v13  ;;  %v4724_v60 = vld [vmem:[#allocation5 + $0xdc8] sm:$0xff]  ;;  %v4726_v13 = vld [vmem:[#allocation5 + $0xdd8] sm:$0xff] }
 0xa48   :  { %5458 = vmatpush1.bf16.msra.mxu0 %v4643_v14  ;;  %5786 = vmatpush1.bf16.msra.mxu1 %v4645_v21  ;;  %v4723_v14 = vld [vmem:[#allocation5 + $0xdc0] sm:$0xff]  ;;  %v4725_v21 = vld [vmem:[#allocation5 + $0xdd0] sm:$0xff] }
 0xa49   :  { %5459 = vmatprep.subr.bf16.mxu0 %v4652_v0  ;;  %5787 = vmatprep.subr.bf16.mxu1 %v4654_v1  ;;  %v4732_v0 = vld [vmem:[#allocation5 + $0xe08] sm:$0xff]  ;;  %v4734_v1 = vld [vmem:[#allocation5 + $0xe18] sm:$0xff] }
 0xa4c   :  { %5460 = vmatpush1.bf16.msra.mxu0 %v4651_v15  ;;  %5788 = vmatpush1.bf16.msra.mxu1 %v4653_v16  ;;  %v4731_v15 = vld [vmem:[#allocation5 + $0xe00] sm:$0xff]  ;;  %v4733_v16 = vld [vmem:[#allocation5 + $0xe10] sm:$0xff] }
 0xa4d   :  { %5461 = vmatprep.subr.bf16.mxu0 %v4660_v20  ;;  %5789 = vmatprep.subr.bf16.mxu1 %v4662_v61  ;;  %v4740_v20 = vld [vmem:[#allocation5 + $0xe48] sm:$0xff]  ;;  %v4742_v61 = vld [vmem:[#allocation5 + $0xe58] sm:$0xff] }
 0xa50   :  { %5462 = vmatpush1.bf16.msra.mxu0 %v4659_v22  ;;  %5790 = vmatpush1.bf16.msra.mxu1 %v4661_v8  ;;  %v4739_v22 = vld [vmem:[#allocation5 + $0xe40] sm:$0xff]  ;;  %v4741_v8 = vld [vmem:[#allocation5 + $0xe50] sm:$0xff] }
 0xa51   :  { %5472 = vmatprep.subr.bf16.mxu0 %v4668_v23  ;;  %5800 = vmatprep.subr.bf16.mxu1 %v4670_v24  ;;  %v4748_v23 = vld [vmem:[#allocation5 + $0xe88] sm:$0xff]  ;;  %v4750_v24 = vld [vmem:[#allocation5 + $0xe98] sm:$0xff] }
 0xa53   :  { %5464 = vmatmul.mubr.bf16.vlgmr.msra.gmra.mrb[32].mxu0 %v9348_v52  ;;  %5792 = vmatmul.mubr.bf16.vlgmr.msra.gmra.mrb[32].mxu1 %v9348_v52 }
 0xa54   :  { %5473 = vmatpush1.bf16.msra.mxu0 %v4667_v5  ;;  %5801 = vmatpush1.bf16.msra.mxu1 %v4669_v25  ;;  %v4747_v5 = vld [vmem:[#allocation5 + $0xe80] sm:$0xff]  ;;  %v4749_v25 = vld [vmem:[#allocation5 + $0xe90] sm:$0xff] }
 0xa55   :  { %5474 = vmatprep.subr.bf16.mxu0 %v4676_v26  ;;  %5802 = vmatprep.subr.bf16.mxu1 %v4678_v27  ;;  %v4756_v26 = vld [vmem:[#allocation5 + $0xec8] sm:$0xff]  ;;  %v4758_v27 = vld [vmem:[#allocation5 + $0xed8] sm:$0xff] }
 0xa56   :  { %5504 = vmatprep.mubr.bf16.mxu0 %v9354_v59  ;;  %5832 = vmatprep.mubr.bf16.mxu1 %v9354_v59 }
 0xa58   :  { %5475 = vmatpush1.bf16.msra.mxu0 %v4675_v40  ;;  %5803 = vmatpush1.bf16.msra.mxu1 %v4677_v11  ;;  %v4755_v40 = vld [vmem:[#allocation5 + $0xec0] sm:$0xff]  ;;  %v4757_v11 = vld [vmem:[#allocation5 + $0xed0] sm:$0xff] }
 0xa59   :  { %5476 = vmatprep.subr.bf16.mxu0 %v4684_v32  ;;  %5804 = vmatprep.subr.bf16.mxu1 %v4686_v44  ;;  %v4764_v32 = vld [vmem:[#allocation5 + $0xf08] sm:$0xff]  ;;  %v4766_v44 = vld [vmem:[#allocation5 + $0xf18] sm:$0xff] }
 0xa5c   :  { %5477 = vmatpush1.bf16.msra.mxu0 %v4683_v2  ;;  %5805 = vmatpush1.bf16.msra.mxu1 %v4685_v45  ;;  %v4763_v2 = vld [vmem:[#allocation5 + $0xf00] sm:$0xff]  ;;  %v4765_v45 = vld [vmem:[#allocation5 + $0xf10] sm:$0xff] }
 0xa5d   :  { %5478 = vmatprep.subr.bf16.mxu0 %v4692_v46  ;;  %5806 = vmatprep.subr.bf16.mxu1 %v4694_v47  ;;  %v4772_v46 = vld [vmem:[#allocation5 + $0xf48] sm:$0xff]  ;;  %v4774_v47 = vld [vmem:[#allocation5 + $0xf58] sm:$0xff] }
 0xa60   :  { %5479 = vmatpush1.bf16.msra.mxu0 %v4691_v48  ;;  %5807 = vmatpush1.bf16.msra.mxu1 %v4693_v49  ;;  %v4771_v48 = vld [vmem:[#allocation5 + $0xf40] sm:$0xff]  ;;  %v4773_v49 = vld [vmem:[#allocation5 + $0xf50] sm:$0xff] }
 0xa61   :  { %5480 = vmatprep.subr.bf16.mxu0 %v4700_v50  ;;  %5808 = vmatprep.subr.bf16.mxu1 %v4702_v51  ;;  %v4780_v50 = vld [vmem:[#allocation5 + $0xf88] sm:$0xff]  ;;  %v4782_v51 = vld [vmem:[#allocation5 + $0xf98] sm:$0xff] }
 0xa64   :  { %5481 = vmatpush1.bf16.msra.mxu0 %v4699_v54  ;;  %5809 = vmatpush1.bf16.msra.mxu1 %v4701_v55  ;;  %v4779_v54 = vld [vmem:[#allocation5 + $0xf80] sm:$0xff]  ;;  %v4781_v55 = vld [vmem:[#allocation5 + $0xf90] sm:$0xff] }
 0xa65   :  { %5482 = vmatprep.subr.bf16.mxu0 %v4708_v56  ;;  %5810 = vmatprep.subr.bf16.mxu1 %v4710_v33  ;;  %v4788_v56 = vld [vmem:[#allocation5 + $0xfc8] sm:$0xff]  ;;  %v4790_v33 = vld [vmem:[#allocation5 + $0xfd8] sm:$0xff] }
 0xa68   :  { %5483 = vmatpush1.bf16.msra.mxu0 %v4707_v57  ;;  %5811 = vmatpush1.bf16.msra.mxu1 %v4709_v3  ;;  %v4787_v57 = vld [vmem:[#allocation5 + $0xfc0] sm:$0xff]  ;;  %v4789_v3 = vld [vmem:[#allocation5 + $0xfd0] sm:$0xff] }
 0xa69   :  { %5484 = vmatprep.subr.bf16.mxu0 %v4716_v4  ;;  %5812 = vmatprep.subr.bf16.mxu1 %v4718_v31  ;;  %v4796_v4 = vld [vmem:[#allocation5 + $0x1008] sm:$0xff]  ;;  %v4798_v31 = vld [vmem:[#allocation5 + $0x1018] sm:$0xff] }
 0xa6c   :  { %5485 = vmatpush1.bf16.msra.mxu0 %v4715_v63  ;;  %5813 = vmatpush1.bf16.msra.mxu1 %v4717_v12  ;;  %v4795_v63 = vld [vmem:[#allocation5 + $0x1000] sm:$0xff]  ;;  %v4797_v12 = vld [vmem:[#allocation5 + $0x1010] sm:$0xff] }
 0xa6d   :  { %5486 = vmatprep.subr.bf16.mxu0 %v4724_v60  ;;  %5814 = vmatprep.subr.bf16.mxu1 %v4726_v13  ;;  %v4804_v60 = vld [vmem:[#allocation5 + $0x1048] sm:$0xff]  ;;  %v4806_v13 = vld [vmem:[#allocation5 + $0x1058] sm:$0xff] }
 0xa70   :  { %5487 = vmatpush1.bf16.msra.mxu0 %v4723_v14  ;;  %5815 = vmatpush1.bf16.msra.mxu1 %v4725_v21  ;;  %v4803_v14 = vld [vmem:[#allocation5 + $0x1040] sm:$0xff]  ;;  %v4805_v21 = vld [vmem:[#allocation5 + $0x1050] sm:$0xff] }
 0xa71   :  { %5488 = vmatprep.subr.bf16.mxu0 %v4732_v0  ;;  %5816 = vmatprep.subr.bf16.mxu1 %v4734_v1  ;;  %v4812_v0 = vld [vmem:[#allocation5 + $0x1088] sm:$0xff]  ;;  %v4814_v1 = vld [vmem:[#allocation5 + $0x1098] sm:$0xff] }
 0xa74   :  { %5489 = vmatpush1.bf16.msra.mxu0 %v4731_v15  ;;  %5817 = vmatpush1.bf16.msra.mxu1 %v4733_v16  ;;  %v4811_v15 = vld [vmem:[#allocation5 + $0x1080] sm:$0xff]  ;;  %v4813_v16 = vld [vmem:[#allocation5 + $0x1090] sm:$0xff] }
 0xa75   :  { %5490 = vmatprep.subr.bf16.mxu0 %v4740_v20  ;;  %5818 = vmatprep.subr.bf16.mxu1 %v4742_v61  ;;  %v4820_v20 = vld [vmem:[#allocation5 + $0x10c8] sm:$0xff]  ;;  %v4822_v61 = vld [vmem:[#allocation5 + $0x10d8] sm:$0xff] }
 0xa78   :  { %5491 = vmatpush1.bf16.msra.mxu0 %v4739_v22  ;;  %5819 = vmatpush1.bf16.msra.mxu1 %v4741_v8  ;;  %v4819_v22 = vld [vmem:[#allocation5 + $0x10c0] sm:$0xff]  ;;  %v4821_v8 = vld [vmem:[#allocation5 + $0x10d0] sm:$0xff] }
 0xa79   :  { %5492 = vmatprep.subr.bf16.mxu0 %v4748_v23  ;;  %5820 = vmatprep.subr.bf16.mxu1 %v4750_v24  ;;  %v4828_v23 = vld [vmem:[#allocation5 + $0x1108] sm:$0xff]  ;;  %v4830_v24 = vld [vmem:[#allocation5 + $0x1118] sm:$0xff] }
 0xa7c   :  { %5493 = vmatpush1.bf16.msra.mxu0 %v4747_v5  ;;  %5821 = vmatpush1.bf16.msra.mxu1 %v4749_v25  ;;  %v4827_v5 = vld [vmem:[#allocation5 + $0x1100] sm:$0xff]  ;;  %v4829_v25 = vld [vmem:[#allocation5 + $0x1110] sm:$0xff] }
 0xa7d   :  { %5494 = vmatprep.subr.bf16.mxu0 %v4756_v26  ;;  %5822 = vmatprep.subr.bf16.mxu1 %v4758_v27  ;;  %v4836_v26 = vld [vmem:[#allocation5 + $0x1148] sm:$0xff]  ;;  %v4838_v27 = vld [vmem:[#allocation5 + $0x1158] sm:$0xff] }
 0xa80   :  { %5495 = vmatpush1.bf16.msra.mxu0 %v4755_v40  ;;  %5823 = vmatpush1.bf16.msra.mxu1 %v4757_v11  ;;  %v4835_v40 = vld [vmem:[#allocation5 + $0x1140] sm:$0xff]  ;;  %v4837_v11 = vld [vmem:[#allocation5 + $0x1150] sm:$0xff] }
 0xa81   :  { %5496 = vmatprep.subr.bf16.mxu0 %v4764_v32  ;;  %5824 = vmatprep.subr.bf16.mxu1 %v4766_v44  ;;  %v4844_v32 = vld [vmem:[#allocation5 + $0x1188] sm:$0xff]  ;;  %v4846_v44 = vld [vmem:[#allocation5 + $0x1198] sm:$0xff] }
 0xa84   :  { %5497 = vmatpush1.bf16.msra.mxu0 %v4763_v2  ;;  %5825 = vmatpush1.bf16.msra.mxu1 %v4765_v45  ;;  %v4843_v2 = vld [vmem:[#allocation5 + $0x1180] sm:$0xff]  ;;  %v4845_v45 = vld [vmem:[#allocation5 + $0x1190] sm:$0xff] }
 0xa85   :  { %5498 = vmatprep.subr.bf16.mxu0 %v4772_v46  ;;  %5826 = vmatprep.subr.bf16.mxu1 %v4774_v47  ;;  %v4852_v46 = vld [vmem:[#allocation5 + $0x11c8] sm:$0xff]  ;;  %v4854_v47 = vld [vmem:[#allocation5 + $0x11d8] sm:$0xff] }
 0xa88   :  { %5499 = vmatpush1.bf16.msra.mxu0 %v4771_v48  ;;  %5827 = vmatpush1.bf16.msra.mxu1 %v4773_v49  ;;  %v4851_v48 = vld [vmem:[#allocation5 + $0x11c0] sm:$0xff]  ;;  %v4853_v49 = vld [vmem:[#allocation5 + $0x11d0] sm:$0xff] }
 0xa89   :  { %5500 = vmatprep.subr.bf16.mxu0 %v4780_v50  ;;  %5828 = vmatprep.subr.bf16.mxu1 %v4782_v51  ;;  %v4860_v50 = vld [vmem:[#allocation5 + $0x1208] sm:$0xff]  ;;  %v4862_v51 = vld [vmem:[#allocation5 + $0x1218] sm:$0xff] }
 0xa8c   :  { %5501 = vmatpush1.bf16.msra.mxu0 %v4779_v54  ;;  %5829 = vmatpush1.bf16.msra.mxu1 %v4781_v55  ;;  %v4859_v54 = vld [vmem:[#allocation5 + $0x1200] sm:$0xff]  ;;  %v4861_v55 = vld [vmem:[#allocation5 + $0x1210] sm:$0xff] }
 0xa8d   :  { %5502 = vmatprep.subr.bf16.mxu0 %v4788_v56  ;;  %5830 = vmatprep.subr.bf16.mxu1 %v4790_v33  ;;  %v4868_v56 = vld [vmem:[#allocation5 + $0x1248] sm:$0xff]  ;;  %v4870_v33 = vld [vmem:[#allocation5 + $0x1258] sm:$0xff] }
 0xa90   :  { %5503 = vmatpush1.bf16.msra.mxu0 %v4787_v57  ;;  %5831 = vmatpush1.bf16.msra.mxu1 %v4789_v3  ;;  %v4867_v57 = vld [vmem:[#allocation5 + $0x1240] sm:$0xff]  ;;  %v4869_v3 = vld [vmem:[#allocation5 + $0x1250] sm:$0xff] }
 0xa91   :  { %5513 = vmatprep.subr.bf16.mxu0 %v4796_v4  ;;  %5841 = vmatprep.subr.bf16.mxu1 %v4798_v31  ;;  %v4876_v4 = vld [vmem:[#allocation5 + $0x1288] sm:$0xff]  ;;  %v4878_v31 = vld [vmem:[#allocation5 + $0x1298] sm:$0xff] }
 0xa93   :  { %5505 = vmatmul.mubr.bf16.vlgmr.msra.gmra.mrb[32].mxu0 %v9350_v30  ;;  %5833 = vmatmul.mubr.bf16.vlgmr.msra.gmra.mrb[32].mxu1 %v9350_v30 }
 0xa94   :  { %5514 = vmatpush1.bf16.msra.mxu0 %v4795_v63  ;;  %5842 = vmatpush1.bf16.msra.mxu1 %v4797_v12  ;;  %v4875_v63 = vld [vmem:[#allocation5 + $0x1280] sm:$0xff]  ;;  %v4877_v12 = vld [vmem:[#allocation5 + $0x1290] sm:$0xff] }
 0xa95   :  { %5515 = vmatprep.subr.bf16.mxu0 %v4804_v60  ;;  %5843 = vmatprep.subr.bf16.mxu1 %v4806_v13  ;;  %v4884_v60 = vld [vmem:[#allocation5 + $0x12c8] sm:$0xff]  ;;  %v4886_v13 = vld [vmem:[#allocation5 + $0x12d8] sm:$0xff] }
 0xa96   :  { %5545 = vmatprep.mubr.bf16.mxu0 %v9386_v18  ;;  %5873 = vmatprep.mubr.bf16.mxu1 %v9386_v18 }
 0xa98   :  { %5516 = vmatpush1.bf16.msra.mxu0 %v4803_v14  ;;  %5844 = vmatpush1.bf16.msra.mxu1 %v4805_v21  ;;  %v4883_v14 = vld [vmem:[#allocation5 + $0x12c0] sm:$0xff]  ;;  %v4885_v21 = vld [vmem:[#allocation5 + $0x12d0] sm:$0xff] }
 0xa99   :  { %5517 = vmatprep.subr.bf16.mxu0 %v4812_v0  ;;  %5845 = vmatprep.subr.bf16.mxu1 %v4814_v1  ;;  %v4892_v0 = vld [vmem:[#allocation5 + $0x1308] sm:$0xff]  ;;  %v4894_v1 = vld [vmem:[#allocation5 + $0x1318] sm:$0xff] }
 0xa9c   :  { %5518 = vmatpush1.bf16.msra.mxu0 %v4811_v15  ;;  %5846 = vmatpush1.bf16.msra.mxu1 %v4813_v16  ;;  %v4891_v15 = vld [vmem:[#allocation5 + $0x1300] sm:$0xff]  ;;  %v4893_v16 = vld [vmem:[#allocation5 + $0x1310] sm:$0xff] }
 0xa9d   :  { %5519 = vmatprep.subr.bf16.mxu0 %v4820_v20  ;;  %5847 = vmatprep.subr.bf16.mxu1 %v4822_v61  ;;  %v4900_v20 = vld [vmem:[#allocation5 + $0x1348] sm:$0xff]  ;;  %v4902_v61 = vld [vmem:[#allocation5 + $0x1358] sm:$0xff] }
 0xaa0   :  { %5520 = vmatpush1.bf16.msra.mxu0 %v4819_v22  ;;  %5848 = vmatpush1.bf16.msra.mxu1 %v4821_v8  ;;  %v4899_v22 = vld [vmem:[#allocation5 + $0x1340] sm:$0xff]  ;;  %v4901_v8 = vld [vmem:[#allocation5 + $0x1350] sm:$0xff] }
 0xaa1   :  { %5521 = vmatprep.subr.bf16.mxu0 %v4828_v23  ;;  %5849 = vmatprep.subr.bf16.mxu1 %v4830_v24  ;;  %v4908_v23 = vld [vmem:[#allocation5 + $0x1388] sm:$0xff]  ;;  %v4910_v24 = vld [vmem:[#allocation5 + $0x1398] sm:$0xff] }
 0xaa4   :  { %5522 = vmatpush1.bf16.msra.mxu0 %v4827_v5  ;;  %5850 = vmatpush1.bf16.msra.mxu1 %v4829_v25  ;;  %v4907_v5 = vld [vmem:[#allocation5 + $0x1380] sm:$0xff]  ;;  %v4909_v25 = vld [vmem:[#allocation5 + $0x1390] sm:$0xff] }
 0xaa5   :  { %5523 = vmatprep.subr.bf16.mxu0 %v4836_v26  ;;  %5851 = vmatprep.subr.bf16.mxu1 %v4838_v27  ;;  %v4916_v26 = vld [vmem:[#allocation5 + $0x13c8] sm:$0xff]  ;;  %v4918_v27 = vld [vmem:[#allocation5 + $0x13d8] sm:$0xff] }
 0xaa8   :  { %5524 = vmatpush1.bf16.msra.mxu0 %v4835_v40  ;;  %5852 = vmatpush1.bf16.msra.mxu1 %v4837_v11  ;;  %v4915_v40 = vld [vmem:[#allocation5 + $0x13c0] sm:$0xff]  ;;  %v4917_v11 = vld [vmem:[#allocation5 + $0x13d0] sm:$0xff] }
 0xaa9   :  { %5525 = vmatprep.subr.bf16.mxu0 %v4844_v32  ;;  %5853 = vmatprep.subr.bf16.mxu1 %v4846_v44  ;;  %v4924_v32 = vld [vmem:[#allocation5 + $0x1408] sm:$0xff]  ;;  %v4926_v44 = vld [vmem:[#allocation5 + $0x1418] sm:$0xff] }
 0xaac   :  { %5526 = vmatpush1.bf16.msra.mxu0 %v4843_v2  ;;  %5854 = vmatpush1.bf16.msra.mxu1 %v4845_v45  ;;  %v4923_v2 = vld [vmem:[#allocation5 + $0x1400] sm:$0xff]  ;;  %v4925_v45 = vld [vmem:[#allocation5 + $0x1410] sm:$0xff] }
 0xaad   :  { %5527 = vmatprep.subr.bf16.mxu0 %v4852_v46  ;;  %5855 = vmatprep.subr.bf16.mxu1 %v4854_v47  ;;  %v4932_v46 = vld [vmem:[#allocation5 + $0x1448] sm:$0xff]  ;;  %v4934_v47 = vld [vmem:[#allocation5 + $0x1458] sm:$0xff] }
 0xab0   :  { %5528 = vmatpush1.bf16.msra.mxu0 %v4851_v48  ;;  %5856 = vmatpush1.bf16.msra.mxu1 %v4853_v49  ;;  %v4931_v48 = vld [vmem:[#allocation5 + $0x1440] sm:$0xff]  ;;  %v4933_v49 = vld [vmem:[#allocation5 + $0x1450] sm:$0xff] }
 0xab1   :  { %5529 = vmatprep.subr.bf16.mxu0 %v4860_v50  ;;  %5857 = vmatprep.subr.bf16.mxu1 %v4862_v51  ;;  %v4940_v50 = vld [vmem:[#allocation5 + $0x1488] sm:$0xff]  ;;  %v4942_v51 = vld [vmem:[#allocation5 + $0x1498] sm:$0xff] }
 0xab4   :  { %5530 = vmatpush1.bf16.msra.mxu0 %v4859_v54  ;;  %5858 = vmatpush1.bf16.msra.mxu1 %v4861_v55  ;;  %v4939_v54 = vld [vmem:[#allocation5 + $0x1480] sm:$0xff]  ;;  %v4941_v55 = vld [vmem:[#allocation5 + $0x1490] sm:$0xff] }
 0xab5   :  { %5531 = vmatprep.subr.bf16.mxu0 %v4868_v56  ;;  %5859 = vmatprep.subr.bf16.mxu1 %v4870_v33  ;;  %v4948_v56 = vld [vmem:[#allocation5 + $0x14c8] sm:$0xff]  ;;  %v4950_v33 = vld [vmem:[#allocation5 + $0x14d8] sm:$0xff] }
 0xab8   :  { %5532 = vmatpush1.bf16.msra.mxu0 %v4867_v57  ;;  %5860 = vmatpush1.bf16.msra.mxu1 %v4869_v3  ;;  %v4947_v57 = vld [vmem:[#allocation5 + $0x14c0] sm:$0xff]  ;;  %v4949_v3 = vld [vmem:[#allocation5 + $0x14d0] sm:$0xff] }
 0xab9   :  { %5533 = vmatprep.subr.bf16.mxu0 %v4876_v4  ;;  %5861 = vmatprep.subr.bf16.mxu1 %v4878_v31  ;;  %v4956_v4 = vld [vmem:[#allocation5 + $0x1508] sm:$0xff]  ;;  %v4958_v31 = vld [vmem:[#allocation5 + $0x1518] sm:$0xff] }
 0xabc   :  { %5534 = vmatpush1.bf16.msra.mxu0 %v4875_v63  ;;  %5862 = vmatpush1.bf16.msra.mxu1 %v4877_v12  ;;  %v4955_v63 = vld [vmem:[#allocation5 + $0x1500] sm:$0xff]  ;;  %v4957_v12 = vld [vmem:[#allocation5 + $0x1510] sm:$0xff] }
 0xabd   :  { %5535 = vmatprep.subr.bf16.mxu0 %v4884_v60  ;;  %5863 = vmatprep.subr.bf16.mxu1 %v4886_v13  ;;  %v4964_v60 = vld [vmem:[#allocation5 + $0x1548] sm:$0xff]  ;;  %v4966_v13 = vld [vmem:[#allocation5 + $0x1558] sm:$0xff] }
 0xac0   :  { %5536 = vmatpush1.bf16.msra.mxu0 %v4883_v14  ;;  %5864 = vmatpush1.bf16.msra.mxu1 %v4885_v21  ;;  %v4963_v14 = vld [vmem:[#allocation5 + $0x1540] sm:$0xff]  ;;  %v4965_v21 = vld [vmem:[#allocation5 + $0x1550] sm:$0xff] }
 0xac1   :  { %5537 = vmatprep.subr.bf16.mxu0 %v4892_v0  ;;  %5865 = vmatprep.subr.bf16.mxu1 %v4894_v1  ;;  %v4972_v0 = vld [vmem:[#allocation5 + $0x1588] sm:$0xff]  ;;  %v4974_v1 = vld [vmem:[#allocation5 + $0x1598] sm:$0xff] }
 0xac4   :  { %5538 = vmatpush1.bf16.msra.mxu0 %v4891_v15  ;;  %5866 = vmatpush1.bf16.msra.mxu1 %v4893_v16  ;;  %v4971_v15 = vld [vmem:[#allocation5 + $0x1580] sm:$0xff]  ;;  %v4973_v16 = vld [vmem:[#allocation5 + $0x1590] sm:$0xff] }
 0xac5   :  { %5539 = vmatprep.subr.bf16.mxu0 %v4900_v20  ;;  %5867 = vmatprep.subr.bf16.mxu1 %v4902_v61  ;;  %v4980_v20 = vld [vmem:[#allocation5 + $0x15c8] sm:$0xff]  ;;  %v4982_v61 = vld [vmem:[#allocation5 + $0x15d8] sm:$0xff] }
 0xac8   :  { %5540 = vmatpush1.bf16.msra.mxu0 %v4899_v22  ;;  %5868 = vmatpush1.bf16.msra.mxu1 %v4901_v8  ;;  %v4979_v22 = vld [vmem:[#allocation5 + $0x15c0] sm:$0xff]  ;;  %v4981_v8 = vld [vmem:[#allocation5 + $0x15d0] sm:$0xff] }
 0xac9   :  { %5541 = vmatprep.subr.bf16.mxu0 %v4908_v23  ;;  %5869 = vmatprep.subr.bf16.mxu1 %v4910_v24  ;;  %v4988_v23 = vld [vmem:[#allocation5 + $0x1608] sm:$0xff]  ;;  %v4990_v24 = vld [vmem:[#allocation5 + $0x1618] sm:$0xff] }
 0xacc   :  { %5542 = vmatpush1.bf16.msra.mxu0 %v4907_v5  ;;  %5870 = vmatpush1.bf16.msra.mxu1 %v4909_v25  ;;  %v4987_v5 = vld [vmem:[#allocation5 + $0x1600] sm:$0xff]  ;;  %v4989_v25 = vld [vmem:[#allocation5 + $0x1610] sm:$0xff] }
 0xacd   :  { %5543 = vmatprep.subr.bf16.mxu0 %v4916_v26  ;;  %5871 = vmatprep.subr.bf16.mxu1 %v4918_v27  ;;  %v4996_v26 = vld [vmem:[#allocation5 + $0x1648] sm:$0xff]  ;;  %v4998_v27 = vld [vmem:[#allocation5 + $0x1658] sm:$0xff] }
 0xad0   :  { %5544 = vmatpush1.bf16.msra.mxu0 %v4915_v40  ;;  %5872 = vmatpush1.bf16.msra.mxu1 %v4917_v11  ;;  %v4995_v40 = vld [vmem:[#allocation5 + $0x1640] sm:$0xff]  ;;  %v4997_v11 = vld [vmem:[#allocation5 + $0x1650] sm:$0xff] }
 0xad1   :  { %5554 = vmatprep.subr.bf16.mxu0 %v4924_v32  ;;  %5882 = vmatprep.subr.bf16.mxu1 %v4926_v44  ;;  %v5004_v32 = vld [vmem:[#allocation5 + $0x1688] sm:$0xff]  ;;  %v5006_v44 = vld [vmem:[#allocation5 + $0x1698] sm:$0xff] }
 0xad3   :  { %5546 = vmatmul.mubr.bf16.vlgmr.msra.gmra.mrb[32].mxu0 %v9382_v58  ;;  %5874 = vmatmul.mubr.bf16.vlgmr.msra.gmra.mrb[32].mxu1 %v9382_v58 }
 0xad4   :  { %5555 = vmatpush1.bf16.msra.mxu0 %v4923_v2  ;;  %5883 = vmatpush1.bf16.msra.mxu1 %v4925_v45  ;;  %v5003_v2 = vld [vmem:[#allocation5 + $0x1680] sm:$0xff]  ;;  %v5005_v45 = vld [vmem:[#allocation5 + $0x1690] sm:$0xff] }
 0xad5   :  { %5556 = vmatprep.subr.bf16.mxu0 %v4932_v46  ;;  %5884 = vmatprep.subr.bf16.mxu1 %v4934_v47  ;;  %v5012_v46 = vld [vmem:[#allocation5 + $0x16c8] sm:$0xff]  ;;  %v5014_v47 = vld [vmem:[#allocation5 + $0x16d8] sm:$0xff] }
 0xad6   :  { %5586 = vmatprep.mubr.bf16.mxu0 %v9388_v19  ;;  %5914 = vmatprep.mubr.bf16.mxu1 %v9388_v19 }
 0xad8   :  { %5557 = vmatpush1.bf16.msra.mxu0 %v4931_v48  ;;  %5885 = vmatpush1.bf16.msra.mxu1 %v4933_v49  ;;  %v5011_v48 = vld [vmem:[#allocation5 + $0x16c0] sm:$0xff]  ;;  %v5013_v49 = vld [vmem:[#allocation5 + $0x16d0] sm:$0xff] }
 0xad9   :  { %5558 = vmatprep.subr.bf16.mxu0 %v4940_v50  ;;  %5886 = vmatprep.subr.bf16.mxu1 %v4942_v51  ;;  %v5020_v50 = vld [vmem:[#allocation5 + $0x1708] sm:$0xff]  ;;  %v5022_v51 = vld [vmem:[#allocation5 + $0x1718] sm:$0xff] }
 0xadc   :  { %5559 = vmatpush1.bf16.msra.mxu0 %v4939_v54  ;;  %5887 = vmatpush1.bf16.msra.mxu1 %v4941_v55  ;;  %v5019_v54 = vld [vmem:[#allocation5 + $0x1700] sm:$0xff]  ;;  %v5021_v55 = vld [vmem:[#allocation5 + $0x1710] sm:$0xff] }
 0xadd   :  { %5560 = vmatprep.subr.bf16.mxu0 %v4948_v56  ;;  %5888 = vmatprep.subr.bf16.mxu1 %v4950_v33  ;;  %v5028_v56 = vld [vmem:[#allocation5 + $0x1748] sm:$0xff]  ;;  %v5030_v33 = vld [vmem:[#allocation5 + $0x1758] sm:$0xff] }
 0xae0   :  { %5561 = vmatpush1.bf16.msra.mxu0 %v4947_v57  ;;  %5889 = vmatpush1.bf16.msra.mxu1 %v4949_v3  ;;  %v5027_v57 = vld [vmem:[#allocation5 + $0x1740] sm:$0xff]  ;;  %v5029_v3 = vld [vmem:[#allocation5 + $0x1750] sm:$0xff] }
 0xae1   :  { %5562 = vmatprep.subr.bf16.mxu0 %v4956_v4  ;;  %5890 = vmatprep.subr.bf16.mxu1 %v4958_v31  ;;  %v5036_v4 = vld [vmem:[#allocation5 + $0x1788] sm:$0xff]  ;;  %v5038_v31 = vld [vmem:[#allocation5 + $0x1798] sm:$0xff] }
 0xae4   :  { %5563 = vmatpush1.bf16.msra.mxu0 %v4955_v63  ;;  %5891 = vmatpush1.bf16.msra.mxu1 %v4957_v12  ;;  %v5035_v63 = vld [vmem:[#allocation5 + $0x1780] sm:$0xff]  ;;  %v5037_v12 = vld [vmem:[#allocation5 + $0x1790] sm:$0xff] }
 0xae5   :  { %5564 = vmatprep.subr.bf16.mxu0 %v4964_v60  ;;  %5892 = vmatprep.subr.bf16.mxu1 %v4966_v13  ;;  %v5044_v60 = vld [vmem:[#allocation5 + $0x17c8] sm:$0xff]  ;;  %v5046_v13 = vld [vmem:[#allocation5 + $0x17d8] sm:$0xff] }
 0xae8   :  { %5565 = vmatpush1.bf16.msra.mxu0 %v4963_v14  ;;  %5893 = vmatpush1.bf16.msra.mxu1 %v4965_v21  ;;  %v5043_v14 = vld [vmem:[#allocation5 + $0x17c0] sm:$0xff]  ;;  %v5045_v21 = vld [vmem:[#allocation5 + $0x17d0] sm:$0xff] }
 0xae9   :  { %5566 = vmatprep.subr.bf16.mxu0 %v4972_v0  ;;  %5894 = vmatprep.subr.bf16.mxu1 %v4974_v1  ;;  %v5052_v0 = vld [vmem:[#allocation5 + $0x1808] sm:$0xff]  ;;  %v5054_v1 = vld [vmem:[#allocation5 + $0x1818] sm:$0xff] }
 0xaec   :  { %5567 = vmatpush1.bf16.msra.mxu0 %v4971_v15  ;;  %5895 = vmatpush1.bf16.msra.mxu1 %v4973_v16  ;;  %v5051_v15 = vld [vmem:[#allocation5 + $0x1800] sm:$0xff]  ;;  %v5053_v16 = vld [vmem:[#allocation5 + $0x1810] sm:$0xff] }
 0xaed   :  { %5568 = vmatprep.subr.bf16.mxu0 %v4980_v20  ;;  %5896 = vmatprep.subr.bf16.mxu1 %v4982_v61  ;;  %v5060_v20 = vld [vmem:[#allocation5 + $0x1848] sm:$0xff]  ;;  %v5062_v61 = vld [vmem:[#allocation5 + $0x1858] sm:$0xff] }
 0xaf0   :  { %5569 = vmatpush1.bf16.msra.mxu0 %v4979_v22  ;;  %5897 = vmatpush1.bf16.msra.mxu1 %v4981_v8  ;;  %v5059_v22 = vld [vmem:[#allocation5 + $0x1840] sm:$0xff]  ;;  %v5061_v8 = vld [vmem:[#allocation5 + $0x1850] sm:$0xff] }
 0xaf1   :  { %5570 = vmatprep.subr.bf16.mxu0 %v4988_v23  ;;  %5898 = vmatprep.subr.bf16.mxu1 %v4990_v24  ;;  %v5068_v23 = vld [vmem:[#allocation5 + $0x1888] sm:$0xff]  ;;  %v5070_v24 = vld [vmem:[#allocation5 + $0x1898] sm:$0xff] }
 0xaf4   :  { %5571 = vmatpush1.bf16.msra.mxu0 %v4987_v5  ;;  %5899 = vmatpush1.bf16.msra.mxu1 %v4989_v25  ;;  %v5067_v5 = vld [vmem:[#allocation5 + $0x1880] sm:$0xff]  ;;  %v5069_v25 = vld [vmem:[#allocation5 + $0x1890] sm:$0xff] }
 0xaf5   :  { %5572 = vmatprep.subr.bf16.mxu0 %v4996_v26  ;;  %5900 = vmatprep.subr.bf16.mxu1 %v4998_v27  ;;  %v5076_v26 = vld [vmem:[#allocation5 + $0x18c8] sm:$0xff]  ;;  %v5078_v27 = vld [vmem:[#allocation5 + $0x18d8] sm:$0xff] }
 0xaf8   :  { %5573 = vmatpush1.bf16.msra.mxu0 %v4995_v40  ;;  %5901 = vmatpush1.bf16.msra.mxu1 %v4997_v11  ;;  %v5075_v40 = vld [vmem:[#allocation5 + $0x18c0] sm:$0xff]  ;;  %v5077_v11 = vld [vmem:[#allocation5 + $0x18d0] sm:$0xff] }
 0xaf9   :  { %5574 = vmatprep.subr.bf16.mxu0 %v5004_v32  ;;  %5902 = vmatprep.subr.bf16.mxu1 %v5006_v44  ;;  %v5084_v32 = vld [vmem:[#allocation5 + $0x1908] sm:$0xff]  ;;  %v5086_v44 = vld [vmem:[#allocation5 + $0x1918] sm:$0xff] }
 0xafc   :  { %5575 = vmatpush1.bf16.msra.mxu0 %v5003_v2  ;;  %5903 = vmatpush1.bf16.msra.mxu1 %v5005_v45  ;;  %v5083_v2 = vld [vmem:[#allocation5 + $0x1900] sm:$0xff]  ;;  %v5085_v45 = vld [vmem:[#allocation5 + $0x1910] sm:$0xff] }
 0xafd   :  { %5576 = vmatprep.subr.bf16.mxu0 %v5012_v46  ;;  %5904 = vmatprep.subr.bf16.mxu1 %v5014_v47  ;;  %v5092_v46 = vld [vmem:[#allocation5 + $0x1948] sm:$0xff]  ;;  %v5094_v47 = vld [vmem:[#allocation5 + $0x1958] sm:$0xff] }
 0xb00   :  { %5577 = vmatpush1.bf16.msra.mxu0 %v5011_v48  ;;  %5905 = vmatpush1.bf16.msra.mxu1 %v5013_v49  ;;  %v5091_v48 = vld [vmem:[#allocation5 + $0x1940] sm:$0xff]  ;;  %v5093_v49 = vld [vmem:[#allocation5 + $0x1950] sm:$0xff] }
 0xb01   :  { %5578 = vmatprep.subr.bf16.mxu0 %v5020_v50  ;;  %5906 = vmatprep.subr.bf16.mxu1 %v5022_v51  ;;  %v5100_v50 = vld [vmem:[#allocation5 + $0x1988] sm:$0xff]  ;;  %v5102_v51 = vld [vmem:[#allocation5 + $0x1998] sm:$0xff] }
 0xb04   :  { %5579 = vmatpush1.bf16.msra.mxu0 %v5019_v54  ;;  %5907 = vmatpush1.bf16.msra.mxu1 %v5021_v55  ;;  %v5099_v54 = vld [vmem:[#allocation5 + $0x1980] sm:$0xff]  ;;  %v5101_v55 = vld [vmem:[#allocation5 + $0x1990] sm:$0xff] }
 0xb05   :  { %5580 = vmatprep.subr.bf16.mxu0 %v5028_v56  ;;  %5908 = vmatprep.subr.bf16.mxu1 %v5030_v33  ;;  %v5108_v56 = vld [vmem:[#allocation5 + $0x19c8] sm:$0xff]  ;;  %v5110_v33 = vld [vmem:[#allocation5 + $0x19d8] sm:$0xff] }
 0xb08   :  { %5581 = vmatpush1.bf16.msra.mxu0 %v5027_v57  ;;  %5909 = vmatpush1.bf16.msra.mxu1 %v5029_v3  ;;  %v5107_v57 = vld [vmem:[#allocation5 + $0x19c0] sm:$0xff]  ;;  %v5109_v3 = vld [vmem:[#allocation5 + $0x19d0] sm:$0xff] }
 0xb09   :  { %5582 = vmatprep.subr.bf16.mxu0 %v5036_v4  ;;  %5910 = vmatprep.subr.bf16.mxu1 %v5038_v31  ;;  %v5116_v4 = vld [vmem:[#allocation5 + $0x1a08] sm:$0xff]  ;;  %v5118_v31 = vld [vmem:[#allocation5 + $0x1a18] sm:$0xff] }
 0xb0c   :  { %5583 = vmatpush1.bf16.msra.mxu0 %v5035_v63  ;;  %5911 = vmatpush1.bf16.msra.mxu1 %v5037_v12  ;;  %v5115_v63 = vld [vmem:[#allocation5 + $0x1a00] sm:$0xff]  ;;  %v5117_v12 = vld [vmem:[#allocation5 + $0x1a10] sm:$0xff] }
 0xb0d   :  { %5584 = vmatprep.subr.bf16.mxu0 %v5044_v60  ;;  %5912 = vmatprep.subr.bf16.mxu1 %v5046_v13  ;;  %v5124_v60 = vld [vmem:[#allocation5 + $0x1a48] sm:$0xff]  ;;  %v5126_v13 = vld [vmem:[#allocation5 + $0x1a58] sm:$0xff] }
 0xb10   :  { %5585 = vmatpush1.bf16.msra.mxu0 %v5043_v14  ;;  %5913 = vmatpush1.bf16.msra.mxu1 %v5045_v21  ;;  %v5123_v14 = vld [vmem:[#allocation5 + $0x1a40] sm:$0xff]  ;;  %v5125_v21 = vld [vmem:[#allocation5 + $0x1a50] sm:$0xff] }
 0xb11   :  { %5595 = vmatprep.subr.bf16.mxu0 %v5052_v0  ;;  %5923 = vmatprep.subr.bf16.mxu1 %v5054_v1  ;;  %v5132_v0 = vld [vmem:[#allocation5 + $0x1a88] sm:$0xff]  ;;  %v5134_v1 = vld [vmem:[#allocation5 + $0x1a98] sm:$0xff] }
 0xb13   :  { %5587 = vmatmul.mubr.bf16.vlgmr.msra.gmra.mrb[32].mxu0 %v9384_v17  ;;  %5915 = vmatmul.mubr.bf16.vlgmr.msra.gmra.mrb[32].mxu1 %v9384_v17 }
 0xb14   :  { %5596 = vmatpush1.bf16.msra.mxu0 %v5051_v15  ;;  %5924 = vmatpush1.bf16.msra.mxu1 %v5053_v16  ;;  %v5131_v15 = vld [vmem:[#allocation5 + $0x1a80] sm:$0xff]  ;;  %v5133_v16 = vld [vmem:[#allocation5 + $0x1a90] sm:$0xff] }
 0xb15   :  { %5597 = vmatprep.subr.bf16.mxu0 %v5060_v20  ;;  %5925 = vmatprep.subr.bf16.mxu1 %v5062_v61  ;;  %v5140_v20 = vld [vmem:[#allocation5 + $0x1ac8] sm:$0xff]  ;;  %v5142_v61 = vld [vmem:[#allocation5 + $0x1ad8] sm:$0xff] }
 0xb16   :  { %5627 = vmatprep.mubr.bf16.mxu0 %v9404_v41  ;;  %5955 = vmatprep.mubr.bf16.mxu1 %v9404_v41 }
 0xb18   :  { %5598 = vmatpush1.bf16.msra.mxu0 %v5059_v22  ;;  %5926 = vmatpush1.bf16.msra.mxu1 %v5061_v8  ;;  %v5139_v22 = vld [vmem:[#allocation5 + $0x1ac0] sm:$0xff]  ;;  %v5141_v8 = vld [vmem:[#allocation5 + $0x1ad0] sm:$0xff] }
 0xb19   :  { %5599 = vmatprep.subr.bf16.mxu0 %v5068_v23  ;;  %5927 = vmatprep.subr.bf16.mxu1 %v5070_v24  ;;  %v5148_v23 = vld [vmem:[#allocation5 + $0x1b08] sm:$0xff]  ;;  %v5150_v24 = vld [vmem:[#allocation5 + $0x1b18] sm:$0xff] }
 0xb1c   :  { %5600 = vmatpush1.bf16.msra.mxu0 %v5067_v5  ;;  %5928 = vmatpush1.bf16.msra.mxu1 %v5069_v25  ;;  %v5147_v5 = vld [vmem:[#allocation5 + $0x1b00] sm:$0xff]  ;;  %v5149_v25 = vld [vmem:[#allocation5 + $0x1b10] sm:$0xff] }
 0xb1d   :  { %5601 = vmatprep.subr.bf16.mxu0 %v5076_v26  ;;  %5929 = vmatprep.subr.bf16.mxu1 %v5078_v27  ;;  %v5156_v26 = vld [vmem:[#allocation5 + $0x1b48] sm:$0xff]  ;;  %v5158_v27 = vld [vmem:[#allocation5 + $0x1b58] sm:$0xff] }
 0xb20   :  { %5602 = vmatpush1.bf16.msra.mxu0 %v5075_v40  ;;  %5930 = vmatpush1.bf16.msra.mxu1 %v5077_v11  ;;  %v5155_v40 = vld [vmem:[#allocation5 + $0x1b40] sm:$0xff]  ;;  %v5157_v11 = vld [vmem:[#allocation5 + $0x1b50] sm:$0xff] }
 0xb21   :  { %5603 = vmatprep.subr.bf16.mxu0 %v5084_v32  ;;  %5931 = vmatprep.subr.bf16.mxu1 %v5086_v44  ;;  %v5164_v32 = vld [vmem:[#allocation5 + $0x1b88] sm:$0xff]  ;;  %v5166_v44 = vld [vmem:[#allocation5 + $0x1b98] sm:$0xff] }
 0xb24   :  { %5604 = vmatpush1.bf16.msra.mxu0 %v5083_v2  ;;  %5932 = vmatpush1.bf16.msra.mxu1 %v5085_v45  ;;  %v5163_v2 = vld [vmem:[#allocation5 + $0x1b80] sm:$0xff]  ;;  %v5165_v45 = vld [vmem:[#allocation5 + $0x1b90] sm:$0xff] }
 0xb25   :  { %5605 = vmatprep.subr.bf16.mxu0 %v5092_v46  ;;  %5933 = vmatprep.subr.bf16.mxu1 %v5094_v47  ;;  %v5172_v46 = vld [vmem:[#allocation5 + $0x1bc8] sm:$0xff]  ;;  %v5174_v47 = vld [vmem:[#allocation5 + $0x1bd8] sm:$0xff] }
 0xb28   :  { %5606 = vmatpush1.bf16.msra.mxu0 %v5091_v48  ;;  %5934 = vmatpush1.bf16.msra.mxu1 %v5093_v49  ;;  %v5171_v48 = vld [vmem:[#allocation5 + $0x1bc0] sm:$0xff]  ;;  %v5173_v49 = vld [vmem:[#allocation5 + $0x1bd0] sm:$0xff] }
 0xb29   :  { %5607 = vmatprep.subr.bf16.mxu0 %v5100_v50  ;;  %5935 = vmatprep.subr.bf16.mxu1 %v5102_v51  ;;  %v5180_v50 = vld [vmem:[#allocation5 + $0x1c08] sm:$0xff]  ;;  %v5182_v51 = vld [vmem:[#allocation5 + $0x1c18] sm:$0xff] }
 0xb2c   :  { %5608 = vmatpush1.bf16.msra.mxu0 %v5099_v54  ;;  %5936 = vmatpush1.bf16.msra.mxu1 %v5101_v55  ;;  %v5179_v54 = vld [vmem:[#allocation5 + $0x1c00] sm:$0xff]  ;;  %v5181_v55 = vld [vmem:[#allocation5 + $0x1c10] sm:$0xff] }
 0xb2d   :  { %5609 = vmatprep.subr.bf16.mxu0 %v5108_v56  ;;  %5937 = vmatprep.subr.bf16.mxu1 %v5110_v33  ;;  %v5188_v56 = vld [vmem:[#allocation5 + $0x1c48] sm:$0xff]  ;;  %v5190_v33 = vld [vmem:[#allocation5 + $0x1c58] sm:$0xff] }
 0xb30   :  { %5610 = vmatpush1.bf16.msra.mxu0 %v5107_v57  ;;  %5938 = vmatpush1.bf16.msra.mxu1 %v5109_v3  ;;  %v5187_v57 = vld [vmem:[#allocation5 + $0x1c40] sm:$0xff]  ;;  %v5189_v3 = vld [vmem:[#allocation5 + $0x1c50] sm:$0xff] }
 0xb31   :  { %5611 = vmatprep.subr.bf16.mxu0 %v5116_v4  ;;  %5939 = vmatprep.subr.bf16.mxu1 %v5118_v31  ;;  %v5196_v4 = vld [vmem:[#allocation5 + $0x1c88] sm:$0xff]  ;;  %v5198_v31 = vld [vmem:[#allocation5 + $0x1c98] sm:$0xff] }
 0xb34   :  { %5612 = vmatpush1.bf16.msra.mxu0 %v5115_v63  ;;  %5940 = vmatpush1.bf16.msra.mxu1 %v5117_v12  ;;  %v5195_v63 = vld [vmem:[#allocation5 + $0x1c80] sm:$0xff]  ;;  %v5197_v12 = vld [vmem:[#allocation5 + $0x1c90] sm:$0xff] }
 0xb35   :  { %5613 = vmatprep.subr.bf16.mxu0 %v5124_v60  ;;  %5941 = vmatprep.subr.bf16.mxu1 %v5126_v13  ;;  %v5204_v60 = vld [vmem:[#allocation5 + $0x1cc8] sm:$0xff]  ;;  %v5206_v13 = vld [vmem:[#allocation5 + $0x1cd8] sm:$0xff] }
 0xb38   :  { %5614 = vmatpush1.bf16.msra.mxu0 %v5123_v14  ;;  %5942 = vmatpush1.bf16.msra.mxu1 %v5125_v21  ;;  %v5203_v14 = vld [vmem:[#allocation5 + $0x1cc0] sm:$0xff]  ;;  %v5205_v21 = vld [vmem:[#allocation5 + $0x1cd0] sm:$0xff] }
 0xb39   :  { %5615 = vmatprep.subr.bf16.mxu0 %v5132_v0  ;;  %5943 = vmatprep.subr.bf16.mxu1 %v5134_v1  ;;  %v5212_v0 = vld [vmem:[#allocation5 + $0x1d08] sm:$0xff]  ;;  %v5214_v1 = vld [vmem:[#allocation5 + $0x1d18] sm:$0xff] }
 0xb3c   :  { %5616 = vmatpush1.bf16.msra.mxu0 %v5131_v15  ;;  %5944 = vmatpush1.bf16.msra.mxu1 %v5133_v16  ;;  %v5211_v15 = vld [vmem:[#allocation5 + $0x1d00] sm:$0xff]  ;;  %v5213_v16 = vld [vmem:[#allocation5 + $0x1d10] sm:$0xff] }
 0xb3d   :  { %5617 = vmatprep.subr.bf16.mxu0 %v5140_v20  ;;  %5945 = vmatprep.subr.bf16.mxu1 %v5142_v61  ;;  %v5220_v20 = vld [vmem:[#allocation5 + $0x1d48] sm:$0xff]  ;;  %v5222_v61 = vld [vmem:[#allocation5 + $0x1d58] sm:$0xff] }
 0xb40   :  { %5618 = vmatpush1.bf16.msra.mxu0 %v5139_v22  ;;  %5946 = vmatpush1.bf16.msra.mxu1 %v5141_v8  ;;  %v5219_v22 = vld [vmem:[#allocation5 + $0x1d40] sm:$0xff]  ;;  %v5221_v8 = vld [vmem:[#allocation5 + $0x1d50] sm:$0xff] }
 0xb41   :  { %5619 = vmatprep.subr.bf16.mxu0 %v5148_v23  ;;  %5947 = vmatprep.subr.bf16.mxu1 %v5150_v24  ;;  %v5228_v23 = vld [vmem:[#allocation5 + $0x1d88] sm:$0xff]  ;;  %v5230_v24 = vld [vmem:[#allocation5 + $0x1d98] sm:$0xff] }
 0xb44   :  { %5620 = vmatpush1.bf16.msra.mxu0 %v5147_v5  ;;  %5948 = vmatpush1.bf16.msra.mxu1 %v5149_v25  ;;  %v5227_v5 = vld [vmem:[#allocation5 + $0x1d80] sm:$0xff]  ;;  %v5229_v25 = vld [vmem:[#allocation5 + $0x1d90] sm:$0xff] }
 0xb45   :  { %5621 = vmatprep.subr.bf16.mxu0 %v5156_v26  ;;  %5949 = vmatprep.subr.bf16.mxu1 %v5158_v27  ;;  %v5236_v26 = vld [vmem:[#allocation5 + $0x1dc8] sm:$0xff]  ;;  %v5238_v27 = vld [vmem:[#allocation5 + $0x1dd8] sm:$0xff] }
 0xb48   :  { %5622 = vmatpush1.bf16.msra.mxu0 %v5155_v40  ;;  %5950 = vmatpush1.bf16.msra.mxu1 %v5157_v11  ;;  %v5235_v40 = vld [vmem:[#allocation5 + $0x1dc0] sm:$0xff]  ;;  %v5237_v11 = vld [vmem:[#allocation5 + $0x1dd0] sm:$0xff] }
 0xb49   :  { %5623 = vmatprep.subr.bf16.mxu0 %v5164_v32  ;;  %5951 = vmatprep.subr.bf16.mxu1 %v5166_v44  ;;  %v5244_v32 = vld [vmem:[#allocation5 + $0x1e08] sm:$0xff]  ;;  %v5246_v44 = vld [vmem:[#allocation5 + $0x1e18] sm:$0xff] }
 0xb4c   :  { %5624 = vmatpush1.bf16.msra.mxu0 %v5163_v2  ;;  %5952 = vmatpush1.bf16.msra.mxu1 %v5165_v45  ;;  %v5243_v2 = vld [vmem:[#allocation5 + $0x1e00] sm:$0xff]  ;;  %v5245_v45 = vld [vmem:[#allocation5 + $0x1e10] sm:$0xff] }
 0xb4d   :  { %5625 = vmatprep.subr.bf16.mxu0 %v5172_v46  ;;  %5953 = vmatprep.subr.bf16.mxu1 %v5174_v47  ;;  %v5252_v46 = vld [vmem:[#allocation5 + $0x1e48] sm:$0xff]  ;;  %v5254_v47 = vld [vmem:[#allocation5 + $0x1e58] sm:$0xff] }
 0xb50   :  { %5626 = vmatpush1.bf16.msra.mxu0 %v5171_v48  ;;  %5954 = vmatpush1.bf16.msra.mxu1 %v5173_v49  ;;  %v5251_v48 = vld [vmem:[#allocation5 + $0x1e40] sm:$0xff]  ;;  %v5253_v49 = vld [vmem:[#allocation5 + $0x1e50] sm:$0xff] }
 0xb51   :  { %5636 = vmatprep.subr.bf16.mxu0 %v5180_v50  ;;  %5964 = vmatprep.subr.bf16.mxu1 %v5182_v51  ;;  %v5260_v50 = vld [vmem:[#allocation5 + $0x1e88] sm:$0xff]  ;;  %v5262_v51 = vld [vmem:[#allocation5 + $0x1e98] sm:$0xff] }
 0xb53   :  { %5628 = vmatmul.mubr.bf16.vlgmr.msra.gmra.mrb[32].mxu0 %v9400_v62  ;;  %5956 = vmatmul.mubr.bf16.vlgmr.msra.gmra.mrb[32].mxu1 %v9400_v62 }
 0xb54   :  { %5637 = vmatpush1.bf16.msra.mxu0 %v5179_v54  ;;  %5965 = vmatpush1.bf16.msra.mxu1 %v5181_v55  ;;  %v5259_v54 = vld [vmem:[#allocation5 + $0x1e80] sm:$0xff]  ;;  %v5261_v55 = vld [vmem:[#allocation5 + $0x1e90] sm:$0xff] }
 0xb55   :  { %5638 = vmatprep.subr.bf16.mxu0 %v5188_v56  ;;  %5966 = vmatprep.subr.bf16.mxu1 %v5190_v33  ;;  %v5268_v56 = vld [vmem:[#allocation5 + $0x1ec8] sm:$0xff]  ;;  %v5270_v33 = vld [vmem:[#allocation5 + $0x1ed8] sm:$0xff] }
 0xb56   :  { %5668 = vmatprep.mubr.bf16.mxu0 %v9406_v43  ;;  %5996 = vmatprep.mubr.bf16.mxu1 %v9406_v43 }
 0xb58   :  { %5639 = vmatpush1.bf16.msra.mxu0 %v5187_v57  ;;  %5967 = vmatpush1.bf16.msra.mxu1 %v5189_v3  ;;  %v5267_v57 = vld [vmem:[#allocation5 + $0x1ec0] sm:$0xff]  ;;  %v5269_v3 = vld [vmem:[#allocation5 + $0x1ed0] sm:$0xff] }
 0xb59   :  { %5640 = vmatprep.subr.bf16.mxu0 %v5196_v4  ;;  %5968 = vmatprep.subr.bf16.mxu1 %v5198_v31  ;;  %v5276_v4 = vld [vmem:[#allocation5 + $0x1f08] sm:$0xff]  ;;  %v5278_v31 = vld [vmem:[#allocation5 + $0x1f18] sm:$0xff] }
 0xb5c   :  { %5641 = vmatpush1.bf16.msra.mxu0 %v5195_v63  ;;  %5969 = vmatpush1.bf16.msra.mxu1 %v5197_v12  ;;  %v5275_v63 = vld [vmem:[#allocation5 + $0x1f00] sm:$0xff]  ;;  %v5277_v12 = vld [vmem:[#allocation5 + $0x1f10] sm:$0xff] }
 0xb5d   :  { %5642 = vmatprep.subr.bf16.mxu0 %v5204_v60  ;;  %5970 = vmatprep.subr.bf16.mxu1 %v5206_v13  ;;  %v5284_v60 = vld [vmem:[#allocation5 + $0x1f48] sm:$0xff]  ;;  %v5286_v13 = vld [vmem:[#allocation5 + $0x1f58] sm:$0xff] }
 0xb60   :  { %5643 = vmatpush1.bf16.msra.mxu0 %v5203_v14  ;;  %5971 = vmatpush1.bf16.msra.mxu1 %v5205_v21  ;;  %v5283_v14 = vld [vmem:[#allocation5 + $0x1f40] sm:$0xff]  ;;  %v5285_v21 = vld [vmem:[#allocation5 + $0x1f50] sm:$0xff] }
 0xb61   :  { %5644 = vmatprep.subr.bf16.mxu0 %v5212_v0  ;;  %5972 = vmatprep.subr.bf16.mxu1 %v5214_v1  ;;  %v5292_v0 = vld [vmem:[#allocation5 + $0x1f88] sm:$0xff]  ;;  %v5294_v1 = vld [vmem:[#allocation5 + $0x1f98] sm:$0xff] }
 0xb64   :  { %5645 = vmatpush1.bf16.msra.mxu0 %v5211_v15  ;;  %5973 = vmatpush1.bf16.msra.mxu1 %v5213_v16  ;;  %v5291_v15 = vld [vmem:[#allocation5 + $0x1f80] sm:$0xff]  ;;  %v5293_v16 = vld [vmem:[#allocation5 + $0x1f90] sm:$0xff] }
 0xb65   :  { %5646 = vmatprep.subr.bf16.mxu0 %v5220_v20  ;;  %5974 = vmatprep.subr.bf16.mxu1 %v5222_v61  ;;  %v5300_v20 = vld [vmem:[#allocation5 + $0x1fc8] sm:$0xff]  ;;  %v5302_v61 = vld [vmem:[#allocation5 + $0x1fd8] sm:$0xff] }
 0xb68   :  { %5647 = vmatpush1.bf16.msra.mxu0 %v5219_v22  ;;  %5975 = vmatpush1.bf16.msra.mxu1 %v5221_v8  ;;  %v5299_v22 = vld [vmem:[#allocation5 + $0x1fc0] sm:$0xff]  ;;  %v5301_v8 = vld [vmem:[#allocation5 + $0x1fd0] sm:$0xff] }
 0xb69   :  { %5648 = vmatprep.subr.bf16.mxu0 %v5228_v23  ;;  %5976 = vmatprep.subr.bf16.mxu1 %v5230_v24  ;;  %v4288_v23 = vld [vmem:[#allocation5 + $0x28] sm:$0xff]  ;;  %v4290_v24 = vld [vmem:[#allocation5 + $0x38] sm:$0xff] }
 0xb6c   :  { %5649 = vmatpush1.bf16.msra.mxu0 %v5227_v5  ;;  %5977 = vmatpush1.bf16.msra.mxu1 %v5229_v25  ;;  %v4287_v5 = vld [vmem:[#allocation5 + $0x20] sm:$0xff]  ;;  %v4289_v25 = vld [vmem:[#allocation5 + $0x30] sm:$0xff] }
 0xb6d   :  { %5650 = vmatprep.subr.bf16.mxu0 %v5236_v26  ;;  %5978 = vmatprep.subr.bf16.mxu1 %v5238_v27  ;;  %v4296_v26 = vld [vmem:[#allocation5 + $0x68] sm:$0xff]  ;;  %v4298_v27 = vld [vmem:[#allocation5 + $0x78] sm:$0xff] }
 0xb70   :  { %5651 = vmatpush1.bf16.msra.mxu0 %v5235_v40  ;;  %5979 = vmatpush1.bf16.msra.mxu1 %v5237_v11  ;;  %v4295_v40 = vld [vmem:[#allocation5 + $0x60] sm:$0xff]  ;;  %v4297_v11 = vld [vmem:[#allocation5 + $0x70] sm:$0xff] }
 0xb71   :  { %5652 = vmatprep.subr.bf16.mxu0 %v5244_v32  ;;  %5980 = vmatprep.subr.bf16.mxu1 %v5246_v44  ;;  %v4304_v32 = vld [vmem:[#allocation5 + $0xa8] sm:$0xff]  ;;  %v4306_v44 = vld [vmem:[#allocation5 + $0xb8] sm:$0xff] }
 0xb74   :  { %5653 = vmatpush1.bf16.msra.mxu0 %v5243_v2  ;;  %5981 = vmatpush1.bf16.msra.mxu1 %v5245_v45  ;;  %v4303_v2 = vld [vmem:[#allocation5 + $0xa0] sm:$0xff]  ;;  %v4305_v45 = vld [vmem:[#allocation5 + $0xb0] sm:$0xff] }
 0xb75   :  { %5654 = vmatprep.subr.bf16.mxu0 %v5252_v46  ;;  %5982 = vmatprep.subr.bf16.mxu1 %v5254_v47  ;;  %v4312_v46 = vld [vmem:[#allocation5 + $0xe8] sm:$0xff]  ;;  %v4314_v47 = vld [vmem:[#allocation5 + $0xf8] sm:$0xff] }
 0xb78   :  { %5655 = vmatpush1.bf16.msra.mxu0 %v5251_v48  ;;  %5983 = vmatpush1.bf16.msra.mxu1 %v5253_v49  ;;  %v4311_v48 = vld [vmem:[#allocation5 + $0xe0] sm:$0xff]  ;;  %v4313_v49 = vld [vmem:[#allocation5 + $0xf0] sm:$0xff] }
 0xb79   :  { %5656 = vmatprep.subr.bf16.mxu0 %v5260_v50  ;;  %5984 = vmatprep.subr.bf16.mxu1 %v5262_v51  ;;  %v4320_v50 = vld [vmem:[#allocation5 + $0x128] sm:$0xff]  ;;  %v4322_v51 = vld [vmem:[#allocation5 + $0x138] sm:$0xff] }
 0xb7c   :  { %5657 = vmatpush1.bf16.msra.mxu0 %v5259_v54  ;;  %5985 = vmatpush1.bf16.msra.mxu1 %v5261_v55  ;;  %v4321_v54 = vld [vmem:[#allocation5 + $0x130] sm:$0xff]  ;;  %v4328_v55 = vld [vmem:[#allocation5 + $0x168] sm:$0xff] }
 0xb7d   :  { %5658 = vmatprep.subr.bf16.mxu0 %v5268_v56  ;;  %5986 = vmatprep.subr.bf16.mxu1 %v5270_v33  ;;  %v4330_v56 = vld [vmem:[#allocation5 + $0x178] sm:$0xff]  ;;  %v4327_v33 = vld [vmem:[#allocation5 + $0x160] sm:$0xff] }
 0xb80   :  { %5659 = vmatpush1.bf16.msra.mxu0 %v5267_v57  ;;  %5987 = vmatpush1.bf16.msra.mxu1 %v5269_v3  ;;  %v4329_v57 = vld [vmem:[#allocation5 + $0x170] sm:$0xff]  ;;  %v4336_v3 = vld [vmem:[#allocation5 + $0x1a8] sm:$0xff] }
 0xb81   :  { %5660 = vmatprep.subr.bf16.mxu0 %v5276_v4  ;;  %5988 = vmatprep.subr.bf16.mxu1 %v5278_v31  ;;  %v4338_v4 = vld [vmem:[#allocation5 + $0x1b8] sm:$0xff]  ;;  %v4335_v31 = vld [vmem:[#allocation5 + $0x1a0] sm:$0xff] }
 0xb84   :  { %5661 = vmatpush1.bf16.msra.mxu0 %v5275_v63  ;;  %5989 = vmatpush1.bf16.msra.mxu1 %v5277_v12  ;;  %v4337_v63 = vld [vmem:[#allocation5 + $0x1b0] sm:$0xff]  ;;  %v4344_v12 = vld [vmem:[#allocation5 + $0x1e8] sm:$0xff] }
 0xb85   :  { %5662 = vmatprep.subr.bf16.mxu0 %v5284_v60  ;;  %5990 = vmatprep.subr.bf16.mxu1 %v5286_v13  ;;  %v4346_v60 = vld [vmem:[#allocation5 + $0x1f8] sm:$0xff]  ;;  %v4343_v13 = vld [vmem:[#allocation5 + $0x1e0] sm:$0xff] }
 0xb88   :  { %5663 = vmatpush1.bf16.msra.mxu0 %v5283_v14  ;;  %5991 = vmatpush1.bf16.msra.mxu1 %v5285_v21  ;;  %v4345_v14 = vld [vmem:[#allocation5 + $0x1f0] sm:$0xff]  ;;  %v4352_v21 = vld [vmem:[#allocation5 + $0x228] sm:$0xff] }
 0xb89   :  { %5664 = vmatprep.subr.bf16.mxu0 %v5292_v0  ;;  %5992 = vmatprep.subr.bf16.mxu1 %v5294_v1  ;;  %v4354_v0 = vld [vmem:[#allocation5 + $0x238] sm:$0xff]  ;;  %v4351_v1 = vld [vmem:[#allocation5 + $0x220] sm:$0xff] }
 0xb8c   :  { %5665 = vmatpush1.bf16.msra.mxu0 %v5291_v15  ;;  %5993 = vmatpush1.bf16.msra.mxu1 %v5293_v16  ;;  %v4353_v15 = vld [vmem:[#allocation5 + $0x230] sm:$0xff]  ;;  %v4360_v16 = vld [vmem:[#allocation5 + $0x268] sm:$0xff] }
 0xb8d   :  { %5666 = vmatprep.subr.bf16.mxu0 %v5300_v20  ;;  %5994 = vmatprep.subr.bf16.mxu1 %v5302_v61  ;;  %v4362_v20 = vld [vmem:[#allocation5 + $0x278] sm:$0xff]  ;;  %v4359_v61 = vld [vmem:[#allocation5 + $0x260] sm:$0xff] }
 0xb90   :  { %5667 = vmatpush1.bf16.msra.mxu0 %v5299_v22  ;;  %5995 = vmatpush1.bf16.msra.mxu1 %v5301_v8  ;;  %v4361_v22 = vld [vmem:[#allocation5 + $0x270] sm:$0xff]  ;;  %v4368_v8 = vld [vmem:[#allocation5 + $0x2a8] sm:$0xff] }
 0xb91   :  { %6005 = vmatprep.subr.bf16.mxu0 %v4288_v23  ;;  %6333 = vmatprep.subr.bf16.mxu1 %v4290_v24  ;;  %v4370_v23 = vld [vmem:[#allocation5 + $0x2b8] sm:$0xff]  ;;  %v4367_v24 = vld [vmem:[#allocation5 + $0x2a0] sm:$0xff] }
 0xb93   :  { %5669 = vmatmul.mubr.bf16.vlgmr.msra.gmra.mrb[32].mxu0 %v9402_v42  ;;  %5997 = vmatmul.mubr.bf16.vlgmr.msra.gmra.mrb[32].mxu1 %v9402_v42 }
 0xb94   :  { %6006 = vmatpush1.bf16.msra.mxu0 %v4287_v5  ;;  %6334 = vmatpush1.bf16.msra.mxu1 %v4289_v25  ;;  %v4369_v5 = vld [vmem:[#allocation5 + $0x2b0] sm:$0xff]  ;;  %v4376_v25 = vld [vmem:[#allocation5 + $0x2e8] sm:$0xff] }
 0xb95   :  { %6007 = vmatprep.subr.bf16.mxu0 %v4296_v26  ;;  %6335 = vmatprep.subr.bf16.mxu1 %v4298_v27  ;;  %v4378_v26 = vld [vmem:[#allocation5 + $0x2f8] sm:$0xff]  ;;  %v4375_v27 = vld [vmem:[#allocation5 + $0x2e0] sm:$0xff] }
 0xb96   :  { %6037 = vmatprep.mubr.bf16.mxu0 %v9324_v38  ;;  %6365 = vmatprep.mubr.bf16.mxu1 %v9324_v38  ;;  %v4319_v38 = vld [vmem:[#allocation5 + $0x120] sm:$0xff] }
 0xb98   :  { %6008 = vmatpush1.bf16.msra.mxu0 %v4295_v40  ;;  %6336 = vmatpush1.bf16.msra.mxu1 %v4297_v11  ;;  %v4377_v40 = vld [vmem:[#allocation5 + $0x2f0] sm:$0xff]  ;;  %v4384_v11 = vld [vmem:[#allocation5 + $0x328] sm:$0xff] }
 0xb99   :  { %6009 = vmatprep.subr.bf16.mxu0 %v4304_v32  ;;  %6337 = vmatprep.subr.bf16.mxu1 %v4306_v44  ;;  %v4386_v32 = vld [vmem:[#allocation5 + $0x338] sm:$0xff]  ;;  %v4383_v44 = vld [vmem:[#allocation5 + $0x320] sm:$0xff] }
 0xb9c   :  { %6010 = vmatpush1.bf16.msra.mxu0 %v4303_v2  ;;  %6338 = vmatpush1.bf16.msra.mxu1 %v4305_v45  ;;  %v4385_v2 = vld [vmem:[#allocation5 + $0x330] sm:$0xff]  ;;  %v4392_v45 = vld [vmem:[#allocation5 + $0x368] sm:$0xff] }
 0xb9d   :  { %6011 = vmatprep.subr.bf16.mxu0 %v4312_v46  ;;  %6339 = vmatprep.subr.bf16.mxu1 %v4314_v47  ;;  %v4394_v46 = vld [vmem:[#allocation5 + $0x378] sm:$0xff]  ;;  %v4391_v47 = vld [vmem:[#allocation5 + $0x360] sm:$0xff] }
 0xba0   :  { %6012 = vmatpush1.bf16.msra.mxu0 %v4311_v48  ;;  %6340 = vmatpush1.bf16.msra.mxu1 %v4313_v49  ;;  %v4393_v48 = vld [vmem:[#allocation5 + $0x370] sm:$0xff]  ;;  %v4400_v49 = vld [vmem:[#allocation5 + $0x3a8] sm:$0xff] }
 0xba1   :  { %6013 = vmatprep.subr.bf16.mxu0 %v4320_v50  ;;  %6341 = vmatprep.subr.bf16.mxu1 %v4322_v51  ;;  %v4402_v50 = vld [vmem:[#allocation5 + $0x3b8] sm:$0xff]  ;;  %v4399_v51 = vld [vmem:[#allocation5 + $0x3a0] sm:$0xff] }
 0xba4   :  { %6014 = vmatpush1.bf16.msra.mxu0 %v4319_v38  ;;  %6342 = vmatpush1.bf16.msra.mxu1 %v4321_v54  ;;  %v4401_v38 = vld [vmem:[#allocation5 + $0x3b0] sm:$0xff]  ;;  %v4408_v54 = vld [vmem:[#allocation5 + $0x3e8] sm:$0xff] }
 0xba5   :  { %6015 = vmatprep.subr.bf16.mxu0 %v4328_v55  ;;  %6343 = vmatprep.subr.bf16.mxu1 %v4330_v56  ;;  %v4410_v55 = vld [vmem:[#allocation5 + $0x3f8] sm:$0xff]  ;;  %v4407_v56 = vld [vmem:[#allocation5 + $0x3e0] sm:$0xff] }
 0xba8   :  { %6016 = vmatpush1.bf16.msra.mxu0 %v4327_v33  ;;  %6344 = vmatpush1.bf16.msra.mxu1 %v4329_v57  ;;  %v4409_v33 = vld [vmem:[#allocation5 + $0x3f0] sm:$0xff]  ;;  %v4416_v57 = vld [vmem:[#allocation5 + $0x428] sm:$0xff] }
 0xba9   :  { %6017 = vmatprep.subr.bf16.mxu0 %v4336_v3  ;;  %6345 = vmatprep.subr.bf16.mxu1 %v4338_v4  ;;  %v4418_v3 = vld [vmem:[#allocation5 + $0x438] sm:$0xff]  ;;  %v4415_v4 = vld [vmem:[#allocation5 + $0x420] sm:$0xff] }
 0xbac   :  { %6018 = vmatpush1.bf16.msra.mxu0 %v4335_v31  ;;  %6346 = vmatpush1.bf16.msra.mxu1 %v4337_v63  ;;  %v4417_v31 = vld [vmem:[#allocation5 + $0x430] sm:$0xff]  ;;  %v4424_v63 = vld [vmem:[#allocation5 + $0x468] sm:$0xff] }
 0xbad   :  { %6019 = vmatprep.subr.bf16.mxu0 %v4344_v12  ;;  %6347 = vmatprep.subr.bf16.mxu1 %v4346_v60  ;;  %v4426_v12 = vld [vmem:[#allocation5 + $0x478] sm:$0xff]  ;;  %v4423_v60 = vld [vmem:[#allocation5 + $0x460] sm:$0xff] }
 0xbb0   :  { %6020 = vmatpush1.bf16.msra.mxu0 %v4343_v13  ;;  %6348 = vmatpush1.bf16.msra.mxu1 %v4345_v14  ;;  %v4425_v13 = vld [vmem:[#allocation5 + $0x470] sm:$0xff]  ;;  %v4432_v14 = vld [vmem:[#allocation5 + $0x4a8] sm:$0xff] }
 0xbb1   :  { %6021 = vmatprep.subr.bf16.mxu0 %v4352_v21  ;;  %6349 = vmatprep.subr.bf16.mxu1 %v4354_v0  ;;  %v4434_v21 = vld [vmem:[#allocation5 + $0x4b8] sm:$0xff]  ;;  %v4431_v0 = vld [vmem:[#allocation5 + $0x4a0] sm:$0xff] }
 0xbb4   :  { %6022 = vmatpush1.bf16.msra.mxu0 %v4351_v1  ;;  %6350 = vmatpush1.bf16.msra.mxu1 %v4353_v15  ;;  %v4433_v1 = vld [vmem:[#allocation5 + $0x4b0] sm:$0xff]  ;;  %v4440_v15 = vld [vmem:[#allocation5 + $0x4e8] sm:$0xff] }
 0xbb5   :  { %6023 = vmatprep.subr.bf16.mxu0 %v4360_v16  ;;  %6351 = vmatprep.subr.bf16.mxu1 %v4362_v20  ;;  %v4439_v16 = vld [vmem:[#allocation5 + $0x4e0] sm:$0xff]  ;;  %v4441_v20 = vld [vmem:[#allocation5 + $0x4f0] sm:$0xff] }
 0xbb8   :  { %6024 = vmatpush1.bf16.msra.mxu0 %v4359_v61  ;;  %6352 = vmatpush1.bf16.msra.mxu1 %v4361_v22  ;;  %v4448_v61 = vld [vmem:[#allocation5 + $0x528] sm:$0xff]  ;;  %v4450_v22 = vld [vmem:[#allocation5 + $0x538] sm:$0xff] }
 0xbb9   :  { %6025 = vmatprep.subr.bf16.mxu0 %v4368_v8  ;;  %6353 = vmatprep.subr.bf16.mxu1 %v4370_v23  ;;  %v4449_v8 = vld [vmem:[#allocation5 + $0x530] sm:$0xff]  ;;  %v4456_v23 = vld [vmem:[#allocation5 + $0x568] sm:$0xff] }
 0xbbc   :  { %6026 = vmatpush1.bf16.msra.mxu0 %v4367_v24  ;;  %6354 = vmatpush1.bf16.msra.mxu1 %v4369_v5  ;;  %v4458_v24 = vld [vmem:[#allocation5 + $0x578] sm:$0xff]  ;;  %v4455_v5 = vld [vmem:[#allocation5 + $0x560] sm:$0xff] }
 0xbbd   :  { %6027 = vmatprep.subr.bf16.mxu0 %v4376_v25  ;;  %6355 = vmatprep.subr.bf16.mxu1 %v4378_v26  ;;  %v4457_v25 = vld [vmem:[#allocation5 + $0x570] sm:$0xff]  ;;  %v4464_v26 = vld [vmem:[#allocation5 + $0x5a8] sm:$0xff] }
 0xbc0   :  { %6028 = vmatpush1.bf16.msra.mxu0 %v4375_v27  ;;  %6356 = vmatpush1.bf16.msra.mxu1 %v4377_v40  ;;  %v4466_v27 = vld [vmem:[#allocation5 + $0x5b8] sm:$0xff]  ;;  %v4463_v40 = vld [vmem:[#allocation5 + $0x5a0] sm:$0xff] }
 0xbc1   :  { %6029 = vmatprep.subr.bf16.mxu0 %v4384_v11  ;;  %6357 = vmatprep.subr.bf16.mxu1 %v4386_v32  ;;  %v4465_v11 = vld [vmem:[#allocation5 + $0x5b0] sm:$0xff]  ;;  %v4472_v32 = vld [vmem:[#allocation5 + $0x5e8] sm:$0xff] }
 0xbc4   :  { %6030 = vmatpush1.bf16.msra.mxu0 %v4383_v44  ;;  %6358 = vmatpush1.bf16.msra.mxu1 %v4385_v2  ;;  %v4474_v44 = vld [vmem:[#allocation5 + $0x5f8] sm:$0xff]  ;;  %v4471_v2 = vld [vmem:[#allocation5 + $0x5e0] sm:$0xff] }
 0xbc5   :  { %6031 = vmatprep.subr.bf16.mxu0 %v4392_v45  ;;  %6359 = vmatprep.subr.bf16.mxu1 %v4394_v46  ;;  %v4473_v45 = vld [vmem:[#allocation5 + $0x5f0] sm:$0xff]  ;;  %v4480_v46 = vld [vmem:[#allocation5 + $0x628] sm:$0xff] }
 0xbc8   :  { %6032 = vmatpush1.bf16.msra.mxu0 %v4391_v47  ;;  %6360 = vmatpush1.bf16.msra.mxu1 %v4393_v48  ;;  %v4482_v47 = vld [vmem:[#allocation5 + $0x638] sm:$0xff]  ;;  %v4479_v48 = vld [vmem:[#allocation5 + $0x620] sm:$0xff] }
 0xbc9   :  { %6033 = vmatprep.subr.bf16.mxu0 %v4400_v49  ;;  %6361 = vmatprep.subr.bf16.mxu1 %v4402_v50  ;;  %v4481_v49 = vld [vmem:[#allocation5 + $0x630] sm:$0xff]  ;;  %v4488_v50 = vld [vmem:[#allocation5 + $0x668] sm:$0xff] }
 0xbcc   :  { %6034 = vmatpush1.bf16.msra.mxu0 %v4399_v51  ;;  %6362 = vmatpush1.bf16.msra.mxu1 %v4401_v38  ;;  %v4490_v51 = vld [vmem:[#allocation5 + $0x678] sm:$0xff]  ;;  %v4487_v38 = vld [vmem:[#allocation5 + $0x660] sm:$0xff] }
 0xbcd   :  { %6035 = vmatprep.subr.bf16.mxu0 %v4408_v54  ;;  %6363 = vmatprep.subr.bf16.mxu1 %v4410_v55  ;;  %v4489_v54 = vld [vmem:[#allocation5 + $0x670] sm:$0xff]  ;;  %v4496_v55 = vld [vmem:[#allocation5 + $0x6a8] sm:$0xff] }
 0xbd0   :  { %6036 = vmatpush1.bf16.msra.mxu0 %v4407_v56  ;;  %6364 = vmatpush1.bf16.msra.mxu1 %v4409_v33  ;;  %v4498_v56 = vld [vmem:[#allocation5 + $0x6b8] sm:$0xff]  ;;  %v4495_v33 = vld [vmem:[#allocation5 + $0x6a0] sm:$0xff] }
 0xbd1   :  { %6046 = vmatprep.subr.bf16.mxu0 %v4416_v57  ;;  %6374 = vmatprep.subr.bf16.mxu1 %v4418_v3  ;;  %v4497_v57 = vld [vmem:[#allocation5 + $0x6b0] sm:$0xff]  ;;  %v4504_v3 = vld [vmem:[#allocation5 + $0x6e8] sm:$0xff] }
 0xbd3   :  { %6038 = vmatmul.mubr.bf16.vlgmr.msra.gmra.mrb[36].mxu0 %v9320_v28  ;;  %6366 = vmatmul.mubr.bf16.vlgmr.msra.gmra.mrb[36].mxu1 %v9320_v28  ;;  %v4442_v28 = vld [vmem:[#allocation5 + $0x4f8] sm:$0xff] }
 0xbd4   :  { %6047 = vmatpush1.bf16.msra.mxu0 %v4415_v4  ;;  %6375 = vmatpush1.bf16.msra.mxu1 %v4417_v31  ;;  %v4506_v4 = vld [vmem:[#allocation5 + $0x6f8] sm:$0xff]  ;;  %v4503_v31 = vld [vmem:[#allocation5 + $0x6e0] sm:$0xff] }
 0xbd5   :  { %6048 = vmatprep.subr.bf16.mxu0 %v4424_v63  ;;  %6376 = vmatprep.subr.bf16.mxu1 %v4426_v12  ;;  %v4505_v63 = vld [vmem:[#allocation5 + $0x6f0] sm:$0xff]  ;;  %v4512_v12 = vld [vmem:[#allocation5 + $0x728] sm:$0xff] }
 0xbd6   :  { %6078 = vmatprep.mubr.bf16.mxu0 %v9326_v39  ;;  %6406 = vmatprep.mubr.bf16.mxu1 %v9326_v39  ;;  %v4447_v39 = vld [vmem:[#allocation5 + $0x520] sm:$0xff] }
 0xbd8   :  { %6049 = vmatpush1.bf16.msra.mxu0 %v4423_v60  ;;  %6377 = vmatpush1.bf16.msra.mxu1 %v4425_v13  ;;  %v4514_v60 = vld [vmem:[#allocation5 + $0x738] sm:$0xff]  ;;  %v4511_v13 = vld [vmem:[#allocation5 + $0x720] sm:$0xff] }
 0xbd9   :  { %6050 = vmatprep.subr.bf16.mxu0 %v4432_v14  ;;  %6378 = vmatprep.subr.bf16.mxu1 %v4434_v21  ;;  %v4513_v14 = vld [vmem:[#allocation5 + $0x730] sm:$0xff]  ;;  %v4520_v21 = vld [vmem:[#allocation5 + $0x768] sm:$0xff] }
 0xbdc   :  { %6051 = vmatpush1.bf16.msra.mxu0 %v4431_v0  ;;  %6379 = vmatpush1.bf16.msra.mxu1 %v4433_v1  ;;  %v4522_v0 = vld [vmem:[#allocation5 + $0x778] sm:$0xff]  ;;  %v4519_v1 = vld [vmem:[#allocation5 + $0x760] sm:$0xff] }
 0xbdd   :  { %6052 = vmatprep.subr.bf16.mxu0 %v4440_v15  ;;  %6380 = vmatprep.subr.bf16.mxu1 %v4442_v28  ;;  %v4521_v15 = vld [vmem:[#allocation5 + $0x770] sm:$0xff]  ;;  %v4528_v28 = vld [vmem:[#allocation5 + $0x7a8] sm:$0xff] }
 0xbe0   :  { %6053 = vmatpush1.bf16.msra.mxu0 %v4439_v16  ;;  %6381 = vmatpush1.bf16.msra.mxu1 %v4441_v20  ;;  %v4530_v16 = vld [vmem:[#allocation5 + $0x7b8] sm:$0xff]  ;;  %v4527_v20 = vld [vmem:[#allocation5 + $0x7a0] sm:$0xff] }
 0xbe1   :  { %6054 = vmatprep.subr.bf16.mxu0 %v4448_v61  ;;  %6382 = vmatprep.subr.bf16.mxu1 %v4450_v22  ;;  %v4529_v61 = vld [vmem:[#allocation5 + $0x7b0] sm:$0xff]  ;;  %v4536_v22 = vld [vmem:[#allocation5 + $0x7e8] sm:$0xff] }
 0xbe4   :  { %6055 = vmatpush1.bf16.msra.mxu0 %v4447_v39  ;;  %6383 = vmatpush1.bf16.msra.mxu1 %v4449_v8  ;;  %v4538_v39 = vld [vmem:[#allocation5 + $0x7f8] sm:$0xff]  ;;  %v4535_v8 = vld [vmem:[#allocation5 + $0x7e0] sm:$0xff] }
 0xbe5   :  { %6056 = vmatprep.subr.bf16.mxu0 %v4456_v23  ;;  %6384 = vmatprep.subr.bf16.mxu1 %v4458_v24  ;;  %v4537_v23 = vld [vmem:[#allocation5 + $0x7f0] sm:$0xff]  ;;  %v4544_v24 = vld [vmem:[#allocation5 + $0x828] sm:$0xff] }
 0xbe8   :  { %6057 = vmatpush1.bf16.msra.mxu0 %v4455_v5  ;;  %6385 = vmatpush1.bf16.msra.mxu1 %v4457_v25  ;;  %v4546_v5 = vld [vmem:[#allocation5 + $0x838] sm:$0xff]  ;;  %v4543_v25 = vld [vmem:[#allocation5 + $0x820] sm:$0xff] }
 0xbe9   :  { %6058 = vmatprep.subr.bf16.mxu0 %v4464_v26  ;;  %6386 = vmatprep.subr.bf16.mxu1 %v4466_v27  ;;  %v4545_v26 = vld [vmem:[#allocation5 + $0x830] sm:$0xff]  ;;  %v4552_v27 = vld [vmem:[#allocation5 + $0x868] sm:$0xff] }
 0xbec   :  { %6059 = vmatpush1.bf16.msra.mxu0 %v4463_v40  ;;  %6387 = vmatpush1.bf16.msra.mxu1 %v4465_v11  ;;  %v4554_v40 = vld [vmem:[#allocation5 + $0x878] sm:$0xff]  ;;  %v4551_v11 = vld [vmem:[#allocation5 + $0x860] sm:$0xff] }
 0xbed   :  { %6060 = vmatprep.subr.bf16.mxu0 %v4472_v32  ;;  %6388 = vmatprep.subr.bf16.mxu1 %v4474_v44  ;;  %v4553_v32 = vld [vmem:[#allocation5 + $0x870] sm:$0xff]  ;;  %v4560_v44 = vld [vmem:[#allocation5 + $0x8a8] sm:$0xff] }
 0xbf0   :  { %6061 = vmatpush1.bf16.msra.mxu0 %v4471_v2  ;;  %6389 = vmatpush1.bf16.msra.mxu1 %v4473_v45  ;;  %v4562_v2 = vld [vmem:[#allocation5 + $0x8b8] sm:$0xff]  ;;  %v4559_v45 = vld [vmem:[#allocation5 + $0x8a0] sm:$0xff] }
 0xbf1   :  { %6062 = vmatprep.subr.bf16.mxu0 %v4480_v46  ;;  %6390 = vmatprep.subr.bf16.mxu1 %v4482_v47  ;;  %v4561_v46 = vld [vmem:[#allocation5 + $0x8b0] sm:$0xff]  ;;  %v4568_v47 = vld [vmem:[#allocation5 + $0x8e8] sm:$0xff] }
 0xbf4   :  { %6063 = vmatpush1.bf16.msra.mxu0 %v4479_v48  ;;  %6391 = vmatpush1.bf16.msra.mxu1 %v4481_v49  ;;  %v4567_v48 = vld [vmem:[#allocation5 + $0x8e0] sm:$0xff]  ;;  %v4569_v49 = vld [vmem:[#allocation5 + $0x8f0] sm:$0xff] }
 0xbf5   :  { %6064 = vmatprep.subr.bf16.mxu0 %v4488_v50  ;;  %6392 = vmatprep.subr.bf16.mxu1 %v4490_v51  ;;  %v4576_v50 = vld [vmem:[#allocation5 + $0x928] sm:$0xff]  ;;  %v4578_v51 = vld [vmem:[#allocation5 + $0x938] sm:$0xff] }
 0xbf8   :  { %6065 = vmatpush1.bf16.msra.mxu0 %v4487_v38  ;;  %6393 = vmatpush1.bf16.msra.mxu1 %v4489_v54  ;;  %v4577_v38 = vld [vmem:[#allocation5 + $0x930] sm:$0xff]  ;;  %v4584_v54 = vld [vmem:[#allocation5 + $0x968] sm:$0xff] }
 0xbf9   :  { %6066 = vmatprep.subr.bf16.mxu0 %v4496_v55  ;;  %6394 = vmatprep.subr.bf16.mxu1 %v4498_v56  ;;  %v4586_v55 = vld [vmem:[#allocation5 + $0x978] sm:$0xff]  ;;  %v4583_v56 = vld [vmem:[#allocation5 + $0x960] sm:$0xff] }
 0xbfc   :  { %6067 = vmatpush1.bf16.msra.mxu0 %v4495_v33  ;;  %6395 = vmatpush1.bf16.msra.mxu1 %v4497_v57  ;;  %v4585_v33 = vld [vmem:[#allocation5 + $0x970] sm:$0xff]  ;;  %v4592_v57 = vld [vmem:[#allocation5 + $0x9a8] sm:$0xff] }
 0xbfd   :  { %6068 = vmatprep.subr.bf16.mxu0 %v4504_v3  ;;  %6396 = vmatprep.subr.bf16.mxu1 %v4506_v4  ;;  %v4594_v3 = vld [vmem:[#allocation5 + $0x9b8] sm:$0xff]  ;;  %v4591_v4 = vld [vmem:[#allocation5 + $0x9a0] sm:$0xff] }
 0xc00   :  { %6069 = vmatpush1.bf16.msra.mxu0 %v4503_v31  ;;  %6397 = vmatpush1.bf16.msra.mxu1 %v4505_v63  ;;  %v4593_v31 = vld [vmem:[#allocation5 + $0x9b0] sm:$0xff]  ;;  %v4600_v63 = vld [vmem:[#allocation5 + $0x9e8] sm:$0xff] }
 0xc01   :  { %6070 = vmatprep.subr.bf16.mxu0 %v4512_v12  ;;  %6398 = vmatprep.subr.bf16.mxu1 %v4514_v60  ;;  %v4602_v12 = vld [vmem:[#allocation5 + $0x9f8] sm:$0xff]  ;;  %v4599_v60 = vld [vmem:[#allocation5 + $0x9e0] sm:$0xff] }
 0xc04   :  { %6071 = vmatpush1.bf16.msra.mxu0 %v4511_v13  ;;  %6399 = vmatpush1.bf16.msra.mxu1 %v4513_v14  ;;  %v4601_v13 = vld [vmem:[#allocation5 + $0x9f0] sm:$0xff]  ;;  %v4608_v14 = vld [vmem:[#allocation5 + $0xa28] sm:$0xff] }
 0xc05   :  { %6072 = vmatprep.subr.bf16.mxu0 %v4520_v21  ;;  %6400 = vmatprep.subr.bf16.mxu1 %v4522_v0  ;;  %v4610_v21 = vld [vmem:[#allocation5 + $0xa38] sm:$0xff]  ;;  %v4607_v0 = vld [vmem:[#allocation5 + $0xa20] sm:$0xff] }
 0xc08   :  { %6073 = vmatpush1.bf16.msra.mxu0 %v4519_v1  ;;  %6401 = vmatpush1.bf16.msra.mxu1 %v4521_v15  ;;  %v4609_v1 = vld [vmem:[#allocation5 + $0xa30] sm:$0xff]  ;;  %v4616_v15 = vld [vmem:[#allocation5 + $0xa68] sm:$0xff] }
 0xc09   :  { %6074 = vmatprep.subr.bf16.mxu0 %v4528_v28  ;;  %6402 = vmatprep.subr.bf16.mxu1 %v4530_v16  ;;  %v4618_v28 = vld [vmem:[#allocation5 + $0xa78] sm:$0xff]  ;;  %v4615_v16 = vld [vmem:[#allocation5 + $0xa60] sm:$0xff] }
 0xc0c   :  { %6075 = vmatpush1.bf16.msra.mxu0 %v4527_v20  ;;  %6403 = vmatpush1.bf16.msra.mxu1 %v4529_v61  ;;  %v4617_v20 = vld [vmem:[#allocation5 + $0xa70] sm:$0xff]  ;;  %v4624_v61 = vld [vmem:[#allocation5 + $0xaa8] sm:$0xff] }
 0xc0d   :  { %6076 = vmatprep.subr.bf16.mxu0 %v4536_v22  ;;  %6404 = vmatprep.subr.bf16.mxu1 %v4538_v39  ;;  %v4626_v22 = vld [vmem:[#allocation5 + $0xab8] sm:$0xff]  ;;  %v4623_v39 = vld [vmem:[#allocation5 + $0xaa0] sm:$0xff] }
 0xc10   :  { %6077 = vmatpush1.bf16.msra.mxu0 %v4535_v8  ;;  %6405 = vmatpush1.bf16.msra.mxu1 %v4537_v23  ;;  %v4625_v8 = vld [vmem:[#allocation5 + $0xab0] sm:$0xff]  ;;  %v4632_v23 = vld [vmem:[#allocation5 + $0xae8] sm:$0xff] }
 0xc11   :  { %6087 = vmatprep.subr.bf16.mxu0 %v4544_v24  ;;  %6415 = vmatprep.subr.bf16.mxu1 %v4546_v5  ;;  %v4634_v24 = vld [vmem:[#allocation5 + $0xaf8] sm:$0xff]  ;;  %v4631_v5 = vld [vmem:[#allocation5 + $0xae0] sm:$0xff] }
 0xc13   :  { %6079 = vmatmul.mubr.bf16.vlgmr.msra.gmra.mrb[36].mxu0 %v9322_v29  ;;  %6407 = vmatmul.mubr.bf16.vlgmr.msra.gmra.mrb[36].mxu1 %v9322_v29  ;;  %v4570_v29 = vld [vmem:[#allocation5 + $0x8f8] sm:$0xff] }
 0xc14   :  { %6088 = vmatpush1.bf16.msra.mxu0 %v4543_v25  ;;  %6416 = vmatpush1.bf16.msra.mxu1 %v4545_v26  ;;  %v4633_v25 = vld [vmem:[#allocation5 + $0xaf0] sm:$0xff]  ;;  %v4640_v26 = vld [vmem:[#allocation5 + $0xb28] sm:$0xff] }
 0xc15   :  { %6089 = vmatprep.subr.bf16.mxu0 %v4552_v27  ;;  %6417 = vmatprep.subr.bf16.mxu1 %v4554_v40  ;;  %v4642_v27 = vld [vmem:[#allocation5 + $0xb38] sm:$0xff]  ;;  %v4639_v40 = vld [vmem:[#allocation5 + $0xb20] sm:$0xff] }
 0xc16   :  { %6119 = vmatprep.mubr.bf16.mxu0 %v9352_v53  ;;  %6447 = vmatprep.mubr.bf16.mxu1 %v9352_v53  ;;  %v4575_v53 = vld [vmem:[#allocation5 + $0x920] sm:$0xff] }
 0xc18   :  { %6090 = vmatpush1.bf16.msra.mxu0 %v4551_v11  ;;  %6418 = vmatpush1.bf16.msra.mxu1 %v4553_v32  ;;  %v4641_v11 = vld [vmem:[#allocation5 + $0xb30] sm:$0xff]  ;;  %v4648_v32 = vld [vmem:[#allocation5 + $0xb68] sm:$0xff] }
 0xc19   :  { %6091 = vmatprep.subr.bf16.mxu0 %v4560_v44  ;;  %6419 = vmatprep.subr.bf16.mxu1 %v4562_v2  ;;  %v4650_v44 = vld [vmem:[#allocation5 + $0xb78] sm:$0xff]  ;;  %v4647_v2 = vld [vmem:[#allocation5 + $0xb60] sm:$0xff] }
 0xc1c   :  { %6092 = vmatpush1.bf16.msra.mxu0 %v4559_v45  ;;  %6420 = vmatpush1.bf16.msra.mxu1 %v4561_v46  ;;  %v4649_v45 = vld [vmem:[#allocation5 + $0xb70] sm:$0xff]  ;;  %v4656_v46 = vld [vmem:[#allocation5 + $0xba8] sm:$0xff] }
 0xc1d   :  { %6093 = vmatprep.subr.bf16.mxu0 %v4568_v47  ;;  %6421 = vmatprep.subr.bf16.mxu1 %v4570_v29  ;;  %v4658_v47 = vld [vmem:[#allocation5 + $0xbb8] sm:$0xff]  ;;  %v4655_v29 = vld [vmem:[#allocation5 + $0xba0] sm:$0xff] }
 0xc20   :  { %6094 = vmatpush1.bf16.msra.mxu0 %v4567_v48  ;;  %6422 = vmatpush1.bf16.msra.mxu1 %v4569_v49  ;;  %v4657_v48 = vld [vmem:[#allocation5 + $0xbb0] sm:$0xff]  ;;  %v4664_v49 = vld [vmem:[#allocation5 + $0xbe8] sm:$0xff] }
 0xc21   :  { %6095 = vmatprep.subr.bf16.mxu0 %v4576_v50  ;;  %6423 = vmatprep.subr.bf16.mxu1 %v4578_v51  ;;  %v4666_v50 = vld [vmem:[#allocation5 + $0xbf8] sm:$0xff]  ;;  %v4663_v51 = vld [vmem:[#allocation5 + $0xbe0] sm:$0xff] }
 0xc24   :  { %6096 = vmatpush1.bf16.msra.mxu0 %v4575_v53  ;;  %6424 = vmatpush1.bf16.msra.mxu1 %v4577_v38  ;;  %v4665_v53 = vld [vmem:[#allocation5 + $0xbf0] sm:$0xff]  ;;  %v4672_v38 = vld [vmem:[#allocation5 + $0xc28] sm:$0xff] }
 0xc25   :  { %6097 = vmatprep.subr.bf16.mxu0 %v4584_v54  ;;  %6425 = vmatprep.subr.bf16.mxu1 %v4586_v55  ;;  %v4674_v54 = vld [vmem:[#allocation5 + $0xc38] sm:$0xff]  ;;  %v4671_v55 = vld [vmem:[#allocation5 + $0xc20] sm:$0xff] }
 0xc28   :  { %6098 = vmatpush1.bf16.msra.mxu0 %v4583_v56  ;;  %6426 = vmatpush1.bf16.msra.mxu1 %v4585_v33  ;;  %v4673_v56 = vld [vmem:[#allocation5 + $0xc30] sm:$0xff]  ;;  %v4680_v33 = vld [vmem:[#allocation5 + $0xc68] sm:$0xff] }
 0xc29   :  { %6099 = vmatprep.subr.bf16.mxu0 %v4592_v57  ;;  %6427 = vmatprep.subr.bf16.mxu1 %v4594_v3  ;;  %v4682_v57 = vld [vmem:[#allocation5 + $0xc78] sm:$0xff]  ;;  %v4679_v3 = vld [vmem:[#allocation5 + $0xc60] sm:$0xff] }
 0xc2c   :  { %6100 = vmatpush1.bf16.msra.mxu0 %v4591_v4  ;;  %6428 = vmatpush1.bf16.msra.mxu1 %v4593_v31  ;;  %v4681_v4 = vld [vmem:[#allocation5 + $0xc70] sm:$0xff]  ;;  %v4688_v31 = vld [vmem:[#allocation5 + $0xca8] sm:$0xff] }
 0xc2d   :  { %6101 = vmatprep.subr.bf16.mxu0 %v4600_v63  ;;  %6429 = vmatprep.subr.bf16.mxu1 %v4602_v12  ;;  %v4690_v63 = vld [vmem:[#allocation5 + $0xcb8] sm:$0xff]  ;;  %v4687_v12 = vld [vmem:[#allocation5 + $0xca0] sm:$0xff] }
 0xc30   :  { %6102 = vmatpush1.bf16.msra.mxu0 %v4599_v60  ;;  %6430 = vmatpush1.bf16.msra.mxu1 %v4601_v13  ;;  %v4689_v60 = vld [vmem:[#allocation5 + $0xcb0] sm:$0xff]  ;;  %v4696_v13 = vld [vmem:[#allocation5 + $0xce8] sm:$0xff] }
 0xc31   :  { %6103 = vmatprep.subr.bf16.mxu0 %v4608_v14  ;;  %6431 = vmatprep.subr.bf16.mxu1 %v4610_v21  ;;  %v4695_v14 = vld [vmem:[#allocation5 + $0xce0] sm:$0xff]  ;;  %v4697_v21 = vld [vmem:[#allocation5 + $0xcf0] sm:$0xff] }
 0xc34   :  { %6104 = vmatpush1.bf16.msra.mxu0 %v4607_v0  ;;  %6432 = vmatpush1.bf16.msra.mxu1 %v4609_v1  ;;  %v4704_v0 = vld [vmem:[#allocation5 + $0xd28] sm:$0xff]  ;;  %v4706_v1 = vld [vmem:[#allocation5 + $0xd38] sm:$0xff] }
 0xc35   :  { %6105 = vmatprep.subr.bf16.mxu0 %v4616_v15  ;;  %6433 = vmatprep.subr.bf16.mxu1 %v4618_v28  ;;  %v5307_v15 = vld [vmem:[#allocation17] sm:$0xff]  ;;  %v4705_v28 = vld [vmem:[#allocation5 + $0xd30] sm:$0xff] }
 0xc38   :  { %6106 = vmatpush1.bf16.msra.mxu0 %v4615_v16  ;;  %6434 = vmatpush1.bf16.msra.mxu1 %v4617_v20  ;;  %v4712_v16 = vld [vmem:[#allocation5 + $0xd68] sm:$0xff]  ;;  %v4714_v20 = vld [vmem:[#allocation5 + $0xd78] sm:$0xff] }
 0xc39   :  { %6107 = vmatprep.subr.bf16.mxu0 %v4624_v61  ;;  %6435 = vmatprep.subr.bf16.mxu1 %v4626_v22  ;;  %v5312_v61 = vrot.slane %v5307_v15, %v9180_v6  ;;  %v5320_v22 = vrot.slane %v5307_v15, %v9182_v7 }
 0xc3c   :  { %6108 = vmatpush1.bf16.msra.mxu0 %v4623_v39  ;;  %6436 = vmatpush1.bf16.msra.mxu1 %v4625_v8  ;;  %v5316_v39 = vrot.slane %v5307_v15, %v9184_v9  ;;  %v5324_v8 = vrot.slane %v5307_v15, %v9186_v10  ;;  %v4752_v15 = vld [vmem:[#allocation5 + $0xea8] sm:$0xff] }
 0xc3d   :  { %6109 = vmatprep.subr.bf16.mxu0 %v4632_v23  ;;  %6437 = vmatprep.subr.bf16.mxu1 %v4634_v24  ;;  %v4711_v23 = vld [vmem:[#allocation5 + $0xd60] sm:$0xff]  ;;  %v4713_v24 = vld [vmem:[#allocation5 + $0xd70] sm:$0xff] }
 0xc40   :  { %6110 = vmatpush1.bf16.msra.mxu0 %v4631_v5  ;;  %6438 = vmatpush1.bf16.msra.mxu1 %v4633_v25 }
 0xc41   :  { %6111 = vmatprep.subr.bf16.mxu0 %v4640_v26  ;;  %6439 = vmatprep.subr.bf16.mxu1 %v4642_v27  ;;  %v4720_v26 = vld [vmem:[#allocation5 + $0xda8] sm:$0xff]  ;;  %v4722_v27 = vld [vmem:[#allocation5 + $0xdb8] sm:$0xff] }
 0xc44   :  { %6112 = vmatpush1.bf16.msra.mxu0 %v4639_v40  ;;  %6440 = vmatpush1.bf16.msra.mxu1 %v4641_v11 }
 0xc45   :  { %6113 = vmatprep.subr.bf16.mxu0 %v4648_v32  ;;  %6441 = vmatprep.subr.bf16.mxu1 %v4650_v44 }
 0xc48   :  { %6114 = vmatpush1.bf16.msra.mxu0 %v4647_v2  ;;  %6442 = vmatpush1.bf16.msra.mxu1 %v4649_v45 }
 0xc49   :  { %6115 = vmatprep.subr.bf16.mxu0 %v4656_v46  ;;  %6443 = vmatprep.subr.bf16.mxu1 %v4658_v47 }
 0xc4c   :  { %6116 = vmatpush1.bf16.msra.mxu0 %v4655_v29  ;;  %6444 = vmatpush1.bf16.msra.mxu1 %v4657_v48 }
 0xc4d   :  { %6117 = vmatprep.subr.bf16.mxu0 %v4664_v49  ;;  %6445 = vmatprep.subr.bf16.mxu1 %v4666_v50 }
 0xc50   :  { %6118 = vmatpush1.bf16.msra.mxu0 %v4663_v51  ;;  %6446 = vmatpush1.bf16.msra.mxu1 %v4665_v53  ;;  %v4719_v51 = vld [vmem:[#allocation5 + $0xda0] sm:$0xff]  ;;  %v4721_v53 = vld [vmem:[#allocation5 + $0xdb0] sm:$0xff] }
 0xc51   :  { %6128 = vmatprep.subr.bf16.mxu0 %v4672_v38  ;;  %6456 = vmatprep.subr.bf16.mxu1 %v4674_v54 }
 0xc53   :  { %6120 = vmatmul.mubr.bf16.vlgmr.msra.gmra.mrb[36].mxu0 %v9348_v52  ;;  %6448 = vmatmul.mubr.bf16.vlgmr.msra.gmra.mrb[36].mxu1 %v9348_v52  ;;  %v4698_v52 = vld [vmem:[#allocation5 + $0xcf8] sm:$0xff] }
 0xc54   :  { %6129 = vmatpush1.bf16.msra.mxu0 %v4671_v55  ;;  %6457 = vmatpush1.bf16.msra.mxu1 %v4673_v56  ;;  %v4728_v55 = vld [vmem:[#allocation5 + $0xde8] sm:$0xff]  ;;  %v4730_v56 = vld [vmem:[#allocation5 + $0xdf8] sm:$0xff] }
 0xc55   :  { %6130 = vmatprep.subr.bf16.mxu0 %v4680_v33  ;;  %6458 = vmatprep.subr.bf16.mxu1 %v4682_v57 }
 0xc56   :  { %6160 = vmatprep.mubr.bf16.mxu0 %v9354_v59  ;;  %6488 = vmatprep.mubr.bf16.mxu1 %v9354_v59  ;;  %v4703_v59 = vld [vmem:[#allocation5 + $0xd20] sm:$0xff] }
 0xc58   :  { %6131 = vmatpush1.bf16.msra.mxu0 %v4679_v3  ;;  %6459 = vmatpush1.bf16.msra.mxu1 %v4681_v4 }
 0xc59   :  { %6132 = vmatprep.subr.bf16.mxu0 %v4688_v31  ;;  %6460 = vmatprep.subr.bf16.mxu1 %v4690_v63  ;;  %v4727_v31 = vld [vmem:[#allocation5 + $0xde0] sm:$0xff]  ;;  %v4729_v63 = vld [vmem:[#allocation5 + $0xdf0] sm:$0xff] }
 0xc5c   :  { %6133 = vmatpush1.bf16.msra.mxu0 %v4687_v12  ;;  %6461 = vmatpush1.bf16.msra.mxu1 %v4689_v60  ;;  %v4736_v12 = vld [vmem:[#allocation5 + $0xe28] sm:$0xff]  ;;  %v4738_v60 = vld [vmem:[#allocation5 + $0xe38] sm:$0xff] }
 0xc5d   :  { %6134 = vmatprep.subr.bf16.mxu0 %v4696_v13  ;;  %6462 = vmatprep.subr.bf16.mxu1 %v4698_v52  ;;  %v4735_v13 = vld [vmem:[#allocation5 + $0xe20] sm:$0xff]  ;;  %v4737_v52 = vld [vmem:[#allocation5 + $0xe30] sm:$0xff] }
 0xc60   :  { %6135 = vmatpush1.bf16.msra.mxu0 %v4695_v14  ;;  %6463 = vmatpush1.bf16.msra.mxu1 %v4697_v21  ;;  %v4744_v14 = vld [vmem:[#allocation5 + $0xe68] sm:$0xff]  ;;  %v4746_v21 = vld [vmem:[#allocation5 + $0xe78] sm:$0xff] }
 0xc61   :  { %6136 = vmatprep.subr.bf16.mxu0 %v4704_v0  ;;  %6464 = vmatprep.subr.bf16.mxu1 %v4706_v1  ;;  %v4743_v0 = vld [vmem:[#allocation5 + $0xe60] sm:$0xff]  ;;  %v4745_v1 = vld [vmem:[#allocation5 + $0xe70] sm:$0xff] }
 0xc64   :  { %6137 = vmatpush1.bf16.msra.mxu0 %v4703_v59  ;;  %6465 = vmatpush1.bf16.msra.mxu1 %v4705_v28  ;;  %v4754_v59 = vld [vmem:[#allocation5 + $0xeb8] sm:$0xff]  ;;  %v4751_v28 = vld [vmem:[#allocation5 + $0xea0] sm:$0xff] }
 0xc65   :  { %6138 = vmatprep.subr.bf16.mxu0 %v4712_v16  ;;  %6466 = vmatprep.subr.bf16.mxu1 %v4714_v20  ;;  %v4753_v16 = vld [vmem:[#allocation5 + $0xeb0] sm:$0xff]  ;;  %v4760_v20 = vld [vmem:[#allocation5 + $0xee8] sm:$0xff] }
 0xc66   :  { %v5670_v5 = vpop.f32.mrb[32].mxu0  ;;  %v5998_v25 = vpop.f32.mrb[32].mxu1 }
 0xc67   :  { %v8330_v40 = vadd.f32 %v5670_v5, %v5312_v61  ;;  %v8332_v11 = vadd.f32 %v5998_v25, %v5320_v22  ;;  %v5672_v32 = vpop.f32.mrb[33].mxu0  ;;  %v6000_v44 = vpop.f32.mrb[33].mxu1  ;;  %v4762_v61 = vld [vmem:[#allocation5 + $0xef8] sm:$0xff]  ;;  %v4759_v22 = vld [vmem:[#allocation5 + $0xee0] sm:$0xff]  ;;  %v4769_v5 = vld [vmem:[#allocation5 + $0xf30] sm:$0xff] }
 0xc68   :  { %v8331_v2 = vadd.f32 %v5672_v32, %v5316_v39  ;;  %v8333_v45 = vadd.f32 %v6000_v44, %v5324_v8  ;;  %v5674_v46 = vpop.f32.mrb[34].mxu0  ;;  %v6002_v47 = vpop.f32.mrb[34].mxu1  ;;  %6139 = vmatpush1.bf16.msra.mxu0 %v4711_v23  ;;  %6467 = vmatpush1.bf16.msra.mxu1 %v4713_v24  ;;  %v4761_v39 = vld [vmem:[#allocation5 + $0xef0] sm:$0xff]  ;;  %v4768_v8 = vld [vmem:[#allocation5 + $0xf28] sm:$0xff]  ;;  %v4770_v23 = vld [vmem:[#allocation5 + $0xf38] sm:$0xff] }
 0xc69   :  { %v6661_v29 = vmax.f32 %v8330_v40, 0.0  ;;  %v6663_v48 = vmax.f32 %v8332_v11, 0.0  ;;  %v5675_v49 = vpop.f32.mrb[35].mxu0  ;;  %v6003_v50 = vpop.f32.mrb[35].mxu1  ;;  %6140 = vmatprep.subr.bf16.mxu0 %v4720_v26  ;;  %6468 = vmatprep.subr.bf16.mxu1 %v4722_v27  ;;  %v4767_v24 = vld [vmem:[#allocation5 + $0xf20] sm:$0xff]  ;;  %v4776_v25 = vld [vmem:[#allocation5 + $0xf68] sm:$0xff] }
 0xc6a   :  { %v6662_v38 = vmax.f32 %v8331_v2, 0.0  ;;  %v6664_v54 = vmax.f32 %v8333_v45, 0.0  ;;  %v4778_v26 = vld [vmem:[#allocation5 + $0xf78] sm:$0xff]  ;;  %v4775_v27 = vld [vmem:[#allocation5 + $0xf60] sm:$0xff]  ;;  %v4777_v40 = vld [vmem:[#allocation5 + $0xf70] sm:$0xff] }
 0xc6b   :  { %v9458_v33 = vpack.c.bf16 %v6661_v29, %v6661_v29  ;;  %v9460_v57 = vpack.c.bf16 %v6663_v48, %v6663_v48  ;;  %v4784_v11 = vld [vmem:[#allocation5 + $0xfa8] sm:$0xff]  ;;  %v4786_v32 = vld [vmem:[#allocation5 + $0xfb8] sm:$0xff]  ;;  %v4783_v44 = vld [vmem:[#allocation5 + $0xfa0] sm:$0xff] }
 0xc6c   :  { %v9462_v3 = vpack.c.bf16 %v6662_v38, %v6662_v38  ;;  %v9464_v4 = vpack.c.bf16 %v6664_v54, %v6664_v54  ;;  %6141 = vmatpush1.bf16.msra.mxu0 %v4719_v51  ;;  %6469 = vmatpush1.bf16.msra.mxu1 %v4721_v53  ;;  %v4785_v2 = vld [vmem:[#allocation5 + $0xfb0] sm:$0xff]  ;;  %v4792_v45 = vld [vmem:[#allocation5 + $0xfe8] sm:$0xff]  ;;  %v4794_v46 = vld [vmem:[#allocation5 + $0xff8] sm:$0xff] }
 0xc6d   :  { %6142 = vmatprep.subr.bf16.mxu0 %v4728_v55  ;;  %6470 = vmatprep.subr.bf16.mxu1 %v4730_v56  ;;  %v4791_v47 = vld [vmem:[#allocation5 + $0xfe0] sm:$0xff]  ;;  %v4793_v29 = vld [vmem:[#allocation5 + $0xff0] sm:$0xff]  ;;  %v4800_v48 = vld [vmem:[#allocation5 + $0x1028] sm:$0xff] }
 0xc6e   :  { %v4802_v49 = vld [vmem:[#allocation5 + $0x1038] sm:$0xff]  ;;  %v4799_v50 = vld [vmem:[#allocation5 + $0x1020] sm:$0xff]  ;;  %v4801_v51 = vld [vmem:[#allocation5 + $0x1030] sm:$0xff] }
 0xc6f   :  { %v4808_v53 = vld [vmem:[#allocation5 + $0x1068] sm:$0xff]  ;;  %v4810_v38 = vld [vmem:[#allocation5 + $0x1078] sm:$0xff]  ;;  %v4807_v54 = vld [vmem:[#allocation5 + $0x1060] sm:$0xff] }
 0xc70   :  { %6143 = vmatpush1.bf16.msra.mxu0 %v4727_v31  ;;  %6471 = vmatpush1.bf16.msra.mxu1 %v4729_v63  ;;  %v4809_v55 = vld [vmem:[#allocation5 + $0x1070] sm:$0xff]  ;;  %v4816_v56 = vld [vmem:[#allocation5 + $0x10a8] sm:$0xff]  ;;  %v4818_v31 = vld [vmem:[#allocation5 + $0x10b8] sm:$0xff] }
 0xc71   :  { %6144 = vmatprep.subr.bf16.mxu0 %v4736_v12  ;;  %6472 = vmatprep.subr.bf16.mxu1 %v4738_v60  ;;  %v4815_v63 = vld [vmem:[#allocation5 + $0x10a0] sm:$0xff]  ;;  %v4817_v12 = vld [vmem:[#allocation5 + $0x10b0] sm:$0xff]  ;;  %v4824_v60 = vld [vmem:[#allocation5 + $0x10e8] sm:$0xff] }
 0xc74   :  { %6145 = vmatpush1.bf16.msra.mxu0 %v4735_v13  ;;  %6473 = vmatpush1.bf16.msra.mxu1 %v4737_v52  ;;  %v4823_v13 = vld [vmem:[#allocation5 + $0x10e0] sm:$0xff]  ;;  %v4825_v52 = vld [vmem:[#allocation5 + $0x10f0] sm:$0xff] }
 0xc75   :  { %6146 = vmatprep.subr.bf16.mxu0 %v4744_v14  ;;  %6474 = vmatprep.subr.bf16.mxu1 %v4746_v21  ;;  %v4832_v14 = vld [vmem:[#allocation5 + $0x1128] sm:$0xff]  ;;  %v4834_v21 = vld [vmem:[#allocation5 + $0x1138] sm:$0xff] }
 0xc78   :  { %6147 = vmatpush1.bf16.msra.mxu0 %v4743_v0  ;;  %6475 = vmatpush1.bf16.msra.mxu1 %v4745_v1  ;;  %v4833_v0 = vld [vmem:[#allocation5 + $0x1130] sm:$0xff]  ;;  %v4840_v1 = vld [vmem:[#allocation5 + $0x1168] sm:$0xff] }
 0xc79   :  { %6148 = vmatprep.subr.bf16.mxu0 %v4752_v15  ;;  %6476 = vmatprep.subr.bf16.mxu1 %v4754_v59  ;;  %v4842_v15 = vld [vmem:[#allocation5 + $0x1178] sm:$0xff]  ;;  %v4839_v59 = vld [vmem:[#allocation5 + $0x1160] sm:$0xff] }
 0xc7c   :  { %6149 = vmatpush1.bf16.msra.mxu0 %v4751_v28  ;;  %6477 = vmatpush1.bf16.msra.mxu1 %v4753_v16  ;;  %v4841_v28 = vld [vmem:[#allocation5 + $0x1170] sm:$0xff]  ;;  %v4848_v16 = vld [vmem:[#allocation5 + $0x11a8] sm:$0xff] }
 0xc7d   :  { %6150 = vmatprep.subr.bf16.mxu0 %v4760_v20  ;;  %6478 = vmatprep.subr.bf16.mxu1 %v4762_v61  ;;  %v4850_v20 = vld [vmem:[#allocation5 + $0x11b8] sm:$0xff]  ;;  %v4847_v61 = vld [vmem:[#allocation5 + $0x11a0] sm:$0xff] }
 0xc80   :  { %6151 = vmatpush1.bf16.msra.mxu0 %v4759_v22  ;;  %6479 = vmatpush1.bf16.msra.mxu1 %v4761_v39  ;;  %v4849_v22 = vld [vmem:[#allocation5 + $0x11b0] sm:$0xff]  ;;  %v4856_v39 = vld [vmem:[#allocation5 + $0x11e8] sm:$0xff] }
 0xc81   :  { %6152 = vmatprep.subr.bf16.mxu0 %v4768_v8  ;;  %6480 = vmatprep.subr.bf16.mxu1 %v4770_v23  ;;  %v4858_v8 = vld [vmem:[#allocation5 + $0x11f8] sm:$0xff]  ;;  %v4855_v23 = vld [vmem:[#allocation5 + $0x11e0] sm:$0xff] }
 0xc84   :  { %6153 = vmatpush1.bf16.msra.mxu0 %v4767_v24  ;;  %6481 = vmatpush1.bf16.msra.mxu1 %v4769_v5  ;;  %v4857_v24 = vld [vmem:[#allocation5 + $0x11f0] sm:$0xff]  ;;  %v4864_v5 = vld [vmem:[#allocation5 + $0x1228] sm:$0xff] }
 0xc85   :  { %6154 = vmatprep.subr.bf16.mxu0 %v4776_v25  ;;  %6482 = vmatprep.subr.bf16.mxu1 %v4778_v26  ;;  %v4866_v25 = vld [vmem:[#allocation5 + $0x1238] sm:$0xff]  ;;  %v4863_v26 = vld [vmem:[#allocation5 + $0x1220] sm:$0xff] }
 0xc88   :  { %6155 = vmatpush1.bf16.msra.mxu0 %v4775_v27  ;;  %6483 = vmatpush1.bf16.msra.mxu1 %v4777_v40  ;;  %v4865_v27 = vld [vmem:[#allocation5 + $0x1230] sm:$0xff]  ;;  %v4872_v40 = vld [vmem:[#allocation5 + $0x1268] sm:$0xff] }
 0xc89   :  { %6156 = vmatprep.subr.bf16.mxu0 %v4784_v11  ;;  %6484 = vmatprep.subr.bf16.mxu1 %v4786_v32  ;;  %v4874_v11 = vld [vmem:[#allocation5 + $0x1278] sm:$0xff]  ;;  %v4871_v32 = vld [vmem:[#allocation5 + $0x1260] sm:$0xff] }
 0xc8c   :  { %6157 = vmatpush1.bf16.msra.mxu0 %v4783_v44  ;;  %6485 = vmatpush1.bf16.msra.mxu1 %v4785_v2  ;;  %v4873_v44 = vld [vmem:[#allocation5 + $0x1270] sm:$0xff]  ;;  %v4880_v2 = vld [vmem:[#allocation5 + $0x12a8] sm:$0xff] }
 0xc8d   :  { %6158 = vmatprep.subr.bf16.mxu0 %v4792_v45  ;;  %6486 = vmatprep.subr.bf16.mxu1 %v4794_v46  ;;  %v4882_v45 = vld [vmem:[#allocation5 + $0x12b8] sm:$0xff]  ;;  %v4879_v46 = vld [vmem:[#allocation5 + $0x12a0] sm:$0xff] }
 0xc90   :  { %6159 = vmatpush1.bf16.msra.mxu0 %v4791_v47  ;;  %6487 = vmatpush1.bf16.msra.mxu1 %v4793_v29  ;;  %v4881_v47 = vld [vmem:[#allocation5 + $0x12b0] sm:$0xff]  ;;  %v4888_v29 = vld [vmem:[#allocation5 + $0x12e8] sm:$0xff] }
 0xc91   :  { %6169 = vmatprep.subr.bf16.mxu0 %v4800_v48  ;;  %6497 = vmatprep.subr.bf16.mxu1 %v4802_v49  ;;  %v4890_v48 = vld [vmem:[#allocation5 + $0x12f8] sm:$0xff]  ;;  %v4887_v49 = vld [vmem:[#allocation5 + $0x12e0] sm:$0xff] }
 0xc93   :  { %6161 = vmatmul.mubr.bf16.vlgmr.msra.gmra.mrb[36].mxu0 %v9350_v30  ;;  %6489 = vmatmul.mubr.bf16.vlgmr.msra.gmra.mrb[36].mxu1 %v9350_v30  ;;  %v4826_v30 = vld [vmem:[#allocation5 + $0x10f8] sm:$0xff] }
 0xc94   :  { %6170 = vmatpush1.bf16.msra.mxu0 %v4799_v50  ;;  %6498 = vmatpush1.bf16.msra.mxu1 %v4801_v51  ;;  %v4889_v50 = vld [vmem:[#allocation5 + $0x12f0] sm:$0xff]  ;;  %v4896_v51 = vld [vmem:[#allocation5 + $0x1328] sm:$0xff] }
 0xc95   :  { %6171 = vmatprep.subr.bf16.mxu0 %v4808_v53  ;;  %6499 = vmatprep.subr.bf16.mxu1 %v4810_v38  ;;  %v4898_v53 = vld [vmem:[#allocation5 + $0x1338] sm:$0xff]  ;;  %v4895_v38 = vld [vmem:[#allocation5 + $0x1320] sm:$0xff] }
 0xc96   :  { %6201 = vmatprep.mubr.bf16.mxu0 %v9386_v18  ;;  %6529 = vmatprep.mubr.bf16.mxu1 %v9386_v18  ;;  %v4831_v18 = vld [vmem:[#allocation5 + $0x1120] sm:$0xff] }
 0xc98   :  { %6172 = vmatpush1.bf16.msra.mxu0 %v4807_v54  ;;  %6500 = vmatpush1.bf16.msra.mxu1 %v4809_v55  ;;  %v4897_v54 = vld [vmem:[#allocation5 + $0x1330] sm:$0xff]  ;;  %v4904_v55 = vld [vmem:[#allocation5 + $0x1368] sm:$0xff] }
 0xc99   :  { %6173 = vmatprep.subr.bf16.mxu0 %v4816_v56  ;;  %6501 = vmatprep.subr.bf16.mxu1 %v4818_v31  ;;  %v4906_v56 = vld [vmem:[#allocation5 + $0x1378] sm:$0xff]  ;;  %v4903_v31 = vld [vmem:[#allocation5 + $0x1360] sm:$0xff] }
 0xc9c   :  { %6174 = vmatpush1.bf16.msra.mxu0 %v4815_v63  ;;  %6502 = vmatpush1.bf16.msra.mxu1 %v4817_v12  ;;  %v4905_v63 = vld [vmem:[#allocation5 + $0x1370] sm:$0xff]  ;;  %v4912_v12 = vld [vmem:[#allocation5 + $0x13a8] sm:$0xff] }
 0xc9d   :  { %6175 = vmatprep.subr.bf16.mxu0 %v4824_v60  ;;  %6503 = vmatprep.subr.bf16.mxu1 %v4826_v30  ;;  %v4914_v60 = vld [vmem:[#allocation5 + $0x13b8] sm:$0xff]  ;;  %v4911_v30 = vld [vmem:[#allocation5 + $0x13a0] sm:$0xff] }
 0xca0   :  { %6176 = vmatpush1.bf16.msra.mxu0 %v4823_v13  ;;  %6504 = vmatpush1.bf16.msra.mxu1 %v4825_v52  ;;  %v4913_v13 = vld [vmem:[#allocation5 + $0x13b0] sm:$0xff]  ;;  %v4920_v52 = vld [vmem:[#allocation5 + $0x13e8] sm:$0xff] }
 0xca1   :  { %6177 = vmatprep.subr.bf16.mxu0 %v4832_v14  ;;  %6505 = vmatprep.subr.bf16.mxu1 %v4834_v21  ;;  %v4922_v14 = vld [vmem:[#allocation5 + $0x13f8] sm:$0xff]  ;;  %v4919_v21 = vld [vmem:[#allocation5 + $0x13e0] sm:$0xff] }
 0xca4   :  { %6178 = vmatpush1.bf16.msra.mxu0 %v4831_v18  ;;  %6506 = vmatpush1.bf16.msra.mxu1 %v4833_v0  ;;  %v4921_v18 = vld [vmem:[#allocation5 + $0x13f0] sm:$0xff]  ;;  %v4928_v0 = vld [vmem:[#allocation5 + $0x1428] sm:$0xff] }
 0xca5   :  { %6179 = vmatprep.subr.bf16.mxu0 %v4840_v1  ;;  %6507 = vmatprep.subr.bf16.mxu1 %v4842_v15  ;;  %v4930_v1 = vld [vmem:[#allocation5 + $0x1438] sm:$0xff]  ;;  %v4927_v15 = vld [vmem:[#allocation5 + $0x1420] sm:$0xff] }
 0xca8   :  { %6180 = vmatpush1.bf16.msra.mxu0 %v4839_v59  ;;  %6508 = vmatpush1.bf16.msra.mxu1 %v4841_v28  ;;  %v4929_v59 = vld [vmem:[#allocation5 + $0x1430] sm:$0xff]  ;;  %v4936_v28 = vld [vmem:[#allocation5 + $0x1468] sm:$0xff] }
 0xca9   :  { %6181 = vmatprep.subr.bf16.mxu0 %v4848_v16  ;;  %6509 = vmatprep.subr.bf16.mxu1 %v4850_v20  ;;  %v4938_v16 = vld [vmem:[#allocation5 + $0x1478] sm:$0xff]  ;;  %v4935_v20 = vld [vmem:[#allocation5 + $0x1460] sm:$0xff] }
 0xcac   :  { %6182 = vmatpush1.bf16.msra.mxu0 %v4847_v61  ;;  %6510 = vmatpush1.bf16.msra.mxu1 %v4849_v22  ;;  %v4937_v61 = vld [vmem:[#allocation5 + $0x1470] sm:$0xff]  ;;  %v4944_v22 = vld [vmem:[#allocation5 + $0x14a8] sm:$0xff] }
 0xcad   :  { %6183 = vmatprep.subr.bf16.mxu0 %v4856_v39  ;;  %6511 = vmatprep.subr.bf16.mxu1 %v4858_v8  ;;  %v4946_v39 = vld [vmem:[#allocation5 + $0x14b8] sm:$0xff]  ;;  %v4943_v8 = vld [vmem:[#allocation5 + $0x14a0] sm:$0xff] }
 0xcb0   :  { %6184 = vmatpush1.bf16.msra.mxu0 %v4855_v23  ;;  %6512 = vmatpush1.bf16.msra.mxu1 %v4857_v24  ;;  %v4945_v23 = vld [vmem:[#allocation5 + $0x14b0] sm:$0xff]  ;;  %v4952_v24 = vld [vmem:[#allocation5 + $0x14e8] sm:$0xff] }
 0xcb1   :  { %6185 = vmatprep.subr.bf16.mxu0 %v4864_v5  ;;  %6513 = vmatprep.subr.bf16.mxu1 %v4866_v25  ;;  %v4951_v5 = vld [vmem:[#allocation5 + $0x14e0] sm:$0xff]  ;;  %v4953_v25 = vld [vmem:[#allocation5 + $0x14f0] sm:$0xff] }
 0xcb4   :  { %6186 = vmatpush1.bf16.msra.mxu0 %v4863_v26  ;;  %6514 = vmatpush1.bf16.msra.mxu1 %v4865_v27  ;;  %v4960_v26 = vld [vmem:[#allocation5 + $0x1528] sm:$0xff]  ;;  %v4962_v27 = vld [vmem:[#allocation5 + $0x1538] sm:$0xff] }
 0xcb5   :  { %6187 = vmatprep.subr.bf16.mxu0 %v4872_v40  ;;  %6515 = vmatprep.subr.bf16.mxu1 %v4874_v11  ;;  %v4961_v40 = vld [vmem:[#allocation5 + $0x1530] sm:$0xff]  ;;  %v4968_v11 = vld [vmem:[#allocation5 + $0x1568] sm:$0xff] }
 0xcb8   :  { %6188 = vmatpush1.bf16.msra.mxu0 %v4871_v32  ;;  %6516 = vmatpush1.bf16.msra.mxu1 %v4873_v44  ;;  %v4970_v32 = vld [vmem:[#allocation5 + $0x1578] sm:$0xff]  ;;  %v4967_v44 = vld [vmem:[#allocation5 + $0x1560] sm:$0xff] }
 0xcb9   :  { %6189 = vmatprep.subr.bf16.mxu0 %v4880_v2  ;;  %6517 = vmatprep.subr.bf16.mxu1 %v4882_v45  ;;  %v4969_v2 = vld [vmem:[#allocation5 + $0x1570] sm:$0xff]  ;;  %v4976_v45 = vld [vmem:[#allocation5 + $0x15a8] sm:$0xff] }
 0xcbc   :  { %6190 = vmatpush1.bf16.msra.mxu0 %v4879_v46  ;;  %6518 = vmatpush1.bf16.msra.mxu1 %v4881_v47  ;;  %v4978_v46 = vld [vmem:[#allocation5 + $0x15b8] sm:$0xff]  ;;  %v4975_v47 = vld [vmem:[#allocation5 + $0x15a0] sm:$0xff] }
 0xcbd   :  { %6191 = vmatprep.subr.bf16.mxu0 %v4888_v29  ;;  %6519 = vmatprep.subr.bf16.mxu1 %v4890_v48  ;;  %v4977_v29 = vld [vmem:[#allocation5 + $0x15b0] sm:$0xff]  ;;  %v4984_v48 = vld [vmem:[#allocation5 + $0x15e8] sm:$0xff] }
 0xcc0   :  { %6192 = vmatpush1.bf16.msra.mxu0 %v4887_v49  ;;  %6520 = vmatpush1.bf16.msra.mxu1 %v4889_v50  ;;  %v4986_v49 = vld [vmem:[#allocation5 + $0x15f8] sm:$0xff]  ;;  %v4983_v50 = vld [vmem:[#allocation5 + $0x15e0] sm:$0xff] }
 0xcc1   :  { %6193 = vmatprep.subr.bf16.mxu0 %v4896_v51  ;;  %6521 = vmatprep.subr.bf16.mxu1 %v4898_v53  ;;  %v4985_v51 = vld [vmem:[#allocation5 + $0x15f0] sm:$0xff]  ;;  %v4992_v53 = vld [vmem:[#allocation5 + $0x1628] sm:$0xff] }
 0xcc4   :  { %6194 = vmatpush1.bf16.msra.mxu0 %v4895_v38  ;;  %6522 = vmatpush1.bf16.msra.mxu1 %v4897_v54  ;;  %v4994_v38 = vld [vmem:[#allocation5 + $0x1638] sm:$0xff]  ;;  %v4991_v54 = vld [vmem:[#allocation5 + $0x1620] sm:$0xff] }
 0xcc5   :  { %6195 = vmatprep.subr.bf16.mxu0 %v4904_v55  ;;  %6523 = vmatprep.subr.bf16.mxu1 %v4906_v56  ;;  %v4993_v55 = vld [vmem:[#allocation5 + $0x1630] sm:$0xff]  ;;  %v5000_v56 = vld [vmem:[#allocation5 + $0x1668] sm:$0xff] }
 0xcc8   :  { %6196 = vmatpush1.bf16.msra.mxu0 %v4903_v31  ;;  %6524 = vmatpush1.bf16.msra.mxu1 %v4905_v63  ;;  %v5002_v31 = vld [vmem:[#allocation5 + $0x1678] sm:$0xff]  ;;  %v4999_v63 = vld [vmem:[#allocation5 + $0x1660] sm:$0xff] }
 0xcc9   :  { %6197 = vmatprep.subr.bf16.mxu0 %v4912_v12  ;;  %6525 = vmatprep.subr.bf16.mxu1 %v4914_v60  ;;  %v5001_v12 = vld [vmem:[#allocation5 + $0x1670] sm:$0xff]  ;;  %v5008_v60 = vld [vmem:[#allocation5 + $0x16a8] sm:$0xff] }
 0xccc   :  { %6198 = vmatpush1.bf16.msra.mxu0 %v4911_v30  ;;  %6526 = vmatpush1.bf16.msra.mxu1 %v4913_v13  ;;  %v5010_v30 = vld [vmem:[#allocation5 + $0x16b8] sm:$0xff]  ;;  %v5007_v13 = vld [vmem:[#allocation5 + $0x16a0] sm:$0xff] }
 0xccd   :  { %6199 = vmatprep.subr.bf16.mxu0 %v4920_v52  ;;  %6527 = vmatprep.subr.bf16.mxu1 %v4922_v14  ;;  %v5009_v52 = vld [vmem:[#allocation5 + $0x16b0] sm:$0xff]  ;;  %v5016_v14 = vld [vmem:[#allocation5 + $0x16e8] sm:$0xff] }
 0xcd0   :  { %6200 = vmatpush1.bf16.msra.mxu0 %v4919_v21  ;;  %6528 = vmatpush1.bf16.msra.mxu1 %v4921_v18  ;;  %v5018_v21 = vld [vmem:[#allocation5 + $0x16f8] sm:$0xff]  ;;  %v5015_v18 = vld [vmem:[#allocation5 + $0x16e0] sm:$0xff] }
 0xcd1   :  { %6210 = vmatprep.subr.bf16.mxu0 %v4928_v0  ;;  %6538 = vmatprep.subr.bf16.mxu1 %v4930_v1  ;;  %v5017_v0 = vld [vmem:[#allocation5 + $0x16f0] sm:$0xff]  ;;  %v5024_v1 = vld [vmem:[#allocation5 + $0x1728] sm:$0xff] }
 0xcd3   :  { %6202 = vmatmul.mubr.bf16.vlgmr.msra.gmra.mrb[36].mxu0 %v9382_v58  ;;  %6530 = vmatmul.mubr.bf16.vlgmr.msra.gmra.mrb[36].mxu1 %v9382_v58  ;;  %v4954_v58 = vld [vmem:[#allocation5 + $0x14f8] sm:$0xff] }
 0xcd4   :  { %6211 = vmatpush1.bf16.msra.mxu0 %v4927_v15  ;;  %6539 = vmatpush1.bf16.msra.mxu1 %v4929_v59  ;;  %v5026_v15 = vld [vmem:[#allocation5 + $0x1738] sm:$0xff]  ;;  %v5023_v59 = vld [vmem:[#allocation5 + $0x1720] sm:$0xff] }
 0xcd5   :  { %6212 = vmatprep.subr.bf16.mxu0 %v4936_v28  ;;  %6540 = vmatprep.subr.bf16.mxu1 %v4938_v16  ;;  %v5025_v28 = vld [vmem:[#allocation5 + $0x1730] sm:$0xff]  ;;  %v5032_v16 = vld [vmem:[#allocation5 + $0x1768] sm:$0xff] }
 0xcd6   :  { %6242 = vmatprep.mubr.bf16.mxu0 %v9388_v19  ;;  %6570 = vmatprep.mubr.bf16.mxu1 %v9388_v19  ;;  %v4959_v19 = vld [vmem:[#allocation5 + $0x1520] sm:$0xff] }
 0xcd8   :  { %6213 = vmatpush1.bf16.msra.mxu0 %v4935_v20  ;;  %6541 = vmatpush1.bf16.msra.mxu1 %v4937_v61  ;;  %v5034_v20 = vld [vmem:[#allocation5 + $0x1778] sm:$0xff]  ;;  %v5031_v61 = vld [vmem:[#allocation5 + $0x1760] sm:$0xff] }
 0xcd9   :  { %6214 = vmatprep.subr.bf16.mxu0 %v4944_v22  ;;  %6542 = vmatprep.subr.bf16.mxu1 %v4946_v39  ;;  %v5033_v22 = vld [vmem:[#allocation5 + $0x1770] sm:$0xff]  ;;  %v5040_v39 = vld [vmem:[#allocation5 + $0x17a8] sm:$0xff] }
 0xcdc   :  { %6215 = vmatpush1.bf16.msra.mxu0 %v4943_v8  ;;  %6543 = vmatpush1.bf16.msra.mxu1 %v4945_v23  ;;  %v5042_v8 = vld [vmem:[#allocation5 + $0x17b8] sm:$0xff]  ;;  %v5039_v23 = vld [vmem:[#allocation5 + $0x17a0] sm:$0xff] }
 0xcdd   :  { %6216 = vmatprep.subr.bf16.mxu0 %v4952_v24  ;;  %6544 = vmatprep.subr.bf16.mxu1 %v4954_v58  ;;  %v5041_v24 = vld [vmem:[#allocation5 + $0x17b0] sm:$0xff]  ;;  %v5048_v58 = vld [vmem:[#allocation5 + $0x17e8] sm:$0xff] }
 0xce0   :  { %6217 = vmatpush1.bf16.msra.mxu0 %v4951_v5  ;;  %6545 = vmatpush1.bf16.msra.mxu1 %v4953_v25  ;;  %v5050_v5 = vld [vmem:[#allocation5 + $0x17f8] sm:$0xff]  ;;  %v5047_v25 = vld [vmem:[#allocation5 + $0x17e0] sm:$0xff] }
 0xce1   :  { %6218 = vmatprep.subr.bf16.mxu0 %v4960_v26  ;;  %6546 = vmatprep.subr.bf16.mxu1 %v4962_v27  ;;  %v5049_v26 = vld [vmem:[#allocation5 + $0x17f0] sm:$0xff]  ;;  %v5056_v27 = vld [vmem:[#allocation5 + $0x1828] sm:$0xff] }
 0xce4   :  { %6219 = vmatpush1.bf16.msra.mxu0 %v4959_v19  ;;  %6547 = vmatpush1.bf16.msra.mxu1 %v4961_v40  ;;  %v5058_v19 = vld [vmem:[#allocation5 + $0x1838] sm:$0xff]  ;;  %v5055_v40 = vld [vmem:[#allocation5 + $0x1820] sm:$0xff] }
 0xce5   :  { %6220 = vmatprep.subr.bf16.mxu0 %v4968_v11  ;;  %6548 = vmatprep.subr.bf16.mxu1 %v4970_v32  ;;  %v5057_v11 = vld [vmem:[#allocation5 + $0x1830] sm:$0xff]  ;;  %v5064_v32 = vld [vmem:[#allocation5 + $0x1868] sm:$0xff] }
 0xce8   :  { %6221 = vmatpush1.bf16.msra.mxu0 %v4967_v44  ;;  %6549 = vmatpush1.bf16.msra.mxu1 %v4969_v2  ;;  %v5066_v44 = vld [vmem:[#allocation5 + $0x1878] sm:$0xff]  ;;  %v5063_v2 = vld [vmem:[#allocation5 + $0x1860] sm:$0xff] }
 0xce9   :  { %6222 = vmatprep.subr.bf16.mxu0 %v4976_v45  ;;  %6550 = vmatprep.subr.bf16.mxu1 %v4978_v46  ;;  %v5065_v45 = vld [vmem:[#allocation5 + $0x1870] sm:$0xff]  ;;  %v5072_v46 = vld [vmem:[#allocation5 + $0x18a8] sm:$0xff] }
 0xcec   :  { %6223 = vmatpush1.bf16.msra.mxu0 %v4975_v47  ;;  %6551 = vmatpush1.bf16.msra.mxu1 %v4977_v29  ;;  %v5074_v47 = vld [vmem:[#allocation5 + $0x18b8] sm:$0xff]  ;;  %v5071_v29 = vld [vmem:[#allocation5 + $0x18a0] sm:$0xff] }
 0xced   :  { %6224 = vmatprep.subr.bf16.mxu0 %v4984_v48  ;;  %6552 = vmatprep.subr.bf16.mxu1 %v4986_v49  ;;  %v5073_v48 = vld [vmem:[#allocation5 + $0x18b0] sm:$0xff]  ;;  %v5080_v49 = vld [vmem:[#allocation5 + $0x18e8] sm:$0xff] }
 0xcf0   :  { %6225 = vmatpush1.bf16.msra.mxu0 %v4983_v50  ;;  %6553 = vmatpush1.bf16.msra.mxu1 %v4985_v51  ;;  %v5079_v50 = vld [vmem:[#allocation5 + $0x18e0] sm:$0xff]  ;;  %v5081_v51 = vld [vmem:[#allocation5 + $0x18f0] sm:$0xff] }
 0xcf1   :  { %6226 = vmatprep.subr.bf16.mxu0 %v4992_v53  ;;  %6554 = vmatprep.subr.bf16.mxu1 %v4994_v38  ;;  %v5088_v53 = vld [vmem:[#allocation5 + $0x1928] sm:$0xff]  ;;  %v5090_v38 = vld [vmem:[#allocation5 + $0x1938] sm:$0xff] }
 0xcf4   :  { %6227 = vmatpush1.bf16.msra.mxu0 %v4991_v54  ;;  %6555 = vmatpush1.bf16.msra.mxu1 %v4993_v55  ;;  %v5089_v54 = vld [vmem:[#allocation5 + $0x1930] sm:$0xff]  ;;  %v5096_v55 = vld [vmem:[#allocation5 + $0x1968] sm:$0xff] }
 0xcf5   :  { %6228 = vmatprep.subr.bf16.mxu0 %v5000_v56  ;;  %6556 = vmatprep.subr.bf16.mxu1 %v5002_v31  ;;  %v5098_v56 = vld [vmem:[#allocation5 + $0x1978] sm:$0xff]  ;;  %v5095_v31 = vld [vmem:[#allocation5 + $0x1960] sm:$0xff] }
 0xcf8   :  { %6229 = vmatpush1.bf16.msra.mxu0 %v4999_v63  ;;  %6557 = vmatpush1.bf16.msra.mxu1 %v5001_v12  ;;  %v5097_v63 = vld [vmem:[#allocation5 + $0x1970] sm:$0xff]  ;;  %v5104_v12 = vld [vmem:[#allocation5 + $0x19a8] sm:$0xff] }
 0xcf9   :  { %6230 = vmatprep.subr.bf16.mxu0 %v5008_v60  ;;  %6558 = vmatprep.subr.bf16.mxu1 %v5010_v30  ;;  %v5106_v60 = vld [vmem:[#allocation5 + $0x19b8] sm:$0xff]  ;;  %v5103_v30 = vld [vmem:[#allocation5 + $0x19a0] sm:$0xff] }
 0xcfc   :  { %6231 = vmatpush1.bf16.msra.mxu0 %v5007_v13  ;;  %6559 = vmatpush1.bf16.msra.mxu1 %v5009_v52  ;;  %v5105_v13 = vld [vmem:[#allocation5 + $0x19b0] sm:$0xff]  ;;  %v5112_v52 = vld [vmem:[#allocation5 + $0x19e8] sm:$0xff] }
 0xcfd   :  { %6232 = vmatprep.subr.bf16.mxu0 %v5016_v14  ;;  %6560 = vmatprep.subr.bf16.mxu1 %v5018_v21  ;;  %v5114_v14 = vld [vmem:[#allocation5 + $0x19f8] sm:$0xff]  ;;  %v5111_v21 = vld [vmem:[#allocation5 + $0x19e0] sm:$0xff] }
 0xd00   :  { %6233 = vmatpush1.bf16.msra.mxu0 %v5015_v18  ;;  %6561 = vmatpush1.bf16.msra.mxu1 %v5017_v0  ;;  %v5113_v18 = vld [vmem:[#allocation5 + $0x19f0] sm:$0xff]  ;;  %v5120_v0 = vld [vmem:[#allocation5 + $0x1a28] sm:$0xff] }
 0xd01   :  { %6234 = vmatprep.subr.bf16.mxu0 %v5024_v1  ;;  %6562 = vmatprep.subr.bf16.mxu1 %v5026_v15  ;;  %v5122_v1 = vld [vmem:[#allocation5 + $0x1a38] sm:$0xff]  ;;  %v5119_v15 = vld [vmem:[#allocation5 + $0x1a20] sm:$0xff] }
 0xd04   :  { %6235 = vmatpush1.bf16.msra.mxu0 %v5023_v59  ;;  %6563 = vmatpush1.bf16.msra.mxu1 %v5025_v28  ;;  %v5121_v59 = vld [vmem:[#allocation5 + $0x1a30] sm:$0xff]  ;;  %v5128_v28 = vld [vmem:[#allocation5 + $0x1a68] sm:$0xff] }
 0xd05   :  { %6236 = vmatprep.subr.bf16.mxu0 %v5032_v16  ;;  %6564 = vmatprep.subr.bf16.mxu1 %v5034_v20  ;;  %v5130_v16 = vld [vmem:[#allocation5 + $0x1a78] sm:$0xff]  ;;  %v5127_v20 = vld [vmem:[#allocation5 + $0x1a60] sm:$0xff] }
 0xd08   :  { %6237 = vmatpush1.bf16.msra.mxu0 %v5031_v61  ;;  %6565 = vmatpush1.bf16.msra.mxu1 %v5033_v22  ;;  %v5129_v61 = vld [vmem:[#allocation5 + $0x1a70] sm:$0xff]  ;;  %v5136_v22 = vld [vmem:[#allocation5 + $0x1aa8] sm:$0xff] }
 0xd09   :  { %6238 = vmatprep.subr.bf16.mxu0 %v5040_v39  ;;  %6566 = vmatprep.subr.bf16.mxu1 %v5042_v8  ;;  %v5138_v39 = vld [vmem:[#allocation5 + $0x1ab8] sm:$0xff]  ;;  %v5135_v8 = vld [vmem:[#allocation5 + $0x1aa0] sm:$0xff] }
 0xd0c   :  { %6239 = vmatpush1.bf16.msra.mxu0 %v5039_v23  ;;  %6567 = vmatpush1.bf16.msra.mxu1 %v5041_v24  ;;  %v5137_v23 = vld [vmem:[#allocation5 + $0x1ab0] sm:$0xff]  ;;  %v5144_v24 = vld [vmem:[#allocation5 + $0x1ae8] sm:$0xff] }
 0xd0d   :  { %6240 = vmatprep.subr.bf16.mxu0 %v5048_v58  ;;  %6568 = vmatprep.subr.bf16.mxu1 %v5050_v5  ;;  %v5146_v58 = vld [vmem:[#allocation5 + $0x1af8] sm:$0xff]  ;;  %v5143_v5 = vld [vmem:[#allocation5 + $0x1ae0] sm:$0xff] }
 0xd10   :  { %6241 = vmatpush1.bf16.msra.mxu0 %v5047_v25  ;;  %6569 = vmatpush1.bf16.msra.mxu1 %v5049_v26  ;;  %v5145_v25 = vld [vmem:[#allocation5 + $0x1af0] sm:$0xff]  ;;  %v5152_v26 = vld [vmem:[#allocation5 + $0x1b28] sm:$0xff] }
 0xd11   :  { %6251 = vmatprep.subr.bf16.mxu0 %v5056_v27  ;;  %6579 = vmatprep.subr.bf16.mxu1 %v5058_v19  ;;  %v5154_v27 = vld [vmem:[#allocation5 + $0x1b38] sm:$0xff]  ;;  %v5151_v19 = vld [vmem:[#allocation5 + $0x1b20] sm:$0xff] }
 0xd13   :  { %6243 = vmatmul.mubr.bf16.vlgmr.msra.gmra.mrb[36].mxu0 %v9384_v17  ;;  %6571 = vmatmul.mubr.bf16.vlgmr.msra.gmra.mrb[36].mxu1 %v9384_v17  ;;  %v5082_v17 = vld [vmem:[#allocation5 + $0x18f8] sm:$0xff] }
 0xd14   :  { %6252 = vmatpush1.bf16.msra.mxu0 %v5055_v40  ;;  %6580 = vmatpush1.bf16.msra.mxu1 %v5057_v11  ;;  %v5153_v40 = vld [vmem:[#allocation5 + $0x1b30] sm:$0xff]  ;;  %v5160_v11 = vld [vmem:[#allocation5 + $0x1b68] sm:$0xff] }
 0xd15   :  { %6253 = vmatprep.subr.bf16.mxu0 %v5064_v32  ;;  %6581 = vmatprep.subr.bf16.mxu1 %v5066_v44  ;;  %v5162_v32 = vld [vmem:[#allocation5 + $0x1b78] sm:$0xff]  ;;  %v5159_v44 = vld [vmem:[#allocation5 + $0x1b60] sm:$0xff] }
 0xd16   :  { %6283 = vmatprep.mubr.bf16.mxu0 %v9404_v41  ;;  %6611 = vmatprep.mubr.bf16.mxu1 %v9404_v41  ;;  %v5087_v41 = vld [vmem:[#allocation5 + $0x1920] sm:$0xff] }
 0xd18   :  { %6254 = vmatpush1.bf16.msra.mxu0 %v5063_v2  ;;  %6582 = vmatpush1.bf16.msra.mxu1 %v5065_v45  ;;  %v5161_v2 = vld [vmem:[#allocation5 + $0x1b70] sm:$0xff]  ;;  %v5168_v45 = vld [vmem:[#allocation5 + $0x1ba8] sm:$0xff] }
 0xd19   :  { %6255 = vmatprep.subr.bf16.mxu0 %v5072_v46  ;;  %6583 = vmatprep.subr.bf16.mxu1 %v5074_v47  ;;  %v5170_v46 = vld [vmem:[#allocation5 + $0x1bb8] sm:$0xff]  ;;  %v5167_v47 = vld [vmem:[#allocation5 + $0x1ba0] sm:$0xff] }
 0xd1c   :  { %6256 = vmatpush1.bf16.msra.mxu0 %v5071_v29  ;;  %6584 = vmatpush1.bf16.msra.mxu1 %v5073_v48  ;;  %v5169_v29 = vld [vmem:[#allocation5 + $0x1bb0] sm:$0xff]  ;;  %v5176_v48 = vld [vmem:[#allocation5 + $0x1be8] sm:$0xff] }
 0xd1d   :  { %6257 = vmatprep.subr.bf16.mxu0 %v5080_v49  ;;  %6585 = vmatprep.subr.bf16.mxu1 %v5082_v17  ;;  %v5178_v49 = vld [vmem:[#allocation5 + $0x1bf8] sm:$0xff]  ;;  %v5175_v17 = vld [vmem:[#allocation5 + $0x1be0] sm:$0xff] }
 0xd20   :  { %6258 = vmatpush1.bf16.msra.mxu0 %v5079_v50  ;;  %6586 = vmatpush1.bf16.msra.mxu1 %v5081_v51  ;;  %v5177_v50 = vld [vmem:[#allocation5 + $0x1bf0] sm:$0xff]  ;;  %v5184_v51 = vld [vmem:[#allocation5 + $0x1c28] sm:$0xff] }
 0xd21   :  { %6259 = vmatprep.subr.bf16.mxu0 %v5088_v53  ;;  %6587 = vmatprep.subr.bf16.mxu1 %v5090_v38  ;;  %v5186_v53 = vld [vmem:[#allocation5 + $0x1c38] sm:$0xff]  ;;  %v5183_v38 = vld [vmem:[#allocation5 + $0x1c20] sm:$0xff] }
 0xd24   :  { %6260 = vmatpush1.bf16.msra.mxu0 %v5087_v41  ;;  %6588 = vmatpush1.bf16.msra.mxu1 %v5089_v54  ;;  %v5185_v41 = vld [vmem:[#allocation5 + $0x1c30] sm:$0xff]  ;;  %v5192_v54 = vld [vmem:[#allocation5 + $0x1c68] sm:$0xff] }
 0xd25   :  { %6261 = vmatprep.subr.bf16.mxu0 %v5096_v55  ;;  %6589 = vmatprep.subr.bf16.mxu1 %v5098_v56  ;;  %v5194_v55 = vld [vmem:[#allocation5 + $0x1c78] sm:$0xff]  ;;  %v5191_v56 = vld [vmem:[#allocation5 + $0x1c60] sm:$0xff] }
 0xd28   :  { %6262 = vmatpush1.bf16.msra.mxu0 %v5095_v31  ;;  %6590 = vmatpush1.bf16.msra.mxu1 %v5097_v63  ;;  %v5193_v31 = vld [vmem:[#allocation5 + $0x1c70] sm:$0xff]  ;;  %v5200_v63 = vld [vmem:[#allocation5 + $0x1ca8] sm:$0xff] }
 0xd29   :  { %6263 = vmatprep.subr.bf16.mxu0 %v5104_v12  ;;  %6591 = vmatprep.subr.bf16.mxu1 %v5106_v60  ;;  %v5202_v12 = vld [vmem:[#allocation5 + $0x1cb8] sm:$0xff]  ;;  %v5199_v60 = vld [vmem:[#allocation5 + $0x1ca0] sm:$0xff] }
 0xd2c   :  { %6264 = vmatpush1.bf16.msra.mxu0 %v5103_v30  ;;  %6592 = vmatpush1.bf16.msra.mxu1 %v5105_v13  ;;  %v5201_v30 = vld [vmem:[#allocation5 + $0x1cb0] sm:$0xff]  ;;  %v5208_v13 = vld [vmem:[#allocation5 + $0x1ce8] sm:$0xff] }
 0xd2d   :  { %6265 = vmatprep.subr.bf16.mxu0 %v5112_v52  ;;  %6593 = vmatprep.subr.bf16.mxu1 %v5114_v14  ;;  %v5207_v52 = vld [vmem:[#allocation5 + $0x1ce0] sm:$0xff]  ;;  %v5209_v14 = vld [vmem:[#allocation5 + $0x1cf0] sm:$0xff] }
 0xd30   :  { %6266 = vmatpush1.bf16.msra.mxu0 %v5111_v21  ;;  %6594 = vmatpush1.bf16.msra.mxu1 %v5113_v18  ;;  %v5216_v21 = vld [vmem:[#allocation5 + $0x1d28] sm:$0xff]  ;;  %v5218_v18 = vld [vmem:[#allocation5 + $0x1d38] sm:$0xff] }
 0xd31   :  { %6267 = vmatprep.subr.bf16.mxu0 %v5120_v0  ;;  %6595 = vmatprep.subr.bf16.mxu1 %v5122_v1  ;;  %v5217_v0 = vld [vmem:[#allocation5 + $0x1d30] sm:$0xff]  ;;  %v5224_v1 = vld [vmem:[#allocation5 + $0x1d68] sm:$0xff] }
 0xd34   :  { %6268 = vmatpush1.bf16.msra.mxu0 %v5119_v15  ;;  %6596 = vmatpush1.bf16.msra.mxu1 %v5121_v59  ;;  %v5226_v15 = vld [vmem:[#allocation5 + $0x1d78] sm:$0xff]  ;;  %v5223_v59 = vld [vmem:[#allocation5 + $0x1d60] sm:$0xff] }
 0xd35   :  { %6269 = vmatprep.subr.bf16.mxu0 %v5128_v28  ;;  %6597 = vmatprep.subr.bf16.mxu1 %v5130_v16  ;;  %v5225_v28 = vld [vmem:[#allocation5 + $0x1d70] sm:$0xff]  ;;  %v5232_v16 = vld [vmem:[#allocation5 + $0x1da8] sm:$0xff] }
 0xd38   :  { %6270 = vmatpush1.bf16.msra.mxu0 %v5127_v20  ;;  %6598 = vmatpush1.bf16.msra.mxu1 %v5129_v61  ;;  %v5234_v20 = vld [vmem:[#allocation5 + $0x1db8] sm:$0xff]  ;;  %v5231_v61 = vld [vmem:[#allocation5 + $0x1da0] sm:$0xff] }
 0xd39   :  { %6271 = vmatprep.subr.bf16.mxu0 %v5136_v22  ;;  %6599 = vmatprep.subr.bf16.mxu1 %v5138_v39  ;;  %v5233_v22 = vld [vmem:[#allocation5 + $0x1db0] sm:$0xff]  ;;  %v5240_v39 = vld [vmem:[#allocation5 + $0x1de8] sm:$0xff] }
 0xd3c   :  { %6272 = vmatpush1.bf16.msra.mxu0 %v5135_v8  ;;  %6600 = vmatpush1.bf16.msra.mxu1 %v5137_v23  ;;  %v5242_v8 = vld [vmem:[#allocation5 + $0x1df8] sm:$0xff]  ;;  %v5239_v23 = vld [vmem:[#allocation5 + $0x1de0] sm:$0xff] }
 0xd3d   :  { %6273 = vmatprep.subr.bf16.mxu0 %v5144_v24  ;;  %6601 = vmatprep.subr.bf16.mxu1 %v5146_v58  ;;  %v5241_v24 = vld [vmem:[#allocation5 + $0x1df0] sm:$0xff]  ;;  %v5248_v58 = vld [vmem:[#allocation5 + $0x1e28] sm:$0xff] }
 0xd40   :  { %6274 = vmatpush1.bf16.msra.mxu0 %v5143_v5  ;;  %6602 = vmatpush1.bf16.msra.mxu1 %v5145_v25  ;;  %v5250_v5 = vld [vmem:[#allocation5 + $0x1e38] sm:$0xff]  ;;  %v5247_v25 = vld [vmem:[#allocation5 + $0x1e20] sm:$0xff] }
 0xd41   :  { %6275 = vmatprep.subr.bf16.mxu0 %v5152_v26  ;;  %6603 = vmatprep.subr.bf16.mxu1 %v5154_v27  ;;  %v5249_v26 = vld [vmem:[#allocation5 + $0x1e30] sm:$0xff]  ;;  %v5256_v27 = vld [vmem:[#allocation5 + $0x1e68] sm:$0xff] }
 0xd44   :  { %6276 = vmatpush1.bf16.msra.mxu0 %v5151_v19  ;;  %6604 = vmatpush1.bf16.msra.mxu1 %v5153_v40  ;;  %v5258_v19 = vld [vmem:[#allocation5 + $0x1e78] sm:$0xff]  ;;  %v5255_v40 = vld [vmem:[#allocation5 + $0x1e60] sm:$0xff] }
 0xd45   :  { %6277 = vmatprep.subr.bf16.mxu0 %v5160_v11  ;;  %6605 = vmatprep.subr.bf16.mxu1 %v5162_v32  ;;  %v5257_v11 = vld [vmem:[#allocation5 + $0x1e70] sm:$0xff]  ;;  %v5264_v32 = vld [vmem:[#allocation5 + $0x1ea8] sm:$0xff] }
 0xd48   :  { %6278 = vmatpush1.bf16.msra.mxu0 %v5159_v44  ;;  %6606 = vmatpush1.bf16.msra.mxu1 %v5161_v2  ;;  %v5266_v44 = vld [vmem:[#allocation5 + $0x1eb8] sm:$0xff]  ;;  %v5263_v2 = vld [vmem:[#allocation5 + $0x1ea0] sm:$0xff] }
 0xd49   :  { %6279 = vmatprep.subr.bf16.mxu0 %v5168_v45  ;;  %6607 = vmatprep.subr.bf16.mxu1 %v5170_v46  ;;  %v5265_v45 = vld [vmem:[#allocation5 + $0x1eb0] sm:$0xff]  ;;  %v5272_v46 = vld [vmem:[#allocation5 + $0x1ee8] sm:$0xff] }
 0xd4c   :  { %6280 = vmatpush1.bf16.msra.mxu0 %v5167_v47  ;;  %6608 = vmatpush1.bf16.msra.mxu1 %v5169_v29  ;;  %v5274_v47 = vld [vmem:[#allocation5 + $0x1ef8] sm:$0xff]  ;;  %v5271_v29 = vld [vmem:[#allocation5 + $0x1ee0] sm:$0xff] }
 0xd4d   :  { %6281 = vmatprep.subr.bf16.mxu0 %v5176_v48  ;;  %6609 = vmatprep.subr.bf16.mxu1 %v5178_v49  ;;  %v5273_v48 = vld [vmem:[#allocation5 + $0x1ef0] sm:$0xff]  ;;  %v5280_v49 = vld [vmem:[#allocation5 + $0x1f28] sm:$0xff] }
 0xd50   :  { %6282 = vmatpush1.bf16.msra.mxu0 %v5175_v17  ;;  %6610 = vmatpush1.bf16.msra.mxu1 %v5177_v50  ;;  %v5282_v17 = vld [vmem:[#allocation5 + $0x1f38] sm:$0xff]  ;;  %v5279_v50 = vld [vmem:[#allocation5 + $0x1f20] sm:$0xff] }
 0xd51   :  { %6292 = vmatprep.subr.bf16.mxu0 %v5184_v51  ;;  %6620 = vmatprep.subr.bf16.mxu1 %v5186_v53  ;;  %v5281_v51 = vld [vmem:[#allocation5 + $0x1f30] sm:$0xff]  ;;  %v5288_v53 = vld [vmem:[#allocation5 + $0x1f68] sm:$0xff] }
 0xd53   :  { %6284 = vmatmul.mubr.bf16.vlgmr.msra.gmra.mrb[36].mxu0 %v9400_v62  ;;  %6612 = vmatmul.mubr.bf16.vlgmr.msra.gmra.mrb[36].mxu1 %v9400_v62  ;;  %v5210_v62 = vld [vmem:[#allocation5 + $0x1cf8] sm:$0xff] }
 0xd54   :  { %6293 = vmatpush1.bf16.msra.mxu0 %v5183_v38  ;;  %6621 = vmatpush1.bf16.msra.mxu1 %v5185_v41  ;;  %v5290_v38 = vld [vmem:[#allocation5 + $0x1f78] sm:$0xff]  ;;  %v5287_v41 = vld [vmem:[#allocation5 + $0x1f60] sm:$0xff] }
 0xd55   :  { %6294 = vmatprep.subr.bf16.mxu0 %v5192_v54  ;;  %6622 = vmatprep.subr.bf16.mxu1 %v5194_v55  ;;  %v5289_v54 = vld [vmem:[#allocation5 + $0x1f70] sm:$0xff]  ;;  %v5296_v55 = vld [vmem:[#allocation5 + $0x1fa8] sm:$0xff] }
 0xd56   :  { %6324 = vmatprep.mubr.bf16.mxu0 %v9406_v43  ;;  %6652 = vmatprep.mubr.bf16.mxu1 %v9406_v43  ;;  %v5215_v43 = vld [vmem:[#allocation5 + $0x1d20] sm:$0xff] }
 0xd58   :  { %6295 = vmatpush1.bf16.msra.mxu0 %v5191_v56  ;;  %6623 = vmatpush1.bf16.msra.mxu1 %v5193_v31  ;;  %v5298_v56 = vld [vmem:[#allocation5 + $0x1fb8] sm:$0xff]  ;;  %v5295_v31 = vld [vmem:[#allocation5 + $0x1fa0] sm:$0xff] }
 0xd59   :  { %6296 = vmatprep.subr.bf16.mxu0 %v5200_v63  ;;  %6624 = vmatprep.subr.bf16.mxu1 %v5202_v12  ;;  %v5297_v63 = vld [vmem:[#allocation5 + $0x1fb0] sm:$0xff]  ;;  %v5304_v12 = vld [vmem:[#allocation5 + $0x1fe8] sm:$0xff] }
 0xd5c   :  { %6297 = vmatpush1.bf16.msra.mxu0 %v5199_v60  ;;  %6625 = vmatpush1.bf16.msra.mxu1 %v5201_v30  ;;  %v5306_v60 = vld [vmem:[#allocation5 + $0x1ff8] sm:$0xff]  ;;  %v5303_v30 = vld [vmem:[#allocation5 + $0x1fe0] sm:$0xff] }
 0xd5d   :  { %6298 = vmatprep.subr.bf16.mxu0 %v5208_v13  ;;  %6626 = vmatprep.subr.bf16.mxu1 %v5210_v62  ;;  %v5305_v13 = vld [vmem:[#allocation5 + $0x1ff0] sm:$0xff]  ;;  %v8685_v62 = vld [vmem:[#allocation17] sm:$0xff] }
 0xd60   :  { %6299 = vmatpush1.bf16.msra.mxu0 %v5207_v52  ;;  %6627 = vmatpush1.bf16.msra.mxu1 %v5209_v14  ;;  %v5328_v52 = vrot.slane %v8685_v62, %v9200_v34  ;;  %v5336_v14 = vrot.slane %v8685_v62, %v9202_v35 }
 0xd61   :  { %6300 = vmatprep.subr.bf16.mxu0 %v5216_v21  ;;  %6628 = vmatprep.subr.bf16.mxu1 %v5218_v18  ;;  %v5332_v21 = vrot.slane %v8685_v62, %v9204_v36  ;;  %v5340_v18 = vrot.slane %v8685_v62, %v9206_v37 }
 0xd64   :  { %6301 = vmatpush1.bf16.msra.mxu0 %v5215_v43  ;;  %6629 = vmatpush1.bf16.msra.mxu1 %v5217_v0 }
 0xd65   :  { %6302 = vmatprep.subr.bf16.mxu0 %v5224_v1  ;;  %6630 = vmatprep.subr.bf16.mxu1 %v5226_v15 }
 0xd68   :  { %6303 = vmatpush1.bf16.msra.mxu0 %v5223_v59  ;;  %6631 = vmatpush1.bf16.msra.mxu1 %v5225_v28 }
 0xd69   :  { %6304 = vmatprep.subr.bf16.mxu0 %v5232_v16  ;;  %6632 = vmatprep.subr.bf16.mxu1 %v5234_v20 }
 0xd6c   :  { %6305 = vmatpush1.bf16.msra.mxu0 %v5231_v61  ;;  %6633 = vmatpush1.bf16.msra.mxu1 %v5233_v22 }
 0xd6d   :  { %6306 = vmatprep.subr.bf16.mxu0 %v5240_v39  ;;  %6634 = vmatprep.subr.bf16.mxu1 %v5242_v8 }
 0xd70   :  { %6307 = vmatpush1.bf16.msra.mxu0 %v5239_v23  ;;  %6635 = vmatpush1.bf16.msra.mxu1 %v5241_v24 }
 0xd71   :  { %6308 = vmatprep.subr.bf16.mxu0 %v5248_v58  ;;  %6636 = vmatprep.subr.bf16.mxu1 %v5250_v5 }
 0xd74   :  { %6309 = vmatpush1.bf16.msra.mxu0 %v5247_v25  ;;  %6637 = vmatpush1.bf16.msra.mxu1 %v5249_v26 }
 0xd75   :  { %6310 = vmatprep.subr.bf16.mxu0 %v5256_v27  ;;  %6638 = vmatprep.subr.bf16.mxu1 %v5258_v19 }
 0xd78   :  { %6311 = vmatpush1.bf16.msra.mxu0 %v5255_v40  ;;  %6639 = vmatpush1.bf16.msra.mxu1 %v5257_v11 }
 0xd79   :  { %6312 = vmatprep.subr.bf16.mxu0 %v5264_v32  ;;  %6640 = vmatprep.subr.bf16.mxu1 %v5266_v44 }
 0xd7c   :  { %6313 = vmatpush1.bf16.msra.mxu0 %v5263_v2  ;;  %6641 = vmatpush1.bf16.msra.mxu1 %v5265_v45 }
 0xd7d   :  { %6314 = vmatprep.subr.bf16.mxu0 %v5272_v46  ;;  %6642 = vmatprep.subr.bf16.mxu1 %v5274_v47 }
 0xd80   :  { %6315 = vmatpush1.bf16.msra.mxu0 %v5271_v29  ;;  %6643 = vmatpush1.bf16.msra.mxu1 %v5273_v48 }
 0xd81   :  { %6316 = vmatprep.subr.bf16.mxu0 %v5280_v49  ;;  %6644 = vmatprep.subr.bf16.mxu1 %v5282_v17 }
 0xd84   :  { %6317 = vmatpush1.bf16.msra.mxu0 %v5279_v50  ;;  %6645 = vmatpush1.bf16.msra.mxu1 %v5281_v51 }
 0xd85   :  { %6318 = vmatprep.subr.bf16.mxu0 %v5288_v53  ;;  %6646 = vmatprep.subr.bf16.mxu1 %v5290_v38 }
 0xd88   :  { %6319 = vmatpush1.bf16.msra.mxu0 %v5287_v41  ;;  %6647 = vmatpush1.bf16.msra.mxu1 %v5289_v54 }
 0xd89   :  { %6320 = vmatprep.subr.bf16.mxu0 %v5296_v55  ;;  %6648 = vmatprep.subr.bf16.mxu1 %v5298_v56 }
 0xd8c   :  { %6321 = vmatpush1.bf16.msra.mxu0 %v5295_v31  ;;  %6649 = vmatpush1.bf16.msra.mxu1 %v5297_v63 }
 0xd8d   :  { %6322 = vmatprep.subr.bf16.mxu0 %v5304_v12  ;;  %6650 = vmatprep.subr.bf16.mxu1 %v5306_v60 }
 0xd90   :  { %6323 = vmatpush1.bf16.msra.mxu0 %v5303_v30  ;;  %6651 = vmatpush1.bf16.msra.mxu1 %v5305_v13 }
 0xd93   :  { %6325 = vmatmul.mubr.bf16.vlgmr.msra.gmra.mrb[36].mxu0 %v9402_v42  ;;  %6653 = vmatmul.mubr.bf16.vlgmr.msra.gmra.mrb[36].mxu1 %v9402_v42 }
 0xe66   :  { %v6326_v43 = vpop.f32.mrb[36].mxu0  ;;  %v6654_v0 = vpop.f32.mrb[36].mxu1 }
 0xe67   :  { %v8334_v1 = vadd.f32 %v6326_v43, %v5328_v52  ;;  %v8336_v15 = vadd.f32 %v6654_v0, %v5336_v14  ;;  %v6328_v59 = vpop.f32.mrb[37].mxu0  ;;  %v6656_v28 = vpop.f32.mrb[37].mxu1 }
 0xe68   :  { %v8335_v16 = vadd.f32 %v6328_v59, %v5332_v21  ;;  %v8337_v20 = vadd.f32 %v6656_v28, %v5340_v18  ;;  %v6330_v61 = vpop.f32.mrb[38].mxu0  ;;  %v6658_v22 = vpop.f32.mrb[38].mxu1 }
 0xe69   :  { %v6665_v42 = vmax.f32 %v8334_v1, 0.0  ;;  %v6667_v39 = vmax.f32 %v8336_v15, 0.0  ;;  %v6331_v8 = vpop.f32.mrb[39].mxu0  ;;  %v6659_v23 = vpop.f32.mrb[39].mxu1 }
 0xe6a   :  { %v6666_v24 = vmax.f32 %v8335_v16, 0.0  ;;  %v6668_v58 = vmax.f32 %v8337_v20, 0.0 }
 0xe6b   :  { %v9488_v5 = vpack.c.bf16 %v6665_v42, %v6665_v42  ;;  %v9490_v25 = vpack.c.bf16 %v6667_v39, %v6667_v39 }
 0xe6c   :  { %v9492_v26 = vpack.c.bf16 %v6666_v24, %v6666_v24  ;;  %v9494_v27 = vpack.c.bf16 %v6668_v58, %v6668_v58 }
 0xe6d   :  { %8900 = dma.done.wait [#allocation8 + $0x4], 65536 }
 0xe6e   :  { %8901 = vsyncadd [#allocation8 + $0x4], 4294901760  ;;  %7265 = vmatprep.mubr.bf16.mxu0 %v9462_v3  ;;  %7429 = vmatprep.mubr.bf16.mxu1 %v9462_v3  ;;  %v6680_v19 = vld [vmem:[#allocation6 + $0x8] sm:$0xff]  ;;  %v6682_v40 = vld [vmem:[#allocation6 + $0x18] sm:$0xff] }
 0xe6f   :  { %v6679_v11 = vld [vmem:[#allocation6] sm:$0xff]  ;;  %7233 = vmatprep.subr.bf16.mxu0 %v6680_v19  ;;  %7397 = vmatprep.subr.bf16.mxu1 %v6682_v40  ;;  %v6681_v32 = vld [vmem:[#allocation6 + $0x10] sm:$0xff]  ;;  %v6688_v44 = vld [vmem:[#allocation6 + $0x48] sm:$0xff] }
 0xe70   :  { %v6690_v2 = vld [vmem:[#allocation6 + $0x58] sm:$0xff]  ;;  %7234 = vmatpush1.bf16.msra.mxu0 %v6679_v11  ;;  %7398 = vmatpush1.bf16.msra.mxu1 %v6681_v32  ;;  %v6687_v45 = vld [vmem:[#allocation6 + $0x40] sm:$0xff]  ;;  %v6689_v46 = vld [vmem:[#allocation6 + $0x50] sm:$0xff] }
 0xe71   :  { %7235 = vmatprep.subr.bf16.mxu0 %v6688_v44  ;;  %7399 = vmatprep.subr.bf16.mxu1 %v6690_v2  ;;  %v6696_v47 = vld [vmem:[#allocation6 + $0x88] sm:$0xff]  ;;  %v6698_v29 = vld [vmem:[#allocation6 + $0x98] sm:$0xff]  ;;  %v6695_v48 = vld [vmem:[#allocation6 + $0x80] sm:$0xff] }
 0xe72   :  { %v6697_v49 = vld [vmem:[#allocation6 + $0x90] sm:$0xff]  ;;  %v6704_v17 = vld [vmem:[#allocation6 + $0xc8] sm:$0xff]  ;;  %v6706_v50 = vld [vmem:[#allocation6 + $0xd8] sm:$0xff] }
 0xe73   :  { %v6703_v51 = vld [vmem:[#allocation6 + $0xc0] sm:$0xff]  ;;  %v6705_v53 = vld [vmem:[#allocation6 + $0xd0] sm:$0xff]  ;;  %v6712_v38 = vld [vmem:[#allocation6 + $0x108] sm:$0xff] }
 0xe74   :  { %7236 = vmatpush1.bf16.msra.mxu0 %v6687_v45  ;;  %7400 = vmatpush1.bf16.msra.mxu1 %v6689_v46  ;;  %v6714_v41 = vld [vmem:[#allocation6 + $0x118] sm:$0xff]  ;;  %v6711_v54 = vld [vmem:[#allocation6 + $0x100] sm:$0xff]  ;;  %v6713_v55 = vld [vmem:[#allocation6 + $0x110] sm:$0xff] }
 0xe75   :  { %7237 = vmatprep.subr.bf16.mxu0 %v6696_v47  ;;  %7401 = vmatprep.subr.bf16.mxu1 %v6698_v29  ;;  %v6720_v56 = vld [vmem:[#allocation6 + $0x148] sm:$0xff]  ;;  %v6722_v31 = vld [vmem:[#allocation6 + $0x158] sm:$0xff]  ;;  %v6719_v63 = vld [vmem:[#allocation6 + $0x140] sm:$0xff] }
 0xe76   :  { %v6721_v12 = vld [vmem:[#allocation6 + $0x150] sm:$0xff]  ;;  %v6728_v60 = vld [vmem:[#allocation6 + $0x188] sm:$0xff]  ;;  %v6730_v30 = vld [vmem:[#allocation6 + $0x198] sm:$0xff] }
 0xe77   :  { %v6727_v13 = vld [vmem:[#allocation6 + $0x180] sm:$0xff]  ;;  %v6729_v62 = vld [vmem:[#allocation6 + $0x190] sm:$0xff]  ;;  %v6736_v52 = vld [vmem:[#allocation6 + $0x1c8] sm:$0xff] }
 0xe78   :  { %7238 = vmatpush1.bf16.msra.mxu0 %v6695_v48  ;;  %7402 = vmatpush1.bf16.msra.mxu1 %v6697_v49  ;;  %v6738_v14 = vld [vmem:[#allocation6 + $0x1d8] sm:$0xff]  ;;  %v6735_v21 = vld [vmem:[#allocation6 + $0x1c0] sm:$0xff]  ;;  %v6737_v18 = vld [vmem:[#allocation6 + $0x1d0] sm:$0xff] }
 0xe79   :  { %7239 = vmatprep.subr.bf16.mxu0 %v6704_v17  ;;  %7403 = vmatprep.subr.bf16.mxu1 %v6706_v50  ;;  %v6744_v43 = vld [vmem:[#allocation6 + $0x208] sm:$0xff]  ;;  %v6746_v0 = vld [vmem:[#allocation6 + $0x218] sm:$0xff]  ;;  %v6743_v1 = vld [vmem:[#allocation6 + $0x200] sm:$0xff] }
 0xe7a   :  { %v6745_v15 = vld [vmem:[#allocation6 + $0x210] sm:$0xff]  ;;  %v6752_v59 = vld [vmem:[#allocation6 + $0x248] sm:$0xff]  ;;  %v6754_v28 = vld [vmem:[#allocation6 + $0x258] sm:$0xff] }
 0xe7b   :  { %v6751_v16 = vld [vmem:[#allocation6 + $0x240] sm:$0xff]  ;;  %v6753_v20 = vld [vmem:[#allocation6 + $0x250] sm:$0xff]  ;;  %v6760_v61 = vld [vmem:[#allocation6 + $0x288] sm:$0xff] }
 0xe7c   :  { %7240 = vmatpush1.bf16.msra.mxu0 %v6703_v51  ;;  %7404 = vmatpush1.bf16.msra.mxu1 %v6705_v53  ;;  %v6762_v22 = vld [vmem:[#allocation6 + $0x298] sm:$0xff]  ;;  %v6759_v42 = vld [vmem:[#allocation6 + $0x280] sm:$0xff]  ;;  %v6761_v39 = vld [vmem:[#allocation6 + $0x290] sm:$0xff] }
 0xe7d   :  { %7241 = vmatprep.subr.bf16.mxu0 %v6712_v38  ;;  %7405 = vmatprep.subr.bf16.mxu1 %v6714_v41  ;;  %v6768_v8 = vld [vmem:[#allocation6 + $0x2c8] sm:$0xff]  ;;  %v6770_v23 = vld [vmem:[#allocation6 + $0x2d8] sm:$0xff]  ;;  %v6767_v24 = vld [vmem:[#allocation6 + $0x2c0] sm:$0xff] }
 0xe7e   :  { %v6769_v58 = vld [vmem:[#allocation6 + $0x2d0] sm:$0xff]  ;;  %v6776_v19 = vld [vmem:[#allocation6 + $0x308] sm:$0xff]  ;;  %v6778_v40 = vld [vmem:[#allocation6 + $0x318] sm:$0xff] }
 0xe7f   :  { %v6775_v11 = vld [vmem:[#allocation6 + $0x300] sm:$0xff]  ;;  %v6777_v32 = vld [vmem:[#allocation6 + $0x310] sm:$0xff]  ;;  %v6784_v44 = vld [vmem:[#allocation6 + $0x348] sm:$0xff] }
 0xe80   :  { %7242 = vmatpush1.bf16.msra.mxu0 %v6711_v54  ;;  %7406 = vmatpush1.bf16.msra.mxu1 %v6713_v55  ;;  %v6786_v2 = vld [vmem:[#allocation6 + $0x358] sm:$0xff]  ;;  %v6783_v45 = vld [vmem:[#allocation6 + $0x340] sm:$0xff]  ;;  %v6785_v46 = vld [vmem:[#allocation6 + $0x350] sm:$0xff] }
 0xe81   :  { %7243 = vmatprep.subr.bf16.mxu0 %v6720_v56  ;;  %7407 = vmatprep.subr.bf16.mxu1 %v6722_v31  ;;  %v6792_v47 = vld [vmem:[#allocation6 + $0x388] sm:$0xff]  ;;  %v6794_v29 = vld [vmem:[#allocation6 + $0x398] sm:$0xff]  ;;  %v6791_v48 = vld [vmem:[#allocation6 + $0x380] sm:$0xff] }
 0xe82   :  { %v6793_v49 = vld [vmem:[#allocation6 + $0x390] sm:$0xff]  ;;  %v6800_v17 = vld [vmem:[#allocation6 + $0x3c8] sm:$0xff]  ;;  %v6802_v50 = vld [vmem:[#allocation6 + $0x3d8] sm:$0xff] }
 0xe83   :  { %v6799_v51 = vld [vmem:[#allocation6 + $0x3c0] sm:$0xff]  ;;  %v6801_v53 = vld [vmem:[#allocation6 + $0x3d0] sm:$0xff]  ;;  %v6808_v38 = vld [vmem:[#allocation6 + $0x408] sm:$0xff] }
 0xe84   :  { %7244 = vmatpush1.bf16.msra.mxu0 %v6719_v63  ;;  %7408 = vmatpush1.bf16.msra.mxu1 %v6721_v12  ;;  %v6810_v41 = vld [vmem:[#allocation6 + $0x418] sm:$0xff]  ;;  %v6807_v54 = vld [vmem:[#allocation6 + $0x400] sm:$0xff]  ;;  %v6809_v55 = vld [vmem:[#allocation6 + $0x410] sm:$0xff] }
 0xe85   :  { %7245 = vmatprep.subr.bf16.mxu0 %v6728_v60  ;;  %7409 = vmatprep.subr.bf16.mxu1 %v6730_v30  ;;  %v6816_v56 = vld [vmem:[#allocation6 + $0x448] sm:$0xff]  ;;  %v6818_v31 = vld [vmem:[#allocation6 + $0x458] sm:$0xff]  ;;  %v6815_v63 = vld [vmem:[#allocation6 + $0x440] sm:$0xff] }
 0xe86   :  { %v6817_v12 = vld [vmem:[#allocation6 + $0x450] sm:$0xff]  ;;  %v6824_v60 = vld [vmem:[#allocation6 + $0x488] sm:$0xff]  ;;  %v6826_v30 = vld [vmem:[#allocation6 + $0x498] sm:$0xff] }
 0xe88   :  { %7246 = vmatpush1.bf16.msra.mxu0 %v6727_v13  ;;  %7410 = vmatpush1.bf16.msra.mxu1 %v6729_v62  ;;  %v6823_v13 = vld [vmem:[#allocation6 + $0x480] sm:$0xff]  ;;  %v6825_v62 = vld [vmem:[#allocation6 + $0x490] sm:$0xff] }
 0xe89   :  { %7247 = vmatprep.subr.bf16.mxu0 %v6736_v52  ;;  %7411 = vmatprep.subr.bf16.mxu1 %v6738_v14  ;;  %v6832_v52 = vld [vmem:[#allocation6 + $0x4c8] sm:$0xff]  ;;  %v6834_v14 = vld [vmem:[#allocation6 + $0x4d8] sm:$0xff] }
 0xe8c   :  { %7248 = vmatpush1.bf16.msra.mxu0 %v6735_v21  ;;  %7412 = vmatpush1.bf16.msra.mxu1 %v6737_v18  ;;  %v6831_v21 = vld [vmem:[#allocation6 + $0x4c0] sm:$0xff]  ;;  %v6833_v18 = vld [vmem:[#allocation6 + $0x4d0] sm:$0xff] }
 0xe8d   :  { %7249 = vmatprep.subr.bf16.mxu0 %v6744_v43  ;;  %7413 = vmatprep.subr.bf16.mxu1 %v6746_v0  ;;  %v6840_v43 = vld [vmem:[#allocation6 + $0x508] sm:$0xff]  ;;  %v6842_v0 = vld [vmem:[#allocation6 + $0x518] sm:$0xff] }
 0xe90   :  { %7250 = vmatpush1.bf16.msra.mxu0 %v6743_v1  ;;  %7414 = vmatpush1.bf16.msra.mxu1 %v6745_v15  ;;  %v6839_v1 = vld [vmem:[#allocation6 + $0x500] sm:$0xff]  ;;  %v6841_v15 = vld [vmem:[#allocation6 + $0x510] sm:$0xff] }
 0xe91   :  { %7251 = vmatprep.subr.bf16.mxu0 %v6752_v59  ;;  %7415 = vmatprep.subr.bf16.mxu1 %v6754_v28  ;;  %v6848_v59 = vld [vmem:[#allocation6 + $0x548] sm:$0xff]  ;;  %v6850_v28 = vld [vmem:[#allocation6 + $0x558] sm:$0xff] }
 0xe94   :  { %7252 = vmatpush1.bf16.msra.mxu0 %v6751_v16  ;;  %7416 = vmatpush1.bf16.msra.mxu1 %v6753_v20  ;;  %v6847_v16 = vld [vmem:[#allocation6 + $0x540] sm:$0xff]  ;;  %v6849_v20 = vld [vmem:[#allocation6 + $0x550] sm:$0xff] }
 0xe95   :  { %7253 = vmatprep.subr.bf16.mxu0 %v6760_v61  ;;  %7417 = vmatprep.subr.bf16.mxu1 %v6762_v22  ;;  %v6856_v61 = vld [vmem:[#allocation6 + $0x588] sm:$0xff]  ;;  %v6858_v22 = vld [vmem:[#allocation6 + $0x598] sm:$0xff] }
 0xe98   :  { %7254 = vmatpush1.bf16.msra.mxu0 %v6759_v42  ;;  %7418 = vmatpush1.bf16.msra.mxu1 %v6761_v39  ;;  %v6855_v42 = vld [vmem:[#allocation6 + $0x580] sm:$0xff]  ;;  %v6857_v39 = vld [vmem:[#allocation6 + $0x590] sm:$0xff] }
 0xe99   :  { %7255 = vmatprep.subr.bf16.mxu0 %v6768_v8  ;;  %7419 = vmatprep.subr.bf16.mxu1 %v6770_v23  ;;  %v6864_v8 = vld [vmem:[#allocation6 + $0x5c8] sm:$0xff]  ;;  %v6866_v23 = vld [vmem:[#allocation6 + $0x5d8] sm:$0xff] }
 0xe9c   :  { %7256 = vmatpush1.bf16.msra.mxu0 %v6767_v24  ;;  %7420 = vmatpush1.bf16.msra.mxu1 %v6769_v58  ;;  %v6863_v24 = vld [vmem:[#allocation6 + $0x5c0] sm:$0xff]  ;;  %v6865_v58 = vld [vmem:[#allocation6 + $0x5d0] sm:$0xff] }
 0xe9d   :  { %7257 = vmatprep.subr.bf16.mxu0 %v6776_v19  ;;  %7421 = vmatprep.subr.bf16.mxu1 %v6778_v40  ;;  %v6872_v19 = vld [vmem:[#allocation6 + $0x608] sm:$0xff]  ;;  %v6874_v40 = vld [vmem:[#allocation6 + $0x618] sm:$0xff] }
 0xea0   :  { %7258 = vmatpush1.bf16.msra.mxu0 %v6775_v11  ;;  %7422 = vmatpush1.bf16.msra.mxu1 %v6777_v32  ;;  %v6871_v11 = vld [vmem:[#allocation6 + $0x600] sm:$0xff]  ;;  %v6873_v32 = vld [vmem:[#allocation6 + $0x610] sm:$0xff] }
 0xea1   :  { %7259 = vmatprep.subr.bf16.mxu0 %v6784_v44  ;;  %7423 = vmatprep.subr.bf16.mxu1 %v6786_v2  ;;  %v6880_v44 = vld [vmem:[#allocation6 + $0x648] sm:$0xff]  ;;  %v6882_v2 = vld [vmem:[#allocation6 + $0x658] sm:$0xff] }
 0xea4   :  { %7260 = vmatpush1.bf16.msra.mxu0 %v6783_v45  ;;  %7424 = vmatpush1.bf16.msra.mxu1 %v6785_v46  ;;  %v6879_v45 = vld [vmem:[#allocation6 + $0x640] sm:$0xff]  ;;  %v6881_v46 = vld [vmem:[#allocation6 + $0x650] sm:$0xff] }
 0xea5   :  { %7261 = vmatprep.subr.bf16.mxu0 %v6792_v47  ;;  %7425 = vmatprep.subr.bf16.mxu1 %v6794_v29  ;;  %v6888_v47 = vld [vmem:[#allocation6 + $0x688] sm:$0xff]  ;;  %v6890_v29 = vld [vmem:[#allocation6 + $0x698] sm:$0xff] }
 0xea8   :  { %7262 = vmatpush1.bf16.msra.mxu0 %v6791_v48  ;;  %7426 = vmatpush1.bf16.msra.mxu1 %v6793_v49  ;;  %v6887_v48 = vld [vmem:[#allocation6 + $0x680] sm:$0xff]  ;;  %v6889_v49 = vld [vmem:[#allocation6 + $0x690] sm:$0xff] }
 0xea9   :  { %7263 = vmatprep.subr.bf16.mxu0 %v6800_v17  ;;  %7427 = vmatprep.subr.bf16.mxu1 %v6802_v50  ;;  %v6896_v17 = vld [vmem:[#allocation6 + $0x6c8] sm:$0xff]  ;;  %v6898_v50 = vld [vmem:[#allocation6 + $0x6d8] sm:$0xff] }
 0xeac   :  { %7264 = vmatpush1.bf16.msra.mxu0 %v6799_v51  ;;  %7428 = vmatpush1.bf16.msra.mxu1 %v6801_v53  ;;  %v6895_v51 = vld [vmem:[#allocation6 + $0x6c0] sm:$0xff]  ;;  %v6897_v53 = vld [vmem:[#allocation6 + $0x6d0] sm:$0xff] }
 0xead   :  { %7274 = vmatprep.subr.bf16.mxu0 %v6808_v38  ;;  %7438 = vmatprep.subr.bf16.mxu1 %v6810_v41  ;;  %v6904_v38 = vld [vmem:[#allocation6 + $0x708] sm:$0xff]  ;;  %v6906_v41 = vld [vmem:[#allocation6 + $0x718] sm:$0xff] }
 0xeaf   :  { %7266 = vmatmul.mubr.bf16.vlgmr.msra.gmra.mrb[40].mxu0 %v9458_v33  ;;  %7430 = vmatmul.mubr.bf16.vlgmr.msra.gmra.mrb[40].mxu1 %v9458_v33 }
 0xeb0   :  { %7275 = vmatpush1.bf16.msra.mxu0 %v6807_v54  ;;  %7439 = vmatpush1.bf16.msra.mxu1 %v6809_v55  ;;  %v6903_v54 = vld [vmem:[#allocation6 + $0x700] sm:$0xff]  ;;  %v6905_v55 = vld [vmem:[#allocation6 + $0x710] sm:$0xff] }
 0xeb1   :  { %7276 = vmatprep.subr.bf16.mxu0 %v6816_v56  ;;  %7440 = vmatprep.subr.bf16.mxu1 %v6818_v31  ;;  %v6912_v56 = vld [vmem:[#allocation6 + $0x748] sm:$0xff]  ;;  %v6914_v31 = vld [vmem:[#allocation6 + $0x758] sm:$0xff] }
 0xeb2   :  { %7306 = vmatprep.mubr.bf16.mxu0 %v9464_v4  ;;  %7470 = vmatprep.mubr.bf16.mxu1 %v9464_v4 }
 0xeb4   :  { %7277 = vmatpush1.bf16.msra.mxu0 %v6815_v63  ;;  %7441 = vmatpush1.bf16.msra.mxu1 %v6817_v12  ;;  %v6911_v63 = vld [vmem:[#allocation6 + $0x740] sm:$0xff]  ;;  %v6913_v12 = vld [vmem:[#allocation6 + $0x750] sm:$0xff] }
 0xeb5   :  { %7278 = vmatprep.subr.bf16.mxu0 %v6824_v60  ;;  %7442 = vmatprep.subr.bf16.mxu1 %v6826_v30  ;;  %v6920_v60 = vld [vmem:[#allocation6 + $0x788] sm:$0xff]  ;;  %v6922_v30 = vld [vmem:[#allocation6 + $0x798] sm:$0xff] }
 0xeb8   :  { %7279 = vmatpush1.bf16.msra.mxu0 %v6823_v13  ;;  %7443 = vmatpush1.bf16.msra.mxu1 %v6825_v62  ;;  %v6919_v13 = vld [vmem:[#allocation6 + $0x780] sm:$0xff]  ;;  %v6921_v62 = vld [vmem:[#allocation6 + $0x790] sm:$0xff] }
 0xeb9   :  { %7280 = vmatprep.subr.bf16.mxu0 %v6832_v52  ;;  %7444 = vmatprep.subr.bf16.mxu1 %v6834_v14  ;;  %v6928_v52 = vld [vmem:[#allocation6 + $0x7c8] sm:$0xff]  ;;  %v6930_v14 = vld [vmem:[#allocation6 + $0x7d8] sm:$0xff] }
 0xebc   :  { %7281 = vmatpush1.bf16.msra.mxu0 %v6831_v21  ;;  %7445 = vmatpush1.bf16.msra.mxu1 %v6833_v18  ;;  %v6927_v21 = vld [vmem:[#allocation6 + $0x7c0] sm:$0xff]  ;;  %v6929_v18 = vld [vmem:[#allocation6 + $0x7d0] sm:$0xff] }
 0xebd   :  { %7282 = vmatprep.subr.bf16.mxu0 %v6840_v43  ;;  %7446 = vmatprep.subr.bf16.mxu1 %v6842_v0  ;;  %v6936_v43 = vld [vmem:[#allocation6 + $0x808] sm:$0xff]  ;;  %v6938_v0 = vld [vmem:[#allocation6 + $0x818] sm:$0xff] }
 0xec0   :  { %7283 = vmatpush1.bf16.msra.mxu0 %v6839_v1  ;;  %7447 = vmatpush1.bf16.msra.mxu1 %v6841_v15  ;;  %v6935_v1 = vld [vmem:[#allocation6 + $0x800] sm:$0xff]  ;;  %v6937_v15 = vld [vmem:[#allocation6 + $0x810] sm:$0xff] }
 0xec1   :  { %7284 = vmatprep.subr.bf16.mxu0 %v6848_v59  ;;  %7448 = vmatprep.subr.bf16.mxu1 %v6850_v28  ;;  %v6944_v59 = vld [vmem:[#allocation6 + $0x848] sm:$0xff]  ;;  %v6946_v28 = vld [vmem:[#allocation6 + $0x858] sm:$0xff] }
 0xec4   :  { %7285 = vmatpush1.bf16.msra.mxu0 %v6847_v16  ;;  %7449 = vmatpush1.bf16.msra.mxu1 %v6849_v20  ;;  %v6943_v16 = vld [vmem:[#allocation6 + $0x840] sm:$0xff]  ;;  %v6945_v20 = vld [vmem:[#allocation6 + $0x850] sm:$0xff] }
 0xec5   :  { %7286 = vmatprep.subr.bf16.mxu0 %v6856_v61  ;;  %7450 = vmatprep.subr.bf16.mxu1 %v6858_v22  ;;  %v6952_v61 = vld [vmem:[#allocation6 + $0x888] sm:$0xff]  ;;  %v6954_v22 = vld [vmem:[#allocation6 + $0x898] sm:$0xff] }
 0xec8   :  { %7287 = vmatpush1.bf16.msra.mxu0 %v6855_v42  ;;  %7451 = vmatpush1.bf16.msra.mxu1 %v6857_v39  ;;  %v6951_v42 = vld [vmem:[#allocation6 + $0x880] sm:$0xff]  ;;  %v6953_v39 = vld [vmem:[#allocation6 + $0x890] sm:$0xff] }
 0xec9   :  { %7288 = vmatprep.subr.bf16.mxu0 %v6864_v8  ;;  %7452 = vmatprep.subr.bf16.mxu1 %v6866_v23  ;;  %v6960_v8 = vld [vmem:[#allocation6 + $0x8c8] sm:$0xff]  ;;  %v6962_v23 = vld [vmem:[#allocation6 + $0x8d8] sm:$0xff] }
 0xecc   :  { %7289 = vmatpush1.bf16.msra.mxu0 %v6863_v24  ;;  %7453 = vmatpush1.bf16.msra.mxu1 %v6865_v58  ;;  %v6959_v24 = vld [vmem:[#allocation6 + $0x8c0] sm:$0xff]  ;;  %v6961_v58 = vld [vmem:[#allocation6 + $0x8d0] sm:$0xff] }
 0xecd   :  { %7290 = vmatprep.subr.bf16.mxu0 %v6872_v19  ;;  %7454 = vmatprep.subr.bf16.mxu1 %v6874_v40  ;;  %v6968_v19 = vld [vmem:[#allocation6 + $0x908] sm:$0xff]  ;;  %v6970_v40 = vld [vmem:[#allocation6 + $0x918] sm:$0xff] }
 0xed0   :  { %7291 = vmatpush1.bf16.msra.mxu0 %v6871_v11  ;;  %7455 = vmatpush1.bf16.msra.mxu1 %v6873_v32  ;;  %v6967_v11 = vld [vmem:[#allocation6 + $0x900] sm:$0xff]  ;;  %v6969_v32 = vld [vmem:[#allocation6 + $0x910] sm:$0xff] }
 0xed1   :  { %7292 = vmatprep.subr.bf16.mxu0 %v6880_v44  ;;  %7456 = vmatprep.subr.bf16.mxu1 %v6882_v2  ;;  %v6976_v44 = vld [vmem:[#allocation6 + $0x948] sm:$0xff]  ;;  %v6978_v2 = vld [vmem:[#allocation6 + $0x958] sm:$0xff] }
 0xed4   :  { %7293 = vmatpush1.bf16.msra.mxu0 %v6879_v45  ;;  %7457 = vmatpush1.bf16.msra.mxu1 %v6881_v46  ;;  %v6975_v45 = vld [vmem:[#allocation6 + $0x940] sm:$0xff]  ;;  %v6977_v46 = vld [vmem:[#allocation6 + $0x950] sm:$0xff] }
 0xed5   :  { %7294 = vmatprep.subr.bf16.mxu0 %v6888_v47  ;;  %7458 = vmatprep.subr.bf16.mxu1 %v6890_v29  ;;  %v6984_v47 = vld [vmem:[#allocation6 + $0x988] sm:$0xff]  ;;  %v6986_v29 = vld [vmem:[#allocation6 + $0x998] sm:$0xff] }
 0xed8   :  { %7295 = vmatpush1.bf16.msra.mxu0 %v6887_v48  ;;  %7459 = vmatpush1.bf16.msra.mxu1 %v6889_v49  ;;  %v6983_v48 = vld [vmem:[#allocation6 + $0x980] sm:$0xff]  ;;  %v6985_v49 = vld [vmem:[#allocation6 + $0x990] sm:$0xff] }
 0xed9   :  { %7296 = vmatprep.subr.bf16.mxu0 %v6896_v17  ;;  %7460 = vmatprep.subr.bf16.mxu1 %v6898_v50  ;;  %v6992_v17 = vld [vmem:[#allocation6 + $0x9c8] sm:$0xff]  ;;  %v6994_v50 = vld [vmem:[#allocation6 + $0x9d8] sm:$0xff] }
 0xedc   :  { %7297 = vmatpush1.bf16.msra.mxu0 %v6895_v51  ;;  %7461 = vmatpush1.bf16.msra.mxu1 %v6897_v53  ;;  %v6991_v51 = vld [vmem:[#allocation6 + $0x9c0] sm:$0xff]  ;;  %v6993_v53 = vld [vmem:[#allocation6 + $0x9d0] sm:$0xff] }
 0xedd   :  { %7298 = vmatprep.subr.bf16.mxu0 %v6904_v38  ;;  %7462 = vmatprep.subr.bf16.mxu1 %v6906_v41  ;;  %v7000_v38 = vld [vmem:[#allocation6 + $0xa08] sm:$0xff]  ;;  %v7002_v41 = vld [vmem:[#allocation6 + $0xa18] sm:$0xff] }
 0xee0   :  { %7299 = vmatpush1.bf16.msra.mxu0 %v6903_v54  ;;  %7463 = vmatpush1.bf16.msra.mxu1 %v6905_v55  ;;  %v6999_v54 = vld [vmem:[#allocation6 + $0xa00] sm:$0xff]  ;;  %v7001_v55 = vld [vmem:[#allocation6 + $0xa10] sm:$0xff] }
 0xee1   :  { %7300 = vmatprep.subr.bf16.mxu0 %v6912_v56  ;;  %7464 = vmatprep.subr.bf16.mxu1 %v6914_v31  ;;  %v7008_v56 = vld [vmem:[#allocation6 + $0xa48] sm:$0xff]  ;;  %v7010_v31 = vld [vmem:[#allocation6 + $0xa58] sm:$0xff] }
 0xee4   :  { %7301 = vmatpush1.bf16.msra.mxu0 %v6911_v63  ;;  %7465 = vmatpush1.bf16.msra.mxu1 %v6913_v12  ;;  %v7007_v63 = vld [vmem:[#allocation6 + $0xa40] sm:$0xff]  ;;  %v7009_v12 = vld [vmem:[#allocation6 + $0xa50] sm:$0xff] }
 0xee5   :  { %7302 = vmatprep.subr.bf16.mxu0 %v6920_v60  ;;  %7466 = vmatprep.subr.bf16.mxu1 %v6922_v30  ;;  %v7016_v60 = vld [vmem:[#allocation6 + $0xa88] sm:$0xff]  ;;  %v7018_v30 = vld [vmem:[#allocation6 + $0xa98] sm:$0xff] }
 0xee8   :  { %7303 = vmatpush1.bf16.msra.mxu0 %v6919_v13  ;;  %7467 = vmatpush1.bf16.msra.mxu1 %v6921_v62  ;;  %v7015_v13 = vld [vmem:[#allocation6 + $0xa80] sm:$0xff]  ;;  %v7017_v62 = vld [vmem:[#allocation6 + $0xa90] sm:$0xff] }
 0xee9   :  { %7304 = vmatprep.subr.bf16.mxu0 %v6928_v52  ;;  %7468 = vmatprep.subr.bf16.mxu1 %v6930_v14  ;;  %v7024_v52 = vld [vmem:[#allocation6 + $0xac8] sm:$0xff]  ;;  %v7026_v14 = vld [vmem:[#allocation6 + $0xad8] sm:$0xff] }
 0xeec   :  { %7305 = vmatpush1.bf16.msra.mxu0 %v6927_v21  ;;  %7469 = vmatpush1.bf16.msra.mxu1 %v6929_v18  ;;  %v7023_v21 = vld [vmem:[#allocation6 + $0xac0] sm:$0xff]  ;;  %v7025_v18 = vld [vmem:[#allocation6 + $0xad0] sm:$0xff] }
 0xeed   :  { %7315 = vmatprep.subr.bf16.mxu0 %v6936_v43  ;;  %7479 = vmatprep.subr.bf16.mxu1 %v6938_v0  ;;  %v7032_v43 = vld [vmem:[#allocation6 + $0xb08] sm:$0xff]  ;;  %v7034_v0 = vld [vmem:[#allocation6 + $0xb18] sm:$0xff] }
 0xeef   :  { %7307 = vmatmul.mubr.bf16.vlgmr.msra.gmra.mrb[40].mxu0 %v9460_v57  ;;  %7471 = vmatmul.mubr.bf16.vlgmr.msra.gmra.mrb[40].mxu1 %v9460_v57 }
 0xef0   :  { %7316 = vmatpush1.bf16.msra.mxu0 %v6935_v1  ;;  %7480 = vmatpush1.bf16.msra.mxu1 %v6937_v15  ;;  %v7031_v1 = vld [vmem:[#allocation6 + $0xb00] sm:$0xff]  ;;  %v7033_v15 = vld [vmem:[#allocation6 + $0xb10] sm:$0xff] }
 0xef1   :  { %7317 = vmatprep.subr.bf16.mxu0 %v6944_v59  ;;  %7481 = vmatprep.subr.bf16.mxu1 %v6946_v28  ;;  %v7040_v59 = vld [vmem:[#allocation6 + $0xb48] sm:$0xff]  ;;  %v7042_v28 = vld [vmem:[#allocation6 + $0xb58] sm:$0xff] }
 0xef2   :  { %7347 = vmatprep.mubr.bf16.mxu0 %v9492_v26  ;;  %7511 = vmatprep.mubr.bf16.mxu1 %v9492_v26 }
 0xef4   :  { %7318 = vmatpush1.bf16.msra.mxu0 %v6943_v16  ;;  %7482 = vmatpush1.bf16.msra.mxu1 %v6945_v20  ;;  %v7039_v16 = vld [vmem:[#allocation6 + $0xb40] sm:$0xff]  ;;  %v7041_v20 = vld [vmem:[#allocation6 + $0xb50] sm:$0xff] }
 0xef5   :  { %7319 = vmatprep.subr.bf16.mxu0 %v6952_v61  ;;  %7483 = vmatprep.subr.bf16.mxu1 %v6954_v22  ;;  %v7048_v61 = vld [vmem:[#allocation6 + $0xb88] sm:$0xff]  ;;  %v7050_v22 = vld [vmem:[#allocation6 + $0xb98] sm:$0xff] }
 0xef8   :  { %7320 = vmatpush1.bf16.msra.mxu0 %v6951_v42  ;;  %7484 = vmatpush1.bf16.msra.mxu1 %v6953_v39  ;;  %v7047_v42 = vld [vmem:[#allocation6 + $0xb80] sm:$0xff]  ;;  %v7049_v39 = vld [vmem:[#allocation6 + $0xb90] sm:$0xff] }
 0xef9   :  { %7321 = vmatprep.subr.bf16.mxu0 %v6960_v8  ;;  %7485 = vmatprep.subr.bf16.mxu1 %v6962_v23  ;;  %v7056_v8 = vld [vmem:[#allocation6 + $0xbc8] sm:$0xff]  ;;  %v7058_v23 = vld [vmem:[#allocation6 + $0xbd8] sm:$0xff] }
 0xefc   :  { %7322 = vmatpush1.bf16.msra.mxu0 %v6959_v24  ;;  %7486 = vmatpush1.bf16.msra.mxu1 %v6961_v58  ;;  %v7055_v24 = vld [vmem:[#allocation6 + $0xbc0] sm:$0xff]  ;;  %v7057_v58 = vld [vmem:[#allocation6 + $0xbd0] sm:$0xff] }
 0xefd   :  { %7323 = vmatprep.subr.bf16.mxu0 %v6968_v19  ;;  %7487 = vmatprep.subr.bf16.mxu1 %v6970_v40  ;;  %v7064_v19 = vld [vmem:[#allocation6 + $0xc08] sm:$0xff]  ;;  %v7066_v40 = vld [vmem:[#allocation6 + $0xc18] sm:$0xff] }
 0xf00   :  { %7324 = vmatpush1.bf16.msra.mxu0 %v6967_v11  ;;  %7488 = vmatpush1.bf16.msra.mxu1 %v6969_v32  ;;  %v7063_v11 = vld [vmem:[#allocation6 + $0xc00] sm:$0xff]  ;;  %v7065_v32 = vld [vmem:[#allocation6 + $0xc10] sm:$0xff] }
 0xf01   :  { %7325 = vmatprep.subr.bf16.mxu0 %v6976_v44  ;;  %7489 = vmatprep.subr.bf16.mxu1 %v6978_v2  ;;  %v7072_v44 = vld [vmem:[#allocation6 + $0xc48] sm:$0xff]  ;;  %v7074_v2 = vld [vmem:[#allocation6 + $0xc58] sm:$0xff] }
 0xf04   :  { %7326 = vmatpush1.bf16.msra.mxu0 %v6975_v45  ;;  %7490 = vmatpush1.bf16.msra.mxu1 %v6977_v46  ;;  %v7071_v45 = vld [vmem:[#allocation6 + $0xc40] sm:$0xff]  ;;  %v7073_v46 = vld [vmem:[#allocation6 + $0xc50] sm:$0xff] }
 0xf05   :  { %7327 = vmatprep.subr.bf16.mxu0 %v6984_v47  ;;  %7491 = vmatprep.subr.bf16.mxu1 %v6986_v29  ;;  %v7080_v47 = vld [vmem:[#allocation6 + $0xc88] sm:$0xff]  ;;  %v7082_v29 = vld [vmem:[#allocation6 + $0xc98] sm:$0xff] }
 0xf08   :  { %7328 = vmatpush1.bf16.msra.mxu0 %v6983_v48  ;;  %7492 = vmatpush1.bf16.msra.mxu1 %v6985_v49  ;;  %v7079_v48 = vld [vmem:[#allocation6 + $0xc80] sm:$0xff]  ;;  %v7081_v49 = vld [vmem:[#allocation6 + $0xc90] sm:$0xff] }
 0xf09   :  { %7329 = vmatprep.subr.bf16.mxu0 %v6992_v17  ;;  %7493 = vmatprep.subr.bf16.mxu1 %v6994_v50  ;;  %v7088_v17 = vld [vmem:[#allocation6 + $0xcc8] sm:$0xff]  ;;  %v7090_v50 = vld [vmem:[#allocation6 + $0xcd8] sm:$0xff] }
 0xf0c   :  { %7330 = vmatpush1.bf16.msra.mxu0 %v6991_v51  ;;  %7494 = vmatpush1.bf16.msra.mxu1 %v6993_v53  ;;  %v7087_v51 = vld [vmem:[#allocation6 + $0xcc0] sm:$0xff]  ;;  %v7089_v53 = vld [vmem:[#allocation6 + $0xcd0] sm:$0xff] }
 0xf0d   :  { %7331 = vmatprep.subr.bf16.mxu0 %v7000_v38  ;;  %7495 = vmatprep.subr.bf16.mxu1 %v7002_v41  ;;  %v7096_v38 = vld [vmem:[#allocation6 + $0xd08] sm:$0xff]  ;;  %v7098_v41 = vld [vmem:[#allocation6 + $0xd18] sm:$0xff] }
 0xf10   :  { %7332 = vmatpush1.bf16.msra.mxu0 %v6999_v54  ;;  %7496 = vmatpush1.bf16.msra.mxu1 %v7001_v55  ;;  %v7095_v54 = vld [vmem:[#allocation6 + $0xd00] sm:$0xff]  ;;  %v7097_v55 = vld [vmem:[#allocation6 + $0xd10] sm:$0xff] }
 0xf11   :  { %7333 = vmatprep.subr.bf16.mxu0 %v7008_v56  ;;  %7497 = vmatprep.subr.bf16.mxu1 %v7010_v31  ;;  %v7104_v56 = vld [vmem:[#allocation6 + $0xd48] sm:$0xff]  ;;  %v7106_v31 = vld [vmem:[#allocation6 + $0xd58] sm:$0xff] }
 0xf14   :  { %7334 = vmatpush1.bf16.msra.mxu0 %v7007_v63  ;;  %7498 = vmatpush1.bf16.msra.mxu1 %v7009_v12  ;;  %v7103_v63 = vld [vmem:[#allocation6 + $0xd40] sm:$0xff]  ;;  %v7105_v12 = vld [vmem:[#allocation6 + $0xd50] sm:$0xff] }
 0xf15   :  { %7335 = vmatprep.subr.bf16.mxu0 %v7016_v60  ;;  %7499 = vmatprep.subr.bf16.mxu1 %v7018_v30  ;;  %v7112_v60 = vld [vmem:[#allocation6 + $0xd88] sm:$0xff]  ;;  %v7114_v30 = vld [vmem:[#allocation6 + $0xd98] sm:$0xff] }
 0xf18   :  { %7336 = vmatpush1.bf16.msra.mxu0 %v7015_v13  ;;  %7500 = vmatpush1.bf16.msra.mxu1 %v7017_v62  ;;  %v7111_v13 = vld [vmem:[#allocation6 + $0xd80] sm:$0xff]  ;;  %v7113_v62 = vld [vmem:[#allocation6 + $0xd90] sm:$0xff] }
 0xf19   :  { %7337 = vmatprep.subr.bf16.mxu0 %v7024_v52  ;;  %7501 = vmatprep.subr.bf16.mxu1 %v7026_v14  ;;  %v7120_v52 = vld [vmem:[#allocation6 + $0xdc8] sm:$0xff]  ;;  %v7122_v14 = vld [vmem:[#allocation6 + $0xdd8] sm:$0xff] }
 0xf1c   :  { %7338 = vmatpush1.bf16.msra.mxu0 %v7023_v21  ;;  %7502 = vmatpush1.bf16.msra.mxu1 %v7025_v18  ;;  %v7119_v21 = vld [vmem:[#allocation6 + $0xdc0] sm:$0xff]  ;;  %v7121_v18 = vld [vmem:[#allocation6 + $0xdd0] sm:$0xff] }
 0xf1d   :  { %7339 = vmatprep.subr.bf16.mxu0 %v7032_v43  ;;  %7503 = vmatprep.subr.bf16.mxu1 %v7034_v0  ;;  %v7128_v43 = vld [vmem:[#allocation6 + $0xe08] sm:$0xff]  ;;  %v7130_v0 = vld [vmem:[#allocation6 + $0xe18] sm:$0xff] }
 0xf20   :  { %7340 = vmatpush1.bf16.msra.mxu0 %v7031_v1  ;;  %7504 = vmatpush1.bf16.msra.mxu1 %v7033_v15  ;;  %v7127_v1 = vld [vmem:[#allocation6 + $0xe00] sm:$0xff]  ;;  %v7129_v15 = vld [vmem:[#allocation6 + $0xe10] sm:$0xff] }
 0xf21   :  { %7341 = vmatprep.subr.bf16.mxu0 %v7040_v59  ;;  %7505 = vmatprep.subr.bf16.mxu1 %v7042_v28  ;;  %v7136_v59 = vld [vmem:[#allocation6 + $0xe48] sm:$0xff]  ;;  %v7138_v28 = vld [vmem:[#allocation6 + $0xe58] sm:$0xff] }
 0xf24   :  { %7342 = vmatpush1.bf16.msra.mxu0 %v7039_v16  ;;  %7506 = vmatpush1.bf16.msra.mxu1 %v7041_v20  ;;  %v7135_v16 = vld [vmem:[#allocation6 + $0xe40] sm:$0xff]  ;;  %v7137_v20 = vld [vmem:[#allocation6 + $0xe50] sm:$0xff] }
 0xf25   :  { %7343 = vmatprep.subr.bf16.mxu0 %v7048_v61  ;;  %7507 = vmatprep.subr.bf16.mxu1 %v7050_v22  ;;  %v7144_v61 = vld [vmem:[#allocation6 + $0xe88] sm:$0xff]  ;;  %v7146_v22 = vld [vmem:[#allocation6 + $0xe98] sm:$0xff] }
 0xf28   :  { %7344 = vmatpush1.bf16.msra.mxu0 %v7047_v42  ;;  %7508 = vmatpush1.bf16.msra.mxu1 %v7049_v39  ;;  %v7143_v42 = vld [vmem:[#allocation6 + $0xe80] sm:$0xff]  ;;  %v7145_v39 = vld [vmem:[#allocation6 + $0xe90] sm:$0xff] }
 0xf29   :  { %7345 = vmatprep.subr.bf16.mxu0 %v7056_v8  ;;  %7509 = vmatprep.subr.bf16.mxu1 %v7058_v23  ;;  %v7152_v8 = vld [vmem:[#allocation6 + $0xec8] sm:$0xff]  ;;  %v7154_v23 = vld [vmem:[#allocation6 + $0xed8] sm:$0xff] }
 0xf2c   :  { %7346 = vmatpush1.bf16.msra.mxu0 %v7055_v24  ;;  %7510 = vmatpush1.bf16.msra.mxu1 %v7057_v58  ;;  %v7151_v24 = vld [vmem:[#allocation6 + $0xec0] sm:$0xff]  ;;  %v7153_v58 = vld [vmem:[#allocation6 + $0xed0] sm:$0xff] }
 0xf2d   :  { %7356 = vmatprep.subr.bf16.mxu0 %v7064_v19  ;;  %7520 = vmatprep.subr.bf16.mxu1 %v7066_v40  ;;  %v7160_v19 = vld [vmem:[#allocation6 + $0xf08] sm:$0xff]  ;;  %v7162_v40 = vld [vmem:[#allocation6 + $0xf18] sm:$0xff] }
 0xf2f   :  { %7348 = vmatmul.mubr.bf16.vlgmr.msra.gmra.mrb[40].mxu0 %v9488_v5  ;;  %7512 = vmatmul.mubr.bf16.vlgmr.msra.gmra.mrb[40].mxu1 %v9488_v5 }
 0xf30   :  { %7357 = vmatpush1.bf16.msra.mxu0 %v7063_v11  ;;  %7521 = vmatpush1.bf16.msra.mxu1 %v7065_v32  ;;  %v7159_v11 = vld [vmem:[#allocation6 + $0xf00] sm:$0xff]  ;;  %v7161_v32 = vld [vmem:[#allocation6 + $0xf10] sm:$0xff] }
 0xf31   :  { %7358 = vmatprep.subr.bf16.mxu0 %v7072_v44  ;;  %7522 = vmatprep.subr.bf16.mxu1 %v7074_v2  ;;  %v7168_v44 = vld [vmem:[#allocation6 + $0xf48] sm:$0xff]  ;;  %v7170_v2 = vld [vmem:[#allocation6 + $0xf58] sm:$0xff] }
 0xf32   :  { %7388 = vmatprep.mubr.bf16.mxu0 %v9494_v27  ;;  %7552 = vmatprep.mubr.bf16.mxu1 %v9494_v27 }
 0xf34   :  { %7359 = vmatpush1.bf16.msra.mxu0 %v7071_v45  ;;  %7523 = vmatpush1.bf16.msra.mxu1 %v7073_v46  ;;  %v7167_v45 = vld [vmem:[#allocation6 + $0xf40] sm:$0xff]  ;;  %v7169_v46 = vld [vmem:[#allocation6 + $0xf50] sm:$0xff] }
 0xf35   :  { %7360 = vmatprep.subr.bf16.mxu0 %v7080_v47  ;;  %7524 = vmatprep.subr.bf16.mxu1 %v7082_v29  ;;  %v7176_v47 = vld [vmem:[#allocation6 + $0xf88] sm:$0xff]  ;;  %v7178_v29 = vld [vmem:[#allocation6 + $0xf98] sm:$0xff] }
 0xf38   :  { %7361 = vmatpush1.bf16.msra.mxu0 %v7079_v48  ;;  %7525 = vmatpush1.bf16.msra.mxu1 %v7081_v49  ;;  %v7175_v48 = vld [vmem:[#allocation6 + $0xf80] sm:$0xff]  ;;  %v7177_v49 = vld [vmem:[#allocation6 + $0xf90] sm:$0xff] }
 0xf39   :  { %7362 = vmatprep.subr.bf16.mxu0 %v7088_v17  ;;  %7526 = vmatprep.subr.bf16.mxu1 %v7090_v50  ;;  %v7184_v17 = vld [vmem:[#allocation6 + $0xfc8] sm:$0xff]  ;;  %v7186_v50 = vld [vmem:[#allocation6 + $0xfd8] sm:$0xff] }
 0xf3c   :  { %7363 = vmatpush1.bf16.msra.mxu0 %v7087_v51  ;;  %7527 = vmatpush1.bf16.msra.mxu1 %v7089_v53  ;;  %v7183_v51 = vld [vmem:[#allocation6 + $0xfc0] sm:$0xff]  ;;  %v7185_v53 = vld [vmem:[#allocation6 + $0xfd0] sm:$0xff] }
 0xf3d   :  { %7364 = vmatprep.subr.bf16.mxu0 %v7096_v38  ;;  %7528 = vmatprep.subr.bf16.mxu1 %v7098_v41  ;;  %v6684_v38 = vld [vmem:[#allocation6 + $0x28] sm:$0xff]  ;;  %v6686_v41 = vld [vmem:[#allocation6 + $0x38] sm:$0xff] }
 0xf40   :  { %7365 = vmatpush1.bf16.msra.mxu0 %v7095_v54  ;;  %7529 = vmatpush1.bf16.msra.mxu1 %v7097_v55  ;;  %v6683_v54 = vld [vmem:[#allocation6 + $0x20] sm:$0xff]  ;;  %v6685_v55 = vld [vmem:[#allocation6 + $0x30] sm:$0xff] }
 0xf41   :  { %7366 = vmatprep.subr.bf16.mxu0 %v7104_v56  ;;  %7530 = vmatprep.subr.bf16.mxu1 %v7106_v31  ;;  %v6692_v56 = vld [vmem:[#allocation6 + $0x68] sm:$0xff]  ;;  %v6694_v31 = vld [vmem:[#allocation6 + $0x78] sm:$0xff] }
 0xf44   :  { %7367 = vmatpush1.bf16.msra.mxu0 %v7103_v63  ;;  %7531 = vmatpush1.bf16.msra.mxu1 %v7105_v12  ;;  %v6691_v63 = vld [vmem:[#allocation6 + $0x60] sm:$0xff]  ;;  %v6693_v12 = vld [vmem:[#allocation6 + $0x70] sm:$0xff] }
 0xf45   :  { %7368 = vmatprep.subr.bf16.mxu0 %v7112_v60  ;;  %7532 = vmatprep.subr.bf16.mxu1 %v7114_v30  ;;  %v6700_v60 = vld [vmem:[#allocation6 + $0xa8] sm:$0xff]  ;;  %v6702_v30 = vld [vmem:[#allocation6 + $0xb8] sm:$0xff] }
 0xf48   :  { %7369 = vmatpush1.bf16.msra.mxu0 %v7111_v13  ;;  %7533 = vmatpush1.bf16.msra.mxu1 %v7113_v62  ;;  %v6699_v13 = vld [vmem:[#allocation6 + $0xa0] sm:$0xff]  ;;  %v6701_v62 = vld [vmem:[#allocation6 + $0xb0] sm:$0xff] }
 0xf49   :  { %7370 = vmatprep.subr.bf16.mxu0 %v7120_v52  ;;  %7534 = vmatprep.subr.bf16.mxu1 %v7122_v14  ;;  %v6708_v52 = vld [vmem:[#allocation6 + $0xe8] sm:$0xff]  ;;  %v6710_v14 = vld [vmem:[#allocation6 + $0xf8] sm:$0xff] }
 0xf4c   :  { %7371 = vmatpush1.bf16.msra.mxu0 %v7119_v21  ;;  %7535 = vmatpush1.bf16.msra.mxu1 %v7121_v18  ;;  %v6707_v21 = vld [vmem:[#allocation6 + $0xe0] sm:$0xff]  ;;  %v6709_v18 = vld [vmem:[#allocation6 + $0xf0] sm:$0xff] }
 0xf4d   :  { %7372 = vmatprep.subr.bf16.mxu0 %v7128_v43  ;;  %7536 = vmatprep.subr.bf16.mxu1 %v7130_v0  ;;  %v6716_v43 = vld [vmem:[#allocation6 + $0x128] sm:$0xff]  ;;  %v6718_v0 = vld [vmem:[#allocation6 + $0x138] sm:$0xff] }
 0xf50   :  { %7373 = vmatpush1.bf16.msra.mxu0 %v7127_v1  ;;  %7537 = vmatpush1.bf16.msra.mxu1 %v7129_v15  ;;  %v6717_v1 = vld [vmem:[#allocation6 + $0x130] sm:$0xff]  ;;  %v6724_v15 = vld [vmem:[#allocation6 + $0x168] sm:$0xff] }
 0xf51   :  { %7374 = vmatprep.subr.bf16.mxu0 %v7136_v59  ;;  %7538 = vmatprep.subr.bf16.mxu1 %v7138_v28  ;;  %v6726_v59 = vld [vmem:[#allocation6 + $0x178] sm:$0xff]  ;;  %v6723_v28 = vld [vmem:[#allocation6 + $0x160] sm:$0xff] }
 0xf54   :  { %7375 = vmatpush1.bf16.msra.mxu0 %v7135_v16  ;;  %7539 = vmatpush1.bf16.msra.mxu1 %v7137_v20  ;;  %v6725_v16 = vld [vmem:[#allocation6 + $0x170] sm:$0xff]  ;;  %v6732_v20 = vld [vmem:[#allocation6 + $0x1a8] sm:$0xff] }
 0xf55   :  { %7376 = vmatprep.subr.bf16.mxu0 %v7144_v61  ;;  %7540 = vmatprep.subr.bf16.mxu1 %v7146_v22  ;;  %v6734_v61 = vld [vmem:[#allocation6 + $0x1b8] sm:$0xff]  ;;  %v6731_v22 = vld [vmem:[#allocation6 + $0x1a0] sm:$0xff] }
 0xf58   :  { %7377 = vmatpush1.bf16.msra.mxu0 %v7143_v42  ;;  %7541 = vmatpush1.bf16.msra.mxu1 %v7145_v39  ;;  %v6733_v42 = vld [vmem:[#allocation6 + $0x1b0] sm:$0xff]  ;;  %v6740_v39 = vld [vmem:[#allocation6 + $0x1e8] sm:$0xff] }
 0xf59   :  { %7378 = vmatprep.subr.bf16.mxu0 %v7152_v8  ;;  %7542 = vmatprep.subr.bf16.mxu1 %v7154_v23  ;;  %v6742_v8 = vld [vmem:[#allocation6 + $0x1f8] sm:$0xff]  ;;  %v6739_v23 = vld [vmem:[#allocation6 + $0x1e0] sm:$0xff] }
 0xf5c   :  { %7379 = vmatpush1.bf16.msra.mxu0 %v7151_v24  ;;  %7543 = vmatpush1.bf16.msra.mxu1 %v7153_v58  ;;  %v6741_v24 = vld [vmem:[#allocation6 + $0x1f0] sm:$0xff]  ;;  %v6748_v58 = vld [vmem:[#allocation6 + $0x228] sm:$0xff] }
 0xf5d   :  { %7380 = vmatprep.subr.bf16.mxu0 %v7160_v19  ;;  %7544 = vmatprep.subr.bf16.mxu1 %v7162_v40  ;;  %v6750_v19 = vld [vmem:[#allocation6 + $0x238] sm:$0xff]  ;;  %v6747_v40 = vld [vmem:[#allocation6 + $0x220] sm:$0xff] }
 0xf60   :  { %7381 = vmatpush1.bf16.msra.mxu0 %v7159_v11  ;;  %7545 = vmatpush1.bf16.msra.mxu1 %v7161_v32  ;;  %v6749_v11 = vld [vmem:[#allocation6 + $0x230] sm:$0xff]  ;;  %v6756_v32 = vld [vmem:[#allocation6 + $0x268] sm:$0xff] }
 0xf61   :  { %7382 = vmatprep.subr.bf16.mxu0 %v7168_v44  ;;  %7546 = vmatprep.subr.bf16.mxu1 %v7170_v2  ;;  %v6758_v44 = vld [vmem:[#allocation6 + $0x278] sm:$0xff]  ;;  %v6755_v2 = vld [vmem:[#allocation6 + $0x260] sm:$0xff] }
 0xf64   :  { %7383 = vmatpush1.bf16.msra.mxu0 %v7167_v45  ;;  %7547 = vmatpush1.bf16.msra.mxu1 %v7169_v46  ;;  %v6757_v45 = vld [vmem:[#allocation6 + $0x270] sm:$0xff]  ;;  %v6764_v46 = vld [vmem:[#allocation6 + $0x2a8] sm:$0xff] }
 0xf65   :  { %7384 = vmatprep.subr.bf16.mxu0 %v7176_v47  ;;  %7548 = vmatprep.subr.bf16.mxu1 %v7178_v29  ;;  %v6766_v47 = vld [vmem:[#allocation6 + $0x2b8] sm:$0xff]  ;;  %v6763_v29 = vld [vmem:[#allocation6 + $0x2a0] sm:$0xff] }
 0xf68   :  { %7385 = vmatpush1.bf16.msra.mxu0 %v7175_v48  ;;  %7549 = vmatpush1.bf16.msra.mxu1 %v7177_v49  ;;  %v6765_v48 = vld [vmem:[#allocation6 + $0x2b0] sm:$0xff]  ;;  %v6772_v49 = vld [vmem:[#allocation6 + $0x2e8] sm:$0xff] }
 0xf69   :  { %7386 = vmatprep.subr.bf16.mxu0 %v7184_v17  ;;  %7550 = vmatprep.subr.bf16.mxu1 %v7186_v50  ;;  %v6774_v17 = vld [vmem:[#allocation6 + $0x2f8] sm:$0xff]  ;;  %v6771_v50 = vld [vmem:[#allocation6 + $0x2e0] sm:$0xff] }
 0xf6c   :  { %7387 = vmatpush1.bf16.msra.mxu0 %v7183_v51  ;;  %7551 = vmatpush1.bf16.msra.mxu1 %v7185_v53  ;;  %v6773_v51 = vld [vmem:[#allocation6 + $0x2f0] sm:$0xff]  ;;  %v6780_v53 = vld [vmem:[#allocation6 + $0x328] sm:$0xff] }
 0xf6d   :  { %7561 = vmatprep.subr.bf16.mxu0 %v6684_v38  ;;  %7725 = vmatprep.subr.bf16.mxu1 %v6686_v41  ;;  %v6782_v38 = vld [vmem:[#allocation6 + $0x338] sm:$0xff]  ;;  %v6779_v41 = vld [vmem:[#allocation6 + $0x320] sm:$0xff] }
 0xf6f   :  { %7389 = vmatmul.mubr.bf16.vlgmr.msra.gmra.mrb[40].mxu0 %v9490_v25  ;;  %7553 = vmatmul.mubr.bf16.vlgmr.msra.gmra.mrb[40].mxu1 %v9490_v25 }
 0xf70   :  { %7562 = vmatpush1.bf16.msra.mxu0 %v6683_v54  ;;  %7726 = vmatpush1.bf16.msra.mxu1 %v6685_v55  ;;  %v6781_v54 = vld [vmem:[#allocation6 + $0x330] sm:$0xff]  ;;  %v6788_v55 = vld [vmem:[#allocation6 + $0x368] sm:$0xff] }
 0xf71   :  { %7563 = vmatprep.subr.bf16.mxu0 %v6692_v56  ;;  %7727 = vmatprep.subr.bf16.mxu1 %v6694_v31  ;;  %v6790_v56 = vld [vmem:[#allocation6 + $0x378] sm:$0xff]  ;;  %v6787_v31 = vld [vmem:[#allocation6 + $0x360] sm:$0xff] }
 0xf72   :  { %7593 = vmatprep.mubr.bf16.mxu0 %v9462_v3  ;;  %7757 = vmatprep.mubr.bf16.mxu1 %v9462_v3  ;;  %v6715_v3 = vld [vmem:[#allocation6 + $0x120] sm:$0xff] }
 0xf74   :  { %7564 = vmatpush1.bf16.msra.mxu0 %v6691_v63  ;;  %7728 = vmatpush1.bf16.msra.mxu1 %v6693_v12  ;;  %v6789_v63 = vld [vmem:[#allocation6 + $0x370] sm:$0xff]  ;;  %v6796_v12 = vld [vmem:[#allocation6 + $0x3a8] sm:$0xff] }
 0xf75   :  { %7565 = vmatprep.subr.bf16.mxu0 %v6700_v60  ;;  %7729 = vmatprep.subr.bf16.mxu1 %v6702_v30  ;;  %v6798_v60 = vld [vmem:[#allocation6 + $0x3b8] sm:$0xff]  ;;  %v6795_v30 = vld [vmem:[#allocation6 + $0x3a0] sm:$0xff] }
 0xf78   :  { %7566 = vmatpush1.bf16.msra.mxu0 %v6699_v13  ;;  %7730 = vmatpush1.bf16.msra.mxu1 %v6701_v62  ;;  %v6797_v13 = vld [vmem:[#allocation6 + $0x3b0] sm:$0xff]  ;;  %v6804_v62 = vld [vmem:[#allocation6 + $0x3e8] sm:$0xff] }
 0xf79   :  { %7567 = vmatprep.subr.bf16.mxu0 %v6708_v52  ;;  %7731 = vmatprep.subr.bf16.mxu1 %v6710_v14  ;;  %v6806_v52 = vld [vmem:[#allocation6 + $0x3f8] sm:$0xff]  ;;  %v6803_v14 = vld [vmem:[#allocation6 + $0x3e0] sm:$0xff] }
 0xf7c   :  { %7568 = vmatpush1.bf16.msra.mxu0 %v6707_v21  ;;  %7732 = vmatpush1.bf16.msra.mxu1 %v6709_v18  ;;  %v6805_v21 = vld [vmem:[#allocation6 + $0x3f0] sm:$0xff]  ;;  %v6812_v18 = vld [vmem:[#allocation6 + $0x428] sm:$0xff] }
 0xf7d   :  { %7569 = vmatprep.subr.bf16.mxu0 %v6716_v43  ;;  %7733 = vmatprep.subr.bf16.mxu1 %v6718_v0  ;;  %v6814_v43 = vld [vmem:[#allocation6 + $0x438] sm:$0xff]  ;;  %v6811_v0 = vld [vmem:[#allocation6 + $0x420] sm:$0xff] }
 0xf80   :  { %7570 = vmatpush1.bf16.msra.mxu0 %v6715_v3  ;;  %7734 = vmatpush1.bf16.msra.mxu1 %v6717_v1  ;;  %v6813_v3 = vld [vmem:[#allocation6 + $0x430] sm:$0xff]  ;;  %v6820_v1 = vld [vmem:[#allocation6 + $0x468] sm:$0xff] }
 0xf81   :  { %7571 = vmatprep.subr.bf16.mxu0 %v6724_v15  ;;  %7735 = vmatprep.subr.bf16.mxu1 %v6726_v59  ;;  %v6822_v15 = vld [vmem:[#allocation6 + $0x478] sm:$0xff]  ;;  %v6819_v59 = vld [vmem:[#allocation6 + $0x460] sm:$0xff] }
 0xf84   :  { %7572 = vmatpush1.bf16.msra.mxu0 %v6723_v28  ;;  %7736 = vmatpush1.bf16.msra.mxu1 %v6725_v16  ;;  %v6821_v28 = vld [vmem:[#allocation6 + $0x470] sm:$0xff]  ;;  %v6828_v16 = vld [vmem:[#allocation6 + $0x4a8] sm:$0xff] }
 0xf85   :  { %7573 = vmatprep.subr.bf16.mxu0 %v6732_v20  ;;  %7737 = vmatprep.subr.bf16.mxu1 %v6734_v61  ;;  %v6830_v20 = vld [vmem:[#allocation6 + $0x4b8] sm:$0xff]  ;;  %v6827_v61 = vld [vmem:[#allocation6 + $0x4a0] sm:$0xff] }
 0xf88   :  { %7574 = vmatpush1.bf16.msra.mxu0 %v6731_v22  ;;  %7738 = vmatpush1.bf16.msra.mxu1 %v6733_v42  ;;  %v6829_v22 = vld [vmem:[#allocation6 + $0x4b0] sm:$0xff]  ;;  %v6836_v42 = vld [vmem:[#allocation6 + $0x4e8] sm:$0xff] }
 0xf89   :  { %7575 = vmatprep.subr.bf16.mxu0 %v6740_v39  ;;  %7739 = vmatprep.subr.bf16.mxu1 %v6742_v8  ;;  %v6835_v39 = vld [vmem:[#allocation6 + $0x4e0] sm:$0xff]  ;;  %v6837_v8 = vld [vmem:[#allocation6 + $0x4f0] sm:$0xff] }
 0xf8c   :  { %7576 = vmatpush1.bf16.msra.mxu0 %v6739_v23  ;;  %7740 = vmatpush1.bf16.msra.mxu1 %v6741_v24  ;;  %v6844_v23 = vld [vmem:[#allocation6 + $0x528] sm:$0xff]  ;;  %v6846_v24 = vld [vmem:[#allocation6 + $0x538] sm:$0xff] }
 0xf8d   :  { %7577 = vmatprep.subr.bf16.mxu0 %v6748_v58  ;;  %7741 = vmatprep.subr.bf16.mxu1 %v6750_v19  ;;  %v6845_v58 = vld [vmem:[#allocation6 + $0x530] sm:$0xff]  ;;  %v6852_v19 = vld [vmem:[#allocation6 + $0x568] sm:$0xff] }
 0xf90   :  { %7578 = vmatpush1.bf16.msra.mxu0 %v6747_v40  ;;  %7742 = vmatpush1.bf16.msra.mxu1 %v6749_v11  ;;  %v6854_v40 = vld [vmem:[#allocation6 + $0x578] sm:$0xff]  ;;  %v6851_v11 = vld [vmem:[#allocation6 + $0x560] sm:$0xff] }
 0xf91   :  { %7579 = vmatprep.subr.bf16.mxu0 %v6756_v32  ;;  %7743 = vmatprep.subr.bf16.mxu1 %v6758_v44  ;;  %v6853_v32 = vld [vmem:[#allocation6 + $0x570] sm:$0xff]  ;;  %v6860_v44 = vld [vmem:[#allocation6 + $0x5a8] sm:$0xff] }
 0xf94   :  { %7580 = vmatpush1.bf16.msra.mxu0 %v6755_v2  ;;  %7744 = vmatpush1.bf16.msra.mxu1 %v6757_v45  ;;  %v6862_v2 = vld [vmem:[#allocation6 + $0x5b8] sm:$0xff]  ;;  %v6859_v45 = vld [vmem:[#allocation6 + $0x5a0] sm:$0xff] }
 0xf95   :  { %7581 = vmatprep.subr.bf16.mxu0 %v6764_v46  ;;  %7745 = vmatprep.subr.bf16.mxu1 %v6766_v47  ;;  %v6861_v46 = vld [vmem:[#allocation6 + $0x5b0] sm:$0xff]  ;;  %v6868_v47 = vld [vmem:[#allocation6 + $0x5e8] sm:$0xff] }
 0xf98   :  { %7582 = vmatpush1.bf16.msra.mxu0 %v6763_v29  ;;  %7746 = vmatpush1.bf16.msra.mxu1 %v6765_v48  ;;  %v6870_v29 = vld [vmem:[#allocation6 + $0x5f8] sm:$0xff]  ;;  %v6867_v48 = vld [vmem:[#allocation6 + $0x5e0] sm:$0xff] }
 0xf99   :  { %7583 = vmatprep.subr.bf16.mxu0 %v6772_v49  ;;  %7747 = vmatprep.subr.bf16.mxu1 %v6774_v17  ;;  %v6869_v49 = vld [vmem:[#allocation6 + $0x5f0] sm:$0xff]  ;;  %v6876_v17 = vld [vmem:[#allocation6 + $0x628] sm:$0xff] }
 0xf9c   :  { %7584 = vmatpush1.bf16.msra.mxu0 %v6771_v50  ;;  %7748 = vmatpush1.bf16.msra.mxu1 %v6773_v51  ;;  %v6878_v50 = vld [vmem:[#allocation6 + $0x638] sm:$0xff]  ;;  %v6875_v51 = vld [vmem:[#allocation6 + $0x620] sm:$0xff] }
 0xf9d   :  { %7585 = vmatprep.subr.bf16.mxu0 %v6780_v53  ;;  %7749 = vmatprep.subr.bf16.mxu1 %v6782_v38  ;;  %v6877_v53 = vld [vmem:[#allocation6 + $0x630] sm:$0xff]  ;;  %v6884_v38 = vld [vmem:[#allocation6 + $0x668] sm:$0xff] }
 0xfa0   :  { %7586 = vmatpush1.bf16.msra.mxu0 %v6779_v41  ;;  %7750 = vmatpush1.bf16.msra.mxu1 %v6781_v54  ;;  %v6886_v41 = vld [vmem:[#allocation6 + $0x678] sm:$0xff]  ;;  %v6883_v54 = vld [vmem:[#allocation6 + $0x660] sm:$0xff] }
 0xfa1   :  { %7587 = vmatprep.subr.bf16.mxu0 %v6788_v55  ;;  %7751 = vmatprep.subr.bf16.mxu1 %v6790_v56  ;;  %v6885_v55 = vld [vmem:[#allocation6 + $0x670] sm:$0xff]  ;;  %v6892_v56 = vld [vmem:[#allocation6 + $0x6a8] sm:$0xff] }
 0xfa4   :  { %7588 = vmatpush1.bf16.msra.mxu0 %v6787_v31  ;;  %7752 = vmatpush1.bf16.msra.mxu1 %v6789_v63  ;;  %v6894_v31 = vld [vmem:[#allocation6 + $0x6b8] sm:$0xff]  ;;  %v6891_v63 = vld [vmem:[#allocation6 + $0x6a0] sm:$0xff] }
 0xfa5   :  { %7589 = vmatprep.subr.bf16.mxu0 %v6796_v12  ;;  %7753 = vmatprep.subr.bf16.mxu1 %v6798_v60  ;;  %v6893_v12 = vld [vmem:[#allocation6 + $0x6b0] sm:$0xff]  ;;  %v6900_v60 = vld [vmem:[#allocation6 + $0x6e8] sm:$0xff] }
 0xfa8   :  { %7590 = vmatpush1.bf16.msra.mxu0 %v6795_v30  ;;  %7754 = vmatpush1.bf16.msra.mxu1 %v6797_v13  ;;  %v6902_v30 = vld [vmem:[#allocation6 + $0x6f8] sm:$0xff]  ;;  %v6899_v13 = vld [vmem:[#allocation6 + $0x6e0] sm:$0xff] }
 0xfa9   :  { %7591 = vmatprep.subr.bf16.mxu0 %v6804_v62  ;;  %7755 = vmatprep.subr.bf16.mxu1 %v6806_v52  ;;  %v6901_v62 = vld [vmem:[#allocation6 + $0x6f0] sm:$0xff]  ;;  %v6908_v52 = vld [vmem:[#allocation6 + $0x728] sm:$0xff] }
 0xfac   :  { %7592 = vmatpush1.bf16.msra.mxu0 %v6803_v14  ;;  %7756 = vmatpush1.bf16.msra.mxu1 %v6805_v21  ;;  %v6910_v14 = vld [vmem:[#allocation6 + $0x738] sm:$0xff]  ;;  %v6907_v21 = vld [vmem:[#allocation6 + $0x720] sm:$0xff] }
 0xfad   :  { %7602 = vmatprep.subr.bf16.mxu0 %v6812_v18  ;;  %7766 = vmatprep.subr.bf16.mxu1 %v6814_v43  ;;  %v6909_v18 = vld [vmem:[#allocation6 + $0x730] sm:$0xff]  ;;  %v6916_v43 = vld [vmem:[#allocation6 + $0x768] sm:$0xff] }
 0xfaf   :  { %7594 = vmatmul.mubr.bf16.vlgmr.msra.gmra.mrb[44].mxu0 %v9458_v33  ;;  %7758 = vmatmul.mubr.bf16.vlgmr.msra.gmra.mrb[44].mxu1 %v9458_v33  ;;  %v6838_v33 = vld [vmem:[#allocation6 + $0x4f8] sm:$0xff] }
 0xfb0   :  { %7603 = vmatpush1.bf16.msra.mxu0 %v6811_v0  ;;  %7767 = vmatpush1.bf16.msra.mxu1 %v6813_v3  ;;  %v6918_v0 = vld [vmem:[#allocation6 + $0x778] sm:$0xff]  ;;  %v6915_v3 = vld [vmem:[#allocation6 + $0x760] sm:$0xff] }
 0xfb1   :  { %7604 = vmatprep.subr.bf16.mxu0 %v6820_v1  ;;  %7768 = vmatprep.subr.bf16.mxu1 %v6822_v15  ;;  %v6917_v1 = vld [vmem:[#allocation6 + $0x770] sm:$0xff]  ;;  %v6924_v15 = vld [vmem:[#allocation6 + $0x7a8] sm:$0xff] }
 0xfb2   :  { %7634 = vmatprep.mubr.bf16.mxu0 %v9464_v4  ;;  %7798 = vmatprep.mubr.bf16.mxu1 %v9464_v4  ;;  %v6843_v4 = vld [vmem:[#allocation6 + $0x520] sm:$0xff] }
 0xfb4   :  { %7605 = vmatpush1.bf16.msra.mxu0 %v6819_v59  ;;  %7769 = vmatpush1.bf16.msra.mxu1 %v6821_v28  ;;  %v6926_v59 = vld [vmem:[#allocation6 + $0x7b8] sm:$0xff]  ;;  %v6923_v28 = vld [vmem:[#allocation6 + $0x7a0] sm:$0xff] }
 0xfb5   :  { %7606 = vmatprep.subr.bf16.mxu0 %v6828_v16  ;;  %7770 = vmatprep.subr.bf16.mxu1 %v6830_v20  ;;  %v6925_v16 = vld [vmem:[#allocation6 + $0x7b0] sm:$0xff]  ;;  %v6932_v20 = vld [vmem:[#allocation6 + $0x7e8] sm:$0xff] }
 0xfb8   :  { %7607 = vmatpush1.bf16.msra.mxu0 %v6827_v61  ;;  %7771 = vmatpush1.bf16.msra.mxu1 %v6829_v22  ;;  %v6934_v61 = vld [vmem:[#allocation6 + $0x7f8] sm:$0xff]  ;;  %v6931_v22 = vld [vmem:[#allocation6 + $0x7e0] sm:$0xff] }
 0xfb9   :  { %7608 = vmatprep.subr.bf16.mxu0 %v6836_v42  ;;  %7772 = vmatprep.subr.bf16.mxu1 %v6838_v33  ;;  %v6933_v42 = vld [vmem:[#allocation6 + $0x7f0] sm:$0xff]  ;;  %v6940_v33 = vld [vmem:[#allocation6 + $0x828] sm:$0xff] }
 0xfbc   :  { %7609 = vmatpush1.bf16.msra.mxu0 %v6835_v39  ;;  %7773 = vmatpush1.bf16.msra.mxu1 %v6837_v8  ;;  %v6942_v39 = vld [vmem:[#allocation6 + $0x838] sm:$0xff]  ;;  %v6939_v8 = vld [vmem:[#allocation6 + $0x820] sm:$0xff] }
 0xfbd   :  { %7610 = vmatprep.subr.bf16.mxu0 %v6844_v23  ;;  %7774 = vmatprep.subr.bf16.mxu1 %v6846_v24  ;;  %v6941_v23 = vld [vmem:[#allocation6 + $0x830] sm:$0xff]  ;;  %v6948_v24 = vld [vmem:[#allocation6 + $0x868] sm:$0xff] }
 0xfc0   :  { %7611 = vmatpush1.bf16.msra.mxu0 %v6843_v4  ;;  %7775 = vmatpush1.bf16.msra.mxu1 %v6845_v58  ;;  %v6950_v4 = vld [vmem:[#allocation6 + $0x878] sm:$0xff]  ;;  %v6947_v58 = vld [vmem:[#allocation6 + $0x860] sm:$0xff] }
 0xfc1   :  { %7612 = vmatprep.subr.bf16.mxu0 %v6852_v19  ;;  %7776 = vmatprep.subr.bf16.mxu1 %v6854_v40  ;;  %v6949_v19 = vld [vmem:[#allocation6 + $0x870] sm:$0xff]  ;;  %v6956_v40 = vld [vmem:[#allocation6 + $0x8a8] sm:$0xff] }
 0xfc4   :  { %7613 = vmatpush1.bf16.msra.mxu0 %v6851_v11  ;;  %7777 = vmatpush1.bf16.msra.mxu1 %v6853_v32  ;;  %v6958_v11 = vld [vmem:[#allocation6 + $0x8b8] sm:$0xff]  ;;  %v6955_v32 = vld [vmem:[#allocation6 + $0x8a0] sm:$0xff] }
 0xfc5   :  { %7614 = vmatprep.subr.bf16.mxu0 %v6860_v44  ;;  %7778 = vmatprep.subr.bf16.mxu1 %v6862_v2  ;;  %v6957_v44 = vld [vmem:[#allocation6 + $0x8b0] sm:$0xff]  ;;  %v6964_v2 = vld [vmem:[#allocation6 + $0x8e8] sm:$0xff] }
 0xfc8   :  { %7615 = vmatpush1.bf16.msra.mxu0 %v6859_v45  ;;  %7779 = vmatpush1.bf16.msra.mxu1 %v6861_v46  ;;  %v6963_v45 = vld [vmem:[#allocation6 + $0x8e0] sm:$0xff]  ;;  %v6965_v46 = vld [vmem:[#allocation6 + $0x8f0] sm:$0xff] }
 0xfc9   :  { %7616 = vmatprep.subr.bf16.mxu0 %v6868_v47  ;;  %7780 = vmatprep.subr.bf16.mxu1 %v6870_v29  ;;  %v6972_v47 = vld [vmem:[#allocation6 + $0x928] sm:$0xff]  ;;  %v6974_v29 = vld [vmem:[#allocation6 + $0x938] sm:$0xff] }
 0xfcc   :  { %7617 = vmatpush1.bf16.msra.mxu0 %v6867_v48  ;;  %7781 = vmatpush1.bf16.msra.mxu1 %v6869_v49  ;;  %v6973_v48 = vld [vmem:[#allocation6 + $0x930] sm:$0xff]  ;;  %v6980_v49 = vld [vmem:[#allocation6 + $0x968] sm:$0xff] }
 0xfcd   :  { %7618 = vmatprep.subr.bf16.mxu0 %v6876_v17  ;;  %7782 = vmatprep.subr.bf16.mxu1 %v6878_v50  ;;  %v6982_v17 = vld [vmem:[#allocation6 + $0x978] sm:$0xff]  ;;  %v6979_v50 = vld [vmem:[#allocation6 + $0x960] sm:$0xff] }
 0xfd0   :  { %7619 = vmatpush1.bf16.msra.mxu0 %v6875_v51  ;;  %7783 = vmatpush1.bf16.msra.mxu1 %v6877_v53  ;;  %v6981_v51 = vld [vmem:[#allocation6 + $0x970] sm:$0xff]  ;;  %v6988_v53 = vld [vmem:[#allocation6 + $0x9a8] sm:$0xff] }
 0xfd1   :  { %7620 = vmatprep.subr.bf16.mxu0 %v6884_v38  ;;  %7784 = vmatprep.subr.bf16.mxu1 %v6886_v41  ;;  %v6990_v38 = vld [vmem:[#allocation6 + $0x9b8] sm:$0xff]  ;;  %v6987_v41 = vld [vmem:[#allocation6 + $0x9a0] sm:$0xff] }
 0xfd4   :  { %7621 = vmatpush1.bf16.msra.mxu0 %v6883_v54  ;;  %7785 = vmatpush1.bf16.msra.mxu1 %v6885_v55  ;;  %v6989_v54 = vld [vmem:[#allocation6 + $0x9b0] sm:$0xff]  ;;  %v6996_v55 = vld [vmem:[#allocation6 + $0x9e8] sm:$0xff] }
 0xfd5   :  { %7622 = vmatprep.subr.bf16.mxu0 %v6892_v56  ;;  %7786 = vmatprep.subr.bf16.mxu1 %v6894_v31  ;;  %v6998_v56 = vld [vmem:[#allocation6 + $0x9f8] sm:$0xff]  ;;  %v6995_v31 = vld [vmem:[#allocation6 + $0x9e0] sm:$0xff] }
 0xfd8   :  { %7623 = vmatpush1.bf16.msra.mxu0 %v6891_v63  ;;  %7787 = vmatpush1.bf16.msra.mxu1 %v6893_v12  ;;  %v6997_v63 = vld [vmem:[#allocation6 + $0x9f0] sm:$0xff]  ;;  %v7004_v12 = vld [vmem:[#allocation6 + $0xa28] sm:$0xff] }
 0xfd9   :  { %7624 = vmatprep.subr.bf16.mxu0 %v6900_v60  ;;  %7788 = vmatprep.subr.bf16.mxu1 %v6902_v30  ;;  %v7006_v60 = vld [vmem:[#allocation6 + $0xa38] sm:$0xff]  ;;  %v7003_v30 = vld [vmem:[#allocation6 + $0xa20] sm:$0xff] }
 0xfdc   :  { %7625 = vmatpush1.bf16.msra.mxu0 %v6899_v13  ;;  %7789 = vmatpush1.bf16.msra.mxu1 %v6901_v62  ;;  %v7005_v13 = vld [vmem:[#allocation6 + $0xa30] sm:$0xff]  ;;  %v7012_v62 = vld [vmem:[#allocation6 + $0xa68] sm:$0xff] }
 0xfdd   :  { %7626 = vmatprep.subr.bf16.mxu0 %v6908_v52  ;;  %7790 = vmatprep.subr.bf16.mxu1 %v6910_v14  ;;  %v7014_v52 = vld [vmem:[#allocation6 + $0xa78] sm:$0xff]  ;;  %v7011_v14 = vld [vmem:[#allocation6 + $0xa60] sm:$0xff] }
 0xfe0   :  { %7627 = vmatpush1.bf16.msra.mxu0 %v6907_v21  ;;  %7791 = vmatpush1.bf16.msra.mxu1 %v6909_v18  ;;  %v7013_v21 = vld [vmem:[#allocation6 + $0xa70] sm:$0xff]  ;;  %v7020_v18 = vld [vmem:[#allocation6 + $0xaa8] sm:$0xff] }
 0xfe1   :  { %7628 = vmatprep.subr.bf16.mxu0 %v6916_v43  ;;  %7792 = vmatprep.subr.bf16.mxu1 %v6918_v0  ;;  %v7022_v43 = vld [vmem:[#allocation6 + $0xab8] sm:$0xff]  ;;  %v7019_v0 = vld [vmem:[#allocation6 + $0xaa0] sm:$0xff] }
 0xfe4   :  { %7629 = vmatpush1.bf16.msra.mxu0 %v6915_v3  ;;  %7793 = vmatpush1.bf16.msra.mxu1 %v6917_v1  ;;  %v7021_v3 = vld [vmem:[#allocation6 + $0xab0] sm:$0xff]  ;;  %v7028_v1 = vld [vmem:[#allocation6 + $0xae8] sm:$0xff] }
 0xfe5   :  { %7630 = vmatprep.subr.bf16.mxu0 %v6924_v15  ;;  %7794 = vmatprep.subr.bf16.mxu1 %v6926_v59  ;;  %v7030_v15 = vld [vmem:[#allocation6 + $0xaf8] sm:$0xff]  ;;  %v7027_v59 = vld [vmem:[#allocation6 + $0xae0] sm:$0xff] }
 0xfe8   :  { %7631 = vmatpush1.bf16.msra.mxu0 %v6923_v28  ;;  %7795 = vmatpush1.bf16.msra.mxu1 %v6925_v16  ;;  %v7029_v28 = vld [vmem:[#allocation6 + $0xaf0] sm:$0xff]  ;;  %v7036_v16 = vld [vmem:[#allocation6 + $0xb28] sm:$0xff] }
 0xfe9   :  { %7632 = vmatprep.subr.bf16.mxu0 %v6932_v20  ;;  %7796 = vmatprep.subr.bf16.mxu1 %v6934_v61  ;;  %v7038_v20 = vld [vmem:[#allocation6 + $0xb38] sm:$0xff]  ;;  %v7035_v61 = vld [vmem:[#allocation6 + $0xb20] sm:$0xff] }
 0xfec   :  { %7633 = vmatpush1.bf16.msra.mxu0 %v6931_v22  ;;  %7797 = vmatpush1.bf16.msra.mxu1 %v6933_v42  ;;  %v7037_v22 = vld [vmem:[#allocation6 + $0xb30] sm:$0xff]  ;;  %v7044_v42 = vld [vmem:[#allocation6 + $0xb68] sm:$0xff] }
 0xfed   :  { %7643 = vmatprep.subr.bf16.mxu0 %v6940_v33  ;;  %7807 = vmatprep.subr.bf16.mxu1 %v6942_v39  ;;  %v7046_v33 = vld [vmem:[#allocation6 + $0xb78] sm:$0xff]  ;;  %v7043_v39 = vld [vmem:[#allocation6 + $0xb60] sm:$0xff] }
 0xfef   :  { %7635 = vmatmul.mubr.bf16.vlgmr.msra.gmra.mrb[44].mxu0 %v9460_v57  ;;  %7799 = vmatmul.mubr.bf16.vlgmr.msra.gmra.mrb[44].mxu1 %v9460_v57  ;;  %v6966_v57 = vld [vmem:[#allocation6 + $0x8f8] sm:$0xff] }
 0xff0   :  { %7644 = vmatpush1.bf16.msra.mxu0 %v6939_v8  ;;  %7808 = vmatpush1.bf16.msra.mxu1 %v6941_v23  ;;  %v7045_v8 = vld [vmem:[#allocation6 + $0xb70] sm:$0xff]  ;;  %v7052_v23 = vld [vmem:[#allocation6 + $0xba8] sm:$0xff] }
 0xff1   :  { %7645 = vmatprep.subr.bf16.mxu0 %v6948_v24  ;;  %7809 = vmatprep.subr.bf16.mxu1 %v6950_v4  ;;  %v7054_v24 = vld [vmem:[#allocation6 + $0xbb8] sm:$0xff]  ;;  %v7051_v4 = vld [vmem:[#allocation6 + $0xba0] sm:$0xff] }
 0xff2   :  { %7675 = vmatprep.mubr.bf16.mxu0 %v9492_v26  ;;  %7839 = vmatprep.mubr.bf16.mxu1 %v9492_v26  ;;  %v6971_v26 = vld [vmem:[#allocation6 + $0x920] sm:$0xff] }
 0xff4   :  { %7646 = vmatpush1.bf16.msra.mxu0 %v6947_v58  ;;  %7810 = vmatpush1.bf16.msra.mxu1 %v6949_v19  ;;  %v7053_v58 = vld [vmem:[#allocation6 + $0xbb0] sm:$0xff]  ;;  %v7060_v19 = vld [vmem:[#allocation6 + $0xbe8] sm:$0xff] }
 0xff5   :  { %7647 = vmatprep.subr.bf16.mxu0 %v6956_v40  ;;  %7811 = vmatprep.subr.bf16.mxu1 %v6958_v11  ;;  %v7062_v40 = vld [vmem:[#allocation6 + $0xbf8] sm:$0xff]  ;;  %v7059_v11 = vld [vmem:[#allocation6 + $0xbe0] sm:$0xff] }
 0xff8   :  { %7648 = vmatpush1.bf16.msra.mxu0 %v6955_v32  ;;  %7812 = vmatpush1.bf16.msra.mxu1 %v6957_v44  ;;  %v7061_v32 = vld [vmem:[#allocation6 + $0xbf0] sm:$0xff]  ;;  %v7068_v44 = vld [vmem:[#allocation6 + $0xc28] sm:$0xff] }
 0xff9   :  { %7649 = vmatprep.subr.bf16.mxu0 %v6964_v2  ;;  %7813 = vmatprep.subr.bf16.mxu1 %v6966_v57  ;;  %v7070_v2 = vld [vmem:[#allocation6 + $0xc38] sm:$0xff]  ;;  %v7067_v57 = vld [vmem:[#allocation6 + $0xc20] sm:$0xff] }
 0xffc   :  { %7650 = vmatpush1.bf16.msra.mxu0 %v6963_v45  ;;  %7814 = vmatpush1.bf16.msra.mxu1 %v6965_v46  ;;  %v7069_v45 = vld [vmem:[#allocation6 + $0xc30] sm:$0xff]  ;;  %v7076_v46 = vld [vmem:[#allocation6 + $0xc68] sm:$0xff] }
 0xffd   :  { %7651 = vmatprep.subr.bf16.mxu0 %v6972_v47  ;;  %7815 = vmatprep.subr.bf16.mxu1 %v6974_v29  ;;  %v7078_v47 = vld [vmem:[#allocation6 + $0xc78] sm:$0xff]  ;;  %v7075_v29 = vld [vmem:[#allocation6 + $0xc60] sm:$0xff] }
0x1000   :  { %7652 = vmatpush1.bf16.msra.mxu0 %v6971_v26  ;;  %7816 = vmatpush1.bf16.msra.mxu1 %v6973_v48  ;;  %v7077_v26 = vld [vmem:[#allocation6 + $0xc70] sm:$0xff]  ;;  %v7084_v48 = vld [vmem:[#allocation6 + $0xca8] sm:$0xff] }
0x1001   :  { %7653 = vmatprep.subr.bf16.mxu0 %v6980_v49  ;;  %7817 = vmatprep.subr.bf16.mxu1 %v6982_v17  ;;  %v7086_v49 = vld [vmem:[#allocation6 + $0xcb8] sm:$0xff]  ;;  %v7083_v17 = vld [vmem:[#allocation6 + $0xca0] sm:$0xff] }
0x1004   :  { %7654 = vmatpush1.bf16.msra.mxu0 %v6979_v50  ;;  %7818 = vmatpush1.bf16.msra.mxu1 %v6981_v51  ;;  %v7085_v50 = vld [vmem:[#allocation6 + $0xcb0] sm:$0xff]  ;;  %v7092_v51 = vld [vmem:[#allocation6 + $0xce8] sm:$0xff] }
0x1005   :  { %7655 = vmatprep.subr.bf16.mxu0 %v6988_v53  ;;  %7819 = vmatprep.subr.bf16.mxu1 %v6990_v38  ;;  %v7091_v53 = vld [vmem:[#allocation6 + $0xce0] sm:$0xff]  ;;  %v7093_v38 = vld [vmem:[#allocation6 + $0xcf0] sm:$0xff] }
0x1008   :  { %7656 = vmatpush1.bf16.msra.mxu0 %v6987_v41  ;;  %7820 = vmatpush1.bf16.msra.mxu1 %v6989_v54  ;;  %v7100_v41 = vld [vmem:[#allocation6 + $0xd28] sm:$0xff]  ;;  %v7102_v54 = vld [vmem:[#allocation6 + $0xd38] sm:$0xff] }
0x1009   :  { %7657 = vmatprep.subr.bf16.mxu0 %v6996_v55  ;;  %7821 = vmatprep.subr.bf16.mxu1 %v6998_v56  ;;  %v9526_v55 = vld [vmem:[#allocation18] sm:$0xff] }
0x100a   :  { %v7101_v56 = vld [vmem:[#allocation6 + $0xd30] sm:$0xff] }
0x100c   :  { %7658 = vmatpush1.bf16.msra.mxu0 %v6995_v31  ;;  %7822 = vmatpush1.bf16.msra.mxu1 %v6997_v63  ;;  %v7108_v31 = vld [vmem:[#allocation6 + $0xd68] sm:$0xff]  ;;  %v7110_v63 = vld [vmem:[#allocation6 + $0xd78] sm:$0xff] }
0x100d   :  { %7659 = vmatprep.subr.bf16.mxu0 %v7004_v12  ;;  %7823 = vmatprep.subr.bf16.mxu1 %v7006_v60  ;;  %v7196_v12 = vrot.slane %v9526_v55, %v9180_v6  ;;  %v7204_v60 = vrot.slane %v9526_v55, %v9182_v7 }
0x1010   :  { %7660 = vmatpush1.bf16.msra.mxu0 %v7003_v30  ;;  %7824 = vmatpush1.bf16.msra.mxu1 %v7005_v13  ;;  %v7200_v30 = vrot.slane %v9526_v55, %v9184_v9  ;;  %v7208_v13 = vrot.slane %v9526_v55, %v9186_v10 }
0x1011   :  { %7661 = vmatprep.subr.bf16.mxu0 %v7012_v62  ;;  %7825 = vmatprep.subr.bf16.mxu1 %v7014_v52  ;;  %v7107_v62 = vld [vmem:[#allocation6 + $0xd60] sm:$0xff]  ;;  %v7109_v52 = vld [vmem:[#allocation6 + $0xd70] sm:$0xff] }
0x1014   :  { %7662 = vmatpush1.bf16.msra.mxu0 %v7011_v14  ;;  %7826 = vmatpush1.bf16.msra.mxu1 %v7013_v21 }
0x1015   :  { %7663 = vmatprep.subr.bf16.mxu0 %v7020_v18  ;;  %7827 = vmatprep.subr.bf16.mxu1 %v7022_v43  ;;  %v7116_v18 = vld [vmem:[#allocation6 + $0xda8] sm:$0xff]  ;;  %v7118_v43 = vld [vmem:[#allocation6 + $0xdb8] sm:$0xff] }
0x1018   :  { %7664 = vmatpush1.bf16.msra.mxu0 %v7019_v0  ;;  %7828 = vmatpush1.bf16.msra.mxu1 %v7021_v3 }
0x1019   :  { %7665 = vmatprep.subr.bf16.mxu0 %v7028_v1  ;;  %7829 = vmatprep.subr.bf16.mxu1 %v7030_v15 }
0x101c   :  { %7666 = vmatpush1.bf16.msra.mxu0 %v7027_v59  ;;  %7830 = vmatpush1.bf16.msra.mxu1 %v7029_v28 }
0x101d   :  { %7667 = vmatprep.subr.bf16.mxu0 %v7036_v16  ;;  %7831 = vmatprep.subr.bf16.mxu1 %v7038_v20 }
0x1020   :  { %7668 = vmatpush1.bf16.msra.mxu0 %v7035_v61  ;;  %7832 = vmatpush1.bf16.msra.mxu1 %v7037_v22  ;;  %v7115_v61 = vld [vmem:[#allocation6 + $0xda0] sm:$0xff]  ;;  %v7117_v22 = vld [vmem:[#allocation6 + $0xdb0] sm:$0xff] }
0x1021   :  { %7669 = vmatprep.subr.bf16.mxu0 %v7044_v42  ;;  %7833 = vmatprep.subr.bf16.mxu1 %v7046_v33 }
0x1024   :  { %7670 = vmatpush1.bf16.msra.mxu0 %v7043_v39  ;;  %7834 = vmatpush1.bf16.msra.mxu1 %v7045_v8  ;;  %v7124_v39 = vld [vmem:[#allocation6 + $0xde8] sm:$0xff]  ;;  %v7126_v8 = vld [vmem:[#allocation6 + $0xdf8] sm:$0xff] }
0x1025   :  { %7671 = vmatprep.subr.bf16.mxu0 %v7052_v23  ;;  %7835 = vmatprep.subr.bf16.mxu1 %v7054_v24 }
0x1028   :  { %7672 = vmatpush1.bf16.msra.mxu0 %v7051_v4  ;;  %7836 = vmatpush1.bf16.msra.mxu1 %v7053_v58 }
0x1029   :  { %7673 = vmatprep.subr.bf16.mxu0 %v7060_v19  ;;  %7837 = vmatprep.subr.bf16.mxu1 %v7062_v40  ;;  %v7123_v19 = vld [vmem:[#allocation6 + $0xde0] sm:$0xff]  ;;  %v7125_v40 = vld [vmem:[#allocation6 + $0xdf0] sm:$0xff] }
0x102c   :  { %7674 = vmatpush1.bf16.msra.mxu0 %v7059_v11  ;;  %7838 = vmatpush1.bf16.msra.mxu1 %v7061_v32  ;;  %v7132_v11 = vld [vmem:[#allocation6 + $0xe28] sm:$0xff]  ;;  %v7134_v32 = vld [vmem:[#allocation6 + $0xe38] sm:$0xff] }
0x102d   :  { %7684 = vmatprep.subr.bf16.mxu0 %v7068_v44  ;;  %7848 = vmatprep.subr.bf16.mxu1 %v7070_v2  ;;  %v7131_v44 = vld [vmem:[#allocation6 + $0xe20] sm:$0xff]  ;;  %v7133_v2 = vld [vmem:[#allocation6 + $0xe30] sm:$0xff] }
0x102f   :  { %7676 = vmatmul.mubr.bf16.vlgmr.msra.gmra.mrb[44].mxu0 %v9488_v5  ;;  %7840 = vmatmul.mubr.bf16.vlgmr.msra.gmra.mrb[44].mxu1 %v9488_v5  ;;  %v7094_v5 = vld [vmem:[#allocation6 + $0xcf8] sm:$0xff] }
0x1030   :  { %7685 = vmatpush1.bf16.msra.mxu0 %v7067_v57  ;;  %7849 = vmatpush1.bf16.msra.mxu1 %v7069_v45  ;;  %v7140_v57 = vld [vmem:[#allocation6 + $0xe68] sm:$0xff]  ;;  %v7142_v45 = vld [vmem:[#allocation6 + $0xe78] sm:$0xff] }
0x1031   :  { %7686 = vmatprep.subr.bf16.mxu0 %v7076_v46  ;;  %7850 = vmatprep.subr.bf16.mxu1 %v7078_v47  ;;  %v7139_v46 = vld [vmem:[#allocation6 + $0xe60] sm:$0xff]  ;;  %v7141_v47 = vld [vmem:[#allocation6 + $0xe70] sm:$0xff] }
0x1032   :  { %7716 = vmatprep.mubr.bf16.mxu0 %v9494_v27  ;;  %7880 = vmatprep.mubr.bf16.mxu1 %v9494_v27  ;;  %v7099_v27 = vld [vmem:[#allocation6 + $0xd20] sm:$0xff] }
0x1034   :  { %7687 = vmatpush1.bf16.msra.mxu0 %v7075_v29  ;;  %7851 = vmatpush1.bf16.msra.mxu1 %v7077_v26  ;;  %v7148_v29 = vld [vmem:[#allocation6 + $0xea8] sm:$0xff]  ;;  %v7150_v26 = vld [vmem:[#allocation6 + $0xeb8] sm:$0xff] }
0x1035   :  { %7688 = vmatprep.subr.bf16.mxu0 %v7084_v48  ;;  %7852 = vmatprep.subr.bf16.mxu1 %v7086_v49  ;;  %v7147_v48 = vld [vmem:[#allocation6 + $0xea0] sm:$0xff]  ;;  %v7149_v49 = vld [vmem:[#allocation6 + $0xeb0] sm:$0xff] }
0x1038   :  { %7689 = vmatpush1.bf16.msra.mxu0 %v7083_v17  ;;  %7853 = vmatpush1.bf16.msra.mxu1 %v7085_v50  ;;  %v7156_v17 = vld [vmem:[#allocation6 + $0xee8] sm:$0xff]  ;;  %v7158_v50 = vld [vmem:[#allocation6 + $0xef8] sm:$0xff] }
0x1039   :  { %7690 = vmatprep.subr.bf16.mxu0 %v7092_v51  ;;  %7854 = vmatprep.subr.bf16.mxu1 %v7094_v5  ;;  %v7155_v51 = vld [vmem:[#allocation6 + $0xee0] sm:$0xff]  ;;  %v7157_v5 = vld [vmem:[#allocation6 + $0xef0] sm:$0xff] }
0x103c   :  { %7691 = vmatpush1.bf16.msra.mxu0 %v7091_v53  ;;  %7855 = vmatpush1.bf16.msra.mxu1 %v7093_v38  ;;  %v7164_v53 = vld [vmem:[#allocation6 + $0xf28] sm:$0xff]  ;;  %v7166_v38 = vld [vmem:[#allocation6 + $0xf38] sm:$0xff] }
0x103d   :  { %7692 = vmatprep.subr.bf16.mxu0 %v7100_v41  ;;  %7856 = vmatprep.subr.bf16.mxu1 %v7102_v54  ;;  %v7163_v41 = vld [vmem:[#allocation6 + $0xf20] sm:$0xff]  ;;  %v7165_v54 = vld [vmem:[#allocation6 + $0xf30] sm:$0xff] }
0x1040   :  { %7693 = vmatpush1.bf16.msra.mxu0 %v7099_v27  ;;  %7857 = vmatpush1.bf16.msra.mxu1 %v7101_v56  ;;  %v7172_v27 = vld [vmem:[#allocation6 + $0xf68] sm:$0xff]  ;;  %v7174_v56 = vld [vmem:[#allocation6 + $0xf78] sm:$0xff] }
0x1041   :  { %7694 = vmatprep.subr.bf16.mxu0 %v7108_v31  ;;  %7858 = vmatprep.subr.bf16.mxu1 %v7110_v63  ;;  %v7171_v31 = vld [vmem:[#allocation6 + $0xf60] sm:$0xff]  ;;  %v7173_v63 = vld [vmem:[#allocation6 + $0xf70] sm:$0xff] }
0x1042   :  { %v7390_v14 = vpop.f32.mrb[40].mxu0  ;;  %v7554_v21 = vpop.f32.mrb[40].mxu1 }
0x1043   :  { %v8338_v6 = vadd.f32 %v7390_v14, %v7196_v12  ;;  %v8340_v0 = vadd.f32 %v7554_v21, %v7204_v60  ;;  %v7392_v3 = vpop.f32.mrb[41].mxu0  ;;  %v7556_v7 = vpop.f32.mrb[41].mxu1  ;;  %v7180_v12 = vld [vmem:[#allocation6 + $0xfa8] sm:$0xff]  ;;  %v7182_v60 = vld [vmem:[#allocation6 + $0xfb8] sm:$0xff]  ;;  %v7187_v14 = vld [vmem:[#allocation6 + $0xfe0] sm:$0xff] }
0x1044   :  { %v8339_v1 = vadd.f32 %v7392_v3, %v7200_v30  ;;  %v8341_v15 = vadd.f32 %v7556_v7, %v7208_v13  ;;  %v7394_v59 = vpop.f32.mrb[42].mxu0  ;;  %v7558_v28 = vpop.f32.mrb[42].mxu1  ;;  %7695 = vmatpush1.bf16.msra.mxu0 %v7107_v62  ;;  %7859 = vmatpush1.bf16.msra.mxu1 %v7109_v52  ;;  %v7179_v30 = vld [vmem:[#allocation6 + $0xfa0] sm:$0xff]  ;;  %v7181_v13 = vld [vmem:[#allocation6 + $0xfb0] sm:$0xff]  ;;  %v7188_v62 = vld [vmem:[#allocation6 + $0xfe8] sm:$0xff] }
0x1045   :  { %v7889_v9 = vmax.f32 %v8338_v6, 0.0  ;;  %v7891_v10 = vmax.f32 %v8340_v0, 0.0  ;;  %v7395_v16 = vpop.f32.mrb[43].mxu0  ;;  %v7559_v20 = vpop.f32.mrb[43].mxu1  ;;  %7696 = vmatprep.subr.bf16.mxu0 %v7116_v18  ;;  %7860 = vmatprep.subr.bf16.mxu1 %v7118_v43  ;;  %v7190_v52 = vld [vmem:[#allocation6 + $0xff8] sm:$0xff]  ;;  %v7189_v21 = vld [vmem:[#allocation6 + $0xff0] sm:$0xff]  ;;  %v7212_v18 = vrot.slane %v9526_v55, %v9200_v34  ;;  %v7220_v43 = vrot.slane %v9526_v55, %v9202_v35 }
0x1046   :  { %v7890_v42 = vmax.f32 %v8339_v1, 0.0  ;;  %v7892_v33 = vmax.f32 %v8341_v15, 0.0  ;;  %v7216_v6 = vrot.slane %v9526_v55, %v9204_v36  ;;  %v7224_v0 = vrot.slane %v9526_v55, %v9206_v37 }
0x1047   :  { %v9536_v23 = vpack.c.bf16 %v7889_v9, %v7889_v9  ;;  %v9538_v24 = vpack.c.bf16 %v7891_v10, %v7891_v10 }
0x1048   :  { %v9540_v4 = vpack.c.bf16 %v7890_v42, %v7890_v42  ;;  %v9542_v58 = vpack.c.bf16 %v7892_v33, %v7892_v33  ;;  %7697 = vmatpush1.bf16.msra.mxu0 %v7115_v61  ;;  %7861 = vmatpush1.bf16.msra.mxu1 %v7117_v22 }
0x1049   :  { %7698 = vmatprep.subr.bf16.mxu0 %v7124_v39  ;;  %7862 = vmatprep.subr.bf16.mxu1 %v7126_v8 }
0x104c   :  { %7699 = vmatpush1.bf16.msra.mxu0 %v7123_v19  ;;  %7863 = vmatpush1.bf16.msra.mxu1 %v7125_v40 }
0x104d   :  { %7700 = vmatprep.subr.bf16.mxu0 %v7132_v11  ;;  %7864 = vmatprep.subr.bf16.mxu1 %v7134_v32 }
0x1050   :  { %7701 = vmatpush1.bf16.msra.mxu0 %v7131_v44  ;;  %7865 = vmatpush1.bf16.msra.mxu1 %v7133_v2 }
0x1051   :  { %7702 = vmatprep.subr.bf16.mxu0 %v7140_v57  ;;  %7866 = vmatprep.subr.bf16.mxu1 %v7142_v45 }
0x1054   :  { %7703 = vmatpush1.bf16.msra.mxu0 %v7139_v46  ;;  %7867 = vmatpush1.bf16.msra.mxu1 %v7141_v47 }
0x1055   :  { %7704 = vmatprep.subr.bf16.mxu0 %v7148_v29  ;;  %7868 = vmatprep.subr.bf16.mxu1 %v7150_v26 }
0x1058   :  { %7705 = vmatpush1.bf16.msra.mxu0 %v7147_v48  ;;  %7869 = vmatpush1.bf16.msra.mxu1 %v7149_v49 }
0x1059   :  { %7706 = vmatprep.subr.bf16.mxu0 %v7156_v17  ;;  %7870 = vmatprep.subr.bf16.mxu1 %v7158_v50 }
0x105c   :  { %7707 = vmatpush1.bf16.msra.mxu0 %v7155_v51  ;;  %7871 = vmatpush1.bf16.msra.mxu1 %v7157_v5 }
0x105d   :  { %7708 = vmatprep.subr.bf16.mxu0 %v7164_v53  ;;  %7872 = vmatprep.subr.bf16.mxu1 %v7166_v38 }
0x1060   :  { %7709 = vmatpush1.bf16.msra.mxu0 %v7163_v41  ;;  %7873 = vmatpush1.bf16.msra.mxu1 %v7165_v54 }
0x1061   :  { %7710 = vmatprep.subr.bf16.mxu0 %v7172_v27  ;;  %7874 = vmatprep.subr.bf16.mxu1 %v7174_v56 }
0x1064   :  { %7711 = vmatpush1.bf16.msra.mxu0 %v7171_v31  ;;  %7875 = vmatpush1.bf16.msra.mxu1 %v7173_v63 }
0x1065   :  { %7712 = vmatprep.subr.bf16.mxu0 %v7180_v12  ;;  %7876 = vmatprep.subr.bf16.mxu1 %v7182_v60 }
0x1068   :  { %7713 = vmatpush1.bf16.msra.mxu0 %v7179_v30  ;;  %7877 = vmatpush1.bf16.msra.mxu1 %v7181_v13 }
0x1069   :  { %7714 = vmatprep.subr.bf16.mxu0 %v7188_v62  ;;  %7878 = vmatprep.subr.bf16.mxu1 %v7190_v52 }
0x106c   :  { %7715 = vmatpush1.bf16.msra.mxu0 %v7187_v14  ;;  %7879 = vmatpush1.bf16.msra.mxu1 %v7189_v21 }
0x106f   :  { %7717 = vmatmul.mubr.bf16.vlgmr.msra.gmra.mrb[44].mxu0 %v9490_v25  ;;  %7881 = vmatmul.mubr.bf16.vlgmr.msra.gmra.mrb[44].mxu1 %v9490_v25 }
0x1142   :  { %v7718_v3 = vpop.f32.mrb[44].mxu0  ;;  %v7882_v7 = vpop.f32.mrb[44].mxu1 }
0x1143   :  { %v8342_v1 = vadd.f32 %v7718_v3, %v7212_v18  ;;  %v8344_v15 = vadd.f32 %v7882_v7, %v7220_v43  ;;  %v7720_v59 = vpop.f32.mrb[45].mxu0  ;;  %v7884_v28 = vpop.f32.mrb[45].mxu1 }
0x1144   :  { %v8343_v9 = vadd.f32 %v7720_v59, %v7216_v6  ;;  %v8345_v25 = vadd.f32 %v7884_v28, %v7224_v0  ;;  %v7722_v10 = vpop.f32.mrb[46].mxu0  ;;  %v7886_v16 = vpop.f32.mrb[46].mxu1 }
0x1145   :  { %v7893_v34 = vmax.f32 %v8342_v1, 0.0  ;;  %v7895_v20 = vmax.f32 %v8344_v15, 0.0  ;;  %v7723_v61 = vpop.f32.mrb[47].mxu0  ;;  %v7887_v35 = vpop.f32.mrb[47].mxu1 }
0x1146   :  { %v7894_v22 = vmax.f32 %v8343_v9, 0.0  ;;  %v7896_v42 = vmax.f32 %v8345_v25, 0.0 }
0x1147   :  { %v9554_v36 = vpack.c.bf16 %v7893_v34, %v7893_v34  ;;  %v9556_v33 = vpack.c.bf16 %v7895_v20, %v7895_v20 }
0x1148   :  { %v9558_v37 = vpack.c.bf16 %v7894_v22, %v7894_v22  ;;  %v9560_v55 = vpack.c.bf16 %v7896_v42, %v7896_v42 }
0x1149   :  { %8902 = dma.done.wait [#allocation8 + $0x5], 8192 }
0x114a   :  { %8903 = vsyncadd [#allocation8 + $0x5], 4294959104  ;;  %8011 = vmatprep.mubr.bf16.mxu0 %v9540_v4  ;;  %8051 = vmatprep.mubr.bf16.mxu1 %v9542_v58  ;;  %v7916_v39 = vld [vmem:[#allocation7 + $0x40] sm:$0xff]  ;;  %v7917_v11 = vld [vmem:[#allocation7 + $0x48] sm:$0xff]  ;;  %s8939_s6 = smov [#allocation21]   ;;  %vm8140_vm0 = vcmask 64512  }
0x114b   :  { %v7932_v8 = vld [vmem:[#allocation7 + $0xc0] sm:$0xff]  ;;  %8218 = vmatprep.subr.bf16.mxu0 %v7916_v39  ;;  %v7933_v32 = vld [vmem:[#allocation7 + $0xc8] sm:$0xff]  ;;  %v7918_v57 = vld [vmem:[#allocation7 + $0x50] sm:$0xff]  ;;  %s8148_s8 = sshll.u32 %s8939_s6, 4  ;;  %s8149_s8 = int_to_ptr.vmem [resolvable:$true] %s8148_s8 }
0x114c   :  { %v7908_v19 = vld [vmem:[#allocation7] sm:$0xff]  ;;  %8240 = vmatprep.subr.bf16.mxu1 %v7932_v8  ;;  %v7909_v44 = vld [vmem:[#allocation7 + $0x8] sm:$0xff]  ;;  %v7934_v45 = vld [vmem:[#allocation7 + $0xd0] sm:$0xff]  ;;  %s8862_s2 = scalar_lea.vmem %s8149_s8, 128  ;;  %p8867_p9 = scmp.lt.s32.totalorder %s8149_s8, %s8149_s8 }
0x114d   :  { %v7924_v40 = vld [vmem:[#allocation7 + $0x80] sm:$0xff]  ;;  %8219 = vmatpush3.bf16.msra.mxu0 %v7908_v19  ;;  %v7925_v2 = vld [vmem:[#allocation7 + $0x88] sm:$0xff]  ;;  %v7910_v4 = vld [vmem:[#allocation7 + $0x10] sm:$0xff]  ;;  %p8863_p8 = scmp.ne.s32.totalorder %s8149_s8, %s8862_s2  ;;  %p8868_p10 = scmp.lt.s32.totalorder %s8862_s2, %s8862_s2 }
0x114e   :  { %8241 = vmatpush3.bf16.msra.mxu1 %v7924_v40  ;;  %8220 = vmatprep.subr.bf16.mxu0 %v7917_v11  ;;  %v7926_v58 = vld [vmem:[#allocation7 + $0x90] sm:$0xff]  ;;  %v7919_v46 = vld [vmem:[#allocation7 + $0x58] sm:$0xff]  ;;  %v7920_v48 = vld [vmem:[#allocation7 + $0x60] sm:$0xff] }
0x114f   :  { %8242 = vmatprep.subr.bf16.mxu1 %v7933_v32  ;;  %v7935_v47 = vld [vmem:[#allocation7 + $0xd8] sm:$0xff]  ;;  %v7936_v49 = vld [vmem:[#allocation7 + $0xe0] sm:$0xff]  ;;  %v7921_v51 = vld [vmem:[#allocation7 + $0x68] sm:$0xff]  ;;  %p8869_p11 = por %p8868_p10, %p8867_p9 }
0x1150   :  { %v7911_v29 = vld [vmem:[#allocation7 + $0x18] sm:$0xff]  ;;  %v7912_v17 = vld [vmem:[#allocation7 + $0x20] sm:$0xff]  ;;  %v7937_v5 = vld [vmem:[#allocation7 + $0xe8] sm:$0xff] }
0x1151   :  { %8221 = vmatpush3.bf16.msra.mxu0 %v7909_v44  ;;  %v7927_v26 = vld [vmem:[#allocation7 + $0x98] sm:$0xff]  ;;  %v7928_v50 = vld [vmem:[#allocation7 + $0xa0] sm:$0xff]  ;;  %v7913_v53 = vld [vmem:[#allocation7 + $0x28] sm:$0xff]  ;;  %p8870_p12 = pnand %p8869_p11, %p8863_p8 }
0x1152   :  { %8243 = vmatpush3.bf16.msra.mxu1 %v7925_v2  ;;  %8222 = vmatprep.subr.bf16.mxu0 %v7918_v57  ;;  %v7929_v38 = vld [vmem:[#allocation7 + $0xa8] sm:$0xff]  ;;  %v7922_v41 = vld [vmem:[#allocation7 + $0x70] sm:$0xff]  ;;  %v7923_v31 = vld [vmem:[#allocation7 + $0x78] sm:$0xff] }
0x1153   :  { %8244 = vmatprep.subr.bf16.mxu1 %v7934_v45  ;;  %v7938_v54 = vld [vmem:[#allocation7 + $0xf0] sm:$0xff]  ;;  %v7939_v63 = vld [vmem:[#allocation7 + $0xf8] sm:$0xff]  ;;  %v7948_v30 = vld [vmem:[#allocation7 + $0x140] sm:$0xff] }
0x1154   :  { %v7914_v27 = vld [vmem:[#allocation7 + $0x30] sm:$0xff]  ;;  %v7915_v12 = vld [vmem:[#allocation7 + $0x38] sm:$0xff]  ;;  %v7964_v13 = vld [vmem:[#allocation7 + $0x1c0] sm:$0xff] }
0x1155   :  { %8223 = vmatpush3.bf16.msra.mxu0 %v7910_v4  ;;  %v7930_v56 = vld [vmem:[#allocation7 + $0xb0] sm:$0xff]  ;;  %v7931_v60 = vld [vmem:[#allocation7 + $0xb8] sm:$0xff]  ;;  %v7940_v62 = vld [vmem:[#allocation7 + $0x100] sm:$0xff] }
0x1156   :  { %8245 = vmatpush3.bf16.msra.mxu1 %v7926_v58  ;;  %8224 = vmatprep.subr.bf16.mxu0 %v7919_v46  ;;  %v7956_v52 = vld [vmem:[#allocation7 + $0x180] sm:$0xff]  ;;  %v7949_v14 = vld [vmem:[#allocation7 + $0x148] sm:$0xff]  ;;  %v7950_v6 = vld [vmem:[#allocation7 + $0x150] sm:$0xff] }
0x1157   :  { %8246 = vmatprep.subr.bf16.mxu1 %v7935_v47  ;;  %v7965_v21 = vld [vmem:[#allocation7 + $0x1c8] sm:$0xff]  ;;  %v7966_v0 = vld [vmem:[#allocation7 + $0x1d0] sm:$0xff]  ;;  %v7951_v7 = vld [vmem:[#allocation7 + $0x158] sm:$0xff] }
0x1158   :  { %v7941_v18 = vld [vmem:[#allocation7 + $0x108] sm:$0xff]  ;;  %v7942_v3 = vld [vmem:[#allocation7 + $0x110] sm:$0xff]  ;;  %v7943_v1 = vld [vmem:[#allocation7 + $0x118] sm:$0xff] }
0x1159   :  { %8225 = vmatpush3.bf16.msra.mxu0 %v7911_v29  ;;  %v7957_v43 = vld [vmem:[#allocation7 + $0x188] sm:$0xff]  ;;  %v7959_v15 = vld [vmem:[#allocation7 + $0x198] sm:$0xff]  ;;  %v7952_v59 = vld [vmem:[#allocation7 + $0x160] sm:$0xff] }
0x115a   :  { %8247 = vmatpush3.bf16.msra.mxu1 %v7927_v26  ;;  %8226 = vmatprep.subr.bf16.mxu0 %v7920_v48  ;;  %v7968_v28 = vld [vmem:[#allocation7 + $0x1e0] sm:$0xff]  ;;  %v7953_v10 = vld [vmem:[#allocation7 + $0x168] sm:$0xff]  ;;  %v7954_v61 = vld [vmem:[#allocation7 + $0x170] sm:$0xff] }
0x115b   :  { %8248 = vmatprep.subr.bf16.mxu1 %v7936_v49  ;;  %v7944_v9 = vld [vmem:[#allocation7 + $0x120] sm:$0xff]  ;;  %v7969_v16 = vld [vmem:[#allocation7 + $0x1e8] sm:$0xff]  ;;  %v7970_v35 = vld [vmem:[#allocation7 + $0x1f0] sm:$0xff] }
0x115c   :  { %v7960_v25 = vld [vmem:[#allocation7 + $0x1a0] sm:$0xff]  ;;  %v7945_v34 = vld [vmem:[#allocation7 + $0x128] sm:$0xff]  ;;  %v7946_v22 = vld [vmem:[#allocation7 + $0x130] sm:$0xff] }
0x115d   :  { %8227 = vmatpush3.bf16.msra.mxu0 %v7912_v17  ;;  %v7961_v20 = vld [vmem:[#allocation7 + $0x1a8] sm:$0xff]  ;;  %v7962_v42 = vld [vmem:[#allocation7 + $0x1b0] sm:$0xff]  ;;  %v7947_v39 = vld [vmem:[#allocation7 + $0x138] sm:$0xff] }
0x115e   :  { %8249 = vmatpush3.bf16.msra.mxu1 %v7928_v50  ;;  %8228 = vmatprep.subr.bf16.mxu0 %v7921_v51  ;;  %v7963_v8 = vld [vmem:[#allocation7 + $0x1b8] sm:$0xff] }
0x115f   :  { %8250 = vmatprep.subr.bf16.mxu1 %v7937_v5  ;;  %v8211_v11 = vld [vmem:[#allocation20] ss:$0 sm:$0xff] }
0x1161   :  { %8229 = vmatpush3.bf16.msra.mxu0 %v7913_v53 }
0x1162   :  { %8251 = vmatpush3.bf16.msra.mxu1 %v7929_v38  ;;  %8230 = vmatprep.subr.bf16.mxu0 %v7922_v41 }
0x1163   :  { %8252 = vmatprep.subr.bf16.mxu1 %v7938_v54 }
0x1165   :  { %8231 = vmatpush3.bf16.msra.mxu0 %v7914_v27 }
0x1166   :  { %8253 = vmatpush3.bf16.msra.mxu1 %v7930_v56  ;;  %8232 = vmatprep.subr.bf16.mxu0 %v7923_v31 }
0x1167   :  { %8254 = vmatprep.subr.bf16.mxu1 %v7939_v63 }
0x1169   :  { %8233 = vmatpush3.bf16.msra.mxu0 %v7915_v12 }
0x116a   :  { %8255 = vmatpush3.bf16.msra.mxu1 %v7931_v60  ;;  %8262 = vmatprep.subr.bf16.mxu0 %v7948_v30 }
0x116b   :  { %8284 = vmatprep.subr.bf16.mxu1 %v7964_v13 }
0x116c   :  { %8012 = vmatmul.mubr.bf16.vlgmr.msra.gmra.mrb[48].mxu0 %v9536_v23  ;;  %v7958_v23 = vld [vmem:[#allocation7 + $0x190] sm:$0xff] }
0x116d   :  { %8052 = vmatmul.mubr.bf16.vlgmr.msra.gmra.mrb[48].mxu1 %v9538_v24  ;;  %8263 = vmatpush3.bf16.msra.mxu0 %v7940_v62  ;;  %v7967_v24 = vld [vmem:[#allocation7 + $0x1d8] sm:$0xff] }
0x116e   :  { %8285 = vmatpush3.bf16.msra.mxu1 %v7956_v52  ;;  %8264 = vmatprep.subr.bf16.mxu0 %v7949_v14 }
0x116f   :  { %8286 = vmatprep.subr.bf16.mxu1 %v7965_v21  ;;  %8091 = vmatprep.mubr.bf16.mxu0 %v9558_v37  ;;  %v7955_v37 = vld [vmem:[#allocation7 + $0x178] sm:$0xff] }
0x1170   :  { %8131 = vmatprep.mubr.bf16.mxu1 %v9560_v55  ;;  %v7971_v55 = vld [vmem:[#allocation7 + $0x1f8] sm:$0xff] }
0x1171   :  { %8265 = vmatpush3.bf16.msra.mxu0 %v7941_v18 }
0x1172   :  { %8287 = vmatpush3.bf16.msra.mxu1 %v7957_v43  ;;  %8266 = vmatprep.subr.bf16.mxu0 %v7950_v6 }
0x1173   :  { %8288 = vmatprep.subr.bf16.mxu1 %v7966_v0 }
0x1175   :  { %8267 = vmatpush3.bf16.msra.mxu0 %v7942_v3 }
0x1176   :  { %8289 = vmatpush3.bf16.msra.mxu1 %v7958_v23  ;;  %8268 = vmatprep.subr.bf16.mxu0 %v7951_v7 }
0x1177   :  { %8290 = vmatprep.subr.bf16.mxu1 %v7967_v24 }
0x1179   :  { %8269 = vmatpush3.bf16.msra.mxu0 %v7943_v1 }
0x117a   :  { %8291 = vmatpush3.bf16.msra.mxu1 %v7959_v15  ;;  %8270 = vmatprep.subr.bf16.mxu0 %v7952_v59 }
0x117b   :  { %8292 = vmatprep.subr.bf16.mxu1 %v7968_v28 }
0x117d   :  { %8271 = vmatpush3.bf16.msra.mxu0 %v7944_v9 }
0x117e   :  { %8293 = vmatpush3.bf16.msra.mxu1 %v7960_v25  ;;  %8272 = vmatprep.subr.bf16.mxu0 %v7953_v10 }
0x117f   :  { %8294 = vmatprep.subr.bf16.mxu1 %v7969_v16 }
0x1181   :  { %8273 = vmatpush3.bf16.msra.mxu0 %v7945_v34 }
0x1182   :  { %8295 = vmatpush3.bf16.msra.mxu1 %v7961_v20  ;;  %8274 = vmatprep.subr.bf16.mxu0 %v7954_v61 }
0x1183   :  { %8296 = vmatprep.subr.bf16.mxu1 %v7970_v35 }
0x1185   :  { %8275 = vmatpush3.bf16.msra.mxu0 %v7946_v22 }
0x1186   :  { %8297 = vmatpush3.bf16.msra.mxu1 %v7962_v42  ;;  %8276 = vmatprep.subr.bf16.mxu0 %v7955_v37 }
0x1187   :  { %8298 = vmatprep.subr.bf16.mxu1 %v7971_v55 }
0x1189   :  { %8277 = vmatpush3.bf16.msra.mxu0 %v7947_v39 }
0x118a   :  { %8299 = vmatpush3.bf16.msra.mxu1 %v7963_v8 }
0x118c   :  { %8092 = vmatmul.mubr.bf16.vlgmr.msra.gmra.mrb[52].mxu0 %v9554_v36 }
0x118d   :  { %8132 = vmatmul.mubr.bf16.vlgmr.msra.gmra.mrb[52].mxu1 %v9556_v33 }
0x123f   :  { %v8234_v19 = vpop.f32.mrb[48].mxu0 }
0x1240   :  { %v8256_v40 = vpop.f32.mrb[48].mxu1  ;;  %v8235_v32 = vpop.f32.mrb[49].mxu0 }
0x1241   :  { %v8257_v44 = vpop.f32.mrb[49].mxu1  ;;  %v8236_v2 = vadd.f32 %v8235_v32, %v8234_v19  ;;  %v8237_v45 = vpop.f32.mrb[50].mxu0 }
0x1242   :  { %v8258_v57 = vadd.f32 %v8257_v44, %v8256_v40  ;;  %v8259_v4 = vpop.f32.mrb[50].mxu1  ;;  %v8238_v58 = vpop.f32.mrb[51].mxu0 }
0x1243   :  { %v8260_v46 = vpop.f32.mrb[51].mxu1  ;;  %v8014_v47 = vadd.f32 %v8236_v2, %v8211_v11 }
0x1245   :  { %v8054_v29 = vadd.f32 %v8258_v57, %v8014_v47 }
0x125f   :  { %v8278_v26 = vpop.f32.mrb[52].mxu0 }
0x1260   :  { %v8300_v48 = vpop.f32.mrb[52].mxu1  ;;  %v8279_v49 = vpop.f32.mrb[53].mxu0 }
0x1261   :  { %v8301_v17 = vpop.f32.mrb[53].mxu1  ;;  %v8280_v36 = vadd.f32 %v8279_v49, %v8278_v26  ;;  %v8281_v33 = vpop.f32.mrb[54].mxu0 }
0x1262   :  { %v8302_v50 = vadd.f32 %v8301_v17, %v8300_v48  ;;  %v8303_v51 = vpop.f32.mrb[54].mxu1  ;;  %v8282_v5 = vpop.f32.mrb[55].mxu0 }
0x1263   :  { %v8304_v53 = vpop.f32.mrb[55].mxu1  ;;  %v8094_v38 = vadd.f32 %v8280_v36, %v8054_v29 }
0x1265   :  { %v8134_v41 = vadd.f32 %v8302_v50, %v8094_v38 }
0x1267   :  { %v8139_v54 = vmax.f32 %v8134_v41, 0.0 }
0x1269   :  { %8141 = vst.msk [vmem:[#allocation21] sm:$0xff] %vm8140_vm0, %v8139_v54 }
0x126a   :  { %8873 = shalt.err (!%p8870_p12)
}
0x126b   :  { %s8874_s16 = scalar_lea.hbm %s9595_s13, 128 }
0x126c   :  { %p8875_p13 = scmp.ne.s32.totalorder %s9595_s13, %s8874_s16  ;;  %p8878_p0 = scmp.lt.u32.totalorder %s8874_s16, %s9595_s13 }
0x126e   :  { %p8880_p1 = pnand %p8878_p0, %p8875_p13 }
0x1270   :  { %8883 = shalt.err (!%p8880_p1)
}
0x1271   :  { %8151 = dma.vmem_to_hbm [thread:$0]  %s8149_s8, 128, %s9595_s13, [#allocation11]  }
0x1272   :  { %8904 = dma.done.wait [#allocation11], 128  }
0x1273   :  { %8905 = vsyncadd [#allocation11], 4294967168 }
0x1274   :  { %8155 = vsyncpa [#allocation10], 1 }
0x1275   :  { %8156 = vsyncpa [#allocation13], 1 }
0x1276   :  { %8157 = vsyncpa [#allocation16], 1 }
0x1277   :  { %8158 = vsyncpa [#allocation19], 1 }
0x1278   :  { %8159 = vsyncpa [#allocation11], 1 }
0x1279   :  { %8160 = vsyncmov [#allocation8] }
0x127c   :  { %s8161_s29 = vpop.sfrf %8160 }
0x127d   :  { %p8212_p2 = scmp.ne.s32.totalorder %s8161_s29, 0 }
0x127f   :  { %8165 = shalt.err (%p8212_p2)  }
0x1280   :  { %8167 = vsyncmov [#allocation8 + $0x1] }
0x1283   :  { %s8168_s1 = vpop.sfrf %8167 }
0x1284   :  { %p8213_p3 = scmp.ne.s32.totalorder %s8168_s1, 0 }
0x1286   :  { %8172 = shalt.err (%p8213_p3)  }
0x1287   :  { %8174 = vsyncmov [#allocation8 + $0x2] }
0x128a   :  { %s8175_s30 = vpop.sfrf %8174 }
0x128b   :  { %p8214_p4 = scmp.ne.s32.totalorder %s8175_s30, 0 }
0x128d   :  { %8179 = shalt.err (%p8214_p4)  }
0x128e   :  { %8181 = vsyncmov [#allocation8 + $0x3] }
0x1291   :  { %s8182_s13 = vpop.sfrf %8181 }
0x1292   :  { %p8215_p5 = scmp.ne.s32.totalorder %s8182_s13, 0 }
0x1294   :  { %8186 = shalt.err (%p8215_p5)  }
0x1295   :  { %8188 = vsyncmov [#allocation8 + $0x4] }
0x1298   :  { %s8189_s0 = vpop.sfrf %8188 }
0x1299   :  { %p8216_p6 = scmp.ne.s32.totalorder %s8189_s0, 0 }
0x129b   :  { %8193 = shalt.err (%p8216_p6)  }
0x129c   :  { %8195 = vsyncmov [#allocation8 + $0x5] }
0x129f   :  { %s8196_s4 = vpop.sfrf %8195 }
0x12a0   :  { %p8217_p7 = scmp.ne.s32.totalorder %s8196_s4, 0 }
0x12a2   :  { %8200 = shalt.err (%p8217_p7)  }

</bundles_post_ra>
